<compile_context>
chip_gen: v7x
topology: tpu7x:2x2x1
jax: 0.10.0
libtpu: 0.0.40
codegen_flags: <defaults>
</compile_context>

<pallas_src>
import functools

import jax
import jax.numpy as jnp
from jax import lax
from jax.experimental import pallas as pl
from jax.experimental.pallas import tpu as pltpu

# ---------------------------------------------------------------------------
# Static geometry (the module's 16*5*5 flatten implies 3x32x32 inputs)
# ---------------------------------------------------------------------------
_H, _W, _CIN = 32, 32, 3
_K = 5                        # conv kernel size
_C1 = 28                      # conv1 output spatial (32 - 5 + 1)
_PH1 = 14                     # pooled conv1 spatial
_PH2 = 5                      # pooled conv2 spatial
_KP1 = 80                     # conv1 im2col contraction: 25 taps * 3 ch = 75 -> 80
_ROWS1 = _C1 * _C1            # 784 conv1 output positions per image
_PITCH1 = _PH1 * _PH1         # 196 pooled1 rows per image (row-major 14x14)
_ROWS2 = 9 * _PH1 + 9 + 1     # 136 conv2 accumulator rows (pitch-14 flat layout)
_M1 = 112                     # conv1 M-chunk (784 = 7 * 112); bounds vreg pressure
_LP = 128                     # lane-dense padding of every output-feature dim


# ---------------------------------------------------------------------------
# Fused forward kernel: one grid step == B_TILE images
# ---------------------------------------------------------------------------
def _cnn_fused_kernel(x_ref, w1_ref, b1_ref, w2_ref, b2_ref,
                      wf1_ref, bf1_ref, wf2_ref, bf2_ref, wo_ref, bo_ref,
                      o_ref,
                      acc1_ref, p1_ref, acc2_ref, vtmp_ref, p2_ref,
                      *, b_tile, num_classes):
    f32 = jnp.float32

    # ---------------- per-image conv/pool stage (rolled over the image tile) ----
    def conv_stage(i, carry):
        # conv1: single fat-K GEMM (K=80), chunked along M.  im2col rows were
        # pre-ordered in the wrapper so rows 4q..4q+3 are the 2x2 pool window of
        # pooled position q = pr*14 + pc.
        for m in range(_ROWS1 // _M1):
            acc1_ref[pl.ds(m * _M1, _M1), :] = jnp.dot(
                x_ref[i, pl.ds(m * _M1, _M1), :], w1_ref[...],
                preferred_element_type=f32)

        # bias + ReLU + 2x2/2 max-pool: 4 stride-4 taps over the whole image.
        # (max commutes with the constant bias add and the monotone ReLU.)
        t0 = acc1_ref[pl.ds(0, _PITCH1, stride=4), :]
        t1 = acc1_ref[pl.ds(1, _PITCH1, stride=4), :]
        t2 = acc1_ref[pl.ds(2, _PITCH1, stride=4), :]
        t3 = acc1_ref[pl.ds(3, _PITCH1, stride=4), :]
        pooled1 = jnp.maximum(jnp.maximum(t0, t1), jnp.maximum(t2, t3))
        pooled1 = jnp.maximum(pooled1 + b1_ref[...], 0.0)        # (196, 128)
        p1_ref[pl.ds(0, _PITCH1), :] = pooled1[:, :8]            # 6 real + 2 pad ch

        # conv2: 25 shifted GEMMs with trimmed K=8, value-accumulated in two
        # M-chunks, one store per chunk (no zero-init / read-modify-write).
        # Accumulator rows where the 5-wide window wraps past column 9 contain
        # garbage but are never read by the pool2 epilogue (c + kj <= 13 < 14
        # only holds for the valid output columns it selects).
        for off, rows in ((0, 64), (64, _ROWS2 - 64)):
            acc = None
            for ki in range(_K):
                for kj in range(_K):
                    s = ki * _PH1 + kj
                    d = jnp.dot(p1_ref[pl.ds(off + s, rows), :],
                                w2_ref[ki * _K + kj],
                                preferred_element_type=f32)
                    acc = d if acc is None else acc + d
            acc2_ref[pl.ds(off, rows), :] = acc

        # bias + ReLU + 2x2/2 max-pool of conv2: vertical max from two contiguous
        # reads, then only 2 stride-2 reads per output row; pooled2 is stacked
        # across the image tile for the batched FC stage.
        for r2 in range(_PH2):
            va = acc2_ref[pl.ds((2 * r2) * _PH1, 2 * _PH2), :]
            vb = acc2_ref[pl.ds((2 * r2 + 1) * _PH1, 2 * _PH2), :]
            vtmp_ref[pl.ds(0, 2 * _PH2), :] = jnp.maximum(va, vb)
            ev = vtmp_ref[pl.ds(0, _PH2, stride=2), :]
            od = vtmp_ref[pl.ds(1, _PH2, stride=2), :]
            chunk = jnp.maximum(jnp.maximum(ev, od) + b2_ref[...], 0.0)  # (5,128)
            p2_ref[i, pl.ds(r2 * _PH2, _PH2), :] = chunk[:, :16]
        return carry

    lax.fori_loop(0, b_tile, conv_stage, 0)

    # ---------------- batched FC stage: M = B_TILE -------------------------------
    p2 = p2_ref[...]                                   # (B, 32, 16) stacked pooled2
    h1 = bf1_ref[...]                                  # (1,128); broadcasts below
    for q in range(_PH2 * _PH2):                       # fc1: 25 (B,16)x(16,128) dots
        h1 = h1 + jnp.dot(p2[:, q, :], wf1_ref[q], preferred_element_type=f32)
    h1 = jnp.maximum(h1, 0.0)                          # (B,128)
    h2 = jnp.maximum(jnp.dot(h1, wf2_ref[...], preferred_element_type=f32)
                     + bf2_ref[...], 0.0)
    logits = jnp.dot(h2, wo_ref[...], preferred_element_type=f32) + bo_ref[...]

    lane = lax.broadcasted_iota(jnp.int32, (1, _LP), 1)
    logits = jnp.where(lane < num_classes, logits, jnp.finfo(f32).min)
    mx = jnp.max(logits, axis=-1, keepdims=True)
    sh = logits - mx
    lse = jnp.log(jnp.sum(jnp.exp(sh), axis=-1, keepdims=True))
    o_ref[0] = (sh - lse).astype(o_ref.dtype)


# ---------------------------------------------------------------------------
# One-time weight preparation (hoisted out of the per-call graph)
# ---------------------------------------------------------------------------
def _pad_to(a, shape):
    a = a.astype(jnp.float32)
    return jnp.pad(a, [(0, t - s) for s, t in zip(a.shape, shape)])


def prepare_params(params, num_classes):
    assert num_classes <= _LP
    # conv1 -> single (75,6) GEMM matrix, K order = (ki*5+kj)*3 + cin
    w1 = jnp.transpose(params["conv1_w"], (2, 3, 1, 0)).reshape(_K * _K * _CIN, 6)
    # conv2 -> 25 GEMM slices with trimmed K (6 real channels -> 8)
    w2 = jnp.transpose(params["conv2_w"], (2, 3, 1, 0)).reshape(_K * _K, 6, 16)
    # fc1 columns permuted from PyTorch's (c, h, w) flatten to our (q, c) layout
    wf1 = params["fc1_w"].reshape(120, 16, _PH2 * _PH2).transpose(2, 1, 0)  # (25,16,120)
    return {
        "w1":  _pad_to(w1, (_KP1, _LP)),
        "b1":  _pad_to(params["conv1_b"].reshape(1, 6), (1, _LP)),
        "w2":  _pad_to(w2, (_K * _K, 8, _LP)),
        "b2":  _pad_to(params["conv2_b"].reshape(1, 16), (1, _LP)),
        "wf1": _pad_to(wf1, (_K * _K, 16, _LP)),
        "bf1": _pad_to(params["fc1_b"].reshape(1, 120), (1, _LP)),
        "wf2": _pad_to(params["fc2_w"].T, (_LP, _LP)),
        "bf2": _pad_to(params["fc2_b"].reshape(1, 84), (1, _LP)),
        "wo":  _pad_to(params["out_w"].T, (_LP, _LP)),
        "bo":  _pad_to(params["out_b"].reshape(1, num_classes), (1, _LP)),
    }


# ---------------------------------------------------------------------------
# Forward wrapper: single pallas_call, grid over tiles of B_TILE images
# ---------------------------------------------------------------------------
def cnn_forward(prep, x_nchw, num_classes, b_tile=4):
    n, c, h, w = x_nchw.shape
    assert (c, h, w) == (_CIN, _H, _W), "CNN expects 3x32x32 inputs"
    x = jnp.transpose(x_nchw.astype(jnp.float32), (0, 2, 3, 1))    # NHWC

    # conv1 im2col (layout plumbing only): rows ordered so each 2x2 pool window
    # occupies 4 consecutive rows; lane order = (ki*5+kj)*3 + cin, padded to 80.
    cols = [x[:, ki:ki + _C1, kj:kj + _C1, :] for ki in range(_K) for kj in range(_K)]
    p = jnp.concatenate(cols, axis=-1)                              # (n,28,28,75)
    p = p.reshape(n, _PH1, 2, _PH1, 2, _K * _K * _CIN)
    p = p.transpose(0, 1, 3, 2, 4, 5).reshape(n, _ROWS1, _K * _K * _CIN)
    p = jnp.pad(p, ((0, 0), (0, 0), (0, _KP1 - _K * _K * _CIN)))    # (n,784,80)

    n_pad = ((n + b_tile - 1) // b_tile) * b_tile
    if n_pad != n:
        p = jnp.pad(p, ((0, n_pad - n), (0, 0), (0, 0)))
    steps = n_pad // b_tile

    kernel = functools.partial(_cnn_fused_kernel, b_tile=b_tile,
                               num_classes=num_classes)
    out = pl.pallas_call(
        kernel,
        out_shape=jax.ShapeDtypeStruct((steps, b_tile, _LP), jnp.float32),
        grid=(steps,),
        in_specs=[
            pl.BlockSpec((b_tile, _ROWS1, _KP1), lambda b: (b, 0, 0)),  # im2col input
            pl.BlockSpec((_KP1, _LP), lambda b: (0, 0)),                 # conv1 w
            pl.BlockSpec((1, _LP), lambda b: (0, 0)),                    # conv1 b
            pl.BlockSpec((_K * _K, 8, _LP), lambda b: (0, 0, 0)),        # conv2 w (K=8)
            pl.BlockSpec((1, _LP), lambda b: (0, 0)),                    # conv2 b
            pl.BlockSpec((_K * _K, 16, _LP), lambda b: (0, 0, 0)),       # fc1 w (K=16)
            pl.BlockSpec((1, _LP), lambda b: (0, 0)),                    # fc1 b
            pl.BlockSpec((_LP, _LP), lambda b: (0, 0)),                  # fc2 w
            pl.BlockSpec((1, _LP), lambda b: (0, 0)),                    # fc2 b
            pl.BlockSpec((_LP, _LP), lambda b: (0, 0)),                  # out w
            pl.BlockSpec((1, _LP), lambda b: (0, 0)),                    # out b
        ],
        out_specs=pl.BlockSpec((1, b_tile, _LP), lambda b: (b, 0, 0)),
        scratch_shapes=[
            pltpu.VMEM((_ROWS1, _LP), jnp.float32),        # conv1 accumulator (per img)
            pltpu.VMEM((_PITCH1, 8), jnp.float32),         # pooled1, narrow-K layout
            pltpu.VMEM((_ROWS2, _LP), jnp.float32),        # conv2 accumulator (per img)
            pltpu.VMEM((16, _LP), jnp.float32),            # pool2 vertical-max temp
            pltpu.VMEM((b_tile, 32, 16), jnp.float32),     # pooled2 stacked across tile
        ],
        compiler_params=pltpu.CompilerParams(dimension_semantics=("parallel",)),
    )(p, prep["w1"], prep["b1"], prep["w2"], prep["b2"],
      prep["wf1"], prep["bf1"], prep["wf2"], prep["bf2"], prep["wo"], prep["bo"])

    return out.reshape(n_pad, _LP)[:n, :num_classes]


# ---------------------------------------------------------------------------
# Deterministic parameter init (PyTorch-style uniform(-1/sqrt(fan_in), +1/sqrt(fan_in)))
# ---------------------------------------------------------------------------
def init_params(key, num_classes):
    def u(k, shape, fan_in):
        b = 1.0 / float(fan_in) ** 0.5
        return jax.random.uniform(k, shape, jnp.float32, -b, b)

    ks = jax.random.split(key, 10)
    return {
        "conv1_w": u(ks[0], (6, 3, 5, 5), 3 * 25),
        "conv1_b": u(ks[1], (6,), 3 * 25),
        "conv2_w": u(ks[2], (16, 6, 5, 5), 6 * 25),
        "conv2_b": u(ks[3], (16,), 6 * 25),
        "fc1_w":   u(ks[4], (120, 400), 400),
        "fc1_b":   u(ks[5], (120,), 400),
        "fc2_w":   u(ks[6], (84, 120), 120),
        "fc2_b":   u(ks[7], (84,), 120),
        "out_w":   u(ks[8], (num_classes, 84), 84),
        "out_b":   u(ks[9], (num_classes,), 84),
    }


# ---------------------------------------------------------------------------
# Pure-JAX reference (same math) for a correctness check
# ---------------------------------------------------------------------------
def reference_forward(params, x_nchw):
    hi = jax.lax.Precision.HIGHEST
    x = jnp.transpose(x_nchw, (0, 2, 3, 1)).astype(jnp.float32)

    def conv(x, w, b):
        y = jax.lax.conv_general_dilated(
            x, jnp.transpose(w, (2, 3, 1, 0)), (1, 1), "VALID",
            dimension_numbers=("NHWC", "HWIO", "NHWC"), precision=hi)
        return y + b

    def pool(y):
        n, h, w, c = y.shape
        return jnp.max(y.reshape(n, h // 2, 2, w // 2, 2, c), axis=(2, 4))

    y = pool(jax.nn.relu(conv(x, params["conv1_w"], params["conv1_b"])))
    y = pool(jax.nn.relu(conv(y, params["conv2_w"], params["conv2_b"])))
    flat = jnp.transpose(y, (0, 3, 1, 2)).reshape(y.shape[0], -1)   # PyTorch flatten order
    h = jax.nn.relu(jnp.dot(flat, params["fc1_w"].T, precision=hi) + params["fc1_b"])
    h = jax.nn.relu(jnp.dot(h, params["fc2_w"].T, precision=hi) + params["fc2_b"])
    logits = jnp.dot(h, params["out_w"].T, precision=hi) + params["out_b"]
    return jax.nn.log_softmax(logits, axis=-1)


if __name__ == "__main__":
    num_classes = 10
    batch = 8            # 2 grid steps of B_TILE=4 -> both v7x TensorCores get work
    b_tile = 4
    key = jax.random.PRNGKey(0)
    k_params, k_x = jax.random.split(key)

    params = init_params(k_params, num_classes)
    x = jax.random.normal(k_x, (batch, 3, 32, 32), jnp.float32)

    prep = prepare_params(params, num_classes)   # one-time weight prep (off hot path)
    fwd = jax.jit(cnn_forward, static_argnums=(2, 3))
    out = jax.block_until_ready(fwd(prep, x, num_classes, b_tile))

    assert out.shape == (batch, num_classes), out.shape
    ref = reference_forward(params, x)
    assert jnp.all(jnp.isfinite(out))
    # log-softmax rows must (log-)sum to 0
    assert jnp.allclose(jax.scipy.special.logsumexp(out, axis=-1), 0.0, atol=1e-4)
    assert jnp.allclose(out, ref, atol=2e-3, rtol=2e-3), float(jnp.max(jnp.abs(out - ref)))

    print("KERNEL_OK")
</pallas_src>

<mosaic_0001>
module attributes {stable_mosaic.version = 11 : i64} {
  func.func @_cnn_fused_kernel(%arg0: i32, %arg1: memref<4x784x80xf32, #tpu.memory_space<vmem>>, %arg2: memref<80x128xf32, #tpu.memory_space<vmem>>, %arg3: memref<1x128xf32, #tpu.memory_space<vmem>>, %arg4: memref<25x8x128xf32, #tpu.memory_space<vmem>>, %arg5: memref<1x128xf32, #tpu.memory_space<vmem>>, %arg6: memref<25x16x128xf32, #tpu.memory_space<vmem>>, %arg7: memref<1x128xf32, #tpu.memory_space<vmem>>, %arg8: memref<128x128xf32, #tpu.memory_space<vmem>>, %arg9: memref<1x128xf32, #tpu.memory_space<vmem>>, %arg10: memref<128x128xf32, #tpu.memory_space<vmem>>, %arg11: memref<1x128xf32, #tpu.memory_space<vmem>>, %arg12: memref<1x4x128xf32, #tpu.memory_space<vmem>>, %arg13: memref<784x128xf32, #tpu.memory_space<vmem>>, %arg14: memref<196x8xf32, #tpu.memory_space<vmem>>, %arg15: memref<136x128xf32, #tpu.memory_space<vmem>>, %arg16: memref<16x128xf32, #tpu.memory_space<vmem>>, %arg17: memref<4x32x16xf32, #tpu.memory_space<vmem>>) attributes {dimension_semantics = [#tpu.dimension_semantics<parallel>], iteration_bounds = array<i64: 2>, scalar_prefetch = 0 : i64, scratch_operands = 5 : i64, tpu.core_type = #tpu.core_type<tc>, window_params = [{transform_indices = @transform_0, window_bounds = array<i64: 4, 784, 80>}, {pipeline_mode = #tpu.pipeline_mode<synchronous>, transform_indices = @transform_1, window_bounds = array<i64: 80, 128>}, {pipeline_mode = #tpu.pipeline_mode<synchronous>, transform_indices = @transform_2, window_bounds = array<i64: 1, 128>}, {pipeline_mode = #tpu.pipeline_mode<synchronous>, transform_indices = @transform_3, window_bounds = array<i64: 25, 8, 128>}, {pipeline_mode = #tpu.pipeline_mode<synchronous>, transform_indices = @transform_4, window_bounds = array<i64: 1, 128>}, {pipeline_mode = #tpu.pipeline_mode<synchronous>, transform_indices = @transform_5, window_bounds = array<i64: 25, 16, 128>}, {pipeline_mode = #tpu.pipeline_mode<synchronous>, transform_indices = @transform_6, window_bounds = array<i64: 1, 128>}, {pipeline_mode = #tpu.pipeline_mode<synchronous>, transform_indices = @transform_7, window_bounds = array<i64: 128, 128>}, {pipeline_mode = #tpu.pipeline_mode<synchronous>, transform_indices = @transform_8, window_bounds = array<i64: 1, 128>}, {pipeline_mode = #tpu.pipeline_mode<synchronous>, transform_indices = @transform_9, window_bounds = array<i64: 128, 128>}, {pipeline_mode = #tpu.pipeline_mode<synchronous>, transform_indices = @transform_10, window_bounds = array<i64: 1, 128>}, {transform_indices = @transform_11, window_bounds = array<i64: 1, 4, 128>}]} {
    %c0_i32 = arith.constant 0 : i32
    %c4_i32 = arith.constant 4 : i32
    %0 = arith.addi %c0_i32, %c4_i32 : i32
    %c1_i32 = arith.constant 1 : i32
    scf.for %arg18 = %c0_i32 to %0 step %c1_i32  : i32 {
      %188 = arith.index_cast %arg18 : i32 to index
      %c0_98 = arith.constant 0 : index
      %c0_99 = arith.constant 0 : index
      %189 = vector.load %arg1[%188, %c0_98, %c0_99] : memref<4x784x80xf32, #tpu.memory_space<vmem>>, vector<1x112x80xf32>
      %190 = vector.shape_cast %189 : vector<1x112x80xf32> to vector<112x80xf32>
      %c0_100 = arith.constant 0 : index
      %c0_101 = arith.constant 0 : index
      %191 = vector.load %arg2[%c0_100, %c0_101] : memref<80x128xf32, #tpu.memory_space<vmem>>, vector<80x128xf32>
      %cst_102 = arith.constant dense<0.000000e+00> : vector<112x128xf32>
      %192 = tpu.matmul %190, %191, %cst_102 {dimension_numbers = #tpu.dot_dimension_numbers<[1], [0], [0], [1], [0, 0, 1, 1], [], []>} : vector<112x80xf32>, vector<80x128xf32>, vector<112x128xf32> -> vector<112x128xf32>
      %c0_103 = arith.constant 0 : index
      %c0_104 = arith.constant 0 : index
      %193 = vector.load %arg13[%c0_103, %c0_104] : memref<784x128xf32, #tpu.memory_space<vmem>>, vector<112x128xf32>
      tpu.vector_store %arg13[%c0_103, %c0_104], %192 {strides = array<i32>} : memref<784x128xf32, #tpu.memory_space<vmem>>, vector<112x128xf32>,
      %194 = arith.index_cast %arg18 : i32 to index
      %c112 = arith.constant 112 : index
      %c0_105 = arith.constant 0 : index
      %195 = vector.load %arg1[%194, %c112, %c0_105] : memref<4x784x80xf32, #tpu.memory_space<vmem>>, vector<1x112x80xf32>
      %196 = vector.shape_cast %195 : vector<1x112x80xf32> to vector<112x80xf32>
      %c0_106 = arith.constant 0 : index
      %c0_107 = arith.constant 0 : index
      %197 = vector.load %arg2[%c0_106, %c0_107] : memref<80x128xf32, #tpu.memory_space<vmem>>, vector<80x128xf32>
      %cst_108 = arith.constant dense<0.000000e+00> : vector<112x128xf32>
      %198 = tpu.matmul %196, %197, %cst_108 {dimension_numbers = #tpu.dot_dimension_numbers<[1], [0], [0], [1], [0, 0, 1, 1], [], []>} : vector<112x80xf32>, vector<80x128xf32>, vector<112x128xf32> -> vector<112x128xf32>
      %c112_109 = arith.constant 112 : index
      %c0_110 = arith.constant 0 : index
      %199 = vector.load %arg13[%c112_109, %c0_110] : memref<784x128xf32, #tpu.memory_space<vmem>>, vector<112x128xf32>
      tpu.vector_store %arg13[%c112_109, %c0_110], %198 {strides = array<i32>} : memref<784x128xf32, #tpu.memory_space<vmem>>, vector<112x128xf32>,
      %200 = arith.index_cast %arg18 : i32 to index
      %c224 = arith.constant 224 : index
      %c0_111 = arith.constant 0 : index
      %201 = vector.load %arg1[%200, %c224, %c0_111] : memref<4x784x80xf32, #tpu.memory_space<vmem>>, vector<1x112x80xf32>
      %202 = vector.shape_cast %201 : vector<1x112x80xf32> to vector<112x80xf32>
      %c0_112 = arith.constant 0 : index
      %c0_113 = arith.constant 0 : index
      %203 = vector.load %arg2[%c0_112, %c0_113] : memref<80x128xf32, #tpu.memory_space<vmem>>, vector<80x128xf32>
      %cst_114 = arith.constant dense<0.000000e+00> : vector<112x128xf32>
      %204 = tpu.matmul %202, %203, %cst_114 {dimension_numbers = #tpu.dot_dimension_numbers<[1], [0], [0], [1], [0, 0, 1, 1], [], []>} : vector<112x80xf32>, vector<80x128xf32>, vector<112x128xf32> -> vector<112x128xf32>
      %c224_115 = arith.constant 224 : index
      %c0_116 = arith.constant 0 : index
      %205 = vector.load %arg13[%c224_115, %c0_116] : memref<784x128xf32, #tpu.memory_space<vmem>>, vector<112x128xf32>
      tpu.vector_store %arg13[%c224_115, %c0_116], %204 {strides = array<i32>} : memref<784x128xf32, #tpu.memory_space<vmem>>, vector<112x128xf32>,
      %206 = arith.index_cast %arg18 : i32 to index
      %c336 = arith.constant 336 : index
      %c0_117 = arith.constant 0 : index
      %207 = vector.load %arg1[%206, %c336, %c0_117] : memref<4x784x80xf32, #tpu.memory_space<vmem>>, vector<1x112x80xf32>
      %208 = vector.shape_cast %207 : vector<1x112x80xf32> to vector<112x80xf32>
      %c0_118 = arith.constant 0 : index
      %c0_119 = arith.constant 0 : index
      %209 = vector.load %arg2[%c0_118, %c0_119] : memref<80x128xf32, #tpu.memory_space<vmem>>, vector<80x128xf32>
      %cst_120 = arith.constant dense<0.000000e+00> : vector<112x128xf32>
      %210 = tpu.matmul %208, %209, %cst_120 {dimension_numbers = #tpu.dot_dimension_numbers<[1], [0], [0], [1], [0, 0, 1, 1], [], []>} : vector<112x80xf32>, vector<80x128xf32>, vector<112x128xf32> -> vector<112x128xf32>
      %c336_121 = arith.constant 336 : index
      %c0_122 = arith.constant 0 : index
      %211 = vector.load %arg13[%c336_121, %c0_122] : memref<784x128xf32, #tpu.memory_space<vmem>>, vector<112x128xf32>
      tpu.vector_store %arg13[%c336_121, %c0_122], %210 {strides = array<i32>} : memref<784x128xf32, #tpu.memory_space<vmem>>, vector<112x128xf32>,
      %212 = arith.index_cast %arg18 : i32 to index
      %c448 = arith.constant 448 : index
      %c0_123 = arith.constant 0 : index
      %213 = vector.load %arg1[%212, %c448, %c0_123] : memref<4x784x80xf32, #tpu.memory_space<vmem>>, vector<1x112x80xf32>
      %214 = vector.shape_cast %213 : vector<1x112x80xf32> to vector<112x80xf32>
      %c0_124 = arith.constant 0 : index
      %c0_125 = arith.constant 0 : index
      %215 = vector.load %arg2[%c0_124, %c0_125] : memref<80x128xf32, #tpu.memory_space<vmem>>, vector<80x128xf32>
      %cst_126 = arith.constant dense<0.000000e+00> : vector<112x128xf32>
      %216 = tpu.matmul %214, %215, %cst_126 {dimension_numbers = #tpu.dot_dimension_numbers<[1], [0], [0], [1], [0, 0, 1, 1], [], []>} : vector<112x80xf32>, vector<80x128xf32>, vector<112x128xf32> -> vector<112x128xf32>
      %c448_127 = arith.constant 448 : index
      %c0_128 = arith.constant 0 : index
      %217 = vector.load %arg13[%c448_127, %c0_128] : memref<784x128xf32, #tpu.memory_space<vmem>>, vector<112x128xf32>
      tpu.vector_store %arg13[%c448_127, %c0_128], %216 {strides = array<i32>} : memref<784x128xf32, #tpu.memory_space<vmem>>, vector<112x128xf32>,
      %218 = arith.index_cast %arg18 : i32 to index
      %c560 = arith.constant 560 : index
      %c0_129 = arith.constant 0 : index
      %219 = vector.load %arg1[%218, %c560, %c0_129] : memref<4x784x80xf32, #tpu.memory_space<vmem>>, vector<1x112x80xf32>
      %220 = vector.shape_cast %219 : vector<1x112x80xf32> to vector<112x80xf32>
      %c0_130 = arith.constant 0 : index
      %c0_131 = arith.constant 0 : index
      %221 = vector.load %arg2[%c0_130, %c0_131] : memref<80x128xf32, #tpu.memory_space<vmem>>, vector<80x128xf32>
      %cst_132 = arith.constant dense<0.000000e+00> : vector<112x128xf32>
      %222 = tpu.matmul %220, %221, %cst_132 {dimension_numbers = #tpu.dot_dimension_numbers<[1], [0], [0], [1], [0, 0, 1, 1], [], []>} : vector<112x80xf32>, vector<80x128xf32>, vector<112x128xf32> -> vector<112x128xf32>
      %c560_133 = arith.constant 560 : index
      %c0_134 = arith.constant 0 : index
      %223 = vector.load %arg13[%c560_133, %c0_134] : memref<784x128xf32, #tpu.memory_space<vmem>>, vector<112x128xf32>
      tpu.vector_store %arg13[%c560_133, %c0_134], %222 {strides = array<i32>} : memref<784x128xf32, #tpu.memory_space<vmem>>, vector<112x128xf32>,
      %224 = arith.index_cast %arg18 : i32 to index
      %c672 = arith.constant 672 : index
      %c0_135 = arith.constant 0 : index
      %225 = vector.load %arg1[%224, %c672, %c0_135] : memref<4x784x80xf32, #tpu.memory_space<vmem>>, vector<1x112x80xf32>
      %226 = vector.shape_cast %225 : vector<1x112x80xf32> to vector<112x80xf32>
      %c0_136 = arith.constant 0 : index
      %c0_137 = arith.constant 0 : index
      %227 = vector.load %arg2[%c0_136, %c0_137] : memref<80x128xf32, #tpu.memory_space<vmem>>, vector<80x128xf32>
      %cst_138 = arith.constant dense<0.000000e+00> : vector<112x128xf32>
      %228 = tpu.matmul %226, %227, %cst_138 {dimension_numbers = #tpu.dot_dimension_numbers<[1], [0], [0], [1], [0, 0, 1, 1], [], []>} : vector<112x80xf32>, vector<80x128xf32>, vector<112x128xf32> -> vector<112x128xf32>
      %c672_139 = arith.constant 672 : index
      %c0_140 = arith.constant 0 : index
      %229 = vector.load %arg13[%c672_139, %c0_140] : memref<784x128xf32, #tpu.memory_space<vmem>>, vector<112x128xf32>
      tpu.vector_store %arg13[%c672_139, %c0_140], %228 {strides = array<i32>} : memref<784x128xf32, #tpu.memory_space<vmem>>, vector<112x128xf32>,
      %c0_141 = arith.constant 0 : index
      %c0_142 = arith.constant 0 : index
      %230 = tpu.strided_load %arg13[%c0_141, %c0_142] {strides = array<i32: 4, 1>} : memref<784x128xf32, #tpu.memory_space<vmem>>, vector<196x128xf32>
      %c1_143 = arith.constant 1 : index
      %c0_144 = arith.constant 0 : index
      %231 = tpu.strided_load %arg13[%c1_143, %c0_144] {strides = array<i32: 4, 1>} : memref<784x128xf32, #tpu.memory_space<vmem>>, vector<196x128xf32>
      %c2_145 = arith.constant 2 : index
      %c0_146 = arith.constant 0 : index
      %232 = tpu.strided_load %arg13[%c2_145, %c0_146] {strides = array<i32: 4, 1>} : memref<784x128xf32, #tpu.memory_space<vmem>>, vector<196x128xf32>
      %c3_147 = arith.constant 3 : index
      %c0_148 = arith.constant 0 : index
      %233 = tpu.strided_load %arg13[%c3_147, %c0_148] {strides = array<i32: 4, 1>} : memref<784x128xf32, #tpu.memory_space<vmem>>, vector<196x128xf32>
      %234 = arith.maximumf %230, %231 : vector<196x128xf32>
      %235 = arith.maximumf %232, %233 : vector<196x128xf32>
      %236 = arith.maximumf %234, %235 : vector<196x128xf32>
      %c0_149 = arith.constant 0 : index
      %c0_150 = arith.constant 0 : index
      %237 = vector.load %arg3[%c0_149, %c0_150] : memref<1x128xf32, #tpu.memory_space<vmem>>, vector<1x128xf32>
      %238 = vector.broadcast %237 : vector<1x128xf32> to vector<196x128xf32>
      %239 = arith.addf %236, %238 : vector<196x128xf32>
      %cst_151 = arith.constant 0.000000e+00 : f32
      %240 = vector.broadcast %cst_151 : f32 to vector<196x128xf32>
      %241 = arith.maximumf %239, %240 : vector<196x128xf32>
      %242 = vector.extract_strided_slice %241 {offsets = [0, 0], sizes = [196, 8], strides = [1, 1]} : vector<196x128xf32> to vector<196x8xf32>
      %c0_152 = arith.constant 0 : index
      %c0_153 = arith.constant 0 : index
      %243 = vector.load %arg14[%c0_152, %c0_153] : memref<196x8xf32, #tpu.memory_space<vmem>>, vector<196x8xf32>
      tpu.vector_store %arg14[%c0_152, %c0_153], %242 {strides = array<i32>} : memref<196x8xf32, #tpu.memory_space<vmem>>, vector<196x8xf32>,
      %c0_154 = arith.constant 0 : index
      %c0_155 = arith.constant 0 : index
      %244 = vector.load %arg14[%c0_154, %c0_155] : memref<196x8xf32, #tpu.memory_space<vmem>>, vector<64x8xf32>
      %c0_156 = arith.constant 0 : index
      %c0_157 = arith.constant 0 : index
      %c0_158 = arith.constant 0 : index
      %245 = vector.load %arg4[%c0_156, %c0_157, %c0_158] : memref<25x8x128xf32, #tpu.memory_space<vmem>>, vector<1x8x128xf32>
      %246 = vector.shape_cast %245 : vector<1x8x128xf32> to vector<8x128xf32>
      %cst_159 = arith.constant dense<0.000000e+00> : vector<64x128xf32>
      %247 = tpu.matmul %244, %246, %cst_159 {dimension_numbers = #tpu.dot_dimension_numbers<[1], [0], [0], [1], [0, 0, 1, 1], [], []>} : vector<64x8xf32>, vector<8x128xf32>, vector<64x128xf32> -> vector<64x128xf32>
      %c1_160 = arith.constant 1 : index
      %c0_161 = arith.constant 0 : index
      %248 = vector.load %arg14[%c1_160, %c0_161] : memref<196x8xf32, #tpu.memory_space<vmem>>, vector<64x8xf32>
      %c1_162 = arith.constant 1 : index
      %c0_163 = arith.constant 0 : index
      %c0_164 = arith.constant 0 : index
      %249 = vector.load %arg4[%c1_162, %c0_163, %c0_164] : memref<25x8x128xf32, #tpu.memory_space<vmem>>, vector<1x8x128xf32>
      %250 = vector.shape_cast %249 : vector<1x8x128xf32> to vector<8x128xf32>
      %cst_165 = arith.constant dense<0.000000e+00> : vector<64x128xf32>
      %251 = tpu.matmul %248, %250, %cst_165 {dimension_numbers = #tpu.dot_dimension_numbers<[1], [0], [0], [1], [0, 0, 1, 1], [], []>} : vector<64x8xf32>, vector<8x128xf32>, vector<64x128xf32> -> vector<64x128xf32>
      %252 = arith.addf %247, %251 : vector<64x128xf32>
      %c2_166 = arith.constant 2 : index
      %c0_167 = arith.constant 0 : index
      %253 = vector.load %arg14[%c2_166, %c0_167] : memref<196x8xf32, #tpu.memory_space<vmem>>, vector<64x8xf32>
      %c2_168 = arith.constant 2 : index
      %c0_169 = arith.constant 0 : index
      %c0_170 = arith.constant 0 : index
      %254 = vector.load %arg4[%c2_168, %c0_169, %c0_170] : memref<25x8x128xf32, #tpu.memory_space<vmem>>, vector<1x8x128xf32>
      %255 = vector.shape_cast %254 : vector<1x8x128xf32> to vector<8x128xf32>
      %cst_171 = arith.constant dense<0.000000e+00> : vector<64x128xf32>
      %256 = tpu.matmul %253, %255, %cst_171 {dimension_numbers = #tpu.dot_dimension_numbers<[1], [0], [0], [1], [0, 0, 1, 1], [], []>} : vector<64x8xf32>, vector<8x128xf32>, vector<64x128xf32> -> vector<64x128xf32>
      %257 = arith.addf %252, %256 : vector<64x128xf32>
      %c3_172 = arith.constant 3 : index
      %c0_173 = arith.constant 0 : index
      %258 = vector.load %arg14[%c3_172, %c0_173] : memref<196x8xf32, #tpu.memory_space<vmem>>, vector<64x8xf32>
      %c3_174 = arith.constant 3 : index
      %c0_175 = arith.constant 0 : index
      %c0_176 = arith.constant 0 : index
      %259 = vector.load %arg4[%c3_174, %c0_175, %c0_176] : memref<25x8x128xf32, #tpu.memory_space<vmem>>, vector<1x8x128xf32>
      %260 = vector.shape_cast %259 : vector<1x8x128xf32> to vector<8x128xf32>
      %cst_177 = arith.constant dense<0.000000e+00> : vector<64x128xf32>
      %261 = tpu.matmul %258, %260, %cst_177 {dimension_numbers = #tpu.dot_dimension_numbers<[1], [0], [0], [1], [0, 0, 1, 1], [], []>} : vector<64x8xf32>, vector<8x128xf32>, vector<64x128xf32> -> vector<64x128xf32>
      %262 = arith.addf %257, %261 : vector<64x128xf32>
      %c4_178 = arith.constant 4 : index
      %c0_179 = arith.constant 0 : index
      %263 = vector.load %arg14[%c4_178, %c0_179] : memref<196x8xf32, #tpu.memory_space<vmem>>, vector<64x8xf32>
      %c4_180 = arith.constant 4 : index
      %c0_181 = arith.constant 0 : index
      %c0_182 = arith.constant 0 : index
      %264 = vector.load %arg4[%c4_180, %c0_181, %c0_182] : memref<25x8x128xf32, #tpu.memory_space<vmem>>, vector<1x8x128xf32>
      %265 = vector.shape_cast %264 : vector<1x8x128xf32> to vector<8x128xf32>
      %cst_183 = arith.constant dense<0.000000e+00> : vector<64x128xf32>
      %266 = tpu.matmul %263, %265, %cst_183 {dimension_numbers = #tpu.dot_dimension_numbers<[1], [0], [0], [1], [0, 0, 1, 1], [], []>} : vector<64x8xf32>, vector<8x128xf32>, vector<64x128xf32> -> vector<64x128xf32>
      %267 = arith.addf %262, %266 : vector<64x128xf32>
      %c14_184 = arith.constant 14 : index
      %c0_185 = arith.constant 0 : index
      %268 = vector.load %arg14[%c14_184, %c0_185] : memref<196x8xf32, #tpu.memory_space<vmem>>, vector<64x8xf32>
      %c5_186 = arith.constant 5 : index
      %c0_187 = arith.constant 0 : index
      %c0_188 = arith.constant 0 : index
      %269 = vector.load %arg4[%c5_186, %c0_187, %c0_188] : memref<25x8x128xf32, #tpu.memory_space<vmem>>, vector<1x8x128xf32>
      %270 = vector.shape_cast %269 : vector<1x8x128xf32> to vector<8x128xf32>
      %cst_189 = arith.constant dense<0.000000e+00> : vector<64x128xf32>
      %271 = tpu.matmul %268, %270, %cst_189 {dimension_numbers = #tpu.dot_dimension_numbers<[1], [0], [0], [1], [0, 0, 1, 1], [], []>} : vector<64x8xf32>, vector<8x128xf32>, vector<64x128xf32> -> vector<64x128xf32>
      %272 = arith.addf %267, %271 : vector<64x128xf32>
      %c15_190 = arith.constant 15 : index
      %c0_191 = arith.constant 0 : index
      %273 = vector.load %arg14[%c15_190, %c0_191] : memref<196x8xf32, #tpu.memory_space<vmem>>, vector<64x8xf32>
      %c6_192 = arith.constant 6 : index
      %c0_193 = arith.constant 0 : index
      %c0_194 = arith.constant 0 : index
      %274 = vector.load %arg4[%c6_192, %c0_193, %c0_194] : memref<25x8x128xf32, #tpu.memory_space<vmem>>, vector<1x8x128xf32>
      %275 = vector.shape_cast %274 : vector<1x8x128xf32> to vector<8x128xf32>
      %cst_195 = arith.constant dense<0.000000e+00> : vector<64x128xf32>
      %276 = tpu.matmul %273, %275, %cst_195 {dimension_numbers = #tpu.dot_dimension_numbers<[1], [0], [0], [1], [0, 0, 1, 1], [], []>} : vector<64x8xf32>, vector<8x128xf32>, vector<64x128xf32> -> vector<64x128xf32>
      %277 = arith.addf %272, %276 : vector<64x128xf32>
      %c16_196 = arith.constant 16 : index
      %c0_197 = arith.constant 0 : index
      %278 = vector.load %arg14[%c16_196, %c0_197] : memref<196x8xf32, #tpu.memory_space<vmem>>, vector<64x8xf32>
      %c7_198 = arith.constant 7 : index
      %c0_199 = arith.constant 0 : index
      %c0_200 = arith.constant 0 : index
      %279 = vector.load %arg4[%c7_198, %c0_199, %c0_200] : memref<25x8x128xf32, #tpu.memory_space<vmem>>, vector<1x8x128xf32>
      %280 = vector.shape_cast %279 : vector<1x8x128xf32> to vector<8x128xf32>
      %cst_201 = arith.constant dense<0.000000e+00> : vector<64x128xf32>
      %281 = tpu.matmul %278, %280, %cst_201 {dimension_numbers = #tpu.dot_dimension_numbers<[1], [0], [0], [1], [0, 0, 1, 1], [], []>} : vector<64x8xf32>, vector<8x128xf32>, vector<64x128xf32> -> vector<64x128xf32>
      %282 = arith.addf %277, %281 : vector<64x128xf32>
      %c17_202 = arith.constant 17 : index
      %c0_203 = arith.constant 0 : index
      %283 = vector.load %arg14[%c17_202, %c0_203] : memref<196x8xf32, #tpu.memory_space<vmem>>, vector<64x8xf32>
      %c8_204 = arith.constant 8 : index
      %c0_205 = arith.constant 0 : index
      %c0_206 = arith.constant 0 : index
      %284 = vector.load %arg4[%c8_204, %c0_205, %c0_206] : memref<25x8x128xf32, #tpu.memory_space<vmem>>, vector<1x8x128xf32>
      %285 = vector.shape_cast %284 : vector<1x8x128xf32> to vector<8x128xf32>
      %cst_207 = arith.constant dense<0.000000e+00> : vector<64x128xf32>
      %286 = tpu.matmul %283, %285, %cst_207 {dimension_numbers = #tpu.dot_dimension_numbers<[1], [0], [0], [1], [0, 0, 1, 1], [], []>} : vector<64x8xf32>, vector<8x128xf32>, vector<64x128xf32> -> vector<64x128xf32>
      %287 = arith.addf %282, %286 : vector<64x128xf32>
      %c18_208 = arith.constant 18 : index
      %c0_209 = arith.constant 0 : index
      %288 = vector.load %arg14[%c18_208, %c0_209] : memref<196x8xf32, #tpu.memory_space<vmem>>, vector<64x8xf32>
      %c9_210 = arith.constant 9 : index
      %c0_211 = arith.constant 0 : index
      %c0_212 = arith.constant 0 : index
      %289 = vector.load %arg4[%c9_210, %c0_211, %c0_212] : memref<25x8x128xf32, #tpu.memory_space<vmem>>, vector<1x8x128xf32>
      %290 = vector.shape_cast %289 : vector<1x8x128xf32> to vector<8x128xf32>
      %cst_213 = arith.constant dense<0.000000e+00> : vector<64x128xf32>
      %291 = tpu.matmul %288, %290, %cst_213 {dimension_numbers = #tpu.dot_dimension_numbers<[1], [0], [0], [1], [0, 0, 1, 1], [], []>} : vector<64x8xf32>, vector<8x128xf32>, vector<64x128xf32> -> vector<64x128xf32>
      %292 = arith.addf %287, %291 : vector<64x128xf32>
      %c28 = arith.constant 28 : index
      %c0_214 = arith.constant 0 : index
      %293 = vector.load %arg14[%c28, %c0_214] : memref<196x8xf32, #tpu.memory_space<vmem>>, vector<64x8xf32>
      %c10_215 = arith.constant 10 : index
      %c0_216 = arith.constant 0 : index
      %c0_217 = arith.constant 0 : index
      %294 = vector.load %arg4[%c10_215, %c0_216, %c0_217] : memref<25x8x128xf32, #tpu.memory_space<vmem>>, vector<1x8x128xf32>
      %295 = vector.shape_cast %294 : vector<1x8x128xf32> to vector<8x128xf32>
      %cst_218 = arith.constant dense<0.000000e+00> : vector<64x128xf32>
      %296 = tpu.matmul %293, %295, %cst_218 {dimension_numbers = #tpu.dot_dimension_numbers<[1], [0], [0], [1], [0, 0, 1, 1], [], []>} : vector<64x8xf32>, vector<8x128xf32>, vector<64x128xf32> -> vector<64x128xf32>
      %297 = arith.addf %292, %296 : vector<64x128xf32>
      %c29 = arith.constant 29 : index
      %c0_219 = arith.constant 0 : index
      %298 = vector.load %arg14[%c29, %c0_219] : memref<196x8xf32, #tpu.memory_space<vmem>>, vector<64x8xf32>
      %c11_220 = arith.constant 11 : index
      %c0_221 = arith.constant 0 : index
      %c0_222 = arith.constant 0 : index
      %299 = vector.load %arg4[%c11_220, %c0_221, %c0_222] : memref<25x8x128xf32, #tpu.memory_space<vmem>>, vector<1x8x128xf32>
      %300 = vector.shape_cast %299 : vector<1x8x128xf32> to vector<8x128xf32>
      %cst_223 = arith.constant dense<0.000000e+00> : vector<64x128xf32>
      %301 = tpu.matmul %298, %300, %cst_223 {dimension_numbers = #tpu.dot_dimension_numbers<[1], [0], [0], [1], [0, 0, 1, 1], [], []>} : vector<64x8xf32>, vector<8x128xf32>, vector<64x128xf32> -> vector<64x128xf32>
      %302 = arith.addf %297, %301 : vector<64x128xf32>
      %c30 = arith.constant 30 : index
      %c0_224 = arith.constant 0 : index
      %303 = vector.load %arg14[%c30, %c0_224] : memref<196x8xf32, #tpu.memory_space<vmem>>, vector<64x8xf32>
      %c12_225 = arith.constant 12 : index
      %c0_226 = arith.constant 0 : index
      %c0_227 = arith.constant 0 : index
      %304 = vector.load %arg4[%c12_225, %c0_226, %c0_227] : memref<25x8x128xf32, #tpu.memory_space<vmem>>, vector<1x8x128xf32>
      %305 = vector.shape_cast %304 : vector<1x8x128xf32> to vector<8x128xf32>
      %cst_228 = arith.constant dense<0.000000e+00> : vector<64x128xf32>
      %306 = tpu.matmul %303, %305, %cst_228 {dimension_numbers = #tpu.dot_dimension_numbers<[1], [0], [0], [1], [0, 0, 1, 1], [], []>} : vector<64x8xf32>, vector<8x128xf32>, vector<64x128xf32> -> vector<64x128xf32>
      %307 = arith.addf %302, %306 : vector<64x128xf32>
      %c31 = arith.constant 31 : index
      %c0_229 = arith.constant 0 : index
      %308 = vector.load %arg14[%c31, %c0_229] : memref<196x8xf32, #tpu.memory_space<vmem>>, vector<64x8xf32>
      %c13_230 = arith.constant 13 : index
      %c0_231 = arith.constant 0 : index
      %c0_232 = arith.constant 0 : index
      %309 = vector.load %arg4[%c13_230, %c0_231, %c0_232] : memref<25x8x128xf32, #tpu.memory_space<vmem>>, vector<1x8x128xf32>
      %310 = vector.shape_cast %309 : vector<1x8x128xf32> to vector<8x128xf32>
      %cst_233 = arith.constant dense<0.000000e+00> : vector<64x128xf32>
      %311 = tpu.matmul %308, %310, %cst_233 {dimension_numbers = #tpu.dot_dimension_numbers<[1], [0], [0], [1], [0, 0, 1, 1], [], []>} : vector<64x8xf32>, vector<8x128xf32>, vector<64x128xf32> -> vector<64x128xf32>
      %312 = arith.addf %307, %311 : vector<64x128xf32>
      %c32 = arith.constant 32 : index
      %c0_234 = arith.constant 0 : index
      %313 = vector.load %arg14[%c32, %c0_234] : memref<196x8xf32, #tpu.memory_space<vmem>>, vector<64x8xf32>
      %c14_235 = arith.constant 14 : index
      %c0_236 = arith.constant 0 : index
      %c0_237 = arith.constant 0 : index
      %314 = vector.load %arg4[%c14_235, %c0_236, %c0_237] : memref<25x8x128xf32, #tpu.memory_space<vmem>>, vector<1x8x128xf32>
      %315 = vector.shape_cast %314 : vector<1x8x128xf32> to vector<8x128xf32>
      %cst_238 = arith.constant dense<0.000000e+00> : vector<64x128xf32>
      %316 = tpu.matmul %313, %315, %cst_238 {dimension_numbers = #tpu.dot_dimension_numbers<[1], [0], [0], [1], [0, 0, 1, 1], [], []>} : vector<64x8xf32>, vector<8x128xf32>, vector<64x128xf32> -> vector<64x128xf32>
      %317 = arith.addf %312, %316 : vector<64x128xf32>
      %c42 = arith.constant 42 : index
      %c0_239 = arith.constant 0 : index
      %318 = vector.load %arg14[%c42, %c0_239] : memref<196x8xf32, #tpu.memory_space<vmem>>, vector<64x8xf32>
      %c15_240 = arith.constant 15 : index
      %c0_241 = arith.constant 0 : index
      %c0_242 = arith.constant 0 : index
      %319 = vector.load %arg4[%c15_240, %c0_241, %c0_242] : memref<25x8x128xf32, #tpu.memory_space<vmem>>, vector<1x8x128xf32>
      %320 = vector.shape_cast %319 : vector<1x8x128xf32> to vector<8x128xf32>
      %cst_243 = arith.constant dense<0.000000e+00> : vector<64x128xf32>
      %321 = tpu.matmul %318, %320, %cst_243 {dimension_numbers = #tpu.dot_dimension_numbers<[1], [0], [0], [1], [0, 0, 1, 1], [], []>} : vector<64x8xf32>, vector<8x128xf32>, vector<64x128xf32> -> vector<64x128xf32>
      %322 = arith.addf %317, %321 : vector<64x128xf32>
      %c43 = arith.constant 43 : index
      %c0_244 = arith.constant 0 : index
      %323 = vector.load %arg14[%c43, %c0_244] : memref<196x8xf32, #tpu.memory_space<vmem>>, vector<64x8xf32>
      %c16_245 = arith.constant 16 : index
      %c0_246 = arith.constant 0 : index
      %c0_247 = arith.constant 0 : index
      %324 = vector.load %arg4[%c16_245, %c0_246, %c0_247] : memref<25x8x128xf32, #tpu.memory_space<vmem>>, vector<1x8x128xf32>
      %325 = vector.shape_cast %324 : vector<1x8x128xf32> to vector<8x128xf32>
      %cst_248 = arith.constant dense<0.000000e+00> : vector<64x128xf32>
      %326 = tpu.matmul %323, %325, %cst_248 {dimension_numbers = #tpu.dot_dimension_numbers<[1], [0], [0], [1], [0, 0, 1, 1], [], []>} : vector<64x8xf32>, vector<8x128xf32>, vector<64x128xf32> -> vector<64x128xf32>
      %327 = arith.addf %322, %326 : vector<64x128xf32>
      %c44 = arith.constant 44 : index
      %c0_249 = arith.constant 0 : index
      %328 = vector.load %arg14[%c44, %c0_249] : memref<196x8xf32, #tpu.memory_space<vmem>>, vector<64x8xf32>
      %c17_250 = arith.constant 17 : index
      %c0_251 = arith.constant 0 : index
      %c0_252 = arith.constant 0 : index
      %329 = vector.load %arg4[%c17_250, %c0_251, %c0_252] : memref<25x8x128xf32, #tpu.memory_space<vmem>>, vector<1x8x128xf32>
      %330 = vector.shape_cast %329 : vector<1x8x128xf32> to vector<8x128xf32>
      %cst_253 = arith.constant dense<0.000000e+00> : vector<64x128xf32>
      %331 = tpu.matmul %328, %330, %cst_253 {dimension_numbers = #tpu.dot_dimension_numbers<[1], [0], [0], [1], [0, 0, 1, 1], [], []>} : vector<64x8xf32>, vector<8x128xf32>, vector<64x128xf32> -> vector<64x128xf32>
      %332 = arith.addf %327, %331 : vector<64x128xf32>
      %c45 = arith.constant 45 : index
      %c0_254 = arith.constant 0 : index
      %333 = vector.load %arg14[%c45, %c0_254] : memref<196x8xf32, #tpu.memory_space<vmem>>, vector<64x8xf32>
      %c18_255 = arith.constant 18 : index
      %c0_256 = arith.constant 0 : index
      %c0_257 = arith.constant 0 : index
      %334 = vector.load %arg4[%c18_255, %c0_256, %c0_257] : memref<25x8x128xf32, #tpu.memory_space<vmem>>, vector<1x8x128xf32>
      %335 = vector.shape_cast %334 : vector<1x8x128xf32> to vector<8x128xf32>
      %cst_258 = arith.constant dense<0.000000e+00> : vector<64x128xf32>
      %336 = tpu.matmul %333, %335, %cst_258 {dimension_numbers = #tpu.dot_dimension_numbers<[1], [0], [0], [1], [0, 0, 1, 1], [], []>} : vector<64x8xf32>, vector<8x128xf32>, vector<64x128xf32> -> vector<64x128xf32>
      %337 = arith.addf %332, %336 : vector<64x128xf32>
      %c46 = arith.constant 46 : index
      %c0_259 = arith.constant 0 : index
      %338 = vector.load %arg14[%c46, %c0_259] : memref<196x8xf32, #tpu.memory_space<vmem>>, vector<64x8xf32>
      %c19_260 = arith.constant 19 : index
      %c0_261 = arith.constant 0 : index
      %c0_262 = arith.constant 0 : index
      %339 = vector.load %arg4[%c19_260, %c0_261, %c0_262] : memref<25x8x128xf32, #tpu.memory_space<vmem>>, vector<1x8x128xf32>
      %340 = vector.shape_cast %339 : vector<1x8x128xf32> to vector<8x128xf32>
      %cst_263 = arith.constant dense<0.000000e+00> : vector<64x128xf32>
      %341 = tpu.matmul %338, %340, %cst_263 {dimension_numbers = #tpu.dot_dimension_numbers<[1], [0], [0], [1], [0, 0, 1, 1], [], []>} : vector<64x8xf32>, vector<8x128xf32>, vector<64x128xf32> -> vector<64x128xf32>
      %342 = arith.addf %337, %341 : vector<64x128xf32>
      %c56 = arith.constant 56 : index
      %c0_264 = arith.constant 0 : index
      %343 = vector.load %arg14[%c56, %c0_264] : memref<196x8xf32, #tpu.memory_space<vmem>>, vector<64x8xf32>
      %c20_265 = arith.constant 20 : index
      %c0_266 = arith.constant 0 : index
      %c0_267 = arith.constant 0 : index
      %344 = vector.load %arg4[%c20_265, %c0_266, %c0_267] : memref<25x8x128xf32, #tpu.memory_space<vmem>>, vector<1x8x128xf32>
      %345 = vector.shape_cast %344 : vector<1x8x128xf32> to vector<8x128xf32>
      %cst_268 = arith.constant dense<0.000000e+00> : vector<64x128xf32>
      %346 = tpu.matmul %343, %345, %cst_268 {dimension_numbers = #tpu.dot_dimension_numbers<[1], [0], [0], [1], [0, 0, 1, 1], [], []>} : vector<64x8xf32>, vector<8x128xf32>, vector<64x128xf32> -> vector<64x128xf32>
      %347 = arith.addf %342, %346 : vector<64x128xf32>
      %c57 = arith.constant 57 : index
      %c0_269 = arith.constant 0 : index
      %348 = vector.load %arg14[%c57, %c0_269] : memref<196x8xf32, #tpu.memory_space<vmem>>, vector<64x8xf32>
      %c21_270 = arith.constant 21 : index
      %c0_271 = arith.constant 0 : index
      %c0_272 = arith.constant 0 : index
      %349 = vector.load %arg4[%c21_270, %c0_271, %c0_272] : memref<25x8x128xf32, #tpu.memory_space<vmem>>, vector<1x8x128xf32>
      %350 = vector.shape_cast %349 : vector<1x8x128xf32> to vector<8x128xf32>
      %cst_273 = arith.constant dense<0.000000e+00> : vector<64x128xf32>
      %351 = tpu.matmul %348, %350, %cst_273 {dimension_numbers = #tpu.dot_dimension_numbers<[1], [0], [0], [1], [0, 0, 1, 1], [], []>} : vector<64x8xf32>, vector<8x128xf32>, vector<64x128xf32> -> vector<64x128xf32>
      %352 = arith.addf %347, %351 : vector<64x128xf32>
      %c58 = arith.constant 58 : index
      %c0_274 = arith.constant 0 : index
      %353 = vector.load %arg14[%c58, %c0_274] : memref<196x8xf32, #tpu.memory_space<vmem>>, vector<64x8xf32>
      %c22_275 = arith.constant 22 : index
      %c0_276 = arith.constant 0 : index
      %c0_277 = arith.constant 0 : index
      %354 = vector.load %arg4[%c22_275, %c0_276, %c0_277] : memref<25x8x128xf32, #tpu.memory_space<vmem>>, vector<1x8x128xf32>
      %355 = vector.shape_cast %354 : vector<1x8x128xf32> to vector<8x128xf32>
      %cst_278 = arith.constant dense<0.000000e+00> : vector<64x128xf32>
      %356 = tpu.matmul %353, %355, %cst_278 {dimension_numbers = #tpu.dot_dimension_numbers<[1], [0], [0], [1], [0, 0, 1, 1], [], []>} : vector<64x8xf32>, vector<8x128xf32>, vector<64x128xf32> -> vector<64x128xf32>
      %357 = arith.addf %352, %356 : vector<64x128xf32>
      %c59 = arith.constant 59 : index
      %c0_279 = arith.constant 0 : index
      %358 = vector.load %arg14[%c59, %c0_279] : memref<196x8xf32, #tpu.memory_space<vmem>>, vector<64x8xf32>
      %c23_280 = arith.constant 23 : index
      %c0_281 = arith.constant 0 : index
      %c0_282 = arith.constant 0 : index
      %359 = vector.load %arg4[%c23_280, %c0_281, %c0_282] : memref<25x8x128xf32, #tpu.memory_space<vmem>>, vector<1x8x128xf32>
      %360 = vector.shape_cast %359 : vector<1x8x128xf32> to vector<8x128xf32>
      %cst_283 = arith.constant dense<0.000000e+00> : vector<64x128xf32>
      %361 = tpu.matmul %358, %360, %cst_283 {dimension_numbers = #tpu.dot_dimension_numbers<[1], [0], [0], [1], [0, 0, 1, 1], [], []>} : vector<64x8xf32>, vector<8x128xf32>, vector<64x128xf32> -> vector<64x128xf32>
      %362 = arith.addf %357, %361 : vector<64x128xf32>
      %c60 = arith.constant 60 : index
      %c0_284 = arith.constant 0 : index
      %363 = vector.load %arg14[%c60, %c0_284] : memref<196x8xf32, #tpu.memory_space<vmem>>, vector<64x8xf32>
      %c24_285 = arith.constant 24 : index
      %c0_286 = arith.constant 0 : index
      %c0_287 = arith.constant 0 : index
      %364 = vector.load %arg4[%c24_285, %c0_286, %c0_287] : memref<25x8x128xf32, #tpu.memory_space<vmem>>, vector<1x8x128xf32>
      %365 = vector.shape_cast %364 : vector<1x8x128xf32> to vector<8x128xf32>
      %cst_288 = arith.constant dense<0.000000e+00> : vector<64x128xf32>
      %366 = tpu.matmul %363, %365, %cst_288 {dimension_numbers = #tpu.dot_dimension_numbers<[1], [0], [0], [1], [0, 0, 1, 1], [], []>} : vector<64x8xf32>, vector<8x128xf32>, vector<64x128xf32> -> vector<64x128xf32>
      %367 = arith.addf %362, %366 : vector<64x128xf32>
      %c0_289 = arith.constant 0 : index
      %c0_290 = arith.constant 0 : index
      %368 = vector.load %arg15[%c0_289, %c0_290] : memref<136x128xf32, #tpu.memory_space<vmem>>, vector<64x128xf32>
      tpu.vector_store %arg15[%c0_289, %c0_290], %367 {strides = array<i32>} : memref<136x128xf32, #tpu.memory_space<vmem>>, vector<64x128xf32>,
      %c64 = arith.constant 64 : index
      %c0_291 = arith.constant 0 : index
      %369 = vector.load %arg14[%c64, %c0_291] : memref<196x8xf32, #tpu.memory_space<vmem>>, vector<72x8xf32>
      %c0_292 = arith.constant 0 : index
      %c0_293 = arith.constant 0 : index
      %c0_294 = arith.constant 0 : index
      %370 = vector.load %arg4[%c0_292, %c0_293, %c0_294] : memref<25x8x128xf32, #tpu.memory_space<vmem>>, vector<1x8x128xf32>
      %371 = vector.shape_cast %370 : vector<1x8x128xf32> to vector<8x128xf32>
      %cst_295 = arith.constant dense<0.000000e+00> : vector<72x128xf32>
      %372 = tpu.matmul %369, %371, %cst_295 {dimension_numbers = #tpu.dot_dimension_numbers<[1], [0], [0], [1], [0, 0, 1, 1], [], []>} : vector<72x8xf32>, vector<8x128xf32>, vector<72x128xf32> -> vector<72x128xf32>
      %c65 = arith.constant 65 : index
      %c0_296 = arith.constant 0 : index
      %373 = vector.load %arg14[%c65, %c0_296] : memref<196x8xf32, #tpu.memory_space<vmem>>, vector<72x8xf32>
      %c1_297 = arith.constant 1 : index
      %c0_298 = arith.constant 0 : index
      %c0_299 = arith.constant 0 : index
      %374 = vector.load %arg4[%c1_297, %c0_298, %c0_299] : memref<25x8x128xf32, #tpu.memory_space<vmem>>, vector<1x8x128xf32>
      %375 = vector.shape_cast %374 : vector<1x8x128xf32> to vector<8x128xf32>
      %cst_300 = arith.constant dense<0.000000e+00> : vector<72x128xf32>
      %376 = tpu.matmul %373, %375, %cst_300 {dimension_numbers = #tpu.dot_dimension_numbers<[1], [0], [0], [1], [0, 0, 1, 1], [], []>} : vector<72x8xf32>, vector<8x128xf32>, vector<72x128xf32> -> vector<72x128xf32>
      %377 = arith.addf %372, %376 : vector<72x128xf32>
      %c66 = arith.constant 66 : index
      %c0_301 = arith.constant 0 : index
      %378 = vector.load %arg14[%c66, %c0_301] : memref<196x8xf32, #tpu.memory_space<vmem>>, vector<72x8xf32>
      %c2_302 = arith.constant 2 : index
      %c0_303 = arith.constant 0 : index
      %c0_304 = arith.constant 0 : index
      %379 = vector.load %arg4[%c2_302, %c0_303, %c0_304] : memref<25x8x128xf32, #tpu.memory_space<vmem>>, vector<1x8x128xf32>
      %380 = vector.shape_cast %379 : vector<1x8x128xf32> to vector<8x128xf32>
      %cst_305 = arith.constant dense<0.000000e+00> : vector<72x128xf32>
      %381 = tpu.matmul %378, %380, %cst_305 {dimension_numbers = #tpu.dot_dimension_numbers<[1], [0], [0], [1], [0, 0, 1, 1], [], []>} : vector<72x8xf32>, vector<8x128xf32>, vector<72x128xf32> -> vector<72x128xf32>
      %382 = arith.addf %377, %381 : vector<72x128xf32>
      %c67 = arith.constant 67 : index
      %c0_306 = arith.constant 0 : index
      %383 = vector.load %arg14[%c67, %c0_306] : memref<196x8xf32, #tpu.memory_space<vmem>>, vector<72x8xf32>
      %c3_307 = arith.constant 3 : index
      %c0_308 = arith.constant 0 : index
      %c0_309 = arith.constant 0 : index
      %384 = vector.load %arg4[%c3_307, %c0_308, %c0_309] : memref<25x8x128xf32, #tpu.memory_space<vmem>>, vector<1x8x128xf32>
      %385 = vector.shape_cast %384 : vector<1x8x128xf32> to vector<8x128xf32>
      %cst_310 = arith.constant dense<0.000000e+00> : vector<72x128xf32>
      %386 = tpu.matmul %383, %385, %cst_310 {dimension_numbers = #tpu.dot_dimension_numbers<[1], [0], [0], [1], [0, 0, 1, 1], [], []>} : vector<72x8xf32>, vector<8x128xf32>, vector<72x128xf32> -> vector<72x128xf32>
      %387 = arith.addf %382, %386 : vector<72x128xf32>
      %c68 = arith.constant 68 : index
      %c0_311 = arith.constant 0 : index
      %388 = vector.load %arg14[%c68, %c0_311] : memref<196x8xf32, #tpu.memory_space<vmem>>, vector<72x8xf32>
      %c4_312 = arith.constant 4 : index
      %c0_313 = arith.constant 0 : index
      %c0_314 = arith.constant 0 : index
      %389 = vector.load %arg4[%c4_312, %c0_313, %c0_314] : memref<25x8x128xf32, #tpu.memory_space<vmem>>, vector<1x8x128xf32>
      %390 = vector.shape_cast %389 : vector<1x8x128xf32> to vector<8x128xf32>
      %cst_315 = arith.constant dense<0.000000e+00> : vector<72x128xf32>
      %391 = tpu.matmul %388, %390, %cst_315 {dimension_numbers = #tpu.dot_dimension_numbers<[1], [0], [0], [1], [0, 0, 1, 1], [], []>} : vector<72x8xf32>, vector<8x128xf32>, vector<72x128xf32> -> vector<72x128xf32>
      %392 = arith.addf %387, %391 : vector<72x128xf32>
      %c78 = arith.constant 78 : index
      %c0_316 = arith.constant 0 : index
      %393 = vector.load %arg14[%c78, %c0_316] : memref<196x8xf32, #tpu.memory_space<vmem>>, vector<72x8xf32>
      %c5_317 = arith.constant 5 : index
      %c0_318 = arith.constant 0 : index
      %c0_319 = arith.constant 0 : index
      %394 = vector.load %arg4[%c5_317, %c0_318, %c0_319] : memref<25x8x128xf32, #tpu.memory_space<vmem>>, vector<1x8x128xf32>
      %395 = vector.shape_cast %394 : vector<1x8x128xf32> to vector<8x128xf32>
      %cst_320 = arith.constant dense<0.000000e+00> : vector<72x128xf32>
      %396 = tpu.matmul %393, %395, %cst_320 {dimension_numbers = #tpu.dot_dimension_numbers<[1], [0], [0], [1], [0, 0, 1, 1], [], []>} : vector<72x8xf32>, vector<8x128xf32>, vector<72x128xf32> -> vector<72x128xf32>
      %397 = arith.addf %392, %396 : vector<72x128xf32>
      %c79 = arith.constant 79 : index
      %c0_321 = arith.constant 0 : index
      %398 = vector.load %arg14[%c79, %c0_321] : memref<196x8xf32, #tpu.memory_space<vmem>>, vector<72x8xf32>
      %c6_322 = arith.constant 6 : index
      %c0_323 = arith.constant 0 : index
      %c0_324 = arith.constant 0 : index
      %399 = vector.load %arg4[%c6_322, %c0_323, %c0_324] : memref<25x8x128xf32, #tpu.memory_space<vmem>>, vector<1x8x128xf32>
      %400 = vector.shape_cast %399 : vector<1x8x128xf32> to vector<8x128xf32>
      %cst_325 = arith.constant dense<0.000000e+00> : vector<72x128xf32>
      %401 = tpu.matmul %398, %400, %cst_325 {dimension_numbers = #tpu.dot_dimension_numbers<[1], [0], [0], [1], [0, 0, 1, 1], [], []>} : vector<72x8xf32>, vector<8x128xf32>, vector<72x128xf32> -> vector<72x128xf32>
      %402 = arith.addf %397, %401 : vector<72x128xf32>
      %c80 = arith.constant 80 : index
      %c0_326 = arith.constant 0 : index
      %403 = vector.load %arg14[%c80, %c0_326] : memref<196x8xf32, #tpu.memory_space<vmem>>, vector<72x8xf32>
      %c7_327 = arith.constant 7 : index
      %c0_328 = arith.constant 0 : index
      %c0_329 = arith.constant 0 : index
      %404 = vector.load %arg4[%c7_327, %c0_328, %c0_329] : memref<25x8x128xf32, #tpu.memory_space<vmem>>, vector<1x8x128xf32>
      %405 = vector.shape_cast %404 : vector<1x8x128xf32> to vector<8x128xf32>
      %cst_330 = arith.constant dense<0.000000e+00> : vector<72x128xf32>
      %406 = tpu.matmul %403, %405, %cst_330 {dimension_numbers = #tpu.dot_dimension_numbers<[1], [0], [0], [1], [0, 0, 1, 1], [], []>} : vector<72x8xf32>, vector<8x128xf32>, vector<72x128xf32> -> vector<72x128xf32>
      %407 = arith.addf %402, %406 : vector<72x128xf32>
      %c81 = arith.constant 81 : index
      %c0_331 = arith.constant 0 : index
      %408 = vector.load %arg14[%c81, %c0_331] : memref<196x8xf32, #tpu.memory_space<vmem>>, vector<72x8xf32>
      %c8_332 = arith.constant 8 : index
      %c0_333 = arith.constant 0 : index
      %c0_334 = arith.constant 0 : index
      %409 = vector.load %arg4[%c8_332, %c0_333, %c0_334] : memref<25x8x128xf32, #tpu.memory_space<vmem>>, vector<1x8x128xf32>
      %410 = vector.shape_cast %409 : vector<1x8x128xf32> to vector<8x128xf32>
      %cst_335 = arith.constant dense<0.000000e+00> : vector<72x128xf32>
      %411 = tpu.matmul %408, %410, %cst_335 {dimension_numbers = #tpu.dot_dimension_numbers<[1], [0], [0], [1], [0, 0, 1, 1], [], []>} : vector<72x8xf32>, vector<8x128xf32>, vector<72x128xf32> -> vector<72x128xf32>
      %412 = arith.addf %407, %411 : vector<72x128xf32>
      %c82 = arith.constant 82 : index
      %c0_336 = arith.constant 0 : index
      %413 = vector.load %arg14[%c82, %c0_336] : memref<196x8xf32, #tpu.memory_space<vmem>>, vector<72x8xf32>
      %c9_337 = arith.constant 9 : index
      %c0_338 = arith.constant 0 : index
      %c0_339 = arith.constant 0 : index
      %414 = vector.load %arg4[%c9_337, %c0_338, %c0_339] : memref<25x8x128xf32, #tpu.memory_space<vmem>>, vector<1x8x128xf32>
      %415 = vector.shape_cast %414 : vector<1x8x128xf32> to vector<8x128xf32>
      %cst_340 = arith.constant dense<0.000000e+00> : vector<72x128xf32>
      %416 = tpu.matmul %413, %415, %cst_340 {dimension_numbers = #tpu.dot_dimension_numbers<[1], [0], [0], [1], [0, 0, 1, 1], [], []>} : vector<72x8xf32>, vector<8x128xf32>, vector<72x128xf32> -> vector<72x128xf32>
      %417 = arith.addf %412, %416 : vector<72x128xf32>
      %c92 = arith.constant 92 : index
      %c0_341 = arith.constant 0 : index
      %418 = vector.load %arg14[%c92, %c0_341] : memref<196x8xf32, #tpu.memory_space<vmem>>, vector<72x8xf32>
      %c10_342 = arith.constant 10 : index
      %c0_343 = arith.constant 0 : index
      %c0_344 = arith.constant 0 : index
      %419 = vector.load %arg4[%c10_342, %c0_343, %c0_344] : memref<25x8x128xf32, #tpu.memory_space<vmem>>, vector<1x8x128xf32>
      %420 = vector.shape_cast %419 : vector<1x8x128xf32> to vector<8x128xf32>
      %cst_345 = arith.constant dense<0.000000e+00> : vector<72x128xf32>
      %421 = tpu.matmul %418, %420, %cst_345 {dimension_numbers = #tpu.dot_dimension_numbers<[1], [0], [0], [1], [0, 0, 1, 1], [], []>} : vector<72x8xf32>, vector<8x128xf32>, vector<72x128xf32> -> vector<72x128xf32>
      %422 = arith.addf %417, %421 : vector<72x128xf32>
      %c93 = arith.constant 93 : index
      %c0_346 = arith.constant 0 : index
      %423 = vector.load %arg14[%c93, %c0_346] : memref<196x8xf32, #tpu.memory_space<vmem>>, vector<72x8xf32>
      %c11_347 = arith.constant 11 : index
      %c0_348 = arith.constant 0 : index
      %c0_349 = arith.constant 0 : index
      %424 = vector.load %arg4[%c11_347, %c0_348, %c0_349] : memref<25x8x128xf32, #tpu.memory_space<vmem>>, vector<1x8x128xf32>
      %425 = vector.shape_cast %424 : vector<1x8x128xf32> to vector<8x128xf32>
      %cst_350 = arith.constant dense<0.000000e+00> : vector<72x128xf32>
      %426 = tpu.matmul %423, %425, %cst_350 {dimension_numbers = #tpu.dot_dimension_numbers<[1], [0], [0], [1], [0, 0, 1, 1], [], []>} : vector<72x8xf32>, vector<8x128xf32>, vector<72x128xf32> -> vector<72x128xf32>
      %427 = arith.addf %422, %426 : vector<72x128xf32>
      %c94 = arith.constant 94 : index
      %c0_351 = arith.constant 0 : index
      %428 = vector.load %arg14[%c94, %c0_351] : memref<196x8xf32, #tpu.memory_space<vmem>>, vector<72x8xf32>
      %c12_352 = arith.constant 12 : index
      %c0_353 = arith.constant 0 : index
      %c0_354 = arith.constant 0 : index
      %429 = vector.load %arg4[%c12_352, %c0_353, %c0_354] : memref<25x8x128xf32, #tpu.memory_space<vmem>>, vector<1x8x128xf32>
      %430 = vector.shape_cast %429 : vector<1x8x128xf32> to vector<8x128xf32>
      %cst_355 = arith.constant dense<0.000000e+00> : vector<72x128xf32>
      %431 = tpu.matmul %428, %430, %cst_355 {dimension_numbers = #tpu.dot_dimension_numbers<[1], [0], [0], [1], [0, 0, 1, 1], [], []>} : vector<72x8xf32>, vector<8x128xf32>, vector<72x128xf32> -> vector<72x128xf32>
      %432 = arith.addf %427, %431 : vector<72x128xf32>
      %c95 = arith.constant 95 : index
      %c0_356 = arith.constant 0 : index
      %433 = vector.load %arg14[%c95, %c0_356] : memref<196x8xf32, #tpu.memory_space<vmem>>, vector<72x8xf32>
      %c13_357 = arith.constant 13 : index
      %c0_358 = arith.constant 0 : index
      %c0_359 = arith.constant 0 : index
      %434 = vector.load %arg4[%c13_357, %c0_358, %c0_359] : memref<25x8x128xf32, #tpu.memory_space<vmem>>, vector<1x8x128xf32>
      %435 = vector.shape_cast %434 : vector<1x8x128xf32> to vector<8x128xf32>
      %cst_360 = arith.constant dense<0.000000e+00> : vector<72x128xf32>
      %436 = tpu.matmul %433, %435, %cst_360 {dimension_numbers = #tpu.dot_dimension_numbers<[1], [0], [0], [1], [0, 0, 1, 1], [], []>} : vector<72x8xf32>, vector<8x128xf32>, vector<72x128xf32> -> vector<72x128xf32>
      %437 = arith.addf %432, %436 : vector<72x128xf32>
      %c96 = arith.constant 96 : index
      %c0_361 = arith.constant 0 : index
      %438 = vector.load %arg14[%c96, %c0_361] : memref<196x8xf32, #tpu.memory_space<vmem>>, vector<72x8xf32>
      %c14_362 = arith.constant 14 : index
      %c0_363 = arith.constant 0 : index
      %c0_364 = arith.constant 0 : index
      %439 = vector.load %arg4[%c14_362, %c0_363, %c0_364] : memref<25x8x128xf32, #tpu.memory_space<vmem>>, vector<1x8x128xf32>
      %440 = vector.shape_cast %439 : vector<1x8x128xf32> to vector<8x128xf32>
      %cst_365 = arith.constant dense<0.000000e+00> : vector<72x128xf32>
      %441 = tpu.matmul %438, %440, %cst_365 {dimension_numbers = #tpu.dot_dimension_numbers<[1], [0], [0], [1], [0, 0, 1, 1], [], []>} : vector<72x8xf32>, vector<8x128xf32>, vector<72x128xf32> -> vector<72x128xf32>
      %442 = arith.addf %437, %441 : vector<72x128xf32>
      %c106 = arith.constant 106 : index
      %c0_366 = arith.constant 0 : index
      %443 = vector.load %arg14[%c106, %c0_366] : memref<196x8xf32, #tpu.memory_space<vmem>>, vector<72x8xf32>
      %c15_367 = arith.constant 15 : index
      %c0_368 = arith.constant 0 : index
      %c0_369 = arith.constant 0 : index
      %444 = vector.load %arg4[%c15_367, %c0_368, %c0_369] : memref<25x8x128xf32, #tpu.memory_space<vmem>>, vector<1x8x128xf32>
      %445 = vector.shape_cast %444 : vector<1x8x128xf32> to vector<8x128xf32>
      %cst_370 = arith.constant dense<0.000000e+00> : vector<72x128xf32>
      %446 = tpu.matmul %443, %445, %cst_370 {dimension_numbers = #tpu.dot_dimension_numbers<[1], [0], [0], [1], [0, 0, 1, 1], [], []>} : vector<72x8xf32>, vector<8x128xf32>, vector<72x128xf32> -> vector<72x128xf32>
      %447 = arith.addf %442, %446 : vector<72x128xf32>
      %c107 = arith.constant 107 : index
      %c0_371 = arith.constant 0 : index
      %448 = vector.load %arg14[%c107, %c0_371] : memref<196x8xf32, #tpu.memory_space<vmem>>, vector<72x8xf32>
      %c16_372 = arith.constant 16 : index
      %c0_373 = arith.constant 0 : index
      %c0_374 = arith.constant 0 : index
      %449 = vector.load %arg4[%c16_372, %c0_373, %c0_374] : memref<25x8x128xf32, #tpu.memory_space<vmem>>, vector<1x8x128xf32>
      %450 = vector.shape_cast %449 : vector<1x8x128xf32> to vector<8x128xf32>
      %cst_375 = arith.constant dense<0.000000e+00> : vector<72x128xf32>
      %451 = tpu.matmul %448, %450, %cst_375 {dimension_numbers = #tpu.dot_dimension_numbers<[1], [0], [0], [1], [0, 0, 1, 1], [], []>} : vector<72x8xf32>, vector<8x128xf32>, vector<72x128xf32> -> vector<72x128xf32>
      %452 = arith.addf %447, %451 : vector<72x128xf32>
      %c108 = arith.constant 108 : index
      %c0_376 = arith.constant 0 : index
      %453 = vector.load %arg14[%c108, %c0_376] : memref<196x8xf32, #tpu.memory_space<vmem>>, vector<72x8xf32>
      %c17_377 = arith.constant 17 : index
      %c0_378 = arith.constant 0 : index
      %c0_379 = arith.constant 0 : index
      %454 = vector.load %arg4[%c17_377, %c0_378, %c0_379] : memref<25x8x128xf32, #tpu.memory_space<vmem>>, vector<1x8x128xf32>
      %455 = vector.shape_cast %454 : vector<1x8x128xf32> to vector<8x128xf32>
      %cst_380 = arith.constant dense<0.000000e+00> : vector<72x128xf32>
      %456 = tpu.matmul %453, %455, %cst_380 {dimension_numbers = #tpu.dot_dimension_numbers<[1], [0], [0], [1], [0, 0, 1, 1], [], []>} : vector<72x8xf32>, vector<8x128xf32>, vector<72x128xf32> -> vector<72x128xf32>
      %457 = arith.addf %452, %456 : vector<72x128xf32>
      %c109 = arith.constant 109 : index
      %c0_381 = arith.constant 0 : index
      %458 = vector.load %arg14[%c109, %c0_381] : memref<196x8xf32, #tpu.memory_space<vmem>>, vector<72x8xf32>
      %c18_382 = arith.constant 18 : index
      %c0_383 = arith.constant 0 : index
      %c0_384 = arith.constant 0 : index
      %459 = vector.load %arg4[%c18_382, %c0_383, %c0_384] : memref<25x8x128xf32, #tpu.memory_space<vmem>>, vector<1x8x128xf32>
      %460 = vector.shape_cast %459 : vector<1x8x128xf32> to vector<8x128xf32>
      %cst_385 = arith.constant dense<0.000000e+00> : vector<72x128xf32>
      %461 = tpu.matmul %458, %460, %cst_385 {dimension_numbers = #tpu.dot_dimension_numbers<[1], [0], [0], [1], [0, 0, 1, 1], [], []>} : vector<72x8xf32>, vector<8x128xf32>, vector<72x128xf32> -> vector<72x128xf32>
      %462 = arith.addf %457, %461 : vector<72x128xf32>
      %c110 = arith.constant 110 : index
      %c0_386 = arith.constant 0 : index
      %463 = vector.load %arg14[%c110, %c0_386] : memref<196x8xf32, #tpu.memory_space<vmem>>, vector<72x8xf32>
      %c19_387 = arith.constant 19 : index
      %c0_388 = arith.constant 0 : index
      %c0_389 = arith.constant 0 : index
      %464 = vector.load %arg4[%c19_387, %c0_388, %c0_389] : memref<25x8x128xf32, #tpu.memory_space<vmem>>, vector<1x8x128xf32>
      %465 = vector.shape_cast %464 : vector<1x8x128xf32> to vector<8x128xf32>
      %cst_390 = arith.constant dense<0.000000e+00> : vector<72x128xf32>
      %466 = tpu.matmul %463, %465, %cst_390 {dimension_numbers = #tpu.dot_dimension_numbers<[1], [0], [0], [1], [0, 0, 1, 1], [], []>} : vector<72x8xf32>, vector<8x128xf32>, vector<72x128xf32> -> vector<72x128xf32>
      %467 = arith.addf %462, %466 : vector<72x128xf32>
      %c120 = arith.constant 120 : index
      %c0_391 = arith.constant 0 : index
      %468 = vector.load %arg14[%c120, %c0_391] : memref<196x8xf32, #tpu.memory_space<vmem>>, vector<72x8xf32>
      %c20_392 = arith.constant 20 : index
      %c0_393 = arith.constant 0 : index
      %c0_394 = arith.constant 0 : index
      %469 = vector.load %arg4[%c20_392, %c0_393, %c0_394] : memref<25x8x128xf32, #tpu.memory_space<vmem>>, vector<1x8x128xf32>
      %470 = vector.shape_cast %469 : vector<1x8x128xf32> to vector<8x128xf32>
      %cst_395 = arith.constant dense<0.000000e+00> : vector<72x128xf32>
      %471 = tpu.matmul %468, %470, %cst_395 {dimension_numbers = #tpu.dot_dimension_numbers<[1], [0], [0], [1], [0, 0, 1, 1], [], []>} : vector<72x8xf32>, vector<8x128xf32>, vector<72x128xf32> -> vector<72x128xf32>
      %472 = arith.addf %467, %471 : vector<72x128xf32>
      %c121 = arith.constant 121 : index
      %c0_396 = arith.constant 0 : index
      %473 = vector.load %arg14[%c121, %c0_396] : memref<196x8xf32, #tpu.memory_space<vmem>>, vector<72x8xf32>
      %c21_397 = arith.constant 21 : index
      %c0_398 = arith.constant 0 : index
      %c0_399 = arith.constant 0 : index
      %474 = vector.load %arg4[%c21_397, %c0_398, %c0_399] : memref<25x8x128xf32, #tpu.memory_space<vmem>>, vector<1x8x128xf32>
      %475 = vector.shape_cast %474 : vector<1x8x128xf32> to vector<8x128xf32>
      %cst_400 = arith.constant dense<0.000000e+00> : vector<72x128xf32>
      %476 = tpu.matmul %473, %475, %cst_400 {dimension_numbers = #tpu.dot_dimension_numbers<[1], [0], [0], [1], [0, 0, 1, 1], [], []>} : vector<72x8xf32>, vector<8x128xf32>, vector<72x128xf32> -> vector<72x128xf32>
      %477 = arith.addf %472, %476 : vector<72x128xf32>
      %c122 = arith.constant 122 : index
      %c0_401 = arith.constant 0 : index
      %478 = vector.load %arg14[%c122, %c0_401] : memref<196x8xf32, #tpu.memory_space<vmem>>, vector<72x8xf32>
      %c22_402 = arith.constant 22 : index
      %c0_403 = arith.constant 0 : index
      %c0_404 = arith.constant 0 : index
      %479 = vector.load %arg4[%c22_402, %c0_403, %c0_404] : memref<25x8x128xf32, #tpu.memory_space<vmem>>, vector<1x8x128xf32>
      %480 = vector.shape_cast %479 : vector<1x8x128xf32> to vector<8x128xf32>
      %cst_405 = arith.constant dense<0.000000e+00> : vector<72x128xf32>
      %481 = tpu.matmul %478, %480, %cst_405 {dimension_numbers = #tpu.dot_dimension_numbers<[1], [0], [0], [1], [0, 0, 1, 1], [], []>} : vector<72x8xf32>, vector<8x128xf32>, vector<72x128xf32> -> vector<72x128xf32>
      %482 = arith.addf %477, %481 : vector<72x128xf32>
      %c123 = arith.constant 123 : index
      %c0_406 = arith.constant 0 : index
      %483 = vector.load %arg14[%c123, %c0_406] : memref<196x8xf32, #tpu.memory_space<vmem>>, vector<72x8xf32>
      %c23_407 = arith.constant 23 : index
      %c0_408 = arith.constant 0 : index
      %c0_409 = arith.constant 0 : index
      %484 = vector.load %arg4[%c23_407, %c0_408, %c0_409] : memref<25x8x128xf32, #tpu.memory_space<vmem>>, vector<1x8x128xf32>
      %485 = vector.shape_cast %484 : vector<1x8x128xf32> to vector<8x128xf32>
      %cst_410 = arith.constant dense<0.000000e+00> : vector<72x128xf32>
      %486 = tpu.matmul %483, %485, %cst_410 {dimension_numbers = #tpu.dot_dimension_numbers<[1], [0], [0], [1], [0, 0, 1, 1], [], []>} : vector<72x8xf32>, vector<8x128xf32>, vector<72x128xf32> -> vector<72x128xf32>
      %487 = arith.addf %482, %486 : vector<72x128xf32>
      %c124 = arith.constant 124 : index
      %c0_411 = arith.constant 0 : index
      %488 = vector.load %arg14[%c124, %c0_411] : memref<196x8xf32, #tpu.memory_space<vmem>>, vector<72x8xf32>
      %c24_412 = arith.constant 24 : index
      %c0_413 = arith.constant 0 : index
      %c0_414 = arith.constant 0 : index
      %489 = vector.load %arg4[%c24_412, %c0_413, %c0_414] : memref<25x8x128xf32, #tpu.memory_space<vmem>>, vector<1x8x128xf32>
      %490 = vector.shape_cast %489 : vector<1x8x128xf32> to vector<8x128xf32>
      %cst_415 = arith.constant dense<0.000000e+00> : vector<72x128xf32>
      %491 = tpu.matmul %488, %490, %cst_415 {dimension_numbers = #tpu.dot_dimension_numbers<[1], [0], [0], [1], [0, 0, 1, 1], [], []>} : vector<72x8xf32>, vector<8x128xf32>, vector<72x128xf32> -> vector<72x128xf32>
      %492 = arith.addf %487, %491 : vector<72x128xf32>
      %c64_416 = arith.constant 64 : index
      %c0_417 = arith.constant 0 : index
      %493 = vector.load %arg15[%c64_416, %c0_417] : memref<136x128xf32, #tpu.memory_space<vmem>>, vector<72x128xf32>
      tpu.vector_store %arg15[%c64_416, %c0_417], %492 {strides = array<i32>} : memref<136x128xf32, #tpu.memory_space<vmem>>, vector<72x128xf32>,
      %c0_418 = arith.constant 0 : index
      %c0_419 = arith.constant 0 : index
      %494 = vector.load %arg15[%c0_418, %c0_419] : memref<136x128xf32, #tpu.memory_space<vmem>>, vector<10x128xf32>
      %c14_420 = arith.constant 14 : index
      %c0_421 = arith.constant 0 : index
      %495 = vector.load %arg15[%c14_420, %c0_421] : memref<136x128xf32, #tpu.memory_space<vmem>>, vector<10x128xf32>
      %496 = arith.maximumf %494, %495 : vector<10x128xf32>
      %c0_422 = arith.constant 0 : index
      %c0_423 = arith.constant 0 : index
      %497 = vector.load %arg16[%c0_422, %c0_423] : memref<16x128xf32, #tpu.memory_space<vmem>>, vector<10x128xf32>
      tpu.vector_store %arg16[%c0_422, %c0_423], %496 {strides = array<i32>} : memref<16x128xf32, #tpu.memory_space<vmem>>, vector<10x128xf32>,
      %c0_424 = arith.constant 0 : index
      %c0_425 = arith.constant 0 : index
      %498 = tpu.strided_load %arg16[%c0_424, %c0_425] {strides = array<i32: 2, 1>} : memref<16x128xf32, #tpu.memory_space<vmem>>, vector<5x128xf32>
      %c1_426 = arith.constant 1 : index
      %c0_427 = arith.constant 0 : index
      %499 = tpu.strided_load %arg16[%c1_426, %c0_427] {strides = array<i32: 2, 1>} : memref<16x128xf32, #tpu.memory_space<vmem>>, vector<5x128xf32>
      %500 = arith.maximumf %498, %499 : vector<5x128xf32>
      %c0_428 = arith.constant 0 : index
      %c0_429 = arith.constant 0 : index
      %501 = vector.load %arg5[%c0_428, %c0_429] : memref<1x128xf32, #tpu.memory_space<vmem>>, vector<1x128xf32>
      %502 = vector.broadcast %501 : vector<1x128xf32> to vector<5x128xf32>
      %503 = arith.addf %500, %502 : vector<5x128xf32>
      %cst_430 = arith.constant 0.000000e+00 : f32
      %504 = vector.broadcast %cst_430 : f32 to vector<5x128xf32>
      %505 = arith.maximumf %503, %504 : vector<5x128xf32>
      %506 = vector.extract_strided_slice %505 {offsets = [0, 0], sizes = [5, 16], strides = [1, 1]} : vector<5x128xf32> to vector<5x16xf32>
      %507 = arith.index_cast %arg18 : i32 to index
      %c0_431 = arith.constant 0 : index
      %c0_432 = arith.constant 0 : index
      %508 = vector.load %arg17[%507, %c0_431, %c0_432] : memref<4x32x16xf32, #tpu.memory_space<vmem>>, vector<1x5x16xf32>
      %509 = vector.shape_cast %508 : vector<1x5x16xf32> to vector<5x16xf32>
      %510 = vector.shape_cast %506 : vector<5x16xf32> to vector<1x5x16xf32>
      tpu.vector_store %arg17[%507, %c0_431, %c0_432], %510 {strides = array<i32>} : memref<4x32x16xf32, #tpu.memory_space<vmem>>, vector<1x5x16xf32>,
      %c28_433 = arith.constant 28 : index
      %c0_434 = arith.constant 0 : index
      %511 = vector.load %arg15[%c28_433, %c0_434] : memref<136x128xf32, #tpu.memory_space<vmem>>, vector<10x128xf32>
      %c42_435 = arith.constant 42 : index
      %c0_436 = arith.constant 0 : index
      %512 = vector.load %arg15[%c42_435, %c0_436] : memref<136x128xf32, #tpu.memory_space<vmem>>, vector<10x128xf32>
      %513 = arith.maximumf %511, %512 : vector<10x128xf32>
      %c0_437 = arith.constant 0 : index
      %c0_438 = arith.constant 0 : index
      %514 = vector.load %arg16[%c0_437, %c0_438] : memref<16x128xf32, #tpu.memory_space<vmem>>, vector<10x128xf32>
      tpu.vector_store %arg16[%c0_437, %c0_438], %513 {strides = array<i32>} : memref<16x128xf32, #tpu.memory_space<vmem>>, vector<10x128xf32>,
      %c0_439 = arith.constant 0 : index
      %c0_440 = arith.constant 0 : index
      %515 = tpu.strided_load %arg16[%c0_439, %c0_440] {strides = array<i32: 2, 1>} : memref<16x128xf32, #tpu.memory_space<vmem>>, vector<5x128xf32>
      %c1_441 = arith.constant 1 : index
      %c0_442 = arith.constant 0 : index
      %516 = tpu.strided_load %arg16[%c1_441, %c0_442] {strides = array<i32: 2, 1>} : memref<16x128xf32, #tpu.memory_space<vmem>>, vector<5x128xf32>
      %517 = arith.maximumf %515, %516 : vector<5x128xf32>
      %c0_443 = arith.constant 0 : index
      %c0_444 = arith.constant 0 : index
      %518 = vector.load %arg5[%c0_443, %c0_444] : memref<1x128xf32, #tpu.memory_space<vmem>>, vector<1x128xf32>
      %519 = vector.broadcast %518 : vector<1x128xf32> to vector<5x128xf32>
      %520 = arith.addf %517, %519 : vector<5x128xf32>
      %cst_445 = arith.constant 0.000000e+00 : f32
      %521 = vector.broadcast %cst_445 : f32 to vector<5x128xf32>
      %522 = arith.maximumf %520, %521 : vector<5x128xf32>
      %523 = vector.extract_strided_slice %522 {offsets = [0, 0], sizes = [5, 16], strides = [1, 1]} : vector<5x128xf32> to vector<5x16xf32>
      %524 = arith.index_cast %arg18 : i32 to index
      %c5_446 = arith.constant 5 : index
      %c0_447 = arith.constant 0 : index
      %525 = vector.load %arg17[%524, %c5_446, %c0_447] : memref<4x32x16xf32, #tpu.memory_space<vmem>>, vector<1x5x16xf32>
      %526 = vector.shape_cast %525 : vector<1x5x16xf32> to vector<5x16xf32>
      %527 = vector.shape_cast %523 : vector<5x16xf32> to vector<1x5x16xf32>
      tpu.vector_store %arg17[%524, %c5_446, %c0_447], %527 {strides = array<i32>} : memref<4x32x16xf32, #tpu.memory_space<vmem>>, vector<1x5x16xf32>,
      %c56_448 = arith.constant 56 : index
      %c0_449 = arith.constant 0 : index
      %528 = vector.load %arg15[%c56_448, %c0_449] : memref<136x128xf32, #tpu.memory_space<vmem>>, vector<10x128xf32>
      %c70 = arith.constant 70 : index
      %c0_450 = arith.constant 0 : index
      %529 = vector.load %arg15[%c70, %c0_450] : memref<136x128xf32, #tpu.memory_space<vmem>>, vector<10x128xf32>
      %530 = arith.maximumf %528, %529 : vector<10x128xf32>
      %c0_451 = arith.constant 0 : index
      %c0_452 = arith.constant 0 : index
      %531 = vector.load %arg16[%c0_451, %c0_452] : memref<16x128xf32, #tpu.memory_space<vmem>>, vector<10x128xf32>
      tpu.vector_store %arg16[%c0_451, %c0_452], %530 {strides = array<i32>} : memref<16x128xf32, #tpu.memory_space<vmem>>, vector<10x128xf32>,
      %c0_453 = arith.constant 0 : index
      %c0_454 = arith.constant 0 : index
      %532 = tpu.strided_load %arg16[%c0_453, %c0_454] {strides = array<i32: 2, 1>} : memref<16x128xf32, #tpu.memory_space<vmem>>, vector<5x128xf32>
      %c1_455 = arith.constant 1 : index
      %c0_456 = arith.constant 0 : index
      %533 = tpu.strided_load %arg16[%c1_455, %c0_456] {strides = array<i32: 2, 1>} : memref<16x128xf32, #tpu.memory_space<vmem>>, vector<5x128xf32>
      %534 = arith.maximumf %532, %533 : vector<5x128xf32>
      %c0_457 = arith.constant 0 : index
      %c0_458 = arith.constant 0 : index
      %535 = vector.load %arg5[%c0_457, %c0_458] : memref<1x128xf32, #tpu.memory_space<vmem>>, vector<1x128xf32>
      %536 = vector.broadcast %535 : vector<1x128xf32> to vector<5x128xf32>
      %537 = arith.addf %534, %536 : vector<5x128xf32>
      %cst_459 = arith.constant 0.000000e+00 : f32
      %538 = vector.broadcast %cst_459 : f32 to vector<5x128xf32>
      %539 = arith.maximumf %537, %538 : vector<5x128xf32>
      %540 = vector.extract_strided_slice %539 {offsets = [0, 0], sizes = [5, 16], strides = [1, 1]} : vector<5x128xf32> to vector<5x16xf32>
      %541 = arith.index_cast %arg18 : i32 to index
      %c10_460 = arith.constant 10 : index
      %c0_461 = arith.constant 0 : index
      %542 = vector.load %arg17[%541, %c10_460, %c0_461] : memref<4x32x16xf32, #tpu.memory_space<vmem>>, vector<1x5x16xf32>
      %543 = vector.shape_cast %542 : vector<1x5x16xf32> to vector<5x16xf32>
      %544 = vector.shape_cast %540 : vector<5x16xf32> to vector<1x5x16xf32>
      tpu.vector_store %arg17[%541, %c10_460, %c0_461], %544 {strides = array<i32>} : memref<4x32x16xf32, #tpu.memory_space<vmem>>, vector<1x5x16xf32>,
      %c84 = arith.constant 84 : index
      %c0_462 = arith.constant 0 : index
      %545 = vector.load %arg15[%c84, %c0_462] : memref<136x128xf32, #tpu.memory_space<vmem>>, vector<10x128xf32>
      %c98 = arith.constant 98 : index
      %c0_463 = arith.constant 0 : index
      %546 = vector.load %arg15[%c98, %c0_463] : memref<136x128xf32, #tpu.memory_space<vmem>>, vector<10x128xf32>
      %547 = arith.maximumf %545, %546 : vector<10x128xf32>
      %c0_464 = arith.constant 0 : index
      %c0_465 = arith.constant 0 : index
      %548 = vector.load %arg16[%c0_464, %c0_465] : memref<16x128xf32, #tpu.memory_space<vmem>>, vector<10x128xf32>
      tpu.vector_store %arg16[%c0_464, %c0_465], %547 {strides = array<i32>} : memref<16x128xf32, #tpu.memory_space<vmem>>, vector<10x128xf32>,
      %c0_466 = arith.constant 0 : index
      %c0_467 = arith.constant 0 : index
      %549 = tpu.strided_load %arg16[%c0_466, %c0_467] {strides = array<i32: 2, 1>} : memref<16x128xf32, #tpu.memory_space<vmem>>, vector<5x128xf32>
      %c1_468 = arith.constant 1 : index
      %c0_469 = arith.constant 0 : index
      %550 = tpu.strided_load %arg16[%c1_468, %c0_469] {strides = array<i32: 2, 1>} : memref<16x128xf32, #tpu.memory_space<vmem>>, vector<5x128xf32>
      %551 = arith.maximumf %549, %550 : vector<5x128xf32>
      %c0_470 = arith.constant 0 : index
      %c0_471 = arith.constant 0 : index
      %552 = vector.load %arg5[%c0_470, %c0_471] : memref<1x128xf32, #tpu.memory_space<vmem>>, vector<1x128xf32>
      %553 = vector.broadcast %552 : vector<1x128xf32> to vector<5x128xf32>
      %554 = arith.addf %551, %553 : vector<5x128xf32>
      %cst_472 = arith.constant 0.000000e+00 : f32
      %555 = vector.broadcast %cst_472 : f32 to vector<5x128xf32>
      %556 = arith.maximumf %554, %555 : vector<5x128xf32>
      %557 = vector.extract_strided_slice %556 {offsets = [0, 0], sizes = [5, 16], strides = [1, 1]} : vector<5x128xf32> to vector<5x16xf32>
      %558 = arith.index_cast %arg18 : i32 to index
      %c15_473 = arith.constant 15 : index
      %c0_474 = arith.constant 0 : index
      %559 = vector.load %arg17[%558, %c15_473, %c0_474] : memref<4x32x16xf32, #tpu.memory_space<vmem>>, vector<1x5x16xf32>
      %560 = vector.shape_cast %559 : vector<1x5x16xf32> to vector<5x16xf32>
      %561 = vector.shape_cast %557 : vector<5x16xf32> to vector<1x5x16xf32>
      tpu.vector_store %arg17[%558, %c15_473, %c0_474], %561 {strides = array<i32>} : memref<4x32x16xf32, #tpu.memory_space<vmem>>, vector<1x5x16xf32>,
      %c112_475 = arith.constant 112 : index
      %c0_476 = arith.constant 0 : index
      %562 = vector.load %arg15[%c112_475, %c0_476] : memref<136x128xf32, #tpu.memory_space<vmem>>, vector<10x128xf32>
      %c126 = arith.constant 126 : index
      %c0_477 = arith.constant 0 : index
      %563 = vector.load %arg15[%c126, %c0_477] : memref<136x128xf32, #tpu.memory_space<vmem>>, vector<10x128xf32>
      %564 = arith.maximumf %562, %563 : vector<10x128xf32>
      %c0_478 = arith.constant 0 : index
      %c0_479 = arith.constant 0 : index
      %565 = vector.load %arg16[%c0_478, %c0_479] : memref<16x128xf32, #tpu.memory_space<vmem>>, vector<10x128xf32>
      tpu.vector_store %arg16[%c0_478, %c0_479], %564 {strides = array<i32>} : memref<16x128xf32, #tpu.memory_space<vmem>>, vector<10x128xf32>,
      %c0_480 = arith.constant 0 : index
      %c0_481 = arith.constant 0 : index
      %566 = tpu.strided_load %arg16[%c0_480, %c0_481] {strides = array<i32: 2, 1>} : memref<16x128xf32, #tpu.memory_space<vmem>>, vector<5x128xf32>
      %c1_482 = arith.constant 1 : index
      %c0_483 = arith.constant 0 : index
      %567 = tpu.strided_load %arg16[%c1_482, %c0_483] {strides = array<i32: 2, 1>} : memref<16x128xf32, #tpu.memory_space<vmem>>, vector<5x128xf32>
      %568 = arith.maximumf %566, %567 : vector<5x128xf32>
      %c0_484 = arith.constant 0 : index
      %c0_485 = arith.constant 0 : index
      %569 = vector.load %arg5[%c0_484, %c0_485] : memref<1x128xf32, #tpu.memory_space<vmem>>, vector<1x128xf32>
      %570 = vector.broadcast %569 : vector<1x128xf32> to vector<5x128xf32>
      %571 = arith.addf %568, %570 : vector<5x128xf32>
      %cst_486 = arith.constant 0.000000e+00 : f32
      %572 = vector.broadcast %cst_486 : f32 to vector<5x128xf32>
      %573 = arith.maximumf %571, %572 : vector<5x128xf32>
      %574 = vector.extract_strided_slice %573 {offsets = [0, 0], sizes = [5, 16], strides = [1, 1]} : vector<5x128xf32> to vector<5x16xf32>
      %575 = arith.index_cast %arg18 : i32 to index
      %c20_487 = arith.constant 20 : index
      %c0_488 = arith.constant 0 : index
      %576 = vector.load %arg17[%575, %c20_487, %c0_488] : memref<4x32x16xf32, #tpu.memory_space<vmem>>, vector<1x5x16xf32>
      %577 = vector.shape_cast %576 : vector<1x5x16xf32> to vector<5x16xf32>
      %578 = vector.shape_cast %574 : vector<5x16xf32> to vector<1x5x16xf32>
      tpu.vector_store %arg17[%575, %c20_487, %c0_488], %578 {strides = array<i32>} : memref<4x32x16xf32, #tpu.memory_space<vmem>>, vector<1x5x16xf32>,
    }
    %c4_i32_0 = arith.constant 4 : i32
    %c0 = arith.constant 0 : index
    %c0_1 = arith.constant 0 : index
    %c0_2 = arith.constant 0 : index
    %1 = vector.load %arg17[%c0, %c0_1, %c0_2] : memref<4x32x16xf32, #tpu.memory_space<vmem>>, vector<4x32x16xf32>
    %c0_3 = arith.constant 0 : index
    %c0_4 = arith.constant 0 : index
    %2 = vector.load %arg7[%c0_3, %c0_4] : memref<1x128xf32, #tpu.memory_space<vmem>>, vector<1x128xf32>
    %3 = vector.extract_strided_slice %1 {offsets = [0, 0, 0], sizes = [4, 1, 16], strides = [1, 1, 1]} : vector<4x32x16xf32> to vector<4x1x16xf32>
    %4 = vector.shape_cast %3 : vector<4x1x16xf32> to vector<4x16xf32>
    %c0_5 = arith.constant 0 : index
    %c0_6 = arith.constant 0 : index
    %c0_7 = arith.constant 0 : index
    %5 = vector.load %arg6[%c0_5, %c0_6, %c0_7] : memref<25x16x128xf32, #tpu.memory_space<vmem>>, vector<1x16x128xf32>
    %6 = vector.shape_cast %5 : vector<1x16x128xf32> to vector<16x128xf32>
    %cst = arith.constant dense<0.000000e+00> : vector<4x128xf32>
    %7 = tpu.matmul %4, %6, %cst {dimension_numbers = #tpu.dot_dimension_numbers<[1], [0], [0], [1], [0, 0, 1, 1], [], []>} : vector<4x16xf32>, vector<16x128xf32>, vector<4x128xf32> -> vector<4x128xf32>
    %8 = vector.broadcast %2 : vector<1x128xf32> to vector<4x128xf32>
    %9 = arith.addf %8, %7 : vector<4x128xf32>
    %10 = vector.extract_strided_slice %1 {offsets = [0, 1, 0], sizes = [4, 1, 16], strides = [1, 1, 1]} : vector<4x32x16xf32> to vector<4x1x16xf32>
    %11 = vector.shape_cast %10 : vector<4x1x16xf32> to vector<4x16xf32>
    %c1 = arith.constant 1 : index
    %c0_8 = arith.constant 0 : index
    %c0_9 = arith.constant 0 : index
    %12 = vector.load %arg6[%c1, %c0_8, %c0_9] : memref<25x16x128xf32, #tpu.memory_space<vmem>>, vector<1x16x128xf32>
    %13 = vector.shape_cast %12 : vector<1x16x128xf32> to vector<16x128xf32>
    %cst_10 = arith.constant dense<0.000000e+00> : vector<4x128xf32>
    %14 = tpu.matmul %11, %13, %cst_10 {dimension_numbers = #tpu.dot_dimension_numbers<[1], [0], [0], [1], [0, 0, 1, 1], [], []>} : vector<4x16xf32>, vector<16x128xf32>, vector<4x128xf32> -> vector<4x128xf32>
    %15 = arith.addf %9, %14 : vector<4x128xf32>
    %16 = vector.extract_strided_slice %1 {offsets = [0, 2, 0], sizes = [4, 1, 16], strides = [1, 1, 1]} : vector<4x32x16xf32> to vector<4x1x16xf32>
    %17 = vector.shape_cast %16 : vector<4x1x16xf32> to vector<4x16xf32>
    %c2 = arith.constant 2 : index
    %c0_11 = arith.constant 0 : index
    %c0_12 = arith.constant 0 : index
    %18 = vector.load %arg6[%c2, %c0_11, %c0_12] : memref<25x16x128xf32, #tpu.memory_space<vmem>>, vector<1x16x128xf32>
    %19 = vector.shape_cast %18 : vector<1x16x128xf32> to vector<16x128xf32>
    %cst_13 = arith.constant dense<0.000000e+00> : vector<4x128xf32>
    %20 = tpu.matmul %17, %19, %cst_13 {dimension_numbers = #tpu.dot_dimension_numbers<[1], [0], [0], [1], [0, 0, 1, 1], [], []>} : vector<4x16xf32>, vector<16x128xf32>, vector<4x128xf32> -> vector<4x128xf32>
    %21 = arith.addf %15, %20 : vector<4x128xf32>
    %22 = vector.extract_strided_slice %1 {offsets = [0, 3, 0], sizes = [4, 1, 16], strides = [1, 1, 1]} : vector<4x32x16xf32> to vector<4x1x16xf32>
    %23 = vector.shape_cast %22 : vector<4x1x16xf32> to vector<4x16xf32>
    %c3 = arith.constant 3 : index
    %c0_14 = arith.constant 0 : index
    %c0_15 = arith.constant 0 : index
    %24 = vector.load %arg6[%c3, %c0_14, %c0_15] : memref<25x16x128xf32, #tpu.memory_space<vmem>>, vector<1x16x128xf32>
    %25 = vector.shape_cast %24 : vector<1x16x128xf32> to vector<16x128xf32>
    %cst_16 = arith.constant dense<0.000000e+00> : vector<4x128xf32>
    %26 = tpu.matmul %23, %25, %cst_16 {dimension_numbers = #tpu.dot_dimension_numbers<[1], [0], [0], [1], [0, 0, 1, 1], [], []>} : vector<4x16xf32>, vector<16x128xf32>, vector<4x128xf32> -> vector<4x128xf32>
    %27 = arith.addf %21, %26 : vector<4x128xf32>
    %28 = vector.extract_strided_slice %1 {offsets = [0, 4, 0], sizes = [4, 1, 16], strides = [1, 1, 1]} : vector<4x32x16xf32> to vector<4x1x16xf32>
    %29 = vector.shape_cast %28 : vector<4x1x16xf32> to vector<4x16xf32>
    %c4 = arith.constant 4 : index
    %c0_17 = arith.constant 0 : index
    %c0_18 = arith.constant 0 : index
    %30 = vector.load %arg6[%c4, %c0_17, %c0_18] : memref<25x16x128xf32, #tpu.memory_space<vmem>>, vector<1x16x128xf32>
    %31 = vector.shape_cast %30 : vector<1x16x128xf32> to vector<16x128xf32>
    %cst_19 = arith.constant dense<0.000000e+00> : vector<4x128xf32>
    %32 = tpu.matmul %29, %31, %cst_19 {dimension_numbers = #tpu.dot_dimension_numbers<[1], [0], [0], [1], [0, 0, 1, 1], [], []>} : vector<4x16xf32>, vector<16x128xf32>, vector<4x128xf32> -> vector<4x128xf32>
    %33 = arith.addf %27, %32 : vector<4x128xf32>
    %34 = vector.extract_strided_slice %1 {offsets = [0, 5, 0], sizes = [4, 1, 16], strides = [1, 1, 1]} : vector<4x32x16xf32> to vector<4x1x16xf32>
    %35 = vector.shape_cast %34 : vector<4x1x16xf32> to vector<4x16xf32>
    %c5 = arith.constant 5 : index
    %c0_20 = arith.constant 0 : index
    %c0_21 = arith.constant 0 : index
    %36 = vector.load %arg6[%c5, %c0_20, %c0_21] : memref<25x16x128xf32, #tpu.memory_space<vmem>>, vector<1x16x128xf32>
    %37 = vector.shape_cast %36 : vector<1x16x128xf32> to vector<16x128xf32>
    %cst_22 = arith.constant dense<0.000000e+00> : vector<4x128xf32>
    %38 = tpu.matmul %35, %37, %cst_22 {dimension_numbers = #tpu.dot_dimension_numbers<[1], [0], [0], [1], [0, 0, 1, 1], [], []>} : vector<4x16xf32>, vector<16x128xf32>, vector<4x128xf32> -> vector<4x128xf32>
    %39 = arith.addf %33, %38 : vector<4x128xf32>
    %40 = vector.extract_strided_slice %1 {offsets = [0, 6, 0], sizes = [4, 1, 16], strides = [1, 1, 1]} : vector<4x32x16xf32> to vector<4x1x16xf32>
    %41 = vector.shape_cast %40 : vector<4x1x16xf32> to vector<4x16xf32>
    %c6 = arith.constant 6 : index
    %c0_23 = arith.constant 0 : index
    %c0_24 = arith.constant 0 : index
    %42 = vector.load %arg6[%c6, %c0_23, %c0_24] : memref<25x16x128xf32, #tpu.memory_space<vmem>>, vector<1x16x128xf32>
    %43 = vector.shape_cast %42 : vector<1x16x128xf32> to vector<16x128xf32>
    %cst_25 = arith.constant dense<0.000000e+00> : vector<4x128xf32>
    %44 = tpu.matmul %41, %43, %cst_25 {dimension_numbers = #tpu.dot_dimension_numbers<[1], [0], [0], [1], [0, 0, 1, 1], [], []>} : vector<4x16xf32>, vector<16x128xf32>, vector<4x128xf32> -> vector<4x128xf32>
    %45 = arith.addf %39, %44 : vector<4x128xf32>
    %46 = vector.extract_strided_slice %1 {offsets = [0, 7, 0], sizes = [4, 1, 16], strides = [1, 1, 1]} : vector<4x32x16xf32> to vector<4x1x16xf32>
    %47 = vector.shape_cast %46 : vector<4x1x16xf32> to vector<4x16xf32>
    %c7 = arith.constant 7 : index
    %c0_26 = arith.constant 0 : index
    %c0_27 = arith.constant 0 : index
    %48 = vector.load %arg6[%c7, %c0_26, %c0_27] : memref<25x16x128xf32, #tpu.memory_space<vmem>>, vector<1x16x128xf32>
    %49 = vector.shape_cast %48 : vector<1x16x128xf32> to vector<16x128xf32>
    %cst_28 = arith.constant dense<0.000000e+00> : vector<4x128xf32>
    %50 = tpu.matmul %47, %49, %cst_28 {dimension_numbers = #tpu.dot_dimension_numbers<[1], [0], [0], [1], [0, 0, 1, 1], [], []>} : vector<4x16xf32>, vector<16x128xf32>, vector<4x128xf32> -> vector<4x128xf32>
    %51 = arith.addf %45, %50 : vector<4x128xf32>
    %52 = vector.extract_strided_slice %1 {offsets = [0, 8, 0], sizes = [4, 1, 16], strides = [1, 1, 1]} : vector<4x32x16xf32> to vector<4x1x16xf32>
    %53 = vector.shape_cast %52 : vector<4x1x16xf32> to vector<4x16xf32>
    %c8 = arith.constant 8 : index
    %c0_29 = arith.constant 0 : index
    %c0_30 = arith.constant 0 : index
    %54 = vector.load %arg6[%c8, %c0_29, %c0_30] : memref<25x16x128xf32, #tpu.memory_space<vmem>>, vector<1x16x128xf32>
    %55 = vector.shape_cast %54 : vector<1x16x128xf32> to vector<16x128xf32>
    %cst_31 = arith.constant dense<0.000000e+00> : vector<4x128xf32>
    %56 = tpu.matmul %53, %55, %cst_31 {dimension_numbers = #tpu.dot_dimension_numbers<[1], [0], [0], [1], [0, 0, 1, 1], [], []>} : vector<4x16xf32>, vector<16x128xf32>, vector<4x128xf32> -> vector<4x128xf32>
    %57 = arith.addf %51, %56 : vector<4x128xf32>
    %58 = vector.extract_strided_slice %1 {offsets = [0, 9, 0], sizes = [4, 1, 16], strides = [1, 1, 1]} : vector<4x32x16xf32> to vector<4x1x16xf32>
    %59 = vector.shape_cast %58 : vector<4x1x16xf32> to vector<4x16xf32>
    %c9 = arith.constant 9 : index
    %c0_32 = arith.constant 0 : index
    %c0_33 = arith.constant 0 : index
    %60 = vector.load %arg6[%c9, %c0_32, %c0_33] : memref<25x16x128xf32, #tpu.memory_space<vmem>>, vector<1x16x128xf32>
    %61 = vector.shape_cast %60 : vector<1x16x128xf32> to vector<16x128xf32>
    %cst_34 = arith.constant dense<0.000000e+00> : vector<4x128xf32>
    %62 = tpu.matmul %59, %61, %cst_34 {dimension_numbers = #tpu.dot_dimension_numbers<[1], [0], [0], [1], [0, 0, 1, 1], [], []>} : vector<4x16xf32>, vector<16x128xf32>, vector<4x128xf32> -> vector<4x128xf32>
    %63 = arith.addf %57, %62 : vector<4x128xf32>
    %64 = vector.extract_strided_slice %1 {offsets = [0, 10, 0], sizes = [4, 1, 16], strides = [1, 1, 1]} : vector<4x32x16xf32> to vector<4x1x16xf32>
    %65 = vector.shape_cast %64 : vector<4x1x16xf32> to vector<4x16xf32>
    %c10 = arith.constant 10 : index
    %c0_35 = arith.constant 0 : index
    %c0_36 = arith.constant 0 : index
    %66 = vector.load %arg6[%c10, %c0_35, %c0_36] : memref<25x16x128xf32, #tpu.memory_space<vmem>>, vector<1x16x128xf32>
    %67 = vector.shape_cast %66 : vector<1x16x128xf32> to vector<16x128xf32>
    %cst_37 = arith.constant dense<0.000000e+00> : vector<4x128xf32>
    %68 = tpu.matmul %65, %67, %cst_37 {dimension_numbers = #tpu.dot_dimension_numbers<[1], [0], [0], [1], [0, 0, 1, 1], [], []>} : vector<4x16xf32>, vector<16x128xf32>, vector<4x128xf32> -> vector<4x128xf32>
    %69 = arith.addf %63, %68 : vector<4x128xf32>
    %70 = vector.extract_strided_slice %1 {offsets = [0, 11, 0], sizes = [4, 1, 16], strides = [1, 1, 1]} : vector<4x32x16xf32> to vector<4x1x16xf32>
    %71 = vector.shape_cast %70 : vector<4x1x16xf32> to vector<4x16xf32>
    %c11 = arith.constant 11 : index
    %c0_38 = arith.constant 0 : index
    %c0_39 = arith.constant 0 : index
    %72 = vector.load %arg6[%c11, %c0_38, %c0_39] : memref<25x16x128xf32, #tpu.memory_space<vmem>>, vector<1x16x128xf32>
    %73 = vector.shape_cast %72 : vector<1x16x128xf32> to vector<16x128xf32>
    %cst_40 = arith.constant dense<0.000000e+00> : vector<4x128xf32>
    %74 = tpu.matmul %71, %73, %cst_40 {dimension_numbers = #tpu.dot_dimension_numbers<[1], [0], [0], [1], [0, 0, 1, 1], [], []>} : vector<4x16xf32>, vector<16x128xf32>, vector<4x128xf32> -> vector<4x128xf32>
    %75 = arith.addf %69, %74 : vector<4x128xf32>
    %76 = vector.extract_strided_slice %1 {offsets = [0, 12, 0], sizes = [4, 1, 16], strides = [1, 1, 1]} : vector<4x32x16xf32> to vector<4x1x16xf32>
    %77 = vector.shape_cast %76 : vector<4x1x16xf32> to vector<4x16xf32>
    %c12 = arith.constant 12 : index
    %c0_41 = arith.constant 0 : index
    %c0_42 = arith.constant 0 : index
    %78 = vector.load %arg6[%c12, %c0_41, %c0_42] : memref<25x16x128xf32, #tpu.memory_space<vmem>>, vector<1x16x128xf32>
    %79 = vector.shape_cast %78 : vector<1x16x128xf32> to vector<16x128xf32>
    %cst_43 = arith.constant dense<0.000000e+00> : vector<4x128xf32>
    %80 = tpu.matmul %77, %79, %cst_43 {dimension_numbers = #tpu.dot_dimension_numbers<[1], [0], [0], [1], [0, 0, 1, 1], [], []>} : vector<4x16xf32>, vector<16x128xf32>, vector<4x128xf32> -> vector<4x128xf32>
    %81 = arith.addf %75, %80 : vector<4x128xf32>
    %82 = vector.extract_strided_slice %1 {offsets = [0, 13, 0], sizes = [4, 1, 16], strides = [1, 1, 1]} : vector<4x32x16xf32> to vector<4x1x16xf32>
    %83 = vector.shape_cast %82 : vector<4x1x16xf32> to vector<4x16xf32>
    %c13 = arith.constant 13 : index
    %c0_44 = arith.constant 0 : index
    %c0_45 = arith.constant 0 : index
    %84 = vector.load %arg6[%c13, %c0_44, %c0_45] : memref<25x16x128xf32, #tpu.memory_space<vmem>>, vector<1x16x128xf32>
    %85 = vector.shape_cast %84 : vector<1x16x128xf32> to vector<16x128xf32>
    %cst_46 = arith.constant dense<0.000000e+00> : vector<4x128xf32>
    %86 = tpu.matmul %83, %85, %cst_46 {dimension_numbers = #tpu.dot_dimension_numbers<[1], [0], [0], [1], [0, 0, 1, 1], [], []>} : vector<4x16xf32>, vector<16x128xf32>, vector<4x128xf32> -> vector<4x128xf32>
    %87 = arith.addf %81, %86 : vector<4x128xf32>
    %88 = vector.extract_strided_slice %1 {offsets = [0, 14, 0], sizes = [4, 1, 16], strides = [1, 1, 1]} : vector<4x32x16xf32> to vector<4x1x16xf32>
    %89 = vector.shape_cast %88 : vector<4x1x16xf32> to vector<4x16xf32>
    %c14 = arith.constant 14 : index
    %c0_47 = arith.constant 0 : index
    %c0_48 = arith.constant 0 : index
    %90 = vector.load %arg6[%c14, %c0_47, %c0_48] : memref<25x16x128xf32, #tpu.memory_space<vmem>>, vector<1x16x128xf32>
    %91 = vector.shape_cast %90 : vector<1x16x128xf32> to vector<16x128xf32>
    %cst_49 = arith.constant dense<0.000000e+00> : vector<4x128xf32>
    %92 = tpu.matmul %89, %91, %cst_49 {dimension_numbers = #tpu.dot_dimension_numbers<[1], [0], [0], [1], [0, 0, 1, 1], [], []>} : vector<4x16xf32>, vector<16x128xf32>, vector<4x128xf32> -> vector<4x128xf32>
    %93 = arith.addf %87, %92 : vector<4x128xf32>
    %94 = vector.extract_strided_slice %1 {offsets = [0, 15, 0], sizes = [4, 1, 16], strides = [1, 1, 1]} : vector<4x32x16xf32> to vector<4x1x16xf32>
    %95 = vector.shape_cast %94 : vector<4x1x16xf32> to vector<4x16xf32>
    %c15 = arith.constant 15 : index
    %c0_50 = arith.constant 0 : index
    %c0_51 = arith.constant 0 : index
    %96 = vector.load %arg6[%c15, %c0_50, %c0_51] : memref<25x16x128xf32, #tpu.memory_space<vmem>>, vector<1x16x128xf32>
    %97 = vector.shape_cast %96 : vector<1x16x128xf32> to vector<16x128xf32>
    %cst_52 = arith.constant dense<0.000000e+00> : vector<4x128xf32>
    %98 = tpu.matmul %95, %97, %cst_52 {dimension_numbers = #tpu.dot_dimension_numbers<[1], [0], [0], [1], [0, 0, 1, 1], [], []>} : vector<4x16xf32>, vector<16x128xf32>, vector<4x128xf32> -> vector<4x128xf32>
    %99 = arith.addf %93, %98 : vector<4x128xf32>
    %100 = vector.extract_strided_slice %1 {offsets = [0, 16, 0], sizes = [4, 1, 16], strides = [1, 1, 1]} : vector<4x32x16xf32> to vector<4x1x16xf32>
    %101 = vector.shape_cast %100 : vector<4x1x16xf32> to vector<4x16xf32>
    %c16 = arith.constant 16 : index
    %c0_53 = arith.constant 0 : index
    %c0_54 = arith.constant 0 : index
    %102 = vector.load %arg6[%c16, %c0_53, %c0_54] : memref<25x16x128xf32, #tpu.memory_space<vmem>>, vector<1x16x128xf32>
    %103 = vector.shape_cast %102 : vector<1x16x128xf32> to vector<16x128xf32>
    %cst_55 = arith.constant dense<0.000000e+00> : vector<4x128xf32>
    %104 = tpu.matmul %101, %103, %cst_55 {dimension_numbers = #tpu.dot_dimension_numbers<[1], [0], [0], [1], [0, 0, 1, 1], [], []>} : vector<4x16xf32>, vector<16x128xf32>, vector<4x128xf32> -> vector<4x128xf32>
    %105 = arith.addf %99, %104 : vector<4x128xf32>
    %106 = vector.extract_strided_slice %1 {offsets = [0, 17, 0], sizes = [4, 1, 16], strides = [1, 1, 1]} : vector<4x32x16xf32> to vector<4x1x16xf32>
    %107 = vector.shape_cast %106 : vector<4x1x16xf32> to vector<4x16xf32>
    %c17 = arith.constant 17 : index
    %c0_56 = arith.constant 0 : index
    %c0_57 = arith.constant 0 : index
    %108 = vector.load %arg6[%c17, %c0_56, %c0_57] : memref<25x16x128xf32, #tpu.memory_space<vmem>>, vector<1x16x128xf32>
    %109 = vector.shape_cast %108 : vector<1x16x128xf32> to vector<16x128xf32>
    %cst_58 = arith.constant dense<0.000000e+00> : vector<4x128xf32>
    %110 = tpu.matmul %107, %109, %cst_58 {dimension_numbers = #tpu.dot_dimension_numbers<[1], [0], [0], [1], [0, 0, 1, 1], [], []>} : vector<4x16xf32>, vector<16x128xf32>, vector<4x128xf32> -> vector<4x128xf32>
    %111 = arith.addf %105, %110 : vector<4x128xf32>
    %112 = vector.extract_strided_slice %1 {offsets = [0, 18, 0], sizes = [4, 1, 16], strides = [1, 1, 1]} : vector<4x32x16xf32> to vector<4x1x16xf32>
    %113 = vector.shape_cast %112 : vector<4x1x16xf32> to vector<4x16xf32>
    %c18 = arith.constant 18 : index
    %c0_59 = arith.constant 0 : index
    %c0_60 = arith.constant 0 : index
    %114 = vector.load %arg6[%c18, %c0_59, %c0_60] : memref<25x16x128xf32, #tpu.memory_space<vmem>>, vector<1x16x128xf32>
    %115 = vector.shape_cast %114 : vector<1x16x128xf32> to vector<16x128xf32>
    %cst_61 = arith.constant dense<0.000000e+00> : vector<4x128xf32>
    %116 = tpu.matmul %113, %115, %cst_61 {dimension_numbers = #tpu.dot_dimension_numbers<[1], [0], [0], [1], [0, 0, 1, 1], [], []>} : vector<4x16xf32>, vector<16x128xf32>, vector<4x128xf32> -> vector<4x128xf32>
    %117 = arith.addf %111, %116 : vector<4x128xf32>
    %118 = vector.extract_strided_slice %1 {offsets = [0, 19, 0], sizes = [4, 1, 16], strides = [1, 1, 1]} : vector<4x32x16xf32> to vector<4x1x16xf32>
    %119 = vector.shape_cast %118 : vector<4x1x16xf32> to vector<4x16xf32>
    %c19 = arith.constant 19 : index
    %c0_62 = arith.constant 0 : index
    %c0_63 = arith.constant 0 : index
    %120 = vector.load %arg6[%c19, %c0_62, %c0_63] : memref<25x16x128xf32, #tpu.memory_space<vmem>>, vector<1x16x128xf32>
    %121 = vector.shape_cast %120 : vector<1x16x128xf32> to vector<16x128xf32>
    %cst_64 = arith.constant dense<0.000000e+00> : vector<4x128xf32>
    %122 = tpu.matmul %119, %121, %cst_64 {dimension_numbers = #tpu.dot_dimension_numbers<[1], [0], [0], [1], [0, 0, 1, 1], [], []>} : vector<4x16xf32>, vector<16x128xf32>, vector<4x128xf32> -> vector<4x128xf32>
    %123 = arith.addf %117, %122 : vector<4x128xf32>
    %124 = vector.extract_strided_slice %1 {offsets = [0, 20, 0], sizes = [4, 1, 16], strides = [1, 1, 1]} : vector<4x32x16xf32> to vector<4x1x16xf32>
    %125 = vector.shape_cast %124 : vector<4x1x16xf32> to vector<4x16xf32>
    %c20 = arith.constant 20 : index
    %c0_65 = arith.constant 0 : index
    %c0_66 = arith.constant 0 : index
    %126 = vector.load %arg6[%c20, %c0_65, %c0_66] : memref<25x16x128xf32, #tpu.memory_space<vmem>>, vector<1x16x128xf32>
    %127 = vector.shape_cast %126 : vector<1x16x128xf32> to vector<16x128xf32>
    %cst_67 = arith.constant dense<0.000000e+00> : vector<4x128xf32>
    %128 = tpu.matmul %125, %127, %cst_67 {dimension_numbers = #tpu.dot_dimension_numbers<[1], [0], [0], [1], [0, 0, 1, 1], [], []>} : vector<4x16xf32>, vector<16x128xf32>, vector<4x128xf32> -> vector<4x128xf32>
    %129 = arith.addf %123, %128 : vector<4x128xf32>
    %130 = vector.extract_strided_slice %1 {offsets = [0, 21, 0], sizes = [4, 1, 16], strides = [1, 1, 1]} : vector<4x32x16xf32> to vector<4x1x16xf32>
    %131 = vector.shape_cast %130 : vector<4x1x16xf32> to vector<4x16xf32>
    %c21 = arith.constant 21 : index
    %c0_68 = arith.constant 0 : index
    %c0_69 = arith.constant 0 : index
    %132 = vector.load %arg6[%c21, %c0_68, %c0_69] : memref<25x16x128xf32, #tpu.memory_space<vmem>>, vector<1x16x128xf32>
    %133 = vector.shape_cast %132 : vector<1x16x128xf32> to vector<16x128xf32>
    %cst_70 = arith.constant dense<0.000000e+00> : vector<4x128xf32>
    %134 = tpu.matmul %131, %133, %cst_70 {dimension_numbers = #tpu.dot_dimension_numbers<[1], [0], [0], [1], [0, 0, 1, 1], [], []>} : vector<4x16xf32>, vector<16x128xf32>, vector<4x128xf32> -> vector<4x128xf32>
    %135 = arith.addf %129, %134 : vector<4x128xf32>
    %136 = vector.extract_strided_slice %1 {offsets = [0, 22, 0], sizes = [4, 1, 16], strides = [1, 1, 1]} : vector<4x32x16xf32> to vector<4x1x16xf32>
    %137 = vector.shape_cast %136 : vector<4x1x16xf32> to vector<4x16xf32>
    %c22 = arith.constant 22 : index
    %c0_71 = arith.constant 0 : index
    %c0_72 = arith.constant 0 : index
    %138 = vector.load %arg6[%c22, %c0_71, %c0_72] : memref<25x16x128xf32, #tpu.memory_space<vmem>>, vector<1x16x128xf32>
    %139 = vector.shape_cast %138 : vector<1x16x128xf32> to vector<16x128xf32>
    %cst_73 = arith.constant dense<0.000000e+00> : vector<4x128xf32>
    %140 = tpu.matmul %137, %139, %cst_73 {dimension_numbers = #tpu.dot_dimension_numbers<[1], [0], [0], [1], [0, 0, 1, 1], [], []>} : vector<4x16xf32>, vector<16x128xf32>, vector<4x128xf32> -> vector<4x128xf32>
    %141 = arith.addf %135, %140 : vector<4x128xf32>
    %142 = vector.extract_strided_slice %1 {offsets = [0, 23, 0], sizes = [4, 1, 16], strides = [1, 1, 1]} : vector<4x32x16xf32> to vector<4x1x16xf32>
    %143 = vector.shape_cast %142 : vector<4x1x16xf32> to vector<4x16xf32>
    %c23 = arith.constant 23 : index
    %c0_74 = arith.constant 0 : index
    %c0_75 = arith.constant 0 : index
    %144 = vector.load %arg6[%c23, %c0_74, %c0_75] : memref<25x16x128xf32, #tpu.memory_space<vmem>>, vector<1x16x128xf32>
    %145 = vector.shape_cast %144 : vector<1x16x128xf32> to vector<16x128xf32>
    %cst_76 = arith.constant dense<0.000000e+00> : vector<4x128xf32>
    %146 = tpu.matmul %143, %145, %cst_76 {dimension_numbers = #tpu.dot_dimension_numbers<[1], [0], [0], [1], [0, 0, 1, 1], [], []>} : vector<4x16xf32>, vector<16x128xf32>, vector<4x128xf32> -> vector<4x128xf32>
    %147 = arith.addf %141, %146 : vector<4x128xf32>
    %148 = vector.extract_strided_slice %1 {offsets = [0, 24, 0], sizes = [4, 1, 16], strides = [1, 1, 1]} : vector<4x32x16xf32> to vector<4x1x16xf32>
    %149 = vector.shape_cast %148 : vector<4x1x16xf32> to vector<4x16xf32>
    %c24 = arith.constant 24 : index
    %c0_77 = arith.constant 0 : index
    %c0_78 = arith.constant 0 : index
    %150 = vector.load %arg6[%c24, %c0_77, %c0_78] : memref<25x16x128xf32, #tpu.memory_space<vmem>>, vector<1x16x128xf32>
    %151 = vector.shape_cast %150 : vector<1x16x128xf32> to vector<16x128xf32>
    %cst_79 = arith.constant dense<0.000000e+00> : vector<4x128xf32>
    %152 = tpu.matmul %149, %151, %cst_79 {dimension_numbers = #tpu.dot_dimension_numbers<[1], [0], [0], [1], [0, 0, 1, 1], [], []>} : vector<4x16xf32>, vector<16x128xf32>, vector<4x128xf32> -> vector<4x128xf32>
    %153 = arith.addf %147, %152 : vector<4x128xf32>
    %cst_80 = arith.constant 0.000000e+00 : f32
    %154 = vector.broadcast %cst_80 : f32 to vector<4x128xf32>
    %155 = arith.maximumf %153, %154 : vector<4x128xf32>
    %c0_81 = arith.constant 0 : index
    %c0_82 = arith.constant 0 : index
    %156 = vector.load %arg8[%c0_81, %c0_82] : memref<128x128xf32, #tpu.memory_space<vmem>>, vector<128x128xf32>
    %cst_83 = arith.constant dense<0.000000e+00> : vector<4x128xf32>
    %157 = tpu.matmul %155, %156, %cst_83 {dimension_numbers = #tpu.dot_dimension_numbers<[1], [0], [0], [1], [0, 0, 1, 1], [], []>} : vector<4x128xf32>, vector<128x128xf32>, vector<4x128xf32> -> vector<4x128xf32>
    %c0_84 = arith.constant 0 : index
    %c0_85 = arith.constant 0 : index
    %158 = vector.load %arg9[%c0_84, %c0_85] : memref<1x128xf32, #tpu.memory_space<vmem>>, vector<1x128xf32>
    %159 = vector.broadcast %158 : vector<1x128xf32> to vector<4x128xf32>
    %160 = arith.addf %157, %159 : vector<4x128xf32>
    %cst_86 = arith.constant 0.000000e+00 : f32
    %161 = vector.broadcast %cst_86 : f32 to vector<4x128xf32>
    %162 = arith.maximumf %160, %161 : vector<4x128xf32>
    %c0_87 = arith.constant 0 : index
    %c0_88 = arith.constant 0 : index
    %163 = vector.load %arg10[%c0_87, %c0_88] : memref<128x128xf32, #tpu.memory_space<vmem>>, vector<128x128xf32>
    %cst_89 = arith.constant dense<0.000000e+00> : vector<4x128xf32>
    %164 = tpu.matmul %162, %163, %cst_89 {dimension_numbers = #tpu.dot_dimension_numbers<[1], [0], [0], [1], [0, 0, 1, 1], [], []>} : vector<4x128xf32>, vector<128x128xf32>, vector<4x128xf32> -> vector<4x128xf32>
    %c0_90 = arith.constant 0 : index
    %c0_91 = arith.constant 0 : index
    %165 = vector.load %arg11[%c0_90, %c0_91] : memref<1x128xf32, #tpu.memory_space<vmem>>, vector<1x128xf32>
    %166 = vector.broadcast %165 : vector<1x128xf32> to vector<4x128xf32>
    %167 = arith.addf %164, %166 : vector<4x128xf32>
    %168 = tpu.iota {dimensions = array<i32: 1>} : vector<1x128xi32>
    %c10_i32 = arith.constant 10 : i32
    %169 = vector.broadcast %c10_i32 : i32 to vector<1x128xi32>
    %170 = arith.cmpi slt, %168, %169 : vector<1x128xi32>
    %cst_92 = arith.constant -3.40282347E+38 : f32
    %171 = vector.shape_cast %170 : vector<1x128xi1> to vector<1x128xi1>
    %172 = vector.broadcast %171 : vector<1x128xi1> to vector<4x128xi1>
    %173 = vector.broadcast %cst_92 : f32 to vector<4x128xf32>
    %174 = arith.select %172, %167, %173 : vector<4x128xi1>, vector<4x128xf32>
    %cst_93 = arith.constant dense<0xFF800000> : vector<4xf32>
    %175 = vector.multi_reduction <maximumf>, %174, %cst_93 [1] : vector<4x128xf32> to vector<4xf32>
    %176 = vector.shape_cast %175 : vector<4xf32> to vector<4x1xf32>
    %177 = vector.broadcast %176 : vector<4x1xf32> to vector<4x128xf32>
    %178 = arith.subf %174, %177 : vector<4x128xf32>
    %179 = math.exp %178 : vector<4x128xf32>
    %cst_94 = arith.constant dense<0.000000e+00> : vector<4xf32>
    %180 = vector.multi_reduction <add>, %179, %cst_94 [1] : vector<4x128xf32> to vector<4xf32>
    %181 = vector.shape_cast %180 : vector<4xf32> to vector<4x1xf32>
    %182 = math.log %181 : vector<4x1xf32>
    %183 = vector.broadcast %182 : vector<4x1xf32> to vector<4x128xf32>
    %184 = arith.subf %178, %183 : vector<4x128xf32>
    %c0_95 = arith.constant 0 : index
    %c0_96 = arith.constant 0 : index
    %c0_97 = arith.constant 0 : index
    %185 = vector.load %arg12[%c0_95, %c0_96, %c0_97] : memref<1x4x128xf32, #tpu.memory_space<vmem>>, vector<1x4x128xf32>
    %186 = vector.shape_cast %185 : vector<1x4x128xf32> to vector<4x128xf32>
    %187 = vector.shape_cast %184 : vector<4x128xf32> to vector<1x4x128xf32>
    tpu.vector_store %arg12[%c0_95, %c0_96, %c0_97], %187 {strides = array<i32>} : memref<1x4x128xf32, #tpu.memory_space<vmem>>, vector<1x4x128xf32>,
    return
  }
  func.func @transform_0(%arg0: i32) -> (i32, i32, i32) {
    %c0_i32 = arith.constant 0 : i32
    %c0_i32_0 = arith.constant 0 : i32
    %c0_i32_1 = arith.constant 0 : i32
    return %arg0, %c0_i32, %c0_i32_0 : i32, i32, i32
  }
  func.func @transform_1(%arg0: i32) -> (i32, i32) {
    %c0_i32 = arith.constant 0 : i32
    %c0_i32_0 = arith.constant 0 : i32
    %c0_i32_1 = arith.constant 0 : i32
    return %c0_i32, %c0_i32_0 : i32, i32
  }
  func.func @transform_2(%arg0: i32) -> (i32, i32) {
    %c0_i32 = arith.constant 0 : i32
    %c0_i32_0 = arith.constant 0 : i32
    %c0_i32_1 = arith.constant 0 : i32
    return %c0_i32, %c0_i32_0 : i32, i32
  }
  func.func @transform_3(%arg0: i32) -> (i32, i32, i32) {
    %c0_i32 = arith.constant 0 : i32
    %c0_i32_0 = arith.constant 0 : i32
    %c0_i32_1 = arith.constant 0 : i32
    %c0_i32_2 = arith.constant 0 : i32
    return %c0_i32, %c0_i32_0, %c0_i32_1 : i32, i32, i32
  }
  func.func @transform_4(%arg0: i32) -> (i32, i32) {
    %c0_i32 = arith.constant 0 : i32
    %c0_i32_0 = arith.constant 0 : i32
    %c0_i32_1 = arith.constant 0 : i32
    return %c0_i32, %c0_i32_0 : i32, i32
  }
  func.func @transform_5(%arg0: i32) -> (i32, i32, i32) {
    %c0_i32 = arith.constant 0 : i32
    %c0_i32_0 = arith.constant 0 : i32
    %c0_i32_1 = arith.constant 0 : i32
    %c0_i32_2 = arith.constant 0 : i32
    return %c0_i32, %c0_i32_0, %c0_i32_1 : i32, i32, i32
  }
  func.func @transform_6(%arg0: i32) -> (i32, i32) {
    %c0_i32 = arith.constant 0 : i32
    %c0_i32_0 = arith.constant 0 : i32
    %c0_i32_1 = arith.constant 0 : i32
    return %c0_i32, %c0_i32_0 : i32, i32
  }
  func.func @transform_7(%arg0: i32) -> (i32, i32) {
    %c0_i32 = arith.constant 0 : i32
    %c0_i32_0 = arith.constant 0 : i32
    %c0_i32_1 = arith.constant 0 : i32
    return %c0_i32, %c0_i32_0 : i32, i32
  }
  func.func @transform_8(%arg0: i32) -> (i32, i32) {
    %c0_i32 = arith.constant 0 : i32
    %c0_i32_0 = arith.constant 0 : i32
    %c0_i32_1 = arith.constant 0 : i32
    return %c0_i32, %c0_i32_0 : i32, i32
  }
  func.func @transform_9(%arg0: i32) -> (i32, i32) {
    %c0_i32 = arith.constant 0 : i32
    %c0_i32_0 = arith.constant 0 : i32
    %c0_i32_1 = arith.constant 0 : i32
    return %c0_i32, %c0_i32_0 : i32, i32
  }
  func.func @transform_10(%arg0: i32) -> (i32, i32) {
    %c0_i32 = arith.constant 0 : i32
    %c0_i32_0 = arith.constant 0 : i32
    %c0_i32_1 = arith.constant 0 : i32
    return %c0_i32, %c0_i32_0 : i32, i32
  }
  func.func @transform_11(%arg0: i32) -> (i32, i32, i32) {
    %c0_i32 = arith.constant 0 : i32
    %c0_i32_0 = arith.constant 0 : i32
    %c0_i32_1 = arith.constant 0 : i32
    return %arg0, %c0_i32, %c0_i32_0 : i32, i32, i32
  }
}

</mosaic_0001>

<bundles_post_ra>
// kernel: cnn_forward.1
= control target key start
LH: loop header
LB: loop body
LE: loop exit
PB: predicated region body
PF: predicated region fallthrough
CT: control target
= control target key end

     0   :  { %s19283_s0 = inlined_call_operand.vmem [shape: f32[8,784,80], index: 0, kind: input, shape index: {}]   ;;  %s19284_s1 = inlined_call_operand.vmem [shape: f32[80,128], index: 1, kind: input, shape index: {}]   ;;  %s19285_s2 = inlined_call_operand.vmem [shape: f32[1,128], index: 2, kind: input, shape index: {}]   ;;  %s19286_s3 = inlined_call_operand.vmem [shape: f32[25,8,128], index: 3, kind: input, shape index: {}]   ;;  %s19287_s4 = inlined_call_operand.vmem [shape: f32[1,128], index: 4, kind: input, shape index: {}]   ;;  %s19288_s5 = inlined_call_operand.vmem [shape: f32[25,16,128], index: 5, kind: input, shape index: {}]   ;;  %s19289_s6 = inlined_call_operand.vmem [shape: f32[1,128], index: 6, kind: input, shape index: {}]   ;;  %s19290_s7 = inlined_call_operand.vmem [shape: f32[128,128], index: 7, kind: input, shape index: {}]   ;;  %s19291_s8 = inlined_call_operand.vmem [shape: f32[1,128], index: 8, kind: input, shape index: {}]   ;;  %s19292_s9 = inlined_call_operand.vmem [shape: f32[128,128], index: 9, kind: input, shape index: {}]   ;;  %s19293_s10 = inlined_call_operand.vmem [shape: f32[1,128], index: 10, kind: input, shape index: {}]   ;;  %s19294_s11 = inlined_call_operand.hbm [shape: f32[2,4,128], index: 11, kind: output, shape index: {}]  }
   0x1   :  { %19297 = sst [smem:[#allocation12_spill]] %s19283_s0 }
   0x2   :  { %16 = vsyncpa [#allocation8], 0 }
   0x3   :  { %18 = vsyncpa [#allocation8 + $0x1], 0  ;;  %s16479_s17 = smov 0   ;;  %s16481_s18 = smov 0  }
   0x4   :  { %s16483_s19 = smov 0   ;;  %s16485_s20 = smov 0  }
   0x5 LB: > { %19298 = sst [smem:[#allocation10_spill]] %s16403_s19  ;;  %s16500_s21 = sadd.s32 4294967295, %s16407_s20   ;;  %s16407_s20 = sphi %s16485_s20, %s19310_s20   ;;  %s16403_s19 = sphi %s16483_s19, %s19307_s19   ;;  %s16399_s18 = sphi %s16481_s18, %s19309_s18   ;;  %s16395_s17 = sphi %s16479_s17, %s19308_s17  }
   0x6   : > { %s12322_s22 = sadd.s32 4294967294, %s16407_s20   ;;  %s16504_s23 = sadd.s32 1, %s16407_s20  }
   0x7   : > { %s267_s24 = sadd.s32 1, %s16403_s19  ;;  %s264_s25 = ssub.s32 %s16407_s20, %s16504_s23 }
   0x8   : > { %p277_p0 = scmp.ne.s32.totalorder %s16403_s19, %s16399_s18  ;;  %p265_p1 = scmp.eq.s32.totalorder %s264_s25, 0 }
   0x9   : > { %p278_p2 = scmp.eq.s32.totalorder %s16500_s21, 1  ;;  %p283_p3 = scmp.ne.s32.totalorder %s16399_s18, %s16395_s17 }
   0xa   : > { %p284_p4 = scmp.eq.s32.totalorder %s12322_s22, 1  ;;  %p12325_p7 = scmp.ge.s32.totalorder %s16407_s20, 1 }
   0xb   : > { %s16515_s26 = scalar_select %p265_p1, %s16403_s19, %s267_s24  }
   0xc   : > { %p16517_p5 = por %p278_p2, %p277_p0  ;;  %p16521_p6 = por %p284_p4, %p283_p3 }
   0xd   : > { %19299 = sst [smem:[#allocation11_spill]] %s16515_s26  ;;  %p342_p8 = scmp.lt.s32.totalorder %s16407_s20, 3 }
   0xf   : > { %p343_p9 = pnand %p12325_p7, %p342_p8 }
  0x10   : > { %s19295_s29 = sand.u32 (!%p343_p9), 1, %s16399_s18   ;;  %s12327_s30 = sshll.u32 (!%p343_p9), %s16500_s21, 2 }
  0x11   : > { %346 = sbr.rel (%p343_p9) target bundleno = 2375 (0x947), region = 64  ;;  %s16531_s12 = sshll.u32 (!%p343_p9), %s19295_s29, 2 }
  0x12   : > { %p384_p10 = scmp.lt.s32.totalorder (!%p343_p9), %s12327_s30, 7  ;;  %s19302_s0 = sld [smem:[#allocation12_spill]] (!%p343_p9) }
  0x13   : > { %s16539_s24 = smov (!%p343_p9), 0  }
  0x18   : > { %s19312_s30 = smov (!%p384_p10, %s12327_s30), 7 }
  0x19   : > { %s16282_s13 = smul.u32 784, %s19312_s30 }
  0x1b   : > { %s16536_s16 = scalar_lea.vmem %s19302_s0, %s16282_s13 }
  0x1c LB: >> { %v412_v0 = vld [vmem:[%s19284_s1] sm:$0xff]  ;;  %v413_v1 = vld [vmem:[%s19284_s1 + $0x8] sm:$0xff]  ;;  %v414_v2 = vld [vmem:[%s19284_s1 + $0x10] sm:$0xff]  ;;  %s396_s26 = smul.u32 784, %s16411_s24  ;;  %vm422_vm0 = vcmask 654336   ;;  %vm16414_vm1 = vmmov 0   ;;  %s16411_s24 = sphi %s16539_s24, %s395_s24  }
  0x1d   : >> { %v16553_v3 = vpack.c.bf16 %v413_v1, %v412_v0  ;;  %v415_v4 = vld [vmem:[%s19284_s1 + $0x18] sm:$0xff]  ;;  %v416_v6 = vld [vmem:[%s19284_s1 + $0x20] sm:$0xff]  ;;  %v417_v7 = vld [vmem:[%s19284_s1 + $0x28] sm:$0xff]  ;;  %vm2235_vm2 = vcmask 64512   ;;  %vm2260_vm3 = vcmask 60416   ;;  %s12902_s19 = sshll.u32 %s16411_s24, 5 }
  0x1e   : >> { %v16558_v5 = vpack.c.bf16 %v415_v4, %v414_v2  ;;  %s16572_s22 = scalar_lea.vmem %s16536_s16, %s396_s26  ;;  %v16576_v8 = vpack.c.bf16 %v417_v7, %v416_v6  ;;  %v418_v11 = vld [vmem:[%s19284_s1 + $0x30] sm:$0xff]  ;;  %v419_v12 = vld [vmem:[%s19284_s1 + $0x38] sm:$0xff]  ;;  %v420_v14 = vld [vmem:[%s19284_s1 + $0x40] sm:$0xff]  ;;  %vm9842_vm4 = vcmask 126976   ;;  %s18518_s30 = scalar_lea.vmem [#allocation6], %s12902_s19 }
  0x1f   : >> { %15347 = vmatprep.subr.bf16.mxu0 %v16553_v3  ;;  %15367 = vmatprep.subr.bf16.mxu1 %v16553_v3  ;;  %v398_v9 = vld [vmem:[%s16572_s22] sm:$0xff]  ;;  %v614_v10 = vld [vmem:[%s16572_s22 + $0x70] sm:$0xff]  ;;  %v16592_v13 = vpack.c.bf16 %v419_v12, %v418_v11  ;;  %v421_v15 = vld [vmem:[%s19284_s1 + $0x48] sm:$0xff]  ;;  %s395_s24 = sadd.s32 1, %s16411_s24  }
  0x20   : >> { %15349 = vmatpush3.bf16.msra.mxu0 %v16553_v3  ;;  %15369 = vmatpush3.bf16.msra.mxu1 %v16553_v3  ;;  %v16604_v16 = vpack.c.bf16 %v421_v15, %v420_v14  ;;  %v399_v17 = vld [vmem:[%s16572_s22 + $0x8] sm:$0xff]  ;;  %v615_v18 = vld [vmem:[%s16572_s22 + $0x78] sm:$0xff]  ;;  %v400_v19 = vld [vmem:[%s16572_s22 + $0x10] sm:$0xff]  ;;  %p392_p11 = scmp.ge.s32.totalorder %s395_s24, 4  }
  0x21   : >> { %15351 = vmatprep.subr.bf16.mxu0 %v16558_v5  ;;  %15371 = vmatprep.subr.bf16.mxu1 %v16558_v5  ;;  %v616_v20 = vld [vmem:[%s16572_s22 + $0x80] sm:$0xff]  ;;  %v401_v21 = vld [vmem:[%s16572_s22 + $0x18] sm:$0xff]  ;;  %v617_v22 = vld [vmem:[%s16572_s22 + $0x88] sm:$0xff]  ;;  %vm16416_vm5 = vmmov (%p392_p11), 0   ;;  %vm9952_vm6 = vcmask (%p392_p11), 1041409   ;;  %vm9955_vm7 = vcmask (%p392_p11), 1042434  }
  0x22   : >> { %13759 = vmatprep.mubr.msk.f32.mxu0 %vm422_vm0, %v398_v9  ;;  %13800 = vmatprep.mubr.msk.f32.mxu1 %vm422_vm0, %v614_v10  ;;  %v402_v23 = vld [vmem:[%s16572_s22 + $0x20] sm:$0xff]  ;;  %v618_v24 = vld [vmem:[%s16572_s22 + $0x90] sm:$0xff]  ;;  %v403_v25 = vld [vmem:[%s16572_s22 + $0x28] sm:$0xff]  ;;  %vm9958_vm8 = vcmask (%p392_p11), 1043459   ;;  %vm9960_vm9 = vcmask (%p392_p11), 130048   ;;  %vm12226_vm11 = vcmask (%p392_p11), 1043456  }
  0x23   : >> { %v619_v26 = vld [vmem:[%s16572_s22 + $0x98] sm:$0xff]  ;;  %v404_v27 = vld [vmem:[%s16572_s22 + $0x30] sm:$0xff]  ;;  %v620_v28 = vld [vmem:[%s16572_s22 + $0xa0] sm:$0xff]  ;;  %s19303_s15 = scalar_lea.vmem (%p392_p11), [#allocation7], %s16531_s12  ;;  %s19305_s0 = sand.u32 (%p392_p11), 1, %s16399_s18  }
  0x24   : >> { %15353 = vmatpush3.bf16.msra.mxu0 %v16558_v5  ;;  %15373 = vmatpush3.bf16.msra.mxu1 %v16558_v5  ;;  %v405_v29 = vld [vmem:[%s16572_s22 + $0x38] sm:$0xff]  ;;  %v621_v30 = vld [vmem:[%s16572_s22 + $0xa8] sm:$0xff]  ;;  %v406_v31 = vld [vmem:[%s16572_s22 + $0x40] sm:$0xff]  ;;  %s12254_s16 = sshll.u32 (%p392_p11), %s19303_s15, 4  ;;  %s19304_s26 = smov (%p392_p11), %s19303_s15  ;;  %s19239_s16 = int_to_ptr.vmem [resolvable:$true] %s12254_s16 }
  0x25   : >> { %15355 = vmatprep.subr.bf16.mxu0 %v16576_v8  ;;  %15375 = vmatprep.subr.bf16.mxu1 %v16576_v8  ;;  %v622_v32 = vld [vmem:[%s16572_s22 + $0xb0] sm:$0xff]  ;;  %v407_v33 = vld [vmem:[%s16572_s22 + $0x48] sm:$0xff]  ;;  %v623_v34 = vld [vmem:[%s16572_s22 + $0xb8] sm:$0xff]  ;;  %s12241_s19 = scalar_lea.sflag (%p392_p11), [#allocation8], %s19305_s0 }
  0x26   : >> { %v408_v35 = vld [vmem:[%s16572_s22 + $0x50] sm:$0xff]  ;;  %v624_v36 = vld [vmem:[%s16572_s22 + $0xc0] sm:$0xff]  ;;  %v409_v37 = vld [vmem:[%s16572_s22 + $0x58] sm:$0xff] }
  0x27   : >> { %v625_v38 = vld [vmem:[%s16572_s22 + $0xc8] sm:$0xff]  ;;  %v410_v39 = vld [vmem:[%s16572_s22 + $0x60] sm:$0xff]  ;;  %v626_v40 = vld [vmem:[%s16572_s22 + $0xd0] sm:$0xff] }
  0x28   : >> { %15357 = vmatpush3.bf16.msra.mxu0 %v16576_v8  ;;  %15377 = vmatpush3.bf16.msra.mxu1 %v16576_v8  ;;  %v411_v41 = vld [vmem:[%s16572_s22 + $0x68] sm:$0xff]  ;;  %v627_v42 = vld [vmem:[%s16572_s22 + $0xd8] sm:$0xff]  ;;  %v829_v43 = vld [vmem:[%s16572_s22 + $0xe0] sm:$0xff] }
  0x29   : >> { %15359 = vmatprep.subr.bf16.mxu0 %v16592_v13  ;;  %15379 = vmatprep.subr.bf16.mxu1 %v16592_v13  ;;  %v1044_v44 = vld [vmem:[%s16572_s22 + $0x150] sm:$0xff]  ;;  %v830_v45 = vld [vmem:[%s16572_s22 + $0xe8] sm:$0xff]  ;;  %v1045_v46 = vld [vmem:[%s16572_s22 + $0x158] sm:$0xff] }
  0x2a   : >> { %v831_v47 = vld [vmem:[%s16572_s22 + $0xf0] sm:$0xff]  ;;  %v1046_v48 = vld [vmem:[%s16572_s22 + $0x160] sm:$0xff]  ;;  %v832_v49 = vld [vmem:[%s16572_s22 + $0xf8] sm:$0xff] }
  0x2b   : >> { %v1047_v50 = vld [vmem:[%s16572_s22 + $0x168] sm:$0xff]  ;;  %v833_v51 = vld [vmem:[%s16572_s22 + $0x100] sm:$0xff]  ;;  %v1048_v52 = vld [vmem:[%s16572_s22 + $0x170] sm:$0xff] }
  0x2c   : >> { %15361 = vmatpush3.bf16.msra.mxu0 %v16592_v13  ;;  %15381 = vmatpush3.bf16.msra.mxu1 %v16592_v13  ;;  %v834_v53 = vld [vmem:[%s16572_s22 + $0x108] sm:$0xff]  ;;  %v1049_v54 = vld [vmem:[%s16572_s22 + $0x178] sm:$0xff]  ;;  %v835_v55 = vld [vmem:[%s16572_s22 + $0x110] sm:$0xff] }
  0x2d   : >> { %15363 = vmatprep.subr.bf16.mxu0 %v16604_v16  ;;  %15383 = vmatprep.subr.bf16.mxu1 %v16604_v16  ;;  %v1050_v56 = vld [vmem:[%s16572_s22 + $0x180] sm:$0xff]  ;;  %v836_v57 = vld [vmem:[%s16572_s22 + $0x118] sm:$0xff]  ;;  %v1051_v58 = vld [vmem:[%s16572_s22 + $0x188] sm:$0xff] }
  0x2e   : >> { %v837_v59 = vld [vmem:[%s16572_s22 + $0x120] sm:$0xff]  ;;  %v1052_v60 = vld [vmem:[%s16572_s22 + $0x190] sm:$0xff]  ;;  %v838_v61 = vld [vmem:[%s16572_s22 + $0x128] sm:$0xff] }
  0x2f   : >> { %v1053_v62 = vld [vmem:[%s16572_s22 + $0x198] sm:$0xff]  ;;  %v839_v63 = vld [vmem:[%s16572_s22 + $0x130] sm:$0xff]  ;;  %v1054_v0 = vld [vmem:[%s16572_s22 + $0x1a0] sm:$0xff] }
  0x30   : >> { %15365 = vmatpush3.bf16.msra.mxu0 %v16604_v16  ;;  %15385 = vmatpush3.bf16.msra.mxu1 %v16604_v16  ;;  %v840_v1 = vld [vmem:[%s16572_s22 + $0x138] sm:$0xff]  ;;  %v1055_v2 = vld [vmem:[%s16572_s22 + $0x1a8] sm:$0xff]  ;;  %v841_v4 = vld [vmem:[%s16572_s22 + $0x140] sm:$0xff] }
  0x31   : >> { %15387 = vmatprep.subr.bf16.mxu0 %v16553_v3  ;;  %15407 = vmatprep.subr.bf16.mxu1 %v16553_v3  ;;  %v1056_v6 = vld [vmem:[%s16572_s22 + $0x1b0] sm:$0xff]  ;;  %v842_v7 = vld [vmem:[%s16572_s22 + $0x148] sm:$0xff]  ;;  %v1057_v9 = vld [vmem:[%s16572_s22 + $0x1b8] sm:$0xff] }
  0x32   : >> { %v1259_v10 = vld [vmem:[%s16572_s22 + $0x1c0] sm:$0xff]  ;;  %v1474_v11 = vld [vmem:[%s16572_s22 + $0x230] sm:$0xff]  ;;  %v1260_v12 = vld [vmem:[%s16572_s22 + $0x1c8] sm:$0xff] }
  0x33   : >> { %13760 = vmatmul.mubr.msk.f32.vlgmr.msra.gmra.mrb[0].mxu0 %vm422_vm0, %v399_v17  ;;  %13801 = vmatmul.mubr.msk.f32.vlgmr.msra.gmra.mrb[0].mxu1 %vm422_vm0, %v615_v18  ;;  %v1475_v14 = vld [vmem:[%s16572_s22 + $0x238] sm:$0xff]  ;;  %v1261_v15 = vld [vmem:[%s16572_s22 + $0x1d0] sm:$0xff]  ;;  %v1476_v17 = vld [vmem:[%s16572_s22 + $0x240] sm:$0xff] }
  0x34   : >> { %15389 = vmatpush3.bf16.msra.mxu0 %v16553_v3  ;;  %13762 = vmatprep.mubr.msk.f32.mxu0 %vm422_vm0, %v400_v19  ;;  %v1262_v18 = vld [vmem:[%s16572_s22 + $0x1d8] sm:$0xff]  ;;  %v1477_v19 = vld [vmem:[%s16572_s22 + $0x248] sm:$0xff] }
  0x35   : >> { %13803 = vmatprep.mubr.msk.f32.mxu1 %vm422_vm0, %v616_v20  ;;  %15391 = vmatprep.subr.bf16.mxu0 %v16558_v5  ;;  %v1263_v20 = vld [vmem:[%s16572_s22 + $0x1e0] sm:$0xff] }
  0x36   : >> { %15409 = vmatpush3.bf16.msra.mxu1 %v16553_v3 }
  0x37   : >> { %13763 = vmatmul.mubr.msk.f32.gmra.mrb[2].mxu0 %vm422_vm0, %v401_v21  ;;  %13804 = vmatmul.mubr.msk.f32.gmra.mrb[2].mxu1 %vm422_vm0, %v617_v22  ;;  %v1478_v21 = vld [vmem:[%s16572_s22 + $0x250] sm:$0xff]  ;;  %v1264_v22 = vld [vmem:[%s16572_s22 + $0x1e8] sm:$0xff] }
  0x38   : >> { %13765 = vmatprep.mubr.msk.f32.mxu0 %vm422_vm0, %v402_v23  ;;  %13806 = vmatprep.mubr.msk.f32.mxu1 %vm422_vm0, %v618_v24  ;;  %v1479_v23 = vld [vmem:[%s16572_s22 + $0x258] sm:$0xff]  ;;  %v1265_v24 = vld [vmem:[%s16572_s22 + $0x1f0] sm:$0xff] }
  0x39   : >> { %15393 = vmatpush3.bf16.msra.mxu0 %v16558_v5  ;;  %15411 = vmatprep.subr.bf16.mxu1 %v16558_v5 }
  0x3a   : >> { %15395 = vmatprep.subr.bf16.mxu0 %v16576_v8  ;;  %15413 = vmatpush3.bf16.msra.mxu1 %v16558_v5 }
  0x3b   : >> { %13766 = vmatmul.mubr.msk.f32.gmra.mrb[4].mxu0 %vm422_vm0, %v403_v25  ;;  %13807 = vmatmul.mubr.msk.f32.gmra.mrb[4].mxu1 %vm422_vm0, %v619_v26  ;;  %v1266_v25 = vld [vmem:[%s16572_s22 + $0x1f8] sm:$0xff]  ;;  %v1481_v26 = vld [vmem:[%s16572_s22 + $0x268] sm:$0xff] }
  0x3c   : >> { %13768 = vmatprep.mubr.msk.f32.mxu0 %vm422_vm0, %v404_v27  ;;  %13809 = vmatprep.mubr.msk.f32.mxu1 %vm422_vm0, %v620_v28  ;;  %v1267_v27 = vld [vmem:[%s16572_s22 + $0x200] sm:$0xff]  ;;  %v1268_v28 = vld [vmem:[%s16572_s22 + $0x208] sm:$0xff] }
  0x3d   : >> { %15397 = vmatpush3.bf16.msra.mxu0 %v16576_v8  ;;  %15415 = vmatprep.subr.bf16.mxu1 %v16576_v8 }
  0x3e   : >> { %15399 = vmatprep.subr.bf16.mxu0 %v16592_v13  ;;  %15417 = vmatpush3.bf16.msra.mxu1 %v16576_v8 }
  0x3f   : >> { %13769 = vmatmul.mubr.msk.f32.gmra.mrb[6].mxu0 %vm422_vm0, %v405_v29  ;;  %13810 = vmatmul.mubr.msk.f32.gmra.mrb[6].mxu1 %vm422_vm0, %v621_v30  ;;  %v1483_v29 = vld [vmem:[%s16572_s22 + $0x278] sm:$0xff]  ;;  %v1269_v30 = vld [vmem:[%s16572_s22 + $0x210] sm:$0xff] }
  0x40   : >> { %13771 = vmatprep.mubr.msk.f32.mxu0 %vm422_vm0, %v406_v31  ;;  %13812 = vmatprep.mubr.msk.f32.mxu1 %vm422_vm0, %v622_v32  ;;  %v1270_v31 = vld [vmem:[%s16572_s22 + $0x218] sm:$0xff]  ;;  %v1485_v32 = vld [vmem:[%s16572_s22 + $0x288] sm:$0xff] }
  0x41   : >> { %15401 = vmatpush3.bf16.msra.mxu0 %v16592_v13  ;;  %15419 = vmatprep.subr.bf16.mxu1 %v16592_v13 }
  0x42   : >> { %15421 = vmatpush3.bf16.msra.mxu1 %v16592_v13  ;;  %15403 = vmatprep.subr.bf16.mxu0 %v16604_v16 }
  0x43   : >> { %13772 = vmatmul.mubr.msk.f32.gmra.mrb[8].mxu0 %vm422_vm0, %v407_v33  ;;  %13813 = vmatmul.mubr.msk.f32.gmra.mrb[8].mxu1 %vm422_vm0, %v623_v34  ;;  %v1486_v33 = vld [vmem:[%s16572_s22 + $0x290] sm:$0xff]  ;;  %v1272_v34 = vld [vmem:[%s16572_s22 + $0x228] sm:$0xff] }
  0x44   : >> { %13774 = vmatprep.mubr.msk.f32.mxu0 %vm422_vm0, %v408_v35  ;;  %13815 = vmatprep.mubr.msk.f32.mxu1 %vm422_vm0, %v624_v36  ;;  %v1487_v35 = vld [vmem:[%s16572_s22 + $0x298] sm:$0xff]  ;;  %v1689_v36 = vld [vmem:[%s16572_s22 + $0x2a0] sm:$0xff] }
  0x45   : >> { %15405 = vmatpush3.bf16.msra.mxu0 %v16604_v16  ;;  %15423 = vmatprep.subr.bf16.mxu1 %v16604_v16 }
  0x46   : >> { %15425 = vmatpush3.bf16.msra.mxu1 %v16604_v16  ;;  %15427 = vmatprep.subr.bf16.mxu0 %v16553_v3 }
  0x47   : >> { %13775 = vmatmul.mubr.msk.f32.gmra.mrb[10].mxu0 %vm422_vm0, %v409_v37  ;;  %13816 = vmatmul.mubr.msk.f32.gmra.mrb[10].mxu1 %vm422_vm0, %v625_v38  ;;  %v1691_v37 = vld [vmem:[%s16572_s22 + $0x2b0] sm:$0xff]  ;;  %v1692_v38 = vld [vmem:[%s16572_s22 + $0x2b8] sm:$0xff] }
  0x48   : >> { %13777 = vmatprep.mubr.msk.f32.mxu0 %vm422_vm0, %v410_v39  ;;  %13818 = vmatprep.mubr.msk.f32.mxu1 %vm422_vm0, %v626_v40  ;;  %v1697_v39 = vld [vmem:[%s16572_s22 + $0x2e0] sm:$0xff]  ;;  %v1698_v40 = vld [vmem:[%s16572_s22 + $0x2e8] sm:$0xff] }
  0x49   : >> { %15447 = vmatprep.subr.bf16.mxu1 %v16553_v3 }
  0x4b   : >> { %13778 = vmatmul.mubr.msk.f32.gmra.mrb[12].mxu0 %vm422_vm0, %v411_v41  ;;  %13819 = vmatmul.mubr.msk.f32.gmra.mrb[12].mxu1 %vm422_vm0, %v627_v42  ;;  %v1699_v41 = vld [vmem:[%s16572_s22 + $0x2f0] sm:$0xff]  ;;  %v1700_v42 = vld [vmem:[%s16572_s22 + $0x2f8] sm:$0xff] }
  0x4c   : >> { %13841 = vmatprep.mubr.msk.f32.mxu0 %vm422_vm0, %v829_v43  ;;  %13882 = vmatprep.mubr.msk.f32.mxu1 %vm422_vm0, %v1044_v44  ;;  %v1701_v43 = vld [vmem:[%s16572_s22 + $0x300] sm:$0xff]  ;;  %v1702_v44 = vld [vmem:[%s16572_s22 + $0x308] sm:$0xff] }
  0x4f   : >> { %13842 = vmatmul.mubr.msk.f32.vlgmr.msra.gmra.mrb[14].mxu0 %vm422_vm0, %v830_v45  ;;  %13883 = vmatmul.mubr.msk.f32.vlgmr.msra.gmra.mrb[14].mxu1 %vm422_vm0, %v1045_v46  ;;  %v12428_v45 = vld [vmem:[%s19286_s3 + $0x8] sm:$0xff]  ;;  %v1693_v46 = vld [vmem:[%s16572_s22 + $0x2c0] sm:$0xff] }
  0x50   : >> { %15429 = vmatpush3.bf16.msra.mxu0 %v16553_v3  ;;  %13844 = vmatprep.mubr.msk.f32.mxu0 %vm422_vm0, %v831_v47  ;;  %v1694_v47 = vld [vmem:[%s16572_s22 + $0x2c8] sm:$0xff] }
  0x51   : >> { %13885 = vmatprep.mubr.msk.f32.mxu1 %vm422_vm0, %v1046_v48  ;;  %15431 = vmatprep.subr.bf16.mxu0 %v16558_v5  ;;  %v1695_v48 = vld [vmem:[%s16572_s22 + $0x2d0] sm:$0xff] }
  0x52   : >> { %15449 = vmatpush3.bf16.msra.mxu1 %v16553_v3 }
  0x53   : >> { %13845 = vmatmul.mubr.msk.f32.gmra.mrb[16].mxu0 %vm422_vm0, %v832_v49  ;;  %13886 = vmatmul.mubr.msk.f32.gmra.mrb[16].mxu1 %vm422_vm0, %v1047_v50  ;;  %v1696_v49 = vld [vmem:[%s16572_s22 + $0x2d8] sm:$0xff]  ;;  %v16870_v50 = vld [vmem:[%s19286_s3] sm:$0xff] }
  0x54   : >> { %13847 = vmatprep.mubr.msk.f32.mxu0 %vm422_vm0, %v833_v51  ;;  %13888 = vmatprep.mubr.msk.f32.mxu1 %vm422_vm0, %v1048_v52  ;;  %v12721_v51 = vld [vmem:[%s19286_s3 + $0x38] sm:$0xff]  ;;  %v16413_v52 = vmov 0.0  }
  0x55   : >> { %15433 = vmatpush3.bf16.msra.mxu0 %v16558_v5  ;;  %15451 = vmatprep.subr.bf16.mxu1 %v16558_v5 }
  0x56   : >> { %15435 = vmatprep.subr.bf16.mxu0 %v16576_v8  ;;  %15453 = vmatpush3.bf16.msra.mxu1 %v16558_v5 }
  0x57   : >> { %13848 = vmatmul.mubr.msk.f32.gmra.mrb[18].mxu0 %vm422_vm0, %v834_v53  ;;  %13889 = vmatmul.mubr.msk.f32.gmra.mrb[18].mxu1 %vm422_vm0, %v1049_v54 }
  0x58   : >> { %13850 = vmatprep.mubr.msk.f32.mxu0 %vm422_vm0, %v835_v55  ;;  %13891 = vmatprep.mubr.msk.f32.mxu1 %vm422_vm0, %v1050_v56 }
  0x59   : >> { %15437 = vmatpush3.bf16.msra.mxu0 %v16576_v8  ;;  %15455 = vmatprep.subr.bf16.mxu1 %v16576_v8 }
  0x5a   : >> { %15439 = vmatprep.subr.bf16.mxu0 %v16592_v13  ;;  %15457 = vmatpush3.bf16.msra.mxu1 %v16576_v8 }
  0x5b   : >> { %13851 = vmatmul.mubr.msk.f32.gmra.mrb[20].mxu0 %vm422_vm0, %v836_v57  ;;  %13892 = vmatmul.mubr.msk.f32.gmra.mrb[20].mxu1 %vm422_vm0, %v1051_v58 }
  0x5c   : >> { %13853 = vmatprep.mubr.msk.f32.mxu0 %vm422_vm0, %v837_v59  ;;  %13894 = vmatprep.mubr.msk.f32.mxu1 %vm422_vm0, %v1052_v60 }
  0x5d   : >> { %15441 = vmatpush3.bf16.msra.mxu0 %v16592_v13  ;;  %15459 = vmatprep.subr.bf16.mxu1 %v16592_v13 }
  0x5e   : >> { %15443 = vmatprep.subr.bf16.mxu0 %v16604_v16  ;;  %15461 = vmatpush3.bf16.msra.mxu1 %v16592_v13 }
  0x5f   : >> { %13854 = vmatmul.mubr.msk.f32.gmra.mrb[22].mxu0 %vm422_vm0, %v838_v61  ;;  %13895 = vmatmul.mubr.msk.f32.gmra.mrb[22].mxu1 %vm422_vm0, %v1053_v62 }
  0x60   : >> { %13856 = vmatprep.mubr.msk.f32.mxu0 %vm422_vm0, %v839_v63  ;;  %13897 = vmatprep.mubr.msk.f32.mxu1 %vm422_vm0, %v1054_v0 }
  0x61   : >> { %15445 = vmatpush3.bf16.msra.mxu0 %v16604_v16  ;;  %15463 = vmatprep.subr.bf16.mxu1 %v16604_v16 }
  0x62   : >> { %15465 = vmatpush3.bf16.msra.mxu1 %v16604_v16  ;;  %15467 = vmatprep.subr.bf16.mxu0 %v16553_v3 }
  0x63   : >> { %13857 = vmatmul.mubr.msk.f32.gmra.mrb[24].mxu0 %vm422_vm0, %v840_v1  ;;  %13898 = vmatmul.mubr.msk.f32.gmra.mrb[24].mxu1 %vm422_vm0, %v1055_v2 }
  0x64   : >> { %13859 = vmatprep.mubr.msk.f32.mxu0 %vm422_vm0, %v841_v4  ;;  %13900 = vmatprep.mubr.msk.f32.mxu1 %vm422_vm0, %v1056_v6 }
  0x65   : >> { %15609 = vmatprep.subr.bf16.mxu1 %v16553_v3 }
  0x67   : >> { %13860 = vmatmul.mubr.msk.f32.gmra.mrb[26].mxu0 %vm422_vm0, %v842_v7  ;;  %13901 = vmatmul.mubr.msk.f32.gmra.mrb[26].mxu1 %vm422_vm0, %v1057_v9 }
  0x68   : >> { %13923 = vmatprep.mubr.msk.f32.mxu0 %vm422_vm0, %v1259_v10  ;;  %13964 = vmatprep.mubr.msk.f32.mxu1 %vm422_vm0, %v1474_v11 }
  0x6b   : >> { %13924 = vmatmul.mubr.msk.f32.vlgmr.msra.gmra.mrb[28].mxu0 %vm422_vm0, %v1260_v12  ;;  %13965 = vmatmul.mubr.msk.f32.vlgmr.msra.gmra.mrb[28].mxu1 %vm422_vm0, %v1475_v14 }
  0x6c   : >> { %13926 = vmatprep.mubr.msk.f32.mxu0 %vm422_vm0, %v1261_v15  ;;  %13967 = vmatprep.mubr.msk.f32.mxu1 %vm422_vm0, %v1476_v17  ;;  %v16883_v15 = vld [vmem:[%s19285_s2] ss:$0 sm:$0xff] }
  0x6d   : >> { %15469 = vmatpush3.bf16.msra.mxu0 %v16553_v3  ;;  %15614 = vmatpush3.bf16.msra.mxu1 %v16553_v3  ;;  %v1480_v3 = vld [vmem:[%s16572_s22 + $0x260] sm:$0xff] }
  0x6e   : >> { %15471 = vmatprep.subr.bf16.mxu0 %v16558_v5  ;;  %15610 = vmatprep.subr.bf16.mxu1 %v16558_v5 }
  0x6f   : >> { %13927 = vmatmul.mubr.msk.f32.gmra.mrb[30].mxu0 %vm422_vm0, %v1262_v18  ;;  %13968 = vmatmul.mubr.msk.f32.gmra.mrb[30].mxu1 %vm422_vm0, %v1477_v19 }
  0x70   : >> { %13929 = vmatprep.mubr.msk.f32.mxu0 %vm422_vm0, %v1263_v20  ;;  %13970 = vmatprep.mubr.msk.f32.mxu1 %vm422_vm0, %v1478_v21 }
  0x71   : >> { %15473 = vmatpush3.bf16.msra.mxu0 %v16558_v5  ;;  %15615 = vmatpush3.bf16.msra.mxu1 %v16558_v5  ;;  %v1482_v5 = vld [vmem:[%s16572_s22 + $0x270] sm:$0xff] }
  0x72   : >> { %15475 = vmatprep.subr.bf16.mxu0 %v16576_v8  ;;  %15611 = vmatprep.subr.bf16.mxu1 %v16576_v8 }
  0x73   : >> { %13930 = vmatmul.mubr.msk.f32.gmra.mrb[32].mxu0 %vm422_vm0, %v1264_v22  ;;  %13971 = vmatmul.mubr.msk.f32.gmra.mrb[32].mxu1 %vm422_vm0, %v1479_v23 }
  0x74   : >> { %13932 = vmatprep.mubr.msk.f32.mxu0 %vm422_vm0, %v1265_v24  ;;  %13973 = vmatprep.mubr.msk.f32.mxu1 %vm422_vm0, %v1480_v3 }
  0x75   : >> { %15477 = vmatpush3.bf16.msra.mxu0 %v16576_v8  ;;  %15616 = vmatpush3.bf16.msra.mxu1 %v16576_v8  ;;  %v1484_v8 = vld [vmem:[%s16572_s22 + $0x280] sm:$0xff] }
  0x76   : >> { %15479 = vmatprep.subr.bf16.mxu0 %v16592_v13  ;;  %15612 = vmatprep.subr.bf16.mxu1 %v16592_v13 }
  0x77   : >> { %13933 = vmatmul.mubr.msk.f32.gmra.mrb[34].mxu0 %vm422_vm0, %v1266_v25  ;;  %13974 = vmatmul.mubr.msk.f32.gmra.mrb[34].mxu1 %vm422_vm0, %v1481_v26 }
  0x78   : >> { %13935 = vmatprep.mubr.msk.f32.mxu0 %vm422_vm0, %v1267_v27  ;;  %13976 = vmatprep.mubr.msk.f32.mxu1 %vm422_vm0, %v1482_v5 }
  0x79   : >> { %15481 = vmatpush3.bf16.msra.mxu0 %v16592_v13  ;;  %15617 = vmatpush3.bf16.msra.mxu1 %v16592_v13  ;;  %v1271_v13 = vld [vmem:[%s16572_s22 + $0x220] sm:$0xff] }
  0x7a   : >> { %15483 = vmatprep.subr.bf16.mxu0 %v16604_v16  ;;  %15613 = vmatprep.subr.bf16.mxu1 %v16604_v16 }
  0x7b   : >> { %13936 = vmatmul.mubr.msk.f32.gmra.mrb[36].mxu0 %vm422_vm0, %v1268_v28  ;;  %13977 = vmatmul.mubr.msk.f32.gmra.mrb[36].mxu1 %vm422_vm0, %v1483_v29 }
  0x7c   : >> { %13938 = vmatprep.mubr.msk.f32.mxu0 %vm422_vm0, %v1269_v30  ;;  %13979 = vmatprep.mubr.msk.f32.mxu1 %vm422_vm0, %v1484_v8 }
  0x7d   : >> { %15485 = vmatpush3.bf16.msra.mxu0 %v16604_v16  ;;  %15618 = vmatpush3.bf16.msra.mxu1 %v16604_v16  ;;  %v1690_v16 = vld [vmem:[%s16572_s22 + $0x2a8] sm:$0xff]  ;;  %s12984_s22 = sshll.u32 (%p392_p11), %s16500_s21, 6  ;;  %s16418_s21 = smov (%p392_p11), [#allocation7]  }
  0x7e   : >> { %14026 = vmatprep.subr.mxu1 %v12428_v45  ;;  %14579 = vmatprep.subr.mxu0 %v16413_v52  ;;  %s19237_s25 = scalar_lea.hbm (%p392_p11), %s19294_s11, %s12984_s22  ;;  %s16345_s13 = sshll.u32 (%p392_p11), %s16418_s21, 4  ;;  %s16346_s13 = int_to_ptr.vmem [resolvable:$false] %s16345_s13 }
  0x7f   : >> { %13939 = vmatmul.mubr.msk.f32.gmra.mrb[38].mxu0 %vm422_vm0, %v1270_v31  ;;  %13980 = vmatmul.mubr.msk.f32.gmra.mrb[38].mxu1 %vm422_vm0, %v1485_v32  ;;  %s16347_s14 = scalar_lea.vmem (%p392_p11), %s16346_s13, 128  ;;  %p16348_p1 = scmp.lt.s32.totalorder (%p392_p11), %s19239_s16, %s16346_s13 }
  0x80   : >> { %13941 = vmatprep.mubr.msk.f32.mxu0 %vm422_vm0, %v1271_v13  ;;  %13982 = vmatprep.mubr.msk.f32.mxu1 %vm422_vm0, %v1486_v33 }
  0x83   : >> { %13942 = vmatmul.mubr.msk.f32.gmra.mrb[40].mxu0 %vm422_vm0, %v1272_v34  ;;  %13983 = vmatmul.mubr.msk.f32.gmra.mrb[40].mxu1 %vm422_vm0, %v1487_v35 }
  0x84   : >> { %14005 = vmatprep.mubr.msk.f32.mxu0 %vm422_vm0, %v1689_v36  ;;  %14017 = vmatprep.mubr.msk.f32.mxu1 %vm422_vm0, %v1697_v39 }
  0x87   : >> { %14006 = vmatmul.mubr.msk.f32.vlgmr.msra.gmra.mrb[42].mxu0 %vm422_vm0, %v1690_v16  ;;  %14018 = vmatmul.mubr.msk.f32.vlgmr.msra.gmra.mrb[42].mxu1 %vm422_vm0, %v1698_v40 }
  0x88   : >> { %14008 = vmatprep.mubr.msk.f32.mxu0 %vm422_vm0, %v1691_v37  ;;  %14020 = vmatprep.mubr.msk.f32.mxu1 %vm422_vm0, %v1699_v41 }
  0x89   : >> { %14027 = vmatpush3.msra.mxu1 %v12428_v45  ;;  %14580 = vmatpush3.msra.mxu0 %v12721_v51 }
  0x8a   : >> { %14040 = vmatprep.subr.mxu1 %v16870_v50  ;;  %14608 = vmatprep.subr.mxu0 %v16413_v52 }
  0x8b   : >> { %14009 = vmatmul.mubr.msk.f32.gmra.mrb[44].mxu0 %vm422_vm0, %v1692_v38  ;;  %14021 = vmatmul.mubr.msk.f32.gmra.mrb[44].mxu1 %vm422_vm0, %v1700_v42 }
  0x8c   : >> { %14023 = vmatprep.mubr.msk.f32.mxu1 %vm422_vm0, %v1701_v43  ;;  %14011 = vmatprep.mubr.msk.f32.mxu0 %vm422_vm0, %v1693_v46 }
  0x8f   : >> { %14024 = vmatmul.mubr.msk.f32.gmra.mrb[46].mxu1 %vm422_vm0, %v1702_v44  ;;  %14012 = vmatmul.mubr.msk.f32.gmra.mrb[46].mxu0 %vm422_vm0, %v1694_v47 }
  0x90   : >> { %14014 = vmatprep.mubr.msk.f32.mxu0 %vm422_vm0, %v1695_v48 }
  0x93   : >> { %14015 = vmatmul.mubr.msk.f32.gmra.mrb[48].mxu0 %vm422_vm0, %v1696_v49 }
  0x94   : >> { %14581 = vmatprep.mubr.msk.f32.mxu0 %vm16414_vm1, %v16413_v52 }
 0x106   : >> { %v13761_v53 = vpop.f32.mrb[0].mxu0  ;;  %v13802_v54 = vpop.f32.mrb[0].mxu1 }
 0x107   : >> { %601 = vst [vmem:[#allocation2 + $0x8] sm:$0xff] %v13761_v53  ;;  %v531_v55 = vpop.f32.mrb[1].mxu0  ;;  %816 = vst [vmem:[#allocation2 + $0x78] sm:$0xff] %v13802_v54  ;;  %v746_v56 = vpop.f32.mrb[1].mxu1 }
 0x108   : >> { %600 = vst [vmem:[#allocation2] sm:$0xff] %v531_v55  ;;  %815 = vst [vmem:[#allocation2 + $0x70] sm:$0xff] %v746_v56 }
 0x10a   : >> { %v13764_v57 = vpop.f32.mrb[2].mxu0  ;;  %v13805_v58 = vpop.f32.mrb[2].mxu1 }
 0x10b   : >> { %603 = vst [vmem:[#allocation2 + $0x18] sm:$0xff] %v13764_v57  ;;  %v541_v59 = vpop.f32.mrb[3].mxu0  ;;  %818 = vst [vmem:[#allocation2 + $0x88] sm:$0xff] %v13805_v58  ;;  %v756_v60 = vpop.f32.mrb[3].mxu1 }
 0x10c   : >> { %602 = vst [vmem:[#allocation2 + $0x10] sm:$0xff] %v541_v59  ;;  %817 = vst [vmem:[#allocation2 + $0x80] sm:$0xff] %v756_v60 }
 0x10e   : >> { %v13767_v61 = vpop.f32.mrb[4].mxu0  ;;  %v13808_v62 = vpop.f32.mrb[4].mxu1 }
 0x10f   : >> { %605 = vst [vmem:[#allocation2 + $0x28] sm:$0xff] %v13767_v61  ;;  %v551_v63 = vpop.f32.mrb[5].mxu0  ;;  %820 = vst [vmem:[#allocation2 + $0x98] sm:$0xff] %v13808_v62  ;;  %v766_v0 = vpop.f32.mrb[5].mxu1 }
 0x110   : >> { %604 = vst [vmem:[#allocation2 + $0x20] sm:$0xff] %v551_v63  ;;  %819 = vst [vmem:[#allocation2 + $0x90] sm:$0xff] %v766_v0 }
 0x112   : >> { %v13770_v1 = vpop.f32.mrb[6].mxu0  ;;  %v13811_v2 = vpop.f32.mrb[6].mxu1 }
 0x113   : >> { %v1904_v4 = vld [vmem:[#allocation2] ss:$4 sm:$0xff]  ;;  %v1954_v6 = vld [vmem:[#allocation2 + $0x1] ss:$4 sm:$0xff]  ;;  %v2004_v7 = vld [vmem:[#allocation2 + $0x2] ss:$4 sm:$0xff] }
 0x114   : >> { %607 = vst [vmem:[#allocation2 + $0x38] sm:$0xff] %v13770_v1  ;;  %822 = vst [vmem:[#allocation2 + $0xa8] sm:$0xff] %v13811_v2  ;;  %v2054_v9 = vld [vmem:[#allocation2 + $0x3] ss:$4 sm:$0xff]  ;;  %v2103_v10 = vmax.f32 %v1904_v4, %v1954_v6  ;;  %v561_v11 = vpop.f32.mrb[7].mxu0  ;;  %v776_v12 = vpop.f32.mrb[7].mxu1 }
 0x115   : >> { %v2128_v14 = vmax.f32 %v2004_v7, %v2054_v9  ;;  %606 = vst [vmem:[#allocation2 + $0x30] sm:$0xff] %v561_v11  ;;  %821 = vst [vmem:[#allocation2 + $0xa0] sm:$0xff] %v776_v12 }
 0x116   : >> { %v13773_v17 = vpop.f32.mrb[8].mxu0  ;;  %v13814_v18 = vpop.f32.mrb[8].mxu1 }
 0x117   : >> { %v2153_v19 = vmax.f32 %v2103_v10, %v2128_v14  ;;  %v1912_v20 = vld [vmem:[#allocation2 + $0x80] ss:$4 sm:$0xff]  ;;  %v1962_v21 = vld [vmem:[#allocation2 + $0x81] ss:$4 sm:$0xff]  ;;  %v2012_v22 = vld [vmem:[#allocation2 + $0x82] ss:$4 sm:$0xff] }
 0x118   : >> { %609 = vst [vmem:[#allocation2 + $0x48] sm:$0xff] %v13773_v17  ;;  %824 = vst [vmem:[#allocation2 + $0xb8] sm:$0xff] %v13814_v18  ;;  %v2062_v23 = vld [vmem:[#allocation2 + $0x83] ss:$4 sm:$0xff]  ;;  %v2107_v24 = vmax.f32 %v1912_v20, %v1962_v21  ;;  %v571_v3 = vpop.f32.mrb[9].mxu0  ;;  %v786_v25 = vpop.f32.mrb[9].mxu1 }
 0x119   : >> { %v2185_v26 = vadd.f32 %v16883_v15, %v2153_v19  ;;  %v2132_v27 = vmax.f32 %v2012_v22, %v2062_v23  ;;  %608 = vst [vmem:[#allocation2 + $0x40] sm:$0xff] %v571_v3  ;;  %823 = vst [vmem:[#allocation2 + $0xb0] sm:$0xff] %v786_v25 }
 0x11a   : >> { %v13776_v5 = vpop.f32.mrb[10].mxu0  ;;  %v13817_v28 = vpop.f32.mrb[10].mxu1 }
 0x11b   : >> { %v2157_v29 = vmax.f32 %v2107_v24, %v2132_v27  ;;  %611 = vst [vmem:[#allocation2 + $0x58] sm:$0xff] %v13776_v5  ;;  %v581_v30 = vpop.f32.mrb[11].mxu0  ;;  %826 = vst [vmem:[#allocation2 + $0xc8] sm:$0xff] %v13817_v28  ;;  %v796_v8 = vpop.f32.mrb[11].mxu1  ;;  %v2210_v31 = vmax.f32 %v2185_v26, 0.0 }
 0x11c   : >> { %v1906_v32 = vld [vmem:[#allocation2 + $0x20] ss:$4 sm:$0xff]  ;;  %v1956_v13 = vld [vmem:[#allocation2 + $0x21] ss:$4 sm:$0xff]  ;;  %v2006_v33 = vld [vmem:[#allocation2 + $0x22] ss:$4 sm:$0xff] }
 0x11d   : >> { %610 = vst [vmem:[#allocation2 + $0x50] sm:$0xff] %v581_v30  ;;  %825 = vst [vmem:[#allocation2 + $0xc0] sm:$0xff] %v796_v8  ;;  %v2056_v34 = vld [vmem:[#allocation2 + $0x23] ss:$4 sm:$0xff]  ;;  %v2104_v35 = vmax.f32 %v1906_v32, %v1956_v13  ;;  %v2189_v36 = vadd.f32 %v16883_v15, %v2157_v29 }
 0x11e   : >> { %2236 = vst.msk [vmem:[#allocation3] sm:$0xff] %vm2235_vm2, %v2210_v31  ;;  %v2129_v16 = vmax.f32 %v2006_v33, %v2056_v34  ;;  %v13779_v37 = vpop.f32.mrb[12].mxu0  ;;  %v13820_v38 = vpop.f32.mrb[12].mxu1 }
 0x11f   : >> { %613 = vst [vmem:[#allocation2 + $0x68] sm:$0xff] %v13779_v37  ;;  %828 = vst [vmem:[#allocation2 + $0xd8] sm:$0xff] %v13820_v38  ;;  %v591_v39 = vpop.f32.mrb[13].mxu0  ;;  %v806_v40 = vpop.f32.mrb[13].mxu1  ;;  %v2214_v41 = vmax.f32 %v2189_v36, 0.0 }
 0x120   : >> { %v2154_v42 = vmax.f32 %v2104_v35, %v2129_v16  ;;  %v1914_v43 = vld [vmem:[#allocation2 + $0xa0] ss:$4 sm:$0xff]  ;;  %v1964_v44 = vld [vmem:[#allocation2 + $0xa1] ss:$4 sm:$0xff]  ;;  %v2014_v45 = vld [vmem:[#allocation2 + $0xa2] ss:$4 sm:$0xff] }
 0x121   : >> { %612 = vst [vmem:[#allocation2 + $0x60] sm:$0xff] %v591_v39  ;;  %827 = vst [vmem:[#allocation2 + $0xd0] sm:$0xff] %v806_v40  ;;  %v2064_v46 = vld [vmem:[#allocation2 + $0xa3] ss:$4 sm:$0xff]  ;;  %v2108_v47 = vmax.f32 %v1914_v43, %v1964_v44 }
 0x122   : >> { %2240 = vst.msk [vmem:[#allocation3 + $0x20] sm:$0xff] %vm2235_vm2, %v2214_v41  ;;  %v2186_v48 = vadd.f32 %v16883_v15, %v2154_v42  ;;  %v2133_v49 = vmax.f32 %v2014_v45, %v2064_v46  ;;  %v13843_v51 = vpop.f32.mrb[14].mxu0  ;;  %v13884_v53 = vpop.f32.mrb[14].mxu1 }
 0x123   : >> { %1031 = vst [vmem:[#allocation2 + $0xe8] sm:$0xff] %v13843_v51  ;;  %1246 = vst [vmem:[#allocation2 + $0x158] sm:$0xff] %v13884_v53  ;;  %v961_v60 = vpop.f32.mrb[15].mxu0  ;;  %v1176_v61 = vpop.f32.mrb[15].mxu1 }
 0x124   : >> { %v1908_v54 = vld [vmem:[#allocation2 + $0x40] ss:$4 sm:$0xff]  ;;  %v1958_v55 = vld [vmem:[#allocation2 + $0x41] ss:$4 sm:$0xff]  ;;  %v2008_v56 = vld [vmem:[#allocation2 + $0x42] ss:$4 sm:$0xff]  ;;  %v2158_v57 = vmax.f32 %v2108_v47, %v2133_v49 }
 0x125   : >> { %v2058_v58 = vld [vmem:[#allocation2 + $0x43] ss:$4 sm:$0xff]  ;;  %v2105_v59 = vmax.f32 %v1908_v54, %v1958_v55  ;;  %v2211_v62 = vmax.f32 %v2186_v48, 0.0  ;;  %1030 = vst [vmem:[#allocation2 + $0xe0] sm:$0xff] %v961_v60  ;;  %1245 = vst [vmem:[#allocation2 + $0x150] sm:$0xff] %v1176_v61 }
 0x126   : >> { %v2130_v63 = vmax.f32 %v2008_v56, %v2058_v58  ;;  %v2190_v0 = vadd.f32 %v16883_v15, %v2158_v57  ;;  %v13846_v1 = vpop.f32.mrb[16].mxu0  ;;  %v13887_v2 = vpop.f32.mrb[16].mxu1  ;;  %v16903_v55 = vld [vmem:[%s19286_s3 + $0x10] sm:$0xff] }
 0x127   : >> { %2237 = vst.msk [vmem:[#allocation3 + $0x8] sm:$0xff] %vm2235_vm2, %v2211_v62  ;;  %1033 = vst [vmem:[#allocation2 + $0xf8] sm:$0xff] %v13846_v1  ;;  %v971_v22 = vpop.f32.mrb[17].mxu0  ;;  %v1186_v23 = vpop.f32.mrb[17].mxu1 }
 0x128   : >> { %v2155_v4 = vmax.f32 %v2105_v59, %v2130_v63  ;;  %v1910_v6 = vld [vmem:[#allocation2 + $0x60] ss:$4 sm:$0xff]  ;;  %v1960_v7 = vld [vmem:[#allocation2 + $0x61] ss:$4 sm:$0xff]  ;;  %v2010_v9 = vld [vmem:[#allocation2 + $0x62] ss:$4 sm:$0xff] }
 0x129   : >> { %1248 = vst [vmem:[#allocation2 + $0x168] sm:$0xff] %v13887_v2  ;;  %v2060_v10 = vld [vmem:[#allocation2 + $0x63] ss:$4 sm:$0xff]  ;;  %v2106_v11 = vmax.f32 %v1910_v6, %v1960_v7  ;;  %v1916_v12 = vld [vmem:[#allocation2 + $0xc0] ss:$4 sm:$0xff]  ;;  %1032 = vst [vmem:[#allocation2 + $0xf0] sm:$0xff] %v971_v22 }
 0x12a   : >> { %v1966_v14 = vld [vmem:[#allocation2 + $0xc1] ss:$4 sm:$0xff]  ;;  %v2187_v17 = vadd.f32 %v16883_v15, %v2155_v4  ;;  %v2131_v18 = vmax.f32 %v2010_v9, %v2060_v10  ;;  %v2016_v19 = vld [vmem:[#allocation2 + $0xc2] ss:$4 sm:$0xff]  ;;  %v2066_v20 = vld [vmem:[#allocation2 + $0xc3] ss:$4 sm:$0xff] }
 0x12b   : >> { %v2109_v21 = vmax.f32 %v1916_v12, %v1966_v14  ;;  %v2134_v24 = vmax.f32 %v2016_v19, %v2066_v20  ;;  %v13849_v3 = vpop.f32.mrb[18].mxu0  ;;  %1247 = vst [vmem:[#allocation2 + $0x160] sm:$0xff] %v1186_v23  ;;  %v13890_v25 = vpop.f32.mrb[18].mxu1  ;;  %v2215_v26 = vmax.f32 %v2190_v0, 0.0 }
 0x12c   : >> { %v2212_v27 = vmax.f32 %v2187_v17, 0.0  ;;  %v2156_v5 = vmax.f32 %v2106_v11, %v2131_v18  ;;  %1035 = vst [vmem:[#allocation2 + $0x108] sm:$0xff] %v13849_v3  ;;  %v981_v28 = vpop.f32.mrb[19].mxu0  ;;  %1250 = vst [vmem:[#allocation2 + $0x178] sm:$0xff] %v13890_v25  ;;  %v1196_v29 = vpop.f32.mrb[19].mxu1 }
 0x12d   : >> { %v2159_v30 = vmax.f32 %v2109_v21, %v2134_v24  ;;  %1034 = vst [vmem:[#allocation2 + $0x100] sm:$0xff] %v981_v28  ;;  %1249 = vst [vmem:[#allocation2 + $0x170] sm:$0xff] %v1196_v29 }
 0x12e   : >> { %2241 = vst.msk [vmem:[#allocation3 + $0x28] sm:$0xff] %vm2235_vm2, %v2215_v26  ;;  %2238 = vst.msk [vmem:[#allocation3 + $0x10] sm:$0xff] %vm2235_vm2, %v2212_v27  ;;  %v2188_v8 = vadd.f32 %v16883_v15, %v2156_v5  ;;  %v2271_v31 = vld [vmem:[#allocation3 + $0x1] sm:$0xff]  ;;  %v13852_v13 = vpop.f32.mrb[20].mxu0  ;;  %v13893_v33 = vpop.f32.mrb[20].mxu1 }
 0x12f   : >> { %v2191_v32 = vadd.f32 %v16883_v15, %v2159_v30  ;;  %14028 = vmatprep.mubr.msk.f32.mxu1 %vm2235_vm2, %v2271_v31  ;;  %1037 = vst [vmem:[#allocation2 + $0x118] sm:$0xff] %v13852_v13  ;;  %v991_v34 = vpop.f32.mrb[21].mxu0  ;;  %1252 = vst [vmem:[#allocation2 + $0x188] sm:$0xff] %v13893_v33  ;;  %v1206_v35 = vpop.f32.mrb[21].mxu1 }
 0x130   : >> { %v2213_v36 = vmax.f32 %v2188_v8, 0.0  ;;  %1036 = vst [vmem:[#allocation2 + $0x110] sm:$0xff] %v991_v34  ;;  %1251 = vst [vmem:[#allocation2 + $0x180] sm:$0xff] %v1206_v35  ;;  %v1918_v37 = vld [vmem:[#allocation2 + $0xe0] ss:$4 sm:$0xff] }
 0x131   : >> { %v2216_v16 = vmax.f32 %v2191_v32, 0.0  ;;  %v1968_v38 = vld [vmem:[#allocation2 + $0xe1] ss:$4 sm:$0xff]  ;;  %v2018_v39 = vld [vmem:[#allocation2 + $0xe2] ss:$4 sm:$0xff] }
 0x132   : >> { %2239 = vst.msk [vmem:[#allocation3 + $0x18] sm:$0xff] %vm2235_vm2, %v2213_v36  ;;  %v2068_v40 = vld [vmem:[#allocation2 + $0xe3] ss:$4 sm:$0xff]  ;;  %v2110_v41 = vmax.f32 %v1918_v37, %v1968_v38  ;;  %v13855_v42 = vpop.f32.mrb[22].mxu0  ;;  %v13896_v43 = vpop.f32.mrb[22].mxu1 }
 0x133   : >> { %2242 = vst.msk [vmem:[#allocation3 + $0x30] sm:$0xff] %vm2235_vm2, %v2216_v16  ;;  %v2135_v44 = vmax.f32 %v2018_v39, %v2068_v40  ;;  %1039 = vst [vmem:[#allocation2 + $0x128] sm:$0xff] %v13855_v42  ;;  %v1001_v51 = vpop.f32.mrb[23].mxu0  ;;  %v1216_v53 = vpop.f32.mrb[23].mxu1 }
 0x134   : >> { %v1926_v45 = vld [vmem:[#allocation2 + $0x160] ss:$4 sm:$0xff]  ;;  %v1976_v46 = vld [vmem:[#allocation2 + $0x161] ss:$4 sm:$0xff]  ;;  %v2026_v47 = vld [vmem:[#allocation2 + $0x162] ss:$4 sm:$0xff] }
 0x135   : >> { %1254 = vst [vmem:[#allocation2 + $0x198] sm:$0xff] %v13896_v43  ;;  %v2076_v48 = vld [vmem:[#allocation2 + $0x163] ss:$4 sm:$0xff]  ;;  %v2114_v49 = vmax.f32 %v1926_v45, %v1976_v46  ;;  %v2160_v56 = vmax.f32 %v2110_v41, %v2135_v44  ;;  %1038 = vst [vmem:[#allocation2 + $0x120] sm:$0xff] %v1001_v51 }
 0x136   : >> { %v2272_v54 = vld [vmem:[#allocation3 + $0x9] sm:$0xff]  ;;  %v2139_v57 = vmax.f32 %v2026_v47, %v2076_v48  ;;  %1253 = vst [vmem:[#allocation2 + $0x190] sm:$0xff] %v1216_v53  ;;  %v13858_v58 = vpop.f32.mrb[24].mxu0  ;;  %v13899_v59 = vpop.f32.mrb[24].mxu1  ;;  %v16918_v17 = vld [vmem:[#allocation3 + $0x21] sm:$0xff] }
 0x137   : >> { %14029 = vmatmul.mubr.msk.f32.vlgmr.msra.gmra.mrb[48].mxu1 %vm2235_vm2, %v2272_v54  ;;  %v2192_v60 = vadd.f32 %v16883_v15, %v2160_v56  ;;  %v1920_v61 = vld [vmem:[#allocation2 + $0x100] ss:$4 sm:$0xff]  ;;  %v1970_v62 = vld [vmem:[#allocation2 + $0x101] ss:$4 sm:$0xff]  ;;  %v2020_v63 = vld [vmem:[#allocation2 + $0x102] ss:$4 sm:$0xff] }
 0x138   : >> { %14041 = vmatpush3.msra.mxu1 %v16870_v50  ;;  %v2164_v0 = vmax.f32 %v2114_v49, %v2139_v57  ;;  %1041 = vst [vmem:[#allocation2 + $0x138] sm:$0xff] %v13858_v58  ;;  %1256 = vst [vmem:[#allocation2 + $0x1a8] sm:$0xff] %v13899_v59  ;;  %v2070_v1 = vld [vmem:[#allocation2 + $0x103] ss:$4 sm:$0xff]  ;;  %v2111_v2 = vmax.f32 %v1920_v61, %v1970_v62  ;;  %v1011_v4 = vpop.f32.mrb[25].mxu0  ;;  %v1226_v7 = vpop.f32.mrb[25].mxu1 }
 0x139   : >> { %14054 = vmatprep.subr.mxu1 %v16903_v55  ;;  %v16909_v6 = vld [vmem:[#allocation3 + $0x11] sm:$0xff]  ;;  %v16911_v9 = vld [vmem:[#allocation3 + $0x19] sm:$0xff]  ;;  %v2136_v10 = vmax.f32 %v2020_v63, %v2070_v1  ;;  %1040 = vst [vmem:[#allocation2 + $0x130] sm:$0xff] %v1011_v4  ;;  %1255 = vst [vmem:[#allocation2 + $0x1a0] sm:$0xff] %v1226_v7  ;;  %v2217_v11 = vmax.f32 %v2192_v60, 0.0 }
 0x13a   : >> { %v2196_v50 = vadd.f32 %v16883_v15, %v2164_v0  ;;  %14031 = vmatprep.mubr.msk.f32.mxu1 %vm2235_vm2, %v16909_v6  ;;  %v13861_v12 = vpop.f32.mrb[26].mxu0  ;;  %v13902_v14 = vpop.f32.mrb[26].mxu1  ;;  %v16924_v27 = vld [vmem:[#allocation3 + $0x29] sm:$0xff] }
 0x13b   : >> { %14032 = vmatmul.mubr.msk.f32.gmra.mrb[50].mxu1 %vm2235_vm2, %v16911_v9  ;;  %v2161_v18 = vmax.f32 %v2111_v2, %v2136_v10  ;;  %1043 = vst [vmem:[#allocation2 + $0x148] sm:$0xff] %v13861_v12  ;;  %1258 = vst [vmem:[#allocation2 + $0x1b8] sm:$0xff] %v13902_v14  ;;  %v1021_v19 = vpop.f32.mrb[27].mxu0  ;;  %v1236_v20 = vpop.f32.mrb[27].mxu1 }
 0x13c   : >> { %14034 = vmatprep.mubr.msk.f32.mxu1 %vm2235_vm2, %v16918_v17  ;;  %2243 = vst.msk [vmem:[#allocation3 + $0x38] sm:$0xff] %vm2235_vm2, %v2217_v11  ;;  %v2221_v21 = vmax.f32 %v2196_v50, 0.0  ;;  %1042 = vst [vmem:[#allocation2 + $0x140] sm:$0xff] %v1021_v19  ;;  %v2262_v50 = vld [vmem:[#allocation3] sm:$0xff] }
 0x13d   : >> { %v1928_v22 = vld [vmem:[#allocation2 + $0x180] ss:$4 sm:$0xff]  ;;  %v1978_v23 = vld [vmem:[#allocation2 + $0x181] ss:$4 sm:$0xff]  ;;  %v2028_v24 = vld [vmem:[#allocation2 + $0x182] ss:$4 sm:$0xff]  ;;  %v2193_v3 = vadd.f32 %v16883_v15, %v2161_v18 }
 0x13e   : >> { %1257 = vst [vmem:[#allocation2 + $0x1b0] sm:$0xff] %v1236_v20  ;;  %v2078_v25 = vld [vmem:[#allocation2 + $0x183] ss:$4 sm:$0xff]  ;;  %v2115_v26 = vmax.f32 %v1928_v22, %v1978_v23  ;;  %2247 = vst.msk [vmem:[#allocation3 + $0x58] sm:$0xff] %vm2235_vm2, %v2221_v21  ;;  %v13925_v28 = vpop.f32.mrb[28].mxu0  ;;  %v13966_v29 = vpop.f32.mrb[28].mxu1 }
 0x13f   : >> { %v2140_v5 = vmax.f32 %v2028_v24, %v2078_v25  ;;  %14035 = vmatmul.mubr.msk.f32.gmra.mrb[52].mxu1 %vm2235_vm2, %v16924_v27  ;;  %1461 = vst [vmem:[#allocation2 + $0x1c8] sm:$0xff] %v13925_v28  ;;  %v1391_v30 = vpop.f32.mrb[29].mxu0  ;;  %v2218_v8 = vmax.f32 %v2193_v3, 0.0  ;;  %1676 = vst [vmem:[#allocation2 + $0x238] sm:$0xff] %v13966_v29  ;;  %v1606_v31 = vpop.f32.mrb[29].mxu1  ;;  %v2263_v21 = vld [vmem:[#allocation3 + $0x8] sm:$0xff] }
 0x140   : >> { %v1922_v13 = vld [vmem:[#allocation2 + $0x120] ss:$4 sm:$0xff]  ;;  %v1972_v33 = vld [vmem:[#allocation2 + $0x121] ss:$4 sm:$0xff]  ;;  %v2022_v34 = vld [vmem:[#allocation2 + $0x122] ss:$4 sm:$0xff] }
 0x141   : >> { %v2165_v32 = vmax.f32 %v2115_v26, %v2140_v5  ;;  %1460 = vst [vmem:[#allocation2 + $0x1c0] sm:$0xff] %v1391_v30  ;;  %1675 = vst [vmem:[#allocation2 + $0x230] sm:$0xff] %v1606_v31  ;;  %v2072_v35 = vld [vmem:[#allocation2 + $0x123] ss:$4 sm:$0xff]  ;;  %v2112_v36 = vmax.f32 %v1922_v13, %v1972_v33 }
 0x142   : >> { %2244 = vst.msk [vmem:[#allocation3 + $0x40] sm:$0xff] %vm2235_vm2, %v2218_v8  ;;  %v2137_v37 = vmax.f32 %v2022_v34, %v2072_v35  ;;  %v13928_v39 = vpop.f32.mrb[30].mxu0  ;;  %v13969_v40 = vpop.f32.mrb[30].mxu1  ;;  %v16945_v22 = vld [vmem:[#allocation3 + $0x10] sm:$0xff]  ;;  %v16950_v24 = vld [vmem:[%s19286_s3 + $0x18] sm:$0xff]  ;;  %v16959_v34 = vld [vmem:[#allocation3 + $0x18] sm:$0xff] }
 0x143   : >> { %v2197_v16 = vadd.f32 %v16883_v15, %v2165_v32  ;;  %v16931_v38 = vld [vmem:[#allocation3 + $0x31] sm:$0xff]  ;;  %1463 = vst [vmem:[#allocation2 + $0x1d8] sm:$0xff] %v13928_v39  ;;  %1678 = vst [vmem:[#allocation2 + $0x248] sm:$0xff] %v13969_v40  ;;  %v1401_v56 = vpop.f32.mrb[31].mxu0  ;;  %v1616_v57 = vpop.f32.mrb[31].mxu1 }
 0x144   : >> { %v1924_v41 = vld [vmem:[#allocation2 + $0x140] ss:$4 sm:$0xff]  ;;  %v1974_v42 = vld [vmem:[#allocation2 + $0x141] ss:$4 sm:$0xff]  ;;  %v2024_v43 = vld [vmem:[#allocation2 + $0x142] ss:$4 sm:$0xff]  ;;  %14037 = vmatprep.mubr.msk.f32.mxu1 %vm2235_vm2, %v16931_v38  ;;  %v2162_v44 = vmax.f32 %v2112_v36, %v2137_v37 }
 0x145   : >> { %v2074_v45 = vld [vmem:[#allocation2 + $0x143] ss:$4 sm:$0xff]  ;;  %v2113_v46 = vmax.f32 %v1924_v41, %v1974_v42  ;;  %v1930_v47 = vld [vmem:[#allocation2 + $0x1a0] ss:$4 sm:$0xff]  ;;  %v1980_v48 = vld [vmem:[#allocation2 + $0x1a1] ss:$4 sm:$0xff] }
 0x146   : >> { %v2138_v49 = vmax.f32 %v2024_v43, %v2074_v45  ;;  %v2030_v51 = vld [vmem:[#allocation2 + $0x1a2] ss:$4 sm:$0xff]  ;;  %v2080_v53 = vld [vmem:[#allocation2 + $0x1a3] ss:$4 sm:$0xff]  ;;  %v2116_v54 = vmax.f32 %v1930_v47, %v1980_v48  ;;  %v2194_v58 = vadd.f32 %v16883_v15, %v2162_v44  ;;  %1462 = vst [vmem:[#allocation2 + $0x1d0] sm:$0xff] %v1401_v56  ;;  %v13931_v60 = vpop.f32.mrb[32].mxu0 }
 0x147   : >> { %v2141_v59 = vmax.f32 %v2030_v51, %v2080_v53  ;;  %1677 = vst [vmem:[#allocation2 + $0x240] sm:$0xff] %v1616_v57  ;;  %v13972_v61 = vpop.f32.mrb[32].mxu1  ;;  %v2222_v62 = vmax.f32 %v2197_v16, 0.0  ;;  %1465 = vst [vmem:[#allocation2 + $0x1e8] sm:$0xff] %v13931_v60  ;;  %v1411_v0 = vpop.f32.mrb[33].mxu0  ;;  %v16970_v41 = vld [vmem:[%s19286_s3 + $0x40] sm:$0xff] }
 0x148   : >> { %v2163_v63 = vmax.f32 %v2113_v46, %v2138_v49  ;;  %1680 = vst [vmem:[#allocation2 + $0x258] sm:$0xff] %v13972_v61  ;;  %v1626_v1 = vpop.f32.mrb[33].mxu1  ;;  %1464 = vst [vmem:[#allocation2 + $0x1e0] sm:$0xff] %v1411_v0  ;;  %v2219_v7 = vmax.f32 %v2194_v58, 0.0  ;;  %v16973_v53 = vld [vmem:[#allocation3 + $0x28] sm:$0xff] }
 0x149   : >> { %v2166_v2 = vmax.f32 %v2116_v54, %v2141_v59  ;;  %v16936_v4 = vld [vmem:[#allocation3 + $0x39] sm:$0xff]  ;;  %1679 = vst [vmem:[#allocation2 + $0x250] sm:$0xff] %v1626_v1  ;;  %2248 = vst.msk [vmem:[#allocation3 + $0x60] sm:$0xff] %vm2235_vm2, %v2222_v62  ;;  %v16979_v59 = vld [vmem:[#allocation3 + $0x30] sm:$0xff] }
 0x14a   : >> { %v2195_v10 = vadd.f32 %v16883_v15, %v2163_v63  ;;  %14038 = vmatmul.mubr.msk.f32.gmra.mrb[54].mxu1 %vm2235_vm2, %v16936_v4  ;;  %v13934_v12 = vpop.f32.mrb[34].mxu0  ;;  %v13975_v14 = vpop.f32.mrb[34].mxu1  ;;  %2245 = vst.msk [vmem:[#allocation3 + $0x48] sm:$0xff] %vm2235_vm2, %v2219_v7  ;;  %v16984_v62 = vld [vmem:[#allocation3 + $0x38] sm:$0xff] }
 0x14b   : >> { %v2198_v11 = vadd.f32 %v16883_v15, %v2166_v2  ;;  %14042 = vmatprep.mubr.msk.f32.mxu1 %vm2235_vm2, %v2262_v50  ;;  %1467 = vst [vmem:[#allocation2 + $0x1f8] sm:$0xff] %v13934_v12  ;;  %v1421_v19 = vpop.f32.mrb[35].mxu0  ;;  %1682 = vst [vmem:[#allocation2 + $0x268] sm:$0xff] %v13975_v14  ;;  %v1636_v20 = vpop.f32.mrb[35].mxu1  ;;  %v16990_v14 = vld [vmem:[#allocation3 + $0x58] sm:$0xff] }
 0x14c   : >> { %v2220_v18 = vmax.f32 %v2195_v10, 0.0  ;;  %1466 = vst [vmem:[#allocation2 + $0x1f0] sm:$0xff] %v1421_v19  ;;  %1681 = vst [vmem:[#allocation2 + $0x260] sm:$0xff] %v1636_v20 }
 0x14d   : >> { %v2223_v23 = vmax.f32 %v2198_v11, 0.0  ;;  %v1932_v3 = vld [vmem:[#allocation2 + $0x1c0] ss:$4 sm:$0xff]  ;;  %v1982_v25 = vld [vmem:[#allocation2 + $0x1c1] ss:$4 sm:$0xff] }
 0x14e   : >> { %2246 = vst.msk [vmem:[#allocation3 + $0x50] sm:$0xff] %vm2235_vm2, %v2220_v18  ;;  %v2032_v26 = vld [vmem:[#allocation2 + $0x1c2] ss:$4 sm:$0xff]  ;;  %14043 = vmatmul.mubr.msk.f32.vlgmr.msra.gmra.mrb[48].mxu1 %vm2235_vm2, %v2263_v21  ;;  %v2082_v5 = vld [vmem:[#allocation2 + $0x1c3] ss:$4 sm:$0xff]  ;;  %v2117_v28 = vmax.f32 %v1932_v3, %v1982_v25  ;;  %v13937_v29 = vpop.f32.mrb[36].mxu0 }
 0x14f   : >> { %14045 = vmatprep.mubr.msk.f32.mxu1 %vm2235_vm2, %v16945_v22  ;;  %v13978_v30 = vpop.f32.mrb[36].mxu1  ;;  %14055 = vmatpush3.msra.mxu1 %v16903_v55  ;;  %2249 = vst.msk [vmem:[#allocation3 + $0x68] sm:$0xff] %vm2235_vm2, %v2223_v23  ;;  %v2142_v8 = vmax.f32 %v2032_v26, %v2082_v5  ;;  %1469 = vst [vmem:[#allocation2 + $0x208] sm:$0xff] %v13937_v29  ;;  %v1431_v31 = vpop.f32.mrb[37].mxu0  ;;  %v16963_v55 = vld [vmem:[#allocation3 + $0x20] sm:$0xff]  ;;  %v2540_v25 = vld [vmem:[#allocation3 + $0xa] sm:$0xff] }
 0x150   : >> { %v1940_v32 = vld [vmem:[#allocation2 + $0x240] ss:$4 sm:$0xff]  ;;  %v1990_v13 = vld [vmem:[#allocation2 + $0x241] ss:$4 sm:$0xff]  ;;  %1684 = vst [vmem:[#allocation2 + $0x278] sm:$0xff] %v13978_v30  ;;  %v1646_v33 = vpop.f32.mrb[37].mxu1  ;;  %14068 = vmatprep.subr.mxu1 %v16950_v24 }
 0x151   : >> { %1468 = vst [vmem:[#allocation2 + $0x200] sm:$0xff] %v1431_v31  ;;  %v2040_v35 = vld [vmem:[#allocation2 + $0x242] ss:$4 sm:$0xff]  ;;  %v2090_v36 = vld [vmem:[#allocation2 + $0x243] ss:$4 sm:$0xff]  ;;  %v2121_v16 = vmax.f32 %v1940_v32, %v1990_v13  ;;  %1683 = vst [vmem:[#allocation2 + $0x270] sm:$0xff] %v1646_v33  ;;  %v2167_v37 = vmax.f32 %v2117_v28, %v2142_v8 }
 0x152   : >> { %14046 = vmatmul.mubr.msk.f32.gmra.mrb[50].mxu1 %vm2235_vm2, %v16959_v34  ;;  %v2146_v39 = vmax.f32 %v2040_v35, %v2090_v36  ;;  %v13940_v40 = vpop.f32.mrb[38].mxu0  ;;  %v13981_v42 = vpop.f32.mrb[38].mxu1  ;;  %v2539_v21 = vld [vmem:[#allocation3 + $0x2] sm:$0xff]  ;;  %v17004_v33 = vld [vmem:[#allocation3 + $0x12] sm:$0xff] }
 0x153   : >> { %14048 = vmatprep.mubr.msk.f32.mxu1 %vm2235_vm2, %v16963_v55  ;;  %v2199_v43 = vadd.f32 %v16883_v15, %v2167_v37  ;;  %v1934_v44 = vld [vmem:[#allocation2 + $0x1e0] ss:$4 sm:$0xff]  ;;  %v1984_v45 = vld [vmem:[#allocation2 + $0x1e1] ss:$4 sm:$0xff]  ;;  %v2034_v46 = vld [vmem:[#allocation2 + $0x1e2] ss:$4 sm:$0xff] }
 0x154   : >> { %1471 = vst [vmem:[#allocation2 + $0x218] sm:$0xff] %v13940_v40  ;;  %v2171_v47 = vmax.f32 %v2121_v16, %v2146_v39  ;;  %1686 = vst [vmem:[#allocation2 + $0x288] sm:$0xff] %v13981_v42  ;;  %v2084_v48 = vld [vmem:[#allocation2 + $0x1e3] ss:$4 sm:$0xff]  ;;  %v2118_v49 = vmax.f32 %v1934_v44, %v1984_v45  ;;  %v1441_v51 = vpop.f32.mrb[39].mxu0  ;;  %v1656_v56 = vpop.f32.mrb[39].mxu1 }
 0x155   : >> { %v7002_v54 = vld [vmem:[#allocation3 + $0x50] sm:$0xff]  ;;  %v2143_v57 = vmax.f32 %v2034_v46, %v2084_v48  ;;  %1470 = vst [vmem:[#allocation2 + $0x210] sm:$0xff] %v1441_v51  ;;  %v2224_v60 = vmax.f32 %v2199_v43, 0.0  ;;  %1685 = vst [vmem:[#allocation2 + $0x280] sm:$0xff] %v1656_v56  ;;  %v7004_v26 = vld [vmem:[#allocation3 + $0x60] sm:$0xff] }
 0x156   : >> { %v2203_v58 = vadd.f32 %v16883_v15, %v2171_v47  ;;  %14049 = vmatmul.mubr.msk.f32.gmra.mrb[52].mxu1 %vm2235_vm2, %v16973_v53  ;;  %14582 = vmatmul.mubr.msk.f32.vlgmr.msra.gmra.mrb[50].mxu0 %vm2235_vm2, %v7002_v54  ;;  %v13943_v61 = vpop.f32.mrb[40].mxu0  ;;  %v13984_v63 = vpop.f32.mrb[40].mxu1  ;;  %v17010_v35 = vld [vmem:[%s19286_s3 + $0x20] sm:$0xff]  ;;  %v17016_v16 = vld [vmem:[#allocation3 + $0x1a] sm:$0xff]  ;;  %v17018_v43 = vld [vmem:[#allocation3 + $0x22] sm:$0xff] }
 0x157   : >> { %14051 = vmatprep.mubr.msk.f32.mxu1 %vm2235_vm2, %v16979_v59  ;;  %14609 = vmatpush3.msra.mxu0 %v16970_v41  ;;  %v2168_v0 = vmax.f32 %v2118_v49, %v2143_v57  ;;  %1473 = vst [vmem:[#allocation2 + $0x228] sm:$0xff] %v13943_v61  ;;  %v1451_v1 = vpop.f32.mrb[41].mxu0  ;;  %2250 = vst.msk [vmem:[#allocation3 + $0x70] sm:$0xff] %vm2235_vm2, %v2224_v60  ;;  %v1666_v18 = vpop.f32.mrb[41].mxu1  ;;  %v7005_v47 = vld [vmem:[#allocation3 + $0x68] sm:$0xff] }
 0x158   : >> { %v1942_v2 = vld [vmem:[#allocation2 + $0x260] ss:$4 sm:$0xff]  ;;  %v1992_v7 = vld [vmem:[#allocation2 + $0x261] ss:$4 sm:$0xff]  ;;  %14584 = vmatprep.mubr.msk.f32.mxu0 %vm16414_vm1, %v16413_v52  ;;  %v2228_v10 = vmax.f32 %v2203_v58, 0.0  ;;  %14637 = vmatprep.subr.mxu0 %v16413_v52  ;;  %1688 = vst [vmem:[#allocation2 + $0x298] sm:$0xff] %v13984_v63 }
 0x159   : >> { %1472 = vst [vmem:[#allocation2 + $0x220] sm:$0xff] %v1451_v1  ;;  %v2042_v50 = vld [vmem:[#allocation2 + $0x262] ss:$4 sm:$0xff]  ;;  %v2092_v11 = vld [vmem:[#allocation2 + $0x263] ss:$4 sm:$0xff]  ;;  %v2122_v12 = vmax.f32 %v1942_v2, %v1992_v7  ;;  %v2200_v19 = vadd.f32 %v16883_v15, %v2168_v0  ;;  %1687 = vst [vmem:[#allocation2 + $0x290] sm:$0xff] %v1666_v18 }
 0x15a   : >> { %v2147_v20 = vmax.f32 %v2042_v50, %v2092_v11  ;;  %14052 = vmatmul.mubr.msk.f32.gmra.mrb[54].mxu1 %vm2235_vm2, %v16984_v62  ;;  %14585 = vmatmul.mubr.msk.f32.gmra.mrb[52].mxu0 %vm2235_vm2, %v16990_v14  ;;  %2254 = vst.msk [vmem:[#allocation3 + $0x90] sm:$0xff] %vm2235_vm2, %v2228_v10  ;;  %v14007_v23 = vpop.f32.mrb[42].mxu0  ;;  %v17031_v0 = vld [vmem:[#allocation3 + $0x2a] sm:$0xff]  ;;  %v17037_v50 = vld [vmem:[#allocation3 + $0x32] sm:$0xff]  ;;  %v17045_v18 = vld [vmem:[#allocation3 + $0x3a] sm:$0xff] }
 0x15b   : >> { %14056 = vmatprep.mubr.msk.f32.mxu1 %vm2235_vm2, %v2539_v21  ;;  %14587 = vmatprep.mubr.msk.f32.mxu0 %vm16414_vm1, %v16413_v52  ;;  %v2225_v5 = vmax.f32 %v2200_v19, 0.0  ;;  %1891 = vst [vmem:[#allocation2 + $0x2a8] sm:$0xff] %v14007_v23  ;;  %v1821_v28 = vpop.f32.mrb[43].mxu0  ;;  %v2686_v21 = vld [vmem:[#allocation3 + $0x3] sm:$0xff]  ;;  %v2687_v23 = vld [vmem:[#allocation3 + $0xb] sm:$0xff] }
 0x15c   : >> { %v2172_v3 = vmax.f32 %v2122_v12, %v2147_v20  ;;  %v1936_v29 = vld [vmem:[#allocation2 + $0x200] ss:$4 sm:$0xff]  ;;  %v1986_v30 = vld [vmem:[#allocation2 + $0x201] ss:$4 sm:$0xff]  ;;  %v2036_v8 = vld [vmem:[#allocation2 + $0x202] ss:$4 sm:$0xff] }
 0x15d   : >> { %1890 = vst [vmem:[#allocation2 + $0x2a0] sm:$0xff] %v1821_v28  ;;  %v2086_v31 = vld [vmem:[#allocation2 + $0x203] ss:$4 sm:$0xff]  ;;  %v2119_v32 = vmax.f32 %v1936_v29, %v1986_v30  ;;  %2251 = vst.msk [vmem:[#allocation3 + $0x78] sm:$0xff] %vm2235_vm2, %v2225_v5 }
 0x15e   : >> { %v2204_v13 = vadd.f32 %v16883_v15, %v2172_v3  ;;  %14057 = vmatmul.mubr.msk.f32.vlgmr.msra.gmra.mrb[48].mxu1 %vm2235_vm2, %v2540_v25  ;;  %14588 = vmatmul.mubr.msk.f32.gmra.mrb[54].mxu0 %vm2235_vm2, %v7004_v26  ;;  %v2144_v36 = vmax.f32 %v2036_v8, %v2086_v31  ;;  %v14010_v37 = vpop.f32.mrb[44].mxu0  ;;  %v7006_v1 = vld [vmem:[#allocation3 + $0x70] sm:$0xff]  ;;  %v12472_v26 = vld [vmem:[%s19286_s3 + $0x28] sm:$0xff]  ;;  %v2690_v29 = vld [vmem:[#allocation3 + $0x23] sm:$0xff] }
 0x15f   : >> { %14059 = vmatprep.mubr.msk.f32.mxu1 %vm2235_vm2, %v17004_v33  ;;  %14590 = vmatprep.mubr.msk.f32.mxu0 %vm16414_vm1, %v16413_v52  ;;  %1893 = vst [vmem:[#allocation2 + $0x2b8] sm:$0xff] %v14010_v37  ;;  %v1831_v61 = vpop.f32.mrb[45].mxu0  ;;  %v2688_v25 = vld [vmem:[#allocation3 + $0x13] sm:$0xff]  ;;  %v2689_v5 = vld [vmem:[#allocation3 + $0x1b] sm:$0xff]  ;;  %v17069_v30 = vld [vmem:[#allocation3 + $0x2b] sm:$0xff] }
 0x160   : >> { %v1938_v39 = vld [vmem:[#allocation2 + $0x220] ss:$4 sm:$0xff]  ;;  %v1988_v40 = vld [vmem:[#allocation2 + $0x221] ss:$4 sm:$0xff]  ;;  %v2038_v42 = vld [vmem:[#allocation2 + $0x222] ss:$4 sm:$0xff]  ;;  %14069 = vmatpush3.msra.mxu1 %v16950_v24  ;;  %v2169_v44 = vmax.f32 %v2119_v32, %v2144_v36 }
 0x161   : >> { %v2088_v45 = vld [vmem:[#allocation2 + $0x223] ss:$4 sm:$0xff]  ;;  %v2120_v46 = vmax.f32 %v1938_v39, %v1988_v40  ;;  %14082 = vmatprep.subr.mxu1 %v17010_v35  ;;  %v1944_v48 = vld [vmem:[#allocation2 + $0x280] ss:$4 sm:$0xff]  ;;  %v2229_v49 = vmax.f32 %v2204_v13, 0.0  ;;  %1892 = vst [vmem:[#allocation2 + $0x2b0] sm:$0xff] %v1831_v61 }
 0x162   : >> { %v2145_v51 = vmax.f32 %v2038_v42, %v2088_v45  ;;  %14060 = vmatmul.mubr.msk.f32.gmra.mrb[50].mxu1 %vm2235_vm2, %v17016_v16  ;;  %14591 = vmatmul.mubr.msk.f32.gmra.mrb[56].mxu0 %vm2235_vm2, %v7005_v47  ;;  %v1994_v54 = vld [vmem:[#allocation2 + $0x281] ss:$4 sm:$0xff]  ;;  %v2044_v56 = vld [vmem:[#allocation2 + $0x282] ss:$4 sm:$0xff]  ;;  %v2094_v57 = vld [vmem:[#allocation2 + $0x283] ss:$4 sm:$0xff]  ;;  %v2201_v24 = vadd.f32 %v16883_v15, %v2169_v44 }
 0x163   : >> { %14062 = vmatprep.mubr.msk.f32.mxu1 %vm2235_vm2, %v17018_v43  ;;  %14593 = vmatprep.mubr.msk.f32.mxu0 %vm16414_vm1, %v16413_v52  ;;  %v2123_v58 = vmax.f32 %v1944_v48, %v1994_v54  ;;  %v2148_v60 = vmax.f32 %v2044_v56, %v2094_v57  ;;  %2255 = vst.msk [vmem:[#allocation3 + $0x98] sm:$0xff] %vm2235_vm2, %v2229_v49  ;;  %v7010_v8 = vld [vmem:[#allocation3 + $0x90] sm:$0xff]  ;;  %v17080_v32 = vld [vmem:[#allocation3 + $0x3b] sm:$0xff]  ;;  %v2833_v36 = vld [vmem:[#allocation3 + $0x4] sm:$0xff] }
 0x164   : >> { %v2170_v63 = vmax.f32 %v2120_v46, %v2145_v51  ;;  %v2226_v2 = vmax.f32 %v2201_v24, 0.0  ;;  %v7007_v19 = vld [vmem:[#allocation3 + $0x78] sm:$0xff]  ;;  %v2834_v37 = vld [vmem:[#allocation3 + $0xc] sm:$0xff]  ;;  %v12481_v47 = vld [vmem:[%s19286_s3 + $0x30] sm:$0xff] }
 0x165   : >> { %v2173_v7 = vmax.f32 %v2123_v58, %v2148_v60  ;;  %v17073_v31 = vld [vmem:[#allocation3 + $0x33] sm:$0xff]  ;;  %v17103_v51 = vld [vmem:[#allocation3 + $0x1c] sm:$0xff]  ;;  %v17107_v56 = vld [vmem:[#allocation3 + $0x24] sm:$0xff] }
 0x166   : >> { %v2202_v10 = vadd.f32 %v16883_v15, %v2170_v63  ;;  %14063 = vmatmul.mubr.msk.f32.gmra.mrb[52].mxu1 %vm2235_vm2, %v17031_v0  ;;  %14594 = vmatmul.mubr.msk.f32.gmra.mrb[58].mxu0 %vm2235_vm2, %v7006_v1  ;;  %2252 = vst.msk [vmem:[#allocation3 + $0x80] sm:$0xff] %vm2235_vm2, %v2226_v2  ;;  %v17085_v13 = vld [vmem:[%s19286_s3 + $0x48] sm:$0xff]  ;;  %v7160_v54 = vld [vmem:[#allocation3 + $0x61] sm:$0xff]  ;;  %v17114_v24 = vld [vmem:[#allocation3 + $0x2c] sm:$0xff] }
 0x167   : >> { %14065 = vmatprep.mubr.msk.f32.mxu1 %vm2235_vm2, %v17037_v50  ;;  %14596 = vmatprep.mubr.msk.f32.mxu0 %vm16414_vm1, %v16413_v52  ;;  %v2205_v11 = vadd.f32 %v16883_v15, %v2173_v7  ;;  %v7159_v45 = vld [vmem:[#allocation3 + $0x59] sm:$0xff]  ;;  %v7161_v58 = vld [vmem:[#allocation3 + $0x69] sm:$0xff]  ;;  %v7162_v1 = vld [vmem:[#allocation3 + $0x71] sm:$0xff] }
 0x168   : >> { %v2227_v12 = vmax.f32 %v2202_v10, 0.0  ;;  %v1946_v39 = vld [vmem:[#allocation2 + $0x2a0] ss:$4 sm:$0xff]  ;;  %v1996_v40 = vld [vmem:[#allocation2 + $0x2a1] ss:$4 sm:$0xff] }
 0x169   : >> { %v2230_v20 = vmax.f32 %v2205_v11, 0.0  ;;  %v2046_v42 = vld [vmem:[#allocation2 + $0x2a2] ss:$4 sm:$0xff]  ;;  %v2096_v44 = vld [vmem:[#allocation2 + $0x2a3] ss:$4 sm:$0xff]  ;;  %v2124_v48 = vmax.f32 %v1946_v39, %v1996_v40 }
 0x16a   : >> { %14066 = vmatmul.mubr.msk.f32.gmra.mrb[54].mxu1 %vm2235_vm2, %v17045_v18  ;;  %14597 = vmatmul.mubr.msk.f32.gmra.mrb[60].mxu0 %vm2235_vm2, %v7007_v19  ;;  %2253 = vst.msk [vmem:[#allocation3 + $0x88] sm:$0xff] %vm2235_vm2, %v2227_v12  ;;  %v2835_v46 = vld [vmem:[#allocation3 + $0x14] sm:$0xff]  ;;  %v2149_v49 = vmax.f32 %v2046_v42, %v2096_v44  ;;  %v17126_v63 = vld [vmem:[#allocation3 + $0x3c] sm:$0xff]  ;;  %v17143_v12 = vld [vmem:[#allocation3 + $0x26] sm:$0xff] }
 0x16b   : >> { %14070 = vmatprep.mubr.msk.f32.mxu1 %vm2235_vm2, %v2686_v21  ;;  %14599 = vmatprep.mubr.msk.f32.mxu0 %vm16414_vm1, %v16413_v52  ;;  %2256 = vst.msk [vmem:[#allocation3 + $0xa0] sm:$0xff] %vm2235_vm2, %v2230_v20  ;;  %v17118_v60 = vld [vmem:[#allocation3 + $0x34] sm:$0xff]  ;;  %v16335_v19 = vld [vmem:[%s19286_s3 + $0x38] sm:$0xff] }
 0x16c   : >> { %v2174_v57 = vmax.f32 %v2124_v48, %v2149_v49  ;;  %v2980_v2 = vld [vmem:[#allocation3 + $0xe] sm:$0xff]  ;;  %v2981_v10 = vld [vmem:[#allocation3 + $0x16] sm:$0xff]  ;;  %v17184_v49 = vld [vmem:[#allocation3 + $0x1f] sm:$0xff] }
 0x16d   : >> { %v7008_v3 = vld [vmem:[#allocation3 + $0x80] sm:$0xff]  ;;  %v17150_v21 = vld [vmem:[#allocation3 + $0x2e] sm:$0xff] }
 0x16e   : >> { %14071 = vmatmul.mubr.msk.f32.vlgmr.msra.gmra.mrb[48].mxu1 %vm2235_vm2, %v2687_v23  ;;  %14600 = vmatmul.mubr.msk.f32.gmra.mrb[62].mxu0 %vm2235_vm2, %v7008_v3  ;;  %v2206_v61 = vadd.f32 %v16883_v15, %v2174_v57  ;;  %v7163_v11 = vld [vmem:[#allocation3 + $0x79] sm:$0xff]  ;;  %v14019_v23 = vpop.f32.mrb[42].mxu1  ;;  %v7166_v39 = vld [vmem:[#allocation3 + $0x91] sm:$0xff] }
 0x16f   : >> { %14073 = vmatprep.mubr.msk.f32.mxu1 %vm2235_vm2, %v2688_v25  ;;  %14602 = vmatprep.mubr.msk.f32.mxu0 %vm16414_vm1, %v16413_v52  ;;  %v17135_v15 = vld [vmem:[#allocation3 + $0x1e] sm:$0xff]  ;;  %1899 = vst [vmem:[#allocation2 + $0x2e8] sm:$0xff] %v14019_v23  ;;  %v1861_v3 = vpop.f32.mrb[43].mxu1  ;;  %v17157_v25 = vld [vmem:[#allocation3 + $0x36] sm:$0xff] }
 0x170   : >> { %14083 = vmatpush3.msra.mxu1 %v17010_v35  ;;  %v7158_v35 = vld [vmem:[#allocation3 + $0x51] sm:$0xff]  ;;  %v2231_v7 = vmax.f32 %v2206_v61, 0.0  ;;  %1898 = vst [vmem:[#allocation2 + $0x2e0] sm:$0xff] %v1861_v3  ;;  %v17198_v57 = vld [vmem:[#allocation3 + $0x5a] sm:$0xff]  ;;  %v17347_v3 = vld [vmem:[#allocation3 + $0x42] sm:$0xff] }
 0x171   : >> { %v7009_v28 = vld [vmem:[#allocation3 + $0x88] sm:$0xff]  ;;  %14096 = vmatprep.subr.mxu1 %v12472_v26  ;;  %v17182_v48 = vld [vmem:[#allocation3 + $0x52] sm:$0xff] }
 0x172   : >> { %14074 = vmatmul.mubr.msk.f32.gmra.mrb[50].mxu1 %vm2235_vm2, %v2689_v5  ;;  %14603 = vmatmul.mubr.msk.f32.gmra.mrb[64].mxu0 %vm2235_vm2, %v7009_v28  ;;  %2257 = vst.msk [vmem:[#allocation3 + $0xa8] sm:$0xff] %vm2235_vm2, %v2231_v7  ;;  %v7164_v20 = vld [vmem:[#allocation3 + $0x81] sm:$0xff]  ;;  %v14022_v28 = vpop.f32.mrb[44].mxu1  ;;  %v3127_v40 = vld [vmem:[#allocation3 + $0xf] sm:$0xff]  ;;  %v17209_v61 = vld [vmem:[#allocation3 + $0x37] sm:$0xff] }
 0x173   : >> { %14076 = vmatprep.mubr.msk.f32.mxu1 %vm2235_vm2, %v2690_v29  ;;  %14605 = vmatprep.mubr.msk.f32.mxu0 %vm16414_vm1, %v16413_v52  ;;  %v17161_v5 = vld [vmem:[#allocation3 + $0x3e] sm:$0xff]  ;;  %v14013_v29 = vpop.f32.mrb[46].mxu0  ;;  %1901 = vst [vmem:[#allocation2 + $0x2f8] sm:$0xff] %v14022_v28  ;;  %v17223_v7 = vld [vmem:[#allocation3 + $0x47] sm:$0xff] }
 0x174   : >> { %1895 = vst [vmem:[#allocation2 + $0x2c8] sm:$0xff] %v14013_v29 }
 0x176   : >> { %14077 = vmatmul.mubr.msk.f32.gmra.mrb[52].mxu1 %vm2235_vm2, %v17069_v30  ;;  %14606 = vmatmul.mubr.msk.f32.gmra.mrb[66].mxu0 %vm2235_vm2, %v7010_v8  ;;  %v1871_v8 = vpop.f32.mrb[45].mxu1 }
 0x177   : >> { %14079 = vmatprep.mubr.msk.f32.mxu1 %vm2235_vm2, %v17073_v31  ;;  %14610 = vmatprep.mubr.msk.f32.mxu0 %vm16414_vm1, %v16413_v52  ;;  %1900 = vst [vmem:[#allocation2 + $0x2f0] sm:$0xff] %v1871_v8 }
 0x17a   : >> { %14080 = vmatmul.mubr.msk.f32.gmra.mrb[54].mxu1 %vm2235_vm2, %v17080_v32  ;;  %14611 = vmatmul.mubr.msk.f32.vlgmr.msra.gmra.mrb[50].mxu0 %vm2235_vm2, %v7158_v35  ;;  %v17168_v35 = vld [vmem:[#allocation3 + $0x46] sm:$0xff] }
 0x17b   : >> { %14084 = vmatprep.mubr.msk.f32.mxu1 %vm2235_vm2, %v2833_v36  ;;  %14638 = vmatpush3.msra.mxu0 %v17085_v13  ;;  %v1841_v36 = vpop.f32.mrb[47].mxu0 }
 0x17c   : >> { %14613 = vmatprep.mubr.msk.f32.mxu0 %vm16414_vm1, %v16413_v52  ;;  %14666 = vmatprep.subr.mxu0 %v16413_v52  ;;  %1894 = vst [vmem:[#allocation2 + $0x2c0] sm:$0xff] %v1841_v36  ;;  %v14016_v44 = vpop.f32.mrb[48].mxu0 }
 0x17d   : >> { %1897 = vst [vmem:[#allocation2 + $0x2d8] sm:$0xff] %v14016_v44 }
 0x17e   : >> { %14085 = vmatmul.mubr.msk.f32.vlgmr.msra.gmra.mrb[48].mxu1 %vm2235_vm2, %v2834_v37  ;;  %14614 = vmatmul.mubr.msk.f32.gmra.mrb[52].mxu0 %vm2235_vm2, %v7159_v45  ;;  %v14025_v37 = vpop.f32.mrb[46].mxu1  ;;  %v3128_v45 = vld [vmem:[#allocation3 + $0x17] sm:$0xff] }
 0x17f   : >> { %14087 = vmatprep.mubr.msk.f32.mxu1 %vm2235_vm2, %v2835_v46  ;;  %14616 = vmatprep.mubr.msk.f32.mxu0 %vm16414_vm1, %v16413_v52  ;;  %1903 = vst [vmem:[#allocation2 + $0x308] sm:$0xff] %v14025_v37  ;;  %v1881_v42 = vpop.f32.mrb[47].mxu1  ;;  %v17179_v46 = vld [vmem:[%s19286_s3 + $0x50] sm:$0xff] }
 0x180   : >> { %14097 = vmatpush3.msra.mxu1 %v12472_v26  ;;  %v7165_v26 = vld [vmem:[#allocation3 + $0x89] sm:$0xff]  ;;  %1902 = vst [vmem:[#allocation2 + $0x300] sm:$0xff] %v1881_v42 }
 0x181   : >> { %14110 = vmatprep.subr.mxu1 %v12481_v47  ;;  %v2000_v28 = vld [vmem:[#allocation2 + $0x2e1] ss:$4 sm:$0xff]  ;;  %v2050_v29 = vld [vmem:[#allocation2 + $0x2e2] ss:$4 sm:$0xff]  ;;  %v2100_v8 = vld [vmem:[#allocation2 + $0x2e3] ss:$4 sm:$0xff] }
 0x182   : >> { %14088 = vmatmul.mubr.msk.f32.gmra.mrb[50].mxu1 %vm2235_vm2, %v17103_v51  ;;  %14617 = vmatmul.mubr.msk.f32.gmra.mrb[54].mxu0 %vm2235_vm2, %v7160_v54  ;;  %v17193_v54 = vld [vmem:[#allocation3 + $0x27] sm:$0xff] }
 0x183   : >> { %14090 = vmatprep.mubr.msk.f32.mxu1 %vm2235_vm2, %v17107_v56  ;;  %14619 = vmatprep.mubr.msk.f32.mxu0 %vm16414_vm1, %v16413_v52 }
 0x186   : >> { %14091 = vmatmul.mubr.msk.f32.gmra.mrb[52].mxu1 %vm2235_vm2, %v17114_v24  ;;  %14620 = vmatmul.mubr.msk.f32.gmra.mrb[56].mxu0 %vm2235_vm2, %v7161_v58  ;;  %v17200_v58 = vld [vmem:[#allocation3 + $0x2f] sm:$0xff] }
 0x187   : >> { %14093 = vmatprep.mubr.msk.f32.mxu1 %vm2235_vm2, %v17118_v60  ;;  %14622 = vmatprep.mubr.msk.f32.mxu0 %vm16414_vm1, %v16413_v52  ;;  %v2052_v42 = vld [vmem:[#allocation2 + $0x302] ss:$4 sm:$0xf]  ;;  %v2102_v44 = vld [vmem:[#allocation2 + $0x303] ss:$4 sm:$0xf] }
 0x18a   : >> { %14094 = vmatmul.mubr.msk.f32.gmra.mrb[54].mxu1 %vm2235_vm2, %v17126_v63  ;;  %14623 = vmatmul.mubr.msk.f32.gmra.mrb[58].mxu0 %vm2235_vm2, %v7162_v1  ;;  %v17213_v1 = vld [vmem:[#allocation3 + $0x62] sm:$0xff] }
 0x18b   : >> { %14098 = vmatprep.mubr.msk.f32.mxu1 %vm2235_vm2, %v2980_v2  ;;  %14625 = vmatprep.mubr.msk.f32.mxu0 %vm16414_vm1, %v16413_v52  ;;  %v17215_v2 = vld [vmem:[#allocation3 + $0x3f] sm:$0xff] }
 0x18e   : >> { %14099 = vmatmul.mubr.msk.f32.vlgmr.msra.gmra.mrb[48].mxu1 %vm2235_vm2, %v2981_v10  ;;  %14626 = vmatmul.mubr.msk.f32.gmra.mrb[60].mxu0 %vm2235_vm2, %v7163_v11  ;;  %v17227_v10 = vld [vmem:[#allocation3 + $0x6a] sm:$0xff]  ;;  %v17237_v11 = vld [vmem:[#allocation3 + $0x72] sm:$0xff] }
 0x18f   : >> { %14101 = vmatprep.mubr.msk.f32.mxu1 %vm2235_vm2, %v17135_v15  ;;  %14628 = vmatprep.mubr.msk.f32.mxu0 %vm16414_vm1, %v16413_v52 }
 0x190   : >> { %14111 = vmatpush3.msra.mxu1 %v12481_v47  ;;  %v1851_v47 = vpop.f32.mrb[49].mxu0 }
 0x191   : >> { %14124 = vmatprep.subr.mxu1 %v16335_v19  ;;  %1896 = vst [vmem:[#allocation2 + $0x2d0] sm:$0xff] %v1851_v47  ;;  %v7476_v47 = vld [vmem:[#allocation3 + $0x8c] sm:$0xff] }
 0x192   : >> { %14102 = vmatmul.mubr.msk.f32.gmra.mrb[50].mxu1 %vm2235_vm2, %v17143_v12  ;;  %14629 = vmatmul.mubr.msk.f32.gmra.mrb[62].mxu0 %vm2235_vm2, %v7164_v20 }
 0x193   : >> { %14104 = vmatprep.mubr.msk.f32.mxu1 %vm2235_vm2, %v17150_v21  ;;  %14631 = vmatprep.mubr.msk.f32.mxu0 %vm16414_vm1, %v16413_v52 }
 0x196   : >> { %14105 = vmatmul.mubr.msk.f32.gmra.mrb[52].mxu1 %vm2235_vm2, %v17157_v25  ;;  %14632 = vmatmul.mubr.msk.f32.gmra.mrb[64].mxu0 %vm2235_vm2, %v7165_v26  ;;  %v1950_v26 = vld [vmem:[#allocation2 + $0x2e0] ss:$4 sm:$0xff] }
 0x197   : >> { %14107 = vmatprep.mubr.msk.f32.mxu1 %vm2235_vm2, %v17161_v5  ;;  %14634 = vmatprep.mubr.msk.f32.mxu0 %vm16414_vm1, %v16413_v52 }
 0x198   : >> { %v1998_v20 = vld [vmem:[#allocation2 + $0x2c1] ss:$4 sm:$0xff]  ;;  %v2098_v23 = vld [vmem:[#allocation2 + $0x2c3] ss:$4 sm:$0xff] }
 0x19a   : >> { %14108 = vmatmul.mubr.msk.f32.gmra.mrb[54].mxu1 %vm2235_vm2, %v17168_v35  ;;  %14635 = vmatmul.mubr.msk.f32.gmra.mrb[66].mxu0 %vm2235_vm2, %v7166_v39  ;;  %v1952_v39 = vld [vmem:[#allocation2 + $0x300] ss:$4 sm:$0xf] }
 0x19b   : >> { %14112 = vmatprep.mubr.msk.f32.mxu1 %vm2235_vm2, %v3127_v40  ;;  %14639 = vmatprep.mubr.msk.f32.mxu0 %vm16414_vm1, %v16413_v52  ;;  %v2002_v40 = vld [vmem:[#allocation2 + $0x301] ss:$4 sm:$0xf] }
 0x19e   : >> { %14113 = vmatmul.mubr.msk.f32.vlgmr.msra.gmra.mrb[48].mxu1 %vm2235_vm2, %v3128_v45  ;;  %14640 = vmatmul.mubr.msk.f32.vlgmr.msra.gmra.mrb[50].mxu0 %vm2235_vm2, %v17182_v48  ;;  %v17356_v45 = vld [vmem:[#allocation3 + $0x4a] sm:$0xff] }
 0x19f   : >> { %14115 = vmatprep.mubr.msk.f32.mxu1 %vm2235_vm2, %v17184_v49  ;;  %14667 = vmatpush3.msra.mxu0 %v17179_v46 }
 0x1a0   : >> { %14642 = vmatprep.mubr.msk.f32.mxu0 %vm16414_vm1, %v16413_v52  ;;  %14125 = vmatpush3.msra.mxu1 %v16335_v19  ;;  %v7474_v19 = vld [vmem:[#allocation3 + $0x7c] sm:$0xff] }
 0x1a1   : >> { %14695 = vmatprep.subr.mxu0 %v16413_v52  ;;  %14138 = vmatprep.subr.mxu1 %v16970_v41 }
 0x1a2   : >> { %14116 = vmatmul.mubr.msk.f32.gmra.mrb[50].mxu1 %vm2235_vm2, %v17193_v54  ;;  %14643 = vmatmul.mubr.msk.f32.gmra.mrb[52].mxu0 %vm2235_vm2, %v17198_v57 }
 0x1a3   : >> { %14118 = vmatprep.mubr.msk.f32.mxu1 %vm2235_vm2, %v17200_v58  ;;  %14645 = vmatprep.mubr.msk.f32.mxu0 %vm16414_vm1, %v16413_v52 }
 0x1a6   : >> { %14119 = vmatmul.mubr.msk.f32.gmra.mrb[52].mxu1 %vm2235_vm2, %v17209_v61  ;;  %14646 = vmatmul.mubr.msk.f32.gmra.mrb[54].mxu0 %vm2235_vm2, %v17213_v1 }
 0x1a7   : >> { %14121 = vmatprep.mubr.msk.f32.mxu1 %vm2235_vm2, %v17215_v2  ;;  %14648 = vmatprep.mubr.msk.f32.mxu0 %vm16414_vm1, %v16413_v52 }
 0x1aa   : >> { %14122 = vmatmul.mubr.msk.f32.gmra.mrb[54].mxu1 %vm2235_vm2, %v17223_v7  ;;  %14649 = vmatmul.mubr.msk.f32.gmra.mrb[56].mxu0 %vm2235_vm2, %v17227_v10 }
 0x1ab   : >> { %14126 = vmatprep.mubr.msk.f32.mxu1 %vm2235_vm2, %v16945_v22  ;;  %14651 = vmatprep.mubr.msk.f32.mxu0 %vm16414_vm1, %v16413_v52  ;;  %v17249_v22 = vld [vmem:[#allocation3 + $0x7a] sm:$0xff] }
 0x1ae   : >> { %14127 = vmatmul.mubr.msk.f32.vlgmr.msra.gmra.mrb[48].mxu1 %vm2235_vm2, %v16959_v34  ;;  %14652 = vmatmul.mubr.msk.f32.gmra.mrb[58].mxu0 %vm2235_vm2, %v17237_v11  ;;  %v17259_v34 = vld [vmem:[#allocation3 + $0x82] sm:$0xff] }
 0x1af   : >> { %14129 = vmatprep.mubr.msk.f32.mxu1 %vm2235_vm2, %v16963_v55  ;;  %14654 = vmatprep.mubr.msk.f32.mxu0 %vm16414_vm1, %v16413_v52  ;;  %v17261_v55 = vld [vmem:[#allocation3 + $0x40] sm:$0xff] }
 0x1b0   : >> { %14139 = vmatpush3.msra.mxu1 %v16970_v41  ;;  %v17269_v41 = vld [vmem:[#allocation3 + $0x48] sm:$0xff] }
 0x1b1   : >> { %14152 = vmatprep.subr.mxu1 %v17085_v13 }
 0x1b2   : >> { %14130 = vmatmul.mubr.msk.f32.gmra.mrb[50].mxu1 %vm2235_vm2, %v16973_v53  ;;  %14655 = vmatmul.mubr.msk.f32.gmra.mrb[60].mxu0 %vm2235_vm2, %v17249_v22  ;;  %v17273_v53 = vld [vmem:[#allocation3 + $0x8a] sm:$0xff] }
 0x1b3   : >> { %14132 = vmatprep.mubr.msk.f32.mxu1 %vm2235_vm2, %v16979_v59  ;;  %14657 = vmatprep.mubr.msk.f32.mxu0 %vm16414_vm1, %v16413_v52  ;;  %v17283_v59 = vld [vmem:[#allocation3 + $0x92] sm:$0xff] }
 0x1b6   : >> { %14133 = vmatmul.mubr.msk.f32.gmra.mrb[52].mxu1 %vm2235_vm2, %v16984_v62  ;;  %14658 = vmatmul.mubr.msk.f32.gmra.mrb[62].mxu0 %vm2235_vm2, %v17259_v34 }
 0x1b7   : >> { %14135 = vmatprep.mubr.msk.f32.mxu1 %vm2235_vm2, %v17261_v55  ;;  %14660 = vmatprep.mubr.msk.f32.mxu0 %vm16414_vm1, %v16413_v52 }
 0x1ba   : >> { %14136 = vmatmul.mubr.msk.f32.gmra.mrb[54].mxu1 %vm2235_vm2, %v17269_v41  ;;  %14661 = vmatmul.mubr.msk.f32.gmra.mrb[64].mxu0 %vm2235_vm2, %v17273_v53 }
 0x1bb   : >> { %14140 = vmatprep.mubr.msk.f32.mxu1 %vm2235_vm2, %v16909_v6  ;;  %14663 = vmatprep.mubr.msk.f32.mxu0 %vm16414_vm1, %v16413_v52  ;;  %v17295_v6 = vld [vmem:[%s19286_s3 + $0x58] sm:$0xff] }
 0x1be   : >> { %14141 = vmatmul.mubr.msk.f32.vlgmr.msra.gmra.mrb[48].mxu1 %vm2235_vm2, %v16911_v9  ;;  %14664 = vmatmul.mubr.msk.f32.gmra.mrb[66].mxu0 %vm2235_vm2, %v17283_v59  ;;  %v17300_v9 = vld [vmem:[#allocation3 + $0x5c] sm:$0xff] }
 0x1bf   : >> { %14143 = vmatprep.mubr.msk.f32.mxu1 %vm2235_vm2, %v16918_v17  ;;  %14668 = vmatprep.mubr.msk.f32.mxu0 %vm16414_vm1, %v16413_v52  ;;  %v17312_v17 = vld [vmem:[#allocation3 + $0x64] sm:$0xff] }
 0x1c0   : >> { %14153 = vmatpush3.msra.mxu1 %v17085_v13  ;;  %v7472_v13 = vld [vmem:[#allocation3 + $0x6c] sm:$0xff] }
 0x1c1   : >> { %14166 = vmatprep.subr.mxu1 %v17179_v46 }
 0x1c2   : >> { %14144 = vmatmul.mubr.msk.f32.gmra.mrb[50].mxu1 %vm2235_vm2, %v16924_v27  ;;  %14669 = vmatmul.mubr.msk.f32.vlgmr.msra.gmra.mrb[50].mxu0 %vm2235_vm2, %v17300_v9  ;;  %v17314_v27 = vld [vmem:[#allocation3 + $0x41] sm:$0xff] }
 0x1c3   : >> { %14146 = vmatprep.mubr.msk.f32.mxu1 %vm2235_vm2, %v16931_v38  ;;  %14696 = vmatpush3.msra.mxu0 %v17295_v6  ;;  %v17322_v38 = vld [vmem:[#allocation3 + $0x49] sm:$0xff] }
 0x1c4   : >> { %14671 = vmatprep.mubr.msk.f32.mxu0 %vm16414_vm1, %v16413_v52  ;;  %14724 = vmatprep.subr.mxu0 %v16413_v52 }
 0x1c6   : >> { %14147 = vmatmul.mubr.msk.f32.gmra.mrb[52].mxu1 %vm2235_vm2, %v16936_v4  ;;  %14672 = vmatmul.mubr.msk.f32.gmra.mrb[52].mxu0 %vm2235_vm2, %v17312_v17  ;;  %v7473_v4 = vld [vmem:[#allocation3 + $0x74] sm:$0xff] }
 0x1c7   : >> { %14149 = vmatprep.mubr.msk.f32.mxu1 %vm2235_vm2, %v17314_v27  ;;  %14674 = vmatprep.mubr.msk.f32.mxu0 %vm16414_vm1, %v16413_v52 }
 0x1ca   : >> { %14150 = vmatmul.mubr.msk.f32.gmra.mrb[54].mxu1 %vm2235_vm2, %v17322_v38  ;;  %14675 = vmatmul.mubr.msk.f32.gmra.mrb[54].mxu0 %vm2235_vm2, %v7472_v13  ;;  %v2126_v13 = vmax.f32 %v1950_v26, %v2000_v28 }
 0x1cb   : >> { %14154 = vmatprep.mubr.msk.f32.mxu1 %vm2235_vm2, %v17004_v33  ;;  %14677 = vmatprep.mubr.msk.f32.mxu0 %vm16414_vm1, %v16413_v52  ;;  %v1948_v33 = vld [vmem:[#allocation2 + $0x2c0] ss:$4 sm:$0xff] }
 0x1cc   : >> { %v2125_v36 = vmax.f32 %v1948_v33, %v1998_v20  ;;  %v2152_v33 = vmax.f32 %v2052_v42, %v2102_v44  ;;  %v16336_v20 = vld [vmem:[%s19285_s2] ss:$0 sm:$0xff]  ;;  %v17402_v42 = vld [vmem:[#allocation3 + $0x54] sm:$0xff]  ;;  %v17407_v44 = vld [vmem:[#allocation3 + $0x65] sm:$0xff] }
 0x1ce   : >> { %14155 = vmatmul.mubr.msk.f32.vlgmr.msra.gmra.mrb[48].mxu1 %vm2235_vm2, %v17016_v16  ;;  %14678 = vmatmul.mubr.msk.f32.gmra.mrb[56].mxu0 %vm2235_vm2, %v7473_v4  ;;  %v2048_v16 = vld [vmem:[#allocation2 + $0x2c2] ss:$4 sm:$0xff]  ;;  %v2151_v4 = vmax.f32 %v2050_v29, %v2100_v8 }
 0x1cf   : >> { %14157 = vmatprep.mubr.msk.f32.mxu1 %vm2235_vm2, %v17018_v43  ;;  %14680 = vmatprep.mubr.msk.f32.mxu0 %vm16414_vm1, %v16413_v52  ;;  %v7475_v43 = vld [vmem:[#allocation3 + $0x84] sm:$0xff]  ;;  %v2150_v37 = vmax.f32 %v2048_v16, %v2098_v23  ;;  %v7477_v23 = vld [vmem:[#allocation3 + $0x94] sm:$0xff] }
 0x1d0   : >> { %14167 = vmatpush3.msra.mxu1 %v17179_v46  ;;  %v2176_v26 = vmax.f32 %v2126_v13, %v2151_v4  ;;  %v7628_v13 = vld [vmem:[#allocation3 + $0x6d] sm:$0xff] }
 0x1d1   : >> { %14180 = vmatprep.subr.mxu1 %v17295_v6  ;;  %v2175_v46 = vmax.f32 %v2125_v36, %v2150_v37  ;;  %v17387_v36 = vld [vmem:[#allocation3 + $0x44] sm:$0xff]  ;;  %v17393_v37 = vld [vmem:[#allocation3 + $0x4c] sm:$0xff] }
 0x1d2   : >> { %14158 = vmatmul.mubr.msk.f32.gmra.mrb[50].mxu1 %vm2235_vm2, %v17031_v0  ;;  %14681 = vmatmul.mubr.msk.f32.gmra.mrb[58].mxu0 %vm2235_vm2, %v7474_v19  ;;  %v2127_v19 = vmax.f32 %v1952_v39, %v2002_v40  ;;  %v2208_v29 = vadd.f32 %v16336_v20, %v2176_v26  ;;  %v17415_v4 = vld [vmem:[#allocation3 + $0x2d] sm:$0xff] }
 0x1d3   : >> { %14160 = vmatprep.mubr.msk.f32.mxu1 %vm2235_vm2, %v17037_v50  ;;  %14683 = vmatprep.mubr.msk.f32.mxu0 %vm16414_vm1, %v16413_v52  ;;  %v2207_v16 = vadd.f32 %v16336_v20, %v2175_v46  ;;  %v3862_v46 = vld [vmem:[#allocation3 + $0x1d] sm:$0xff]  ;;  %v17440_v26 = vld [vmem:[#allocation3 + $0x4d] sm:$0xff] }
 0x1d4   : >> { %v2177_v28 = vmax.f32 %v2127_v19, %v2152_v33  ;;  %v2233_v39 = vmax.f32 %v2208_v29, 0.0  ;;  %v12781_v19 = vld [vmem:[%s19286_s3 + $0x68] sm:$0xff]  ;;  %v17461_v29 = vld [vmem:[%s19286_s3 + $0x70] sm:$0xff] }
 0x1d5   : >> { %v17425_v33 = vld [vmem:[#allocation3 + $0x35] sm:$0xff] }
 0x1d6   : >> { %14161 = vmatmul.mubr.msk.f32.gmra.mrb[52].mxu1 %vm2235_vm2, %v17045_v18  ;;  %14684 = vmatmul.mubr.msk.f32.gmra.mrb[60].mxu0 %vm2235_vm2, %v7475_v43  ;;  %v12771_v43 = vld [vmem:[%s19286_s3 + $0x60] sm:$0xff]  ;;  %v2209_v8 = vadd.f32 %v16336_v20, %v2177_v28  ;;  %2259 = vst.msk [vmem:[#allocation3 + $0xb8] sm:$0xff] %vm2235_vm2, %v2233_v39 }
 0x1d7   : >> { %14163 = vmatprep.mubr.msk.f32.mxu1 %vm2235_vm2, %v17347_v3  ;;  %14686 = vmatprep.mubr.msk.f32.mxu0 %vm16414_vm1, %v16413_v52  ;;  %v7629_v20 = vld [vmem:[#allocation3 + $0x75] sm:$0xff] }
 0x1d8   : >> { %v2234_v40 = vmax.f32 %v2209_v8, 0.0  ;;  %v17447_v28 = vld [vmem:[#allocation3 + $0x55] sm:$0xff] }
 0x1d9   : >> { %v17478_v8 = vld [vmem:[#allocation3 + $0x4e] sm:$0xff]  ;;  %v17485_v39 = vld [vmem:[#allocation3 + $0x56] sm:$0xff] }
 0x1da   : >> { %14164 = vmatmul.mubr.msk.f32.gmra.mrb[54].mxu1 %vm2235_vm2, %v17356_v45  ;;  %14687 = vmatmul.mubr.msk.f32.gmra.mrb[62].mxu0 %vm2235_vm2, %v7476_v47  ;;  %2261 = vst.msk [vmem:[#allocation3 + $0xc0] sm:$0xf] %vm2260_vm3, %v2234_v40  ;;  %v3863_v47 = vld [vmem:[#allocation3 + $0x25] sm:$0xff] }
 0x1db   : >> { %14168 = vmatprep.mubr.msk.f32.mxu1 %vm2235_vm2, %v17103_v51  ;;  %14689 = vmatprep.mubr.msk.f32.mxu0 %vm16414_vm1, %v16413_v52  ;;  %v2232_v51 = vmax.f32 %v2207_v16, 0.0  ;;  %v17429_v16 = vld [vmem:[#allocation3 + $0x3d] sm:$0xff] }
 0x1dc   : >> { %v17489_v40 = vld [vmem:[#allocation3 + $0x5e] sm:$0xff] }
 0x1dd   : >> { %2258 = vst.msk [vmem:[#allocation3 + $0xb0] sm:$0xff] %vm2235_vm2, %v2232_v51  ;;  %v7631_v51 = vld [vmem:[#allocation3 + $0x85] sm:$0xff] }
 0x1de   : >> { %14169 = vmatmul.mubr.msk.f32.vlgmr.msra.gmra.mrb[48].mxu1 %vm2235_vm2, %v17107_v56  ;;  %14690 = vmatmul.mubr.msk.f32.gmra.mrb[64].mxu0 %vm2235_vm2, %v7477_v23  ;;  %v7478_v56 = vld [vmem:[#allocation3 + $0x9c] sm:$0xff]  ;;  %v17436_v23 = vld [vmem:[#allocation3 + $0x45] sm:$0xff] }
 0x1df   : >> { %14171 = vmatprep.mubr.msk.f32.mxu1 %vm2235_vm2, %v17114_v24  ;;  %14692 = vmatprep.mubr.msk.f32.mxu0 %vm16414_vm1, %v16413_v52 }
 0x1e0   : >> { %14181 = vmatpush3.msra.mxu1 %v17295_v6  ;;  %v17391_v6 = vld [vmem:[#allocation3 + $0x5d] sm:$0xff] }
 0x1e1   : >> { %14194 = vmatprep.subr.mxu1 %v12771_v43 }
 0x1e2   : >> { %14172 = vmatmul.mubr.msk.f32.gmra.mrb[50].mxu1 %vm2235_vm2, %v17118_v60  ;;  %14693 = vmatmul.mubr.msk.f32.gmra.mrb[66].mxu0 %vm2235_vm2, %v7478_v56  ;;  %v7632_v56 = vld [vmem:[#allocation3 + $0x8d] sm:$0xff] }
 0x1e3   : >> { %14174 = vmatprep.mubr.msk.f32.mxu1 %vm2235_vm2, %v17126_v63  ;;  %14697 = vmatprep.mubr.msk.f32.mxu0 %vm16414_vm1, %v16413_v52 }
 0x1e6   : >> { %14175 = vmatmul.mubr.msk.f32.gmra.mrb[52].mxu1 %vm2235_vm2, %v17387_v36  ;;  %14698 = vmatmul.mubr.msk.f32.vlgmr.msra.gmra.mrb[50].mxu0 %vm2235_vm2, %v17391_v6 }
 0x1e7   : >> { %14177 = vmatprep.mubr.msk.f32.mxu1 %vm2235_vm2, %v17393_v37  ;;  %14725 = vmatpush3.msra.mxu0 %v12771_v43 }
 0x1e8   : >> { %14700 = vmatprep.mubr.msk.f32.mxu0 %vm16414_vm1, %v16413_v52  ;;  %14753 = vmatprep.subr.mxu0 %v16413_v52 }
 0x1ea   : >> { %14178 = vmatmul.mubr.msk.f32.gmra.mrb[54].mxu1 %vm2235_vm2, %v17402_v42  ;;  %14701 = vmatmul.mubr.msk.f32.gmra.mrb[52].mxu0 %vm2235_vm2, %v17407_v44 }
 0x1eb   : >> { %14182 = vmatprep.mubr.msk.f32.mxu1 %vm2235_vm2, %v3862_v46  ;;  %14703 = vmatprep.mubr.msk.f32.mxu0 %vm16414_vm1, %v16413_v52  ;;  %v17500_v46 = vld [vmem:[#allocation3 + $0x66] sm:$0xff] }
 0x1ee   : >> { %14183 = vmatmul.mubr.msk.f32.vlgmr.msra.gmra.mrb[48].mxu1 %vm2235_vm2, %v3863_v47  ;;  %14704 = vmatmul.mubr.msk.f32.gmra.mrb[54].mxu0 %vm2235_vm2, %v7628_v13  ;;  %v17505_v47 = vld [vmem:[%s19286_s3 + $0x78] sm:$0xff]  ;;  %v17529_v13 = vld [vmem:[#allocation3 + $0x7e] sm:$0xff] }
 0x1ef   : >> { %14185 = vmatprep.mubr.msk.f32.mxu1 %vm2235_vm2, %v17415_v4  ;;  %14706 = vmatprep.mubr.msk.f32.mxu0 %vm16414_vm1, %v16413_v52 }
 0x1f0   : >> { %14195 = vmatpush3.msra.mxu1 %v12771_v43  ;;  %v7630_v43 = vld [vmem:[#allocation3 + $0x7d] sm:$0xff] }
 0x1f1   : >> { %14208 = vmatprep.subr.mxu1 %v12781_v19 }
 0x1f2   : >> { %14186 = vmatmul.mubr.msk.f32.gmra.mrb[50].mxu1 %vm2235_vm2, %v17425_v33  ;;  %14707 = vmatmul.mubr.msk.f32.gmra.mrb[56].mxu0 %vm2235_vm2, %v7629_v20  ;;  %v4305_v20 = vld [vmem:[#allocation3 + $0x30] sm:$0xff] }
 0x1f3   : >> { %14188 = vmatprep.mubr.msk.f32.mxu1 %vm2235_vm2, %v17429_v16  ;;  %14709 = vmatprep.mubr.msk.f32.mxu0 %vm16414_vm1, %v16413_v52 }
 0x1f6   : >> { %14189 = vmatmul.mubr.msk.f32.gmra.mrb[52].mxu1 %vm2235_vm2, %v17436_v23  ;;  %14710 = vmatmul.mubr.msk.f32.gmra.mrb[58].mxu0 %vm2235_vm2, %v7630_v43  ;;  %v17542_v43 = vld [vmem:[%s19286_s3 + $0x80] sm:$0xff] }
 0x1f7   : >> { %14191 = vmatprep.mubr.msk.f32.mxu1 %vm2235_vm2, %v17440_v26  ;;  %14712 = vmatprep.mubr.msk.f32.mxu0 %vm16414_vm1, %v16413_v52 }
 0x1fa   : >> { %14192 = vmatmul.mubr.msk.f32.gmra.mrb[54].mxu1 %vm2235_vm2, %v17447_v28  ;;  %14713 = vmatmul.mubr.msk.f32.gmra.mrb[60].mxu0 %vm2235_vm2, %v7631_v51  ;;  %v17553_v51 = vld [vmem:[#allocation3 + $0x8e] sm:$0xff] }
 0x1fb   : >> { %14196 = vmatprep.mubr.msk.f32.mxu1 %vm2235_vm2, %v17135_v15  ;;  %14715 = vmatprep.mubr.msk.f32.mxu0 %vm16414_vm1, %v16413_v52  ;;  %v7633_v15 = vld [vmem:[#allocation3 + $0x95] sm:$0xff] }
 0x1fe   : >> { %14197 = vmatmul.mubr.msk.f32.vlgmr.msra.gmra.mrb[48].mxu1 %vm2235_vm2, %v17143_v12  ;;  %14716 = vmatmul.mubr.msk.f32.gmra.mrb[62].mxu0 %vm2235_vm2, %v7632_v56  ;;  %v7634_v12 = vld [vmem:[#allocation3 + $0x9d] sm:$0xff] }
 0x1ff   : >> { %14199 = vmatprep.mubr.msk.f32.mxu1 %vm2235_vm2, %v17150_v21  ;;  %14718 = vmatprep.mubr.msk.f32.mxu0 %vm16414_vm1, %v16413_v52  ;;  %v17563_v56 = vld [vmem:[#allocation3 + $0x96] sm:$0xff] }
 0x200   : >> { %14209 = vmatpush3.msra.mxu1 %v12781_v19 }
 0x201   : >> { %14222 = vmatprep.subr.mxu1 %v17461_v29 }
 0x202   : >> { %14200 = vmatmul.mubr.msk.f32.gmra.mrb[50].mxu1 %vm2235_vm2, %v17157_v25  ;;  %14719 = vmatmul.mubr.msk.f32.gmra.mrb[64].mxu0 %vm2235_vm2, %v7633_v15  ;;  %v17565_v15 = vld [vmem:[#allocation3 + $0x50] sm:$0xff] }
 0x203   : >> { %14202 = vmatprep.mubr.msk.f32.mxu1 %vm2235_vm2, %v17161_v5  ;;  %14721 = vmatprep.mubr.msk.f32.mxu0 %vm16414_vm1, %v16413_v52 }
 0x206   : >> { %14203 = vmatmul.mubr.msk.f32.gmra.mrb[52].mxu1 %vm2235_vm2, %v17168_v35  ;;  %14722 = vmatmul.mubr.msk.f32.gmra.mrb[66].mxu0 %vm2235_vm2, %v7634_v12  ;;  %v7938_v12 = vld [vmem:[#allocation3 + $0x5f] sm:$0xff] }
 0x207   : >> { %14205 = vmatprep.mubr.msk.f32.mxu1 %vm2235_vm2, %v17478_v8  ;;  %14726 = vmatprep.mubr.msk.f32.mxu0 %vm16414_vm1, %v16413_v52 }
 0x20a   : >> { %14206 = vmatmul.mubr.msk.f32.gmra.mrb[54].mxu1 %vm2235_vm2, %v17485_v39  ;;  %14727 = vmatmul.mubr.msk.f32.vlgmr.msra.gmra.mrb[50].mxu0 %vm2235_vm2, %v17489_v40 }
 0x20b   : >> { %14210 = vmatprep.mubr.msk.f32.mxu1 %vm2235_vm2, %v17184_v49  ;;  %14754 = vmatpush3.msra.mxu0 %v12781_v19  ;;  %v7784_v49 = vld [vmem:[#allocation3 + $0x6e] sm:$0xff]  ;;  %v17537_v19 = vld [vmem:[#allocation3 + $0x86] sm:$0xff] }
 0x20c   : >> { %14729 = vmatprep.mubr.msk.f32.mxu0 %vm16414_vm1, %v16413_v52  ;;  %14782 = vmatprep.subr.mxu0 %v16413_v52 }
 0x20e   : >> { %14211 = vmatmul.mubr.msk.f32.vlgmr.msra.gmra.mrb[48].mxu1 %vm2235_vm2, %v17193_v54  ;;  %14730 = vmatmul.mubr.msk.f32.gmra.mrb[52].mxu0 %vm2235_vm2, %v17500_v46  ;;  %v7785_v54 = vld [vmem:[#allocation3 + $0x76] sm:$0xff] }
 0x20f   : >> { %14213 = vmatprep.mubr.msk.f32.mxu1 %vm2235_vm2, %v17200_v58  ;;  %14732 = vmatprep.mubr.msk.f32.mxu0 %vm16414_vm1, %v16413_v52  ;;  %v4162_v58 = vld [vmem:[#allocation3 + $0x4f] sm:$0xff] }
 0x210   : >> { %14223 = vmatpush3.msra.mxu1 %v17461_v29 }
 0x211   : >> { %14236 = vmatprep.subr.mxu1 %v17505_v47 }
 0x212   : >> { %14214 = vmatmul.mubr.msk.f32.gmra.mrb[50].mxu1 %vm2235_vm2, %v17209_v61  ;;  %14733 = vmatmul.mubr.msk.f32.gmra.mrb[54].mxu0 %vm2235_vm2, %v7784_v49  ;;  %v4163_v61 = vld [vmem:[#allocation3 + $0x57] sm:$0xff] }
 0x213   : >> { %14216 = vmatprep.mubr.msk.f32.mxu1 %vm2235_vm2, %v17215_v2  ;;  %14735 = vmatprep.mubr.msk.f32.mxu0 %vm16414_vm1, %v16413_v52  ;;  %v4303_v2 = vld [vmem:[#allocation3 + $0x20] sm:$0xff] }
 0x214   : >> { %v17649_v49 = vld [vmem:[#allocation3 + $0x5b] sm:$0xff] }
 0x216   : >> { %14217 = vmatmul.mubr.msk.f32.gmra.mrb[52].mxu1 %vm2235_vm2, %v17223_v7  ;;  %14736 = vmatmul.mubr.msk.f32.gmra.mrb[56].mxu0 %vm2235_vm2, %v7785_v54  ;;  %v4304_v7 = vld [vmem:[#allocation3 + $0x28] sm:$0xff] }
 0x217   : >> { %14219 = vmatprep.mubr.msk.f32.mxu1 %vm2235_vm2, %v4162_v58  ;;  %14738 = vmatprep.mubr.msk.f32.mxu0 %vm16414_vm1, %v16413_v52  ;;  %v17656_v54 = vld [vmem:[#allocation3 + $0x63] sm:$0xff]  ;;  %v7945_v58 = vld [vmem:[#allocation3 + $0x97] sm:$0xff] }
 0x21a   : >> { %14220 = vmatmul.mubr.msk.f32.gmra.mrb[54].mxu1 %vm2235_vm2, %v4163_v61  ;;  %14739 = vmatmul.mubr.msk.f32.gmra.mrb[58].mxu0 %vm2235_vm2, %v17529_v13  ;;  %v7946_v61 = vld [vmem:[#allocation3 + $0x9f] sm:$0xff] }
 0x21b   : >> { %14224 = vmatprep.mubr.msk.f32.mxu1 %vm2235_vm2, %v4303_v2  ;;  %14741 = vmatprep.mubr.msk.f32.mxu0 %vm16414_vm1, %v16413_v52  ;;  %v17670_v2 = vld [vmem:[%s19286_s3 + $0x98] sm:$0xff] }
 0x21e   : >> { %14225 = vmatmul.mubr.msk.f32.vlgmr.msra.gmra.mrb[48].mxu1 %vm2235_vm2, %v4304_v7  ;;  %14742 = vmatmul.mubr.msk.f32.gmra.mrb[60].mxu0 %vm2235_vm2, %v17537_v19  ;;  %v17945_v7 = vld [vmem:[#allocation3 + $0x72] sm:$0xff] }
 0x21f   : >> { %14227 = vmatprep.mubr.msk.f32.mxu1 %vm2235_vm2, %v4305_v20  ;;  %14744 = vmatprep.mubr.msk.f32.mxu0 %vm16414_vm1, %v16413_v52  ;;  %v17949_v20 = vld [vmem:[#allocation3 + $0x8b] sm:$0xff] }
 0x220   : >> { %14237 = vmatpush3.msra.mxu1 %v17505_v47 }
 0x221   : >> { %14250 = vmatprep.subr.mxu1 %v17542_v43 }
 0x222   : >> { %14228 = vmatmul.mubr.msk.f32.gmra.mrb[50].mxu1 %vm2235_vm2, %v16984_v62  ;;  %14745 = vmatmul.mubr.msk.f32.gmra.mrb[62].mxu0 %vm2235_vm2, %v17553_v51  ;;  %v17575_v62 = vld [vmem:[#allocation3 + $0x9e] sm:$0xff] }
 0x223   : >> { %14230 = vmatprep.mubr.msk.f32.mxu1 %vm2235_vm2, %v17261_v55  ;;  %14747 = vmatprep.mubr.msk.f32.mxu0 %vm16414_vm1, %v16413_v52 }
 0x226   : >> { %14231 = vmatmul.mubr.msk.f32.gmra.mrb[52].mxu1 %vm2235_vm2, %v17269_v41  ;;  %14748 = vmatmul.mubr.msk.f32.gmra.mrb[64].mxu0 %vm2235_vm2, %v17563_v56 }
 0x227   : >> { %14233 = vmatprep.mubr.msk.f32.mxu1 %vm2235_vm2, %v17565_v15  ;;  %14750 = vmatprep.mubr.msk.f32.mxu0 %vm16414_vm1, %v16413_v52 }
 0x22a   : >> { %14234 = vmatmul.mubr.msk.f32.gmra.mrb[54].mxu1 %vm2235_vm2, %v16990_v14  ;;  %14751 = vmatmul.mubr.msk.f32.gmra.mrb[66].mxu0 %vm2235_vm2, %v17575_v62  ;;  %v17591_v14 = vld [vmem:[%s19286_s3 + $0x88] sm:$0xff] }
 0x22b   : >> { %14238 = vmatprep.mubr.msk.f32.mxu1 %vm2235_vm2, %v17031_v0  ;;  %14755 = vmatprep.mubr.msk.f32.mxu0 %vm16414_vm1, %v16413_v52  ;;  %v7939_v0 = vld [vmem:[#allocation3 + $0x67] sm:$0xff] }
 0x22e   : >> { %14239 = vmatmul.mubr.msk.f32.vlgmr.msra.gmra.mrb[48].mxu1 %vm2235_vm2, %v17037_v50  ;;  %14756 = vmatmul.mubr.msk.f32.vlgmr.msra.gmra.mrb[50].mxu0 %vm2235_vm2, %v7938_v12  ;;  %v7940_v50 = vld [vmem:[#allocation3 + $0x6f] sm:$0xff] }
 0x22f   : >> { %14241 = vmatprep.mubr.msk.f32.mxu1 %vm2235_vm2, %v17045_v18  ;;  %14783 = vmatpush3.msra.mxu0 %v17461_v29  ;;  %v7941_v18 = vld [vmem:[#allocation3 + $0x77] sm:$0xff]  ;;  %v7944_v29 = vld [vmem:[#allocation3 + $0x8f] sm:$0xff] }
 0x230   : >> { %14758 = vmatprep.mubr.msk.f32.mxu0 %vm16414_vm1, %v16413_v52  ;;  %14251 = vmatpush3.msra.mxu1 %v17542_v43  ;;  %v17958_v12 = vld [vmem:[#allocation3 + $0x93] sm:$0xff] }
 0x231   : >> { %14811 = vmatprep.subr.mxu0 %v16413_v52  ;;  %14264 = vmatprep.subr.mxu1 %v17591_v14 }
 0x232   : >> { %14242 = vmatmul.mubr.msk.f32.gmra.mrb[50].mxu1 %vm2235_vm2, %v17347_v3  ;;  %14759 = vmatmul.mubr.msk.f32.gmra.mrb[52].mxu0 %vm2235_vm2, %v7939_v0  ;;  %v17980_v0 = vld [vmem:[#allocation3 + $0xa3] sm:$0xff] }
 0x233   : >> { %14244 = vmatprep.mubr.msk.f32.mxu1 %vm2235_vm2, %v17356_v45  ;;  %14761 = vmatprep.mubr.msk.f32.mxu0 %vm16414_vm1, %v16413_v52 }
 0x236   : >> { %14245 = vmatmul.mubr.msk.f32.gmra.mrb[52].mxu1 %vm2235_vm2, %v17182_v48  ;;  %14762 = vmatmul.mubr.msk.f32.gmra.mrb[54].mxu0 %vm2235_vm2, %v7940_v50  ;;  %v7942_v48 = vld [vmem:[#allocation3 + $0x7f] sm:$0xff]  ;;  %v17990_v50 = vld [vmem:[#allocation3 + $0xab] sm:$0xff] }
 0x237   : >> { %14247 = vmatprep.mubr.msk.f32.mxu1 %vm2235_vm2, %v17198_v57  ;;  %14764 = vmatprep.mubr.msk.f32.mxu0 %vm16414_vm1, %v16413_v52  ;;  %v17625_v57 = vld [vmem:[%s19286_s3 + $0x90] sm:$0xff] }
 0x23a   : >> { %14248 = vmatmul.mubr.msk.f32.gmra.mrb[54].mxu1 %vm2235_vm2, %v17213_v1  ;;  %14765 = vmatmul.mubr.msk.f32.gmra.mrb[56].mxu0 %vm2235_vm2, %v7941_v18  ;;  %v17638_v1 = vld [vmem:[#allocation3 + $0x4b] sm:$0xff]  ;;  %v5773_v18 = vld [vmem:[#allocation3 + $0x3c] sm:$0xff] }
 0x23b   : >> { %14252 = vmatprep.mubr.msk.f32.mxu1 %vm2235_vm2, %v17069_v30  ;;  %14767 = vmatprep.mubr.msk.f32.mxu0 %vm16414_vm1, %v16413_v52  ;;  %v17633_v30 = vld [vmem:[#allocation3 + $0x43] sm:$0xff] }
 0x23e   : >> { %14253 = vmatmul.mubr.msk.f32.vlgmr.msra.gmra.mrb[48].mxu1 %vm2235_vm2, %v17073_v31  ;;  %14768 = vmatmul.mubr.msk.f32.gmra.mrb[58].mxu0 %vm2235_vm2, %v7942_v48  ;;  %v7943_v31 = vld [vmem:[#allocation3 + $0x87] sm:$0xff] }
 0x23f   : >> { %14255 = vmatprep.mubr.msk.f32.mxu1 %vm2235_vm2, %v17080_v32  ;;  %14770 = vmatprep.mubr.msk.f32.mxu0 %vm16414_vm1, %v16413_v52  ;;  %v17645_v32 = vld [vmem:[#allocation3 + $0x53] sm:$0xff] }
 0x240   : >> { %14265 = vmatpush3.msra.mxu1 %v17591_v14  ;;  %v17999_v48 = vld [vmem:[#allocation3 + $0x6c] sm:$0xff] }
 0x241   : >> { %14278 = vmatprep.subr.mxu1 %v17625_v57 }
 0x242   : >> { %14256 = vmatmul.mubr.msk.f32.gmra.mrb[50].mxu1 %vm2235_vm2, %v17633_v30  ;;  %14771 = vmatmul.mubr.msk.f32.gmra.mrb[60].mxu0 %vm2235_vm2, %v7943_v31  ;;  %v12652_v31 = vld [vmem:[%s19286_s3 + $0x8] sm:$0xff] }
 0x243   : >> { %14258 = vmatprep.mubr.msk.f32.mxu1 %vm2235_vm2, %v17638_v1  ;;  %14773 = vmatprep.mubr.msk.f32.mxu0 %vm16414_vm1, %v16413_v52 }
 0x246   : >> { %14259 = vmatmul.mubr.msk.f32.gmra.mrb[52].mxu1 %vm2235_vm2, %v17645_v32  ;;  %14774 = vmatmul.mubr.msk.f32.gmra.mrb[62].mxu0 %vm2235_vm2, %v7944_v29  ;;  %v18016_v29 = vld [vmem:[#allocation3 + $0x5c] sm:$0xff] }
 0x247   : >> { %14261 = vmatprep.mubr.msk.f32.mxu1 %vm2235_vm2, %v17649_v49  ;;  %14776 = vmatprep.mubr.msk.f32.mxu0 %vm16414_vm1, %v16413_v52 }
 0x24a   : >> { %14262 = vmatmul.mubr.msk.f32.gmra.mrb[54].mxu1 %vm2235_vm2, %v17656_v54  ;;  %14777 = vmatmul.mubr.msk.f32.gmra.mrb[64].mxu0 %vm2235_vm2, %v7945_v58  ;;  %v5938_v58 = vld [vmem:[#allocation3 + $0x41] sm:$0xff] }
 0x24b   : >> { %14266 = vmatprep.mubr.msk.f32.mxu1 %vm2235_vm2, %v17114_v24  ;;  %14779 = vmatprep.mubr.msk.f32.mxu0 %vm16414_vm1, %v16413_v52  ;;  %v17681_v24 = vld [vmem:[#allocation3 + $0x60] sm:$0xff] }
 0x24e   : >> { %14267 = vmatmul.mubr.msk.f32.vlgmr.msra.gmra.mrb[48].mxu1 %vm2235_vm2, %v17118_v60  ;;  %14780 = vmatmul.mubr.msk.f32.gmra.mrb[66].mxu0 %vm2235_vm2, %v7946_v61  ;;  %v17693_v60 = vld [vmem:[#allocation3 + $0x68] sm:$0xff]  ;;  %v5937_v61 = vld [vmem:[%s19286_s3] sm:$0xff] }
 0x24f   : >> { %14269 = vmatprep.mubr.msk.f32.mxu1 %vm2235_vm2, %v17126_v63  ;;  %14784 = vmatprep.mubr.msk.f32.mxu0 %vm16414_vm1, %v16413_v52  ;;  %v17703_v63 = vld [vmem:[#allocation3 + $0x70] sm:$0xff] }
 0x250   : >> { %14279 = vmatpush3.msra.mxu1 %v17625_v57 }
 0x251   : >> { %14292 = vmatprep.subr.mxu1 %v17670_v2 }
 0x252   : >> { %14270 = vmatmul.mubr.msk.f32.gmra.mrb[50].mxu1 %vm2235_vm2, %v17387_v36  ;;  %14785 = vmatmul.mubr.msk.f32.vlgmr.msra.gmra.mrb[50].mxu0 %vm2235_vm2, %v17681_v24 }
 0x253   : >> { %14272 = vmatprep.mubr.msk.f32.mxu1 %vm2235_vm2, %v17393_v37  ;;  %14812 = vmatpush3.msra.mxu0 %v17505_v47  ;;  %v17937_v47 = vld [vmem:[#allocation3 + $0x6a] sm:$0xff] }
 0x254   : >> { %14787 = vmatprep.mubr.msk.f32.mxu0 %vm16414_vm1, %v16413_v52  ;;  %14840 = vmatprep.subr.mxu0 %v16413_v52 }
 0x256   : >> { %14273 = vmatmul.mubr.msk.f32.gmra.mrb[52].mxu1 %vm2235_vm2, %v17402_v42  ;;  %14788 = vmatmul.mubr.msk.f32.gmra.mrb[52].mxu0 %vm2235_vm2, %v17693_v60 }
 0x257   : >> { %14275 = vmatprep.mubr.msk.f32.mxu1 %vm2235_vm2, %v17300_v9  ;;  %14790 = vmatprep.mubr.msk.f32.mxu0 %vm16414_vm1, %v16413_v52  ;;  %v17713_v9 = vld [vmem:[#allocation3 + $0x78] sm:$0xff] }
 0x25a   : >> { %14276 = vmatmul.mubr.msk.f32.gmra.mrb[54].mxu1 %vm2235_vm2, %v17312_v17  ;;  %14791 = vmatmul.mubr.msk.f32.gmra.mrb[54].mxu0 %vm2235_vm2, %v17703_v63  ;;  %v17718_v17 = vld [vmem:[%s19286_s3 + $0xa0] sm:$0xff] }
 0x25b   : >> { %14280 = vmatprep.mubr.msk.f32.mxu1 %vm2235_vm2, %v17415_v4  ;;  %14793 = vmatprep.mubr.msk.f32.mxu0 %vm16414_vm1, %v16413_v52  ;;  %v17730_v4 = vld [vmem:[#allocation3 + $0x80] sm:$0xff] }
 0x25e   : >> { %14281 = vmatmul.mubr.msk.f32.vlgmr.msra.gmra.mrb[48].mxu1 %vm2235_vm2, %v17425_v33  ;;  %14794 = vmatmul.mubr.msk.f32.gmra.mrb[56].mxu0 %vm2235_vm2, %v17713_v9  ;;  %v17740_v33 = vld [vmem:[#allocation3 + $0x88] sm:$0xff] }
 0x25f   : >> { %14283 = vmatprep.mubr.msk.f32.mxu1 %vm2235_vm2, %v17429_v16  ;;  %14796 = vmatprep.mubr.msk.f32.mxu0 %vm16414_vm1, %v16413_v52  ;;  %v17750_v16 = vld [vmem:[#allocation3 + $0x90] sm:$0xff] }
 0x260   : >> { %14293 = vmatpush3.msra.mxu1 %v17670_v2 }
 0x261   : >> { %14306 = vmatprep.subr.mxu1 %v17718_v17 }
 0x262   : >> { %14284 = vmatmul.mubr.msk.f32.gmra.mrb[50].mxu1 %vm2235_vm2, %v17436_v23  ;;  %14797 = vmatmul.mubr.msk.f32.gmra.mrb[58].mxu0 %vm2235_vm2, %v17730_v4  ;;  %v17891_v23 = vld [vmem:[#allocation3 + $0x6b] sm:$0xff] }
 0x263   : >> { %14286 = vmatprep.mubr.msk.f32.mxu1 %vm2235_vm2, %v17440_v26  ;;  %14799 = vmatprep.mubr.msk.f32.mxu0 %vm16414_vm1, %v16413_v52  ;;  %v5479_v26 = vld [vmem:[#allocation3 + $0x3a] sm:$0xff] }
 0x266   : >> { %14287 = vmatmul.mubr.msk.f32.gmra.mrb[52].mxu1 %vm2235_vm2, %v17447_v28  ;;  %14800 = vmatmul.mubr.msk.f32.gmra.mrb[60].mxu0 %vm2235_vm2, %v17740_v33  ;;  %v17902_v28 = vld [vmem:[#allocation3 + $0x73] sm:$0xff] }
 0x267   : >> { %14289 = vmatprep.mubr.msk.f32.mxu1 %vm2235_vm2, %v17391_v6  ;;  %14802 = vmatprep.mubr.msk.f32.mxu0 %vm16414_vm1, %v16413_v52  ;;  %v17760_v6 = vld [vmem:[#allocation3 + $0x98] sm:$0xff] }
 0x26a   : >> { %14290 = vmatmul.mubr.msk.f32.gmra.mrb[54].mxu1 %vm2235_vm2, %v17407_v44  ;;  %14803 = vmatmul.mubr.msk.f32.gmra.mrb[62].mxu0 %vm2235_vm2, %v17750_v16  ;;  %v17765_v44 = vld [vmem:[%s19286_s3 + $0xa8] sm:$0xff] }
 0x26b   : >> { %14294 = vmatprep.mubr.msk.f32.mxu1 %vm2235_vm2, %v17150_v21  ;;  %14805 = vmatprep.mubr.msk.f32.mxu0 %vm16414_vm1, %v16413_v52  ;;  %v17777_v21 = vld [vmem:[#allocation3 + $0xa0] sm:$0xff] }
 0x26e   : >> { %14295 = vmatmul.mubr.msk.f32.vlgmr.msra.gmra.mrb[48].mxu1 %vm2235_vm2, %v17157_v25  ;;  %14806 = vmatmul.mubr.msk.f32.gmra.mrb[64].mxu0 %vm2235_vm2, %v17760_v6  ;;  %v5185_v25 = vld [vmem:[#allocation3 + $0x38] sm:$0xff] }
 0x26f   : >> { %14297 = vmatprep.mubr.msk.f32.mxu1 %vm2235_vm2, %v17161_v5  ;;  %14808 = vmatprep.mubr.msk.f32.mxu0 %vm16414_vm1, %v16413_v52  ;;  %v17807_v5 = vld [vmem:[%s19286_s3 + $0xb0] sm:$0xff] }
 0x270   : >> { %14307 = vmatpush3.msra.mxu1 %v17718_v17 }
 0x271   : >> { %14320 = vmatprep.subr.mxu1 %v17765_v44 }
 0x272   : >> { %14298 = vmatmul.mubr.msk.f32.gmra.mrb[50].mxu1 %vm2235_vm2, %v17168_v35  ;;  %14809 = vmatmul.mubr.msk.f32.gmra.mrb[66].mxu0 %vm2235_vm2, %v17777_v21  ;;  %v17819_v35 = vld [vmem:[#allocation3 + $0x58] sm:$0xff] }
 0x273   : >> { %14300 = vmatprep.mubr.msk.f32.mxu1 %vm2235_vm2, %v17478_v8  ;;  %14813 = vmatprep.mubr.msk.f32.mxu0 %vm16414_vm1, %v16413_v52  ;;  %v17907_v8 = vld [vmem:[%s19286_s3 + $0xc0] sm:$0xff] }
 0x276   : >> { %14301 = vmatmul.mubr.msk.f32.gmra.mrb[52].mxu1 %vm2235_vm2, %v17485_v39  ;;  %14814 = vmatmul.mubr.msk.f32.vlgmr.msra.gmra.mrb[50].mxu0 %vm2235_vm2, %v17227_v10  ;;  %v5332_v10 = vld [vmem:[#allocation3 + $0x39] sm:$0xff] }
 0x277   : >> { %14303 = vmatprep.mubr.msk.f32.mxu1 %vm2235_vm2, %v17489_v40  ;;  %14841 = vmatpush3.msra.mxu0 %v17542_v43  ;;  %v17916_v39 = vld [vmem:[#allocation3 + $0x52] sm:$0xff]  ;;  %v17923_v40 = vld [vmem:[#allocation3 + $0x5a] sm:$0xff] }
 0x278   : >> { %14816 = vmatprep.mubr.msk.f32.mxu0 %vm16414_vm1, %v16413_v52  ;;  %14869 = vmatprep.subr.mxu0 %v16413_v52  ;;  %v5626_v43 = vld [vmem:[#allocation3 + $0x3b] sm:$0xff] }
 0x27a   : >> { %14304 = vmatmul.mubr.msk.f32.gmra.mrb[54].mxu1 %vm2235_vm2, %v17500_v46  ;;  %14817 = vmatmul.mubr.msk.f32.gmra.mrb[52].mxu0 %vm2235_vm2, %v17237_v11  ;;  %v17844_v11 = vld [vmem:[#allocation3 + $0x9a] sm:$0xff]  ;;  %v17935_v46 = vld [vmem:[#allocation3 + $0x83] sm:$0xff] }
 0x27b   : >> { %14308 = vmatprep.mubr.msk.f32.mxu1 %vm2235_vm2, %v5185_v25  ;;  %14819 = vmatprep.mubr.msk.f32.mxu0 %vm16414_vm1, %v16413_v52  ;;  %v18051_v25 = vld [vmem:[#allocation3 + $0x8c] sm:$0xff] }
 0x27e   : >> { %14309 = vmatmul.mubr.msk.f32.vlgmr.msra.gmra.mrb[48].mxu1 %vm2235_vm2, %v17261_v55  ;;  %14820 = vmatmul.mubr.msk.f32.gmra.mrb[54].mxu0 %vm2235_vm2, %v17249_v22  ;;  %v17849_v22 = vld [vmem:[%s19286_s3 + $0xb8] sm:$0xff] }
 0x27f   : >> { %14311 = vmatprep.mubr.msk.f32.mxu1 %vm2235_vm2, %v17269_v41  ;;  %14822 = vmatprep.mubr.msk.f32.mxu0 %vm16414_vm1, %v16413_v52  ;;  %v17863_v55 = vld [vmem:[#allocation3 + $0xa2] sm:$0xff]  ;;  %v17865_v41 = vld [vmem:[#allocation3 + $0x59] sm:$0xff] }
 0x280   : >> { %14321 = vmatpush3.msra.mxu1 %v17765_v44 }
 0x281   : >> { %14334 = vmatprep.subr.mxu1 %v17807_v5 }
 0x282   : >> { %14312 = vmatmul.mubr.msk.f32.gmra.mrb[50].mxu1 %vm2235_vm2, %v17565_v15  ;;  %14823 = vmatmul.mubr.msk.f32.gmra.mrb[56].mxu0 %vm2235_vm2, %v17259_v34  ;;  %v17858_v34 = vld [vmem:[#allocation3 + $0x51] sm:$0xff] }
 0x283   : >> { %14314 = vmatprep.mubr.msk.f32.mxu1 %vm2235_vm2, %v17819_v35  ;;  %14825 = vmatprep.mubr.msk.f32.mxu0 %vm16414_vm1, %v16413_v52 }
 0x286   : >> { %14315 = vmatmul.mubr.msk.f32.gmra.mrb[52].mxu1 %vm2235_vm2, %v17681_v24  ;;  %14826 = vmatmul.mubr.msk.f32.gmra.mrb[58].mxu0 %vm2235_vm2, %v17273_v53  ;;  %v17873_v53 = vld [vmem:[#allocation3 + $0x61] sm:$0xff] }
 0x287   : >> { %14317 = vmatprep.mubr.msk.f32.mxu1 %vm2235_vm2, %v17693_v60  ;;  %14828 = vmatprep.mubr.msk.f32.mxu0 %vm16414_vm1, %v16413_v52 }
 0x28a   : >> { %14318 = vmatmul.mubr.msk.f32.gmra.mrb[54].mxu1 %vm2235_vm2, %v17703_v63  ;;  %14829 = vmatmul.mubr.msk.f32.gmra.mrb[60].mxu0 %vm2235_vm2, %v17283_v59  ;;  %v17877_v59 = vld [vmem:[#allocation3 + $0xaa] sm:$0xff] }
 0x28b   : >> { %14322 = vmatprep.mubr.msk.f32.mxu1 %vm2235_vm2, %v5332_v10  ;;  %14831 = vmatprep.mubr.msk.f32.mxu0 %vm16414_vm1, %v16413_v52  ;;  %v5939_v10 = vld [vmem:[#allocation3 + $0x49] sm:$0xff] }
 0x28e   : >> { %14323 = vmatmul.mubr.msk.f32.vlgmr.msra.gmra.mrb[48].mxu1 %vm2235_vm2, %v17314_v27  ;;  %14832 = vmatmul.mubr.msk.f32.gmra.mrb[62].mxu0 %vm2235_vm2, %v17844_v11  ;;  %v17879_v27 = vld [vmem:[#allocation3 + $0x69] sm:$0xff] }
 0x28f   : >> { %14325 = vmatprep.mubr.msk.f32.mxu1 %vm2235_vm2, %v17322_v38  ;;  %14834 = vmatprep.mubr.msk.f32.mxu0 %vm16414_vm1, %v16413_v52  ;;  %v17887_v38 = vld [vmem:[#allocation3 + $0x71] sm:$0xff] }
 0x290   : >> { %14335 = vmatpush3.msra.mxu1 %v17807_v5 }
 0x291   : >> { %14348 = vmatprep.subr.mxu1 %v17849_v22 }
 0x292   : >> { %14326 = vmatmul.mubr.msk.f32.gmra.mrb[50].mxu1 %vm2235_vm2, %v17858_v34  ;;  %14835 = vmatmul.mubr.msk.f32.gmra.mrb[64].mxu0 %vm2235_vm2, %v17863_v55 }
 0x293   : >> { %14328 = vmatprep.mubr.msk.f32.mxu1 %vm2235_vm2, %v17865_v41  ;;  %14837 = vmatprep.mubr.msk.f32.mxu0 %vm16414_vm1, %v16413_v52 }
 0x296   : >> { %14329 = vmatmul.mubr.msk.f32.gmra.mrb[52].mxu1 %vm2235_vm2, %v17873_v53  ;;  %14838 = vmatmul.mubr.msk.f32.gmra.mrb[66].mxu0 %vm2235_vm2, %v17877_v59 }
 0x297   : >> { %14331 = vmatprep.mubr.msk.f32.mxu1 %vm2235_vm2, %v17879_v27  ;;  %14842 = vmatprep.mubr.msk.f32.mxu0 %vm16414_vm1, %v16413_v52 }
 0x29a   : >> { %14332 = vmatmul.mubr.msk.f32.gmra.mrb[54].mxu1 %vm2235_vm2, %v17887_v38  ;;  %14843 = vmatmul.mubr.msk.f32.vlgmr.msra.gmra.mrb[50].mxu0 %vm2235_vm2, %v17891_v23 }
 0x29b   : >> { %14336 = vmatprep.mubr.msk.f32.mxu1 %vm2235_vm2, %v5479_v26  ;;  %14870 = vmatpush3.msra.mxu0 %v17591_v14  ;;  %v17970_v14 = vld [vmem:[#allocation3 + $0x9b] sm:$0xff] }
 0x29c   : >> { %14845 = vmatprep.mubr.msk.f32.mxu0 %vm16414_vm1, %v16413_v52  ;;  %14898 = vmatprep.subr.mxu0 %v16413_v52  ;;  %v18061_v26 = vld [vmem:[#allocation3 + $0x94] sm:$0xff] }
 0x29e   : >> { %14337 = vmatmul.mubr.msk.f32.vlgmr.msra.gmra.mrb[48].mxu1 %vm2235_vm2, %v17347_v3  ;;  %14846 = vmatmul.mubr.msk.f32.gmra.mrb[52].mxu0 %vm2235_vm2, %v17902_v28  ;;  %v17921_v3 = vld [vmem:[#allocation3 + $0x7b] sm:$0xff] }
 0x29f   : >> { %14339 = vmatprep.mubr.msk.f32.mxu1 %vm2235_vm2, %v17356_v45  ;;  %14848 = vmatprep.mubr.msk.f32.mxu0 %vm16414_vm1, %v16413_v52  ;;  %v17931_v45 = vld [vmem:[#allocation3 + $0x62] sm:$0xff] }
 0x2a0   : >> { %14349 = vmatpush3.msra.mxu1 %v17849_v22 }
 0x2a1   : >> { %14362 = vmatprep.subr.mxu1 %v17907_v8 }
 0x2a2   : >> { %14340 = vmatmul.mubr.msk.f32.gmra.mrb[50].mxu1 %vm2235_vm2, %v17916_v39  ;;  %14849 = vmatmul.mubr.msk.f32.gmra.mrb[54].mxu0 %vm2235_vm2, %v17921_v3 }
 0x2a3   : >> { %14342 = vmatprep.mubr.msk.f32.mxu1 %vm2235_vm2, %v17923_v40  ;;  %14851 = vmatprep.mubr.msk.f32.mxu0 %vm16414_vm1, %v16413_v52 }
 0x2a6   : >> { %14343 = vmatmul.mubr.msk.f32.gmra.mrb[52].mxu1 %vm2235_vm2, %v17931_v45  ;;  %14852 = vmatmul.mubr.msk.f32.gmra.mrb[56].mxu0 %vm2235_vm2, %v17935_v46 }
 0x2a7   : >> { %14345 = vmatprep.mubr.msk.f32.mxu1 %vm2235_vm2, %v17937_v47  ;;  %14854 = vmatprep.mubr.msk.f32.mxu0 %vm16414_vm1, %v16413_v52 }
 0x2aa   : >> { %14346 = vmatmul.mubr.msk.f32.gmra.mrb[54].mxu1 %vm2235_vm2, %v17945_v7  ;;  %14855 = vmatmul.mubr.msk.f32.gmra.mrb[58].mxu0 %vm2235_vm2, %v17949_v20 }
 0x2ab   : >> { %14350 = vmatprep.mubr.msk.f32.mxu1 %vm2235_vm2, %v5626_v43  ;;  %14857 = vmatprep.mubr.msk.f32.mxu0 %vm16414_vm1, %v16413_v52  ;;  %v18071_v43 = vld [vmem:[#allocation3 + $0x9c] sm:$0xff] }
 0x2ae   : >> { %14351 = vmatmul.mubr.msk.f32.vlgmr.msra.gmra.mrb[48].mxu1 %vm2235_vm2, %v17633_v30  ;;  %14858 = vmatmul.mubr.msk.f32.gmra.mrb[60].mxu0 %vm2235_vm2, %v17958_v12 }
 0x2af   : >> { %14353 = vmatprep.mubr.msk.f32.mxu1 %vm2235_vm2, %v17638_v1  ;;  %14860 = vmatprep.mubr.msk.f32.mxu0 %vm16414_vm1, %v16413_v52 }
 0x2b0   : >> { %14363 = vmatpush3.msra.mxu1 %v17907_v8 }
 0x2b1   : >> { %14376 = vmatprep.subr.mxu1 %v16413_v52 }
 0x2b2   : >> { %14354 = vmatmul.mubr.msk.f32.gmra.mrb[50].mxu1 %vm2235_vm2, %v17645_v32  ;;  %14861 = vmatmul.mubr.msk.f32.gmra.mrb[62].mxu0 %vm2235_vm2, %v17970_v14 }
 0x2b3   : >> { %14356 = vmatprep.mubr.msk.f32.mxu1 %vm2235_vm2, %v17649_v49  ;;  %14863 = vmatprep.mubr.msk.f32.mxu0 %vm16414_vm1, %v16413_v52 }
 0x2b6   : >> { %14357 = vmatmul.mubr.msk.f32.gmra.mrb[52].mxu1 %vm2235_vm2, %v17656_v54  ;;  %14864 = vmatmul.mubr.msk.f32.gmra.mrb[64].mxu0 %vm2235_vm2, %v17980_v0 }
 0x2b7   : >> { %14359 = vmatprep.mubr.msk.f32.mxu1 %vm2235_vm2, %v17891_v23  ;;  %14866 = vmatprep.mubr.msk.f32.mxu0 %vm16414_vm1, %v16413_v52 }
 0x2ba   : >> { %14360 = vmatmul.mubr.msk.f32.gmra.mrb[54].mxu1 %vm2235_vm2, %v17902_v28  ;;  %14867 = vmatmul.mubr.msk.f32.gmra.mrb[66].mxu0 %vm2235_vm2, %v17990_v50 }
 0x2bb   : >> { %14364 = vmatprep.mubr.msk.f32.mxu1 %vm2235_vm2, %v5773_v18  ;;  %14871 = vmatprep.mubr.msk.f32.mxu0 %vm16414_vm1, %v16413_v52  ;;  %v18081_v18 = vld [vmem:[#allocation3 + $0xa4] sm:$0xff] }
 0x2be   : >> { %14365 = vmatmul.mubr.msk.f32.vlgmr.msra.gmra.mrb[48].mxu1 %vm2235_vm2, %v17387_v36  ;;  %14872 = vmatmul.mubr.msk.f32.vlgmr.msra.gmra.mrb[50].mxu0 %vm2235_vm2, %v17999_v48  ;;  %v18014_v36 = vld [vmem:[#allocation3 + $0x74] sm:$0xff] }
 0x2bf   : >> { %14367 = vmatprep.mubr.msk.f32.mxu1 %vm2235_vm2, %v17393_v37  ;;  %14899 = vmatpush3.msra.mxu0 %v17625_v57  ;;  %v18025_v37 = vld [vmem:[#allocation3 + $0x64] sm:$0xff] }
 0x2c0   : >> { %14874 = vmatprep.mubr.msk.f32.mxu0 %vm16414_vm1, %v16413_v52  ;;  %14377 = vmatpush3.msra.mxu1 %v12652_v31  ;;  %v18039_v57 = vld [vmem:[#allocation3 + $0x84] sm:$0xff] }
 0x2c1   : >> { %14927 = vmatprep.subr.mxu0 %v16413_v52  ;;  %14405 = vmatprep.subr.mxu1 %v16413_v52  ;;  %v8721_v31 = vld [vmem:[#allocation3 + $0x85] sm:$0xff] }
 0x2c2   : >> { %14368 = vmatmul.mubr.msk.f32.gmra.mrb[50].mxu1 %vm2235_vm2, %v17402_v42  ;;  %14875 = vmatmul.mubr.msk.f32.gmra.mrb[52].mxu0 %vm2235_vm2, %v18014_v36  ;;  %v18029_v42 = vld [vmem:[#allocation3 + $0x7c] sm:$0xff] }
 0x2c3   : >> { %14370 = vmatprep.mubr.msk.f32.mxu1 %vm2235_vm2, %v18016_v29  ;;  %14877 = vmatprep.mubr.msk.f32.mxu0 %vm16414_vm1, %v16413_v52 }
 0x2c6   : >> { %14371 = vmatmul.mubr.msk.f32.gmra.mrb[52].mxu1 %vm2235_vm2, %v18025_v37  ;;  %14878 = vmatmul.mubr.msk.f32.gmra.mrb[54].mxu0 %vm2235_vm2, %v18029_v42 }
 0x2c7   : >> { %14373 = vmatprep.mubr.msk.f32.mxu1 %vm2235_vm2, %v17999_v48  ;;  %14880 = vmatprep.mubr.msk.f32.mxu0 %vm16414_vm1, %v16413_v52 }
 0x2ca   : >> { %14374 = vmatmul.mubr.msk.f32.gmra.mrb[54].mxu1 %vm2235_vm2, %v18014_v36  ;;  %14881 = vmatmul.mubr.msk.f32.gmra.mrb[56].mxu0 %vm2235_vm2, %v18039_v57 }
 0x2cb   : >> { %14378 = vmatprep.mubr.msk.f32.mxu1 %vm16414_vm1, %v16413_v52  ;;  %14883 = vmatprep.mubr.msk.f32.mxu0 %vm16414_vm1, %v16413_v52 }
 0x2ce   : >> { %14379 = vmatmul.mubr.msk.f32.vlgmr.msra.gmra.mrb[56].mxu1 %vm2235_vm2, %v5938_v58  ;;  %14884 = vmatmul.mubr.msk.f32.gmra.mrb[58].mxu0 %vm2235_vm2, %v18051_v25  ;;  %v5928_v58 = vld [vmem:[#allocation3 + $0x40] sm:$0xff] }
 0x2cf   : >> { %14381 = vmatprep.mubr.msk.f32.mxu1 %vm16414_vm1, %v16413_v52  ;;  %14886 = vmatprep.mubr.msk.f32.mxu0 %vm16414_vm1, %v16413_v52 }
 0x2d0   : >> { %14406 = vmatpush3.msra.mxu1 %v5937_v61  ;;  %v12671_v61 = vld [vmem:[%s19286_s3 + $0x10] sm:$0xff] }
 0x2d1   : >> { %14434 = vmatprep.subr.mxu1 %v16413_v52 }
 0x2d2   : >> { %14382 = vmatmul.mubr.msk.f32.gmra.mrb[58].mxu1 %vm2235_vm2, %v5939_v10  ;;  %14887 = vmatmul.mubr.msk.f32.gmra.mrb[60].mxu0 %vm2235_vm2, %v18061_v26  ;;  %v8722_v10 = vld [vmem:[#allocation3 + $0x8d] sm:$0xff] }
 0x2d3   : >> { %14384 = vmatprep.mubr.msk.f32.mxu1 %vm16414_vm1, %v16413_v52  ;;  %14889 = vmatprep.mubr.msk.f32.mxu0 %vm16414_vm1, %v16413_v52 }
 0x2d6   : >> { %14385 = vmatmul.mubr.msk.f32.gmra.mrb[60].mxu1 %vm2235_vm2, %v17858_v34  ;;  %14890 = vmatmul.mubr.msk.f32.gmra.mrb[62].mxu0 %vm2235_vm2, %v18071_v43  ;;  %v18091_v34 = vld [vmem:[#allocation3 + $0xac] sm:$0xff] }
 0x2d7   : >> { %14387 = vmatprep.mubr.msk.f32.mxu1 %vm16414_vm1, %v16413_v52  ;;  %14892 = vmatprep.mubr.msk.f32.mxu0 %vm16414_vm1, %v16413_v52 }
 0x2da   : >> { %14388 = vmatmul.mubr.msk.f32.gmra.mrb[62].mxu1 %vm2235_vm2, %v17865_v41  ;;  %14893 = vmatmul.mubr.msk.f32.gmra.mrb[64].mxu0 %vm2235_vm2, %v18081_v18  ;;  %v8718_v41 = vld [vmem:[#allocation3 + $0x6d] sm:$0xff] }
 0x2db   : >> { %14390 = vmatprep.mubr.msk.f32.mxu1 %vm16414_vm1, %v16413_v52  ;;  %14895 = vmatprep.mubr.msk.f32.mxu0 %vm16414_vm1, %v16413_v52 }
 0x2de   : >> { %14391 = vmatmul.mubr.msk.f32.gmra.mrb[64].mxu1 %vm2235_vm2, %v17873_v53  ;;  %14896 = vmatmul.mubr.msk.f32.gmra.mrb[66].mxu0 %vm2235_vm2, %v18091_v34  ;;  %v8719_v53 = vld [vmem:[#allocation3 + $0x75] sm:$0xff] }
 0x2df   : >> { %14393 = vmatprep.mubr.msk.f32.mxu1 %vm16414_vm1, %v16413_v52  ;;  %14900 = vmatprep.mubr.msk.f32.mxu0 %vm16414_vm1, %v16413_v52 }
 0x2e2   : >> { %14394 = vmatmul.mubr.msk.f32.gmra.mrb[66].mxu1 %vm2235_vm2, %v17879_v27  ;;  %14901 = vmatmul.mubr.msk.f32.vlgmr.msra.gmra.mrb[50].mxu0 %vm2235_vm2, %v8718_v41  ;;  %v18115_v27 = vld [vmem:[#allocation3 + $0x79] sm:$0xff]  ;;  %v5929_v41 = vld [vmem:[#allocation3 + $0x48] sm:$0xff] }
 0x2e3   : >> { %14396 = vmatprep.mubr.msk.f32.mxu1 %vm16414_vm1, %v16413_v52  ;;  %14928 = vmatpush3.msra.mxu0 %v17670_v2  ;;  %v8720_v2 = vld [vmem:[#allocation3 + $0x7d] sm:$0xff] }
 0x2e4   : >> { %14903 = vmatprep.mubr.msk.f32.mxu0 %vm16414_vm1, %v16413_v52  ;;  %14956 = vmatprep.subr.mxu0 %v16413_v52 }
 0x2e6   : >> { %14397 = vmatmul.mubr.msk.f32.gmra.mrb[68].mxu1 %vm2235_vm2, %v17887_v38  ;;  %14904 = vmatmul.mubr.msk.f32.gmra.mrb[52].mxu0 %vm2235_vm2, %v8719_v53  ;;  %v18124_v38 = vld [vmem:[#allocation3 + $0x81] sm:$0xff]  ;;  %v8723_v53 = vld [vmem:[#allocation3 + $0x95] sm:$0xff] }
 0x2e7   : >> { %14399 = vmatprep.mubr.msk.f32.mxu1 %vm16414_vm1, %v16413_v52  ;;  %14906 = vmatprep.mubr.msk.f32.mxu0 %vm16414_vm1, %v16413_v52 }
 0x2ea   : >> { %14400 = vmatmul.mubr.msk.f32.gmra.mrb[70].mxu1 %vm2235_vm2, %v18115_v27  ;;  %14907 = vmatmul.mubr.msk.f32.gmra.mrb[54].mxu0 %vm2235_vm2, %v8720_v2  ;;  %v8724_v2 = vld [vmem:[#allocation3 + $0x9d] sm:$0xff] }
 0x2eb   : >> { %14402 = vmatprep.mubr.msk.f32.mxu1 %vm16414_vm1, %v16413_v52  ;;  %14909 = vmatprep.mubr.msk.f32.mxu0 %vm16414_vm1, %v16413_v52 }
 0x2ee   : >> { %14403 = vmatmul.mubr.msk.f32.gmra.mrb[72].mxu1 %vm2235_vm2, %v18124_v38  ;;  %14910 = vmatmul.mubr.msk.f32.gmra.mrb[56].mxu0 %vm2235_vm2, %v8721_v31  ;;  %v8725_v31 = vld [vmem:[#allocation3 + $0xa5] sm:$0xff] }
 0x2ef   : >> { %14407 = vmatprep.mubr.msk.f32.mxu1 %vm16414_vm1, %v16413_v52  ;;  %14912 = vmatprep.mubr.msk.f32.mxu0 %vm16414_vm1, %v16413_v52 }
 0x2f2   : >> { %14408 = vmatmul.mubr.msk.f32.vlgmr.msra.gmra.mrb[56].mxu1 %vm2235_vm2, %v5928_v58  ;;  %14913 = vmatmul.mubr.msk.f32.gmra.mrb[58].mxu0 %vm2235_vm2, %v8722_v10 }
 0x2f3   : >> { %14410 = vmatprep.mubr.msk.f32.mxu1 %vm16414_vm1, %v16413_v52  ;;  %14915 = vmatprep.mubr.msk.f32.mxu0 %vm16414_vm1, %v16413_v52 }
 0x2f4   : >> { %14435 = vmatpush3.msra.mxu1 %v12671_v61 }
 0x2f5   : >> { %14463 = vmatprep.subr.mxu1 %v16413_v52 }
 0x2f6   : >> { %14411 = vmatmul.mubr.msk.f32.gmra.mrb[58].mxu1 %vm2235_vm2, %v5929_v41  ;;  %14916 = vmatmul.mubr.msk.f32.gmra.mrb[60].mxu0 %vm2235_vm2, %v8723_v53 }
 0x2f7   : >> { %14413 = vmatprep.mubr.msk.f32.mxu1 %vm16414_vm1, %v16413_v52  ;;  %14918 = vmatprep.mubr.msk.f32.mxu0 %vm16414_vm1, %v16413_v52 }
 0x2fa   : >> { %14414 = vmatmul.mubr.msk.f32.gmra.mrb[60].mxu1 %vm2235_vm2, %v17565_v15  ;;  %14919 = vmatmul.mubr.msk.f32.gmra.mrb[62].mxu0 %vm2235_vm2, %v8724_v2  ;;  %v8726_v15 = vld [vmem:[#allocation3 + $0xad] sm:$0xff] }
 0x2fb   : >> { %14416 = vmatprep.mubr.msk.f32.mxu1 %vm16414_vm1, %v16413_v52  ;;  %14921 = vmatprep.mubr.msk.f32.mxu0 %vm16414_vm1, %v16413_v52 }
 0x2fe   : >> { %14417 = vmatmul.mubr.msk.f32.gmra.mrb[62].mxu1 %vm2235_vm2, %v17819_v35  ;;  %14922 = vmatmul.mubr.msk.f32.gmra.mrb[64].mxu0 %vm2235_vm2, %v8725_v31  ;;  %v18172_v35 = vld [vmem:[#allocation3 + $0x6e] sm:$0xff] }
 0x2ff   : >> { %14419 = vmatprep.mubr.msk.f32.mxu1 %vm16414_vm1, %v16413_v52  ;;  %14924 = vmatprep.mubr.msk.f32.mxu0 %vm16414_vm1, %v16413_v52  ;;  %v6846_v31 = vld [vmem:[#allocation3 + $0x4f] sm:$0xff] }
 0x302   : >> { %14420 = vmatmul.mubr.msk.f32.gmra.mrb[64].mxu1 %vm2235_vm2, %v17681_v24  ;;  %14925 = vmatmul.mubr.msk.f32.gmra.mrb[66].mxu0 %vm2235_vm2, %v8726_v15  ;;  %v18184_v24 = vld [vmem:[#allocation3 + $0x76] sm:$0xff] }
 0x303   : >> { %14422 = vmatprep.mubr.msk.f32.mxu1 %vm16414_vm1, %v16413_v52  ;;  %14929 = vmatprep.mubr.msk.f32.mxu0 %vm16414_vm1, %v16413_v52 }
 0x306   : >> { %14423 = vmatmul.mubr.msk.f32.gmra.mrb[66].mxu1 %vm2235_vm2, %v17693_v60  ;;  %14930 = vmatmul.mubr.msk.f32.vlgmr.msra.gmra.mrb[50].mxu0 %vm2235_vm2, %v18172_v35  ;;  %v6222_v60 = vld [vmem:[#allocation3 + $0x42] sm:$0xff] }
 0x307   : >> { %14425 = vmatprep.mubr.msk.f32.mxu1 %vm16414_vm1, %v16413_v52  ;;  %14957 = vmatpush3.msra.mxu0 %v17718_v17  ;;  %v6534_v17 = vld [vmem:[#allocation3 + $0x44] sm:$0xff] }
 0x308   : >> { %14932 = vmatprep.mubr.msk.f32.mxu0 %vm16414_vm1, %v16413_v52  ;;  %14985 = vmatprep.subr.mxu0 %v16413_v52 }
 0x30a   : >> { %14426 = vmatmul.mubr.msk.f32.gmra.mrb[68].mxu1 %vm2235_vm2, %v17703_v63  ;;  %14933 = vmatmul.mubr.msk.f32.gmra.mrb[52].mxu0 %vm2235_vm2, %v18184_v24  ;;  %v18276_v63 = vld [vmem:[#allocation3 + $0x82] sm:$0xff] }
 0x30b   : >> { %14428 = vmatprep.mubr.msk.f32.mxu1 %vm16414_vm1, %v16413_v52  ;;  %14935 = vmatprep.mubr.msk.f32.mxu0 %vm16414_vm1, %v16413_v52 }
 0x30e   : >> { %14429 = vmatmul.mubr.msk.f32.gmra.mrb[70].mxu1 %vm2235_vm2, %v17713_v9  ;;  %14936 = vmatmul.mubr.msk.f32.gmra.mrb[54].mxu0 %vm2235_vm2, %v17529_v13  ;;  %v12681_v13 = vld [vmem:[%s19286_s3 + $0x18] sm:$0xff] }
 0x30f   : >> { %14431 = vmatprep.mubr.msk.f32.mxu1 %vm16414_vm1, %v16413_v52  ;;  %14938 = vmatprep.mubr.msk.f32.mxu0 %vm16414_vm1, %v16413_v52 }
 0x312   : >> { %14432 = vmatmul.mubr.msk.f32.gmra.mrb[72].mxu1 %vm2235_vm2, %v17730_v4  ;;  %14939 = vmatmul.mubr.msk.f32.gmra.mrb[56].mxu0 %vm2235_vm2, %v17537_v19  ;;  %v6223_v19 = vld [vmem:[#allocation3 + $0x4a] sm:$0xff] }
 0x313   : >> { %14436 = vmatprep.mubr.msk.f32.mxu1 %vm16414_vm1, %v16413_v52  ;;  %14941 = vmatprep.mubr.msk.f32.mxu0 %vm16414_vm1, %v16413_v52 }
 0x316   : >> { %14437 = vmatmul.mubr.msk.f32.vlgmr.msra.gmra.mrb[56].mxu1 %vm2235_vm2, %v6222_v60  ;;  %14942 = vmatmul.mubr.msk.f32.gmra.mrb[58].mxu0 %vm2235_vm2, %v17553_v51  ;;  %v8881_v51 = vld [vmem:[#allocation3 + $0xa6] sm:$0xff]  ;;  %v18500_v60 = vld [vmem:[%s19287_s4] ss:$0 sm:$0xff] }
 0x317   : >> { %14439 = vmatprep.mubr.msk.f32.mxu1 %vm16414_vm1, %v16413_v52  ;;  %14944 = vmatprep.mubr.msk.f32.mxu0 %vm16414_vm1, %v16413_v52 }
 0x318   : >> { %14464 = vmatpush3.msra.mxu1 %v12681_v13 }
 0x319   : >> { %14492 = vmatprep.subr.mxu1 %v16413_v52 }
 0x31a   : >> { %14440 = vmatmul.mubr.msk.f32.gmra.mrb[58].mxu1 %vm2235_vm2, %v6223_v19  ;;  %14945 = vmatmul.mubr.msk.f32.gmra.mrb[60].mxu0 %vm2235_vm2, %v17563_v56  ;;  %v8882_v56 = vld [vmem:[#allocation3 + $0xae] sm:$0xff] }
 0x31b   : >> { %14442 = vmatprep.mubr.msk.f32.mxu1 %vm16414_vm1, %v16413_v52  ;;  %14947 = vmatprep.mubr.msk.f32.mxu0 %vm16414_vm1, %v16413_v52 }
 0x31e   : >> { %14443 = vmatmul.mubr.msk.f32.gmra.mrb[60].mxu1 %vm2235_vm2, %v17916_v39  ;;  %14948 = vmatmul.mubr.msk.f32.gmra.mrb[62].mxu0 %vm2235_vm2, %v17575_v62  ;;  %v18266_v62 = vld [vmem:[#allocation3 + $0x7a] sm:$0xff]  ;;  %v6690_v39 = vld [vmem:[#allocation3 + $0x4e] sm:$0xff] }
 0x31f   : >> { %14445 = vmatprep.mubr.msk.f32.mxu1 %vm16414_vm1, %v16413_v52  ;;  %14950 = vmatprep.mubr.msk.f32.mxu0 %vm16414_vm1, %v16413_v52 }
 0x322   : >> { %14446 = vmatmul.mubr.msk.f32.gmra.mrb[62].mxu1 %vm2235_vm2, %v17923_v40  ;;  %14951 = vmatmul.mubr.msk.f32.gmra.mrb[64].mxu0 %vm2235_vm2, %v8881_v51  ;;  %v12711_v40 = vld [vmem:[%s19286_s3 + $0x30] sm:$0xff] }
 0x323   : >> { %14448 = vmatprep.mubr.msk.f32.mxu1 %vm16414_vm1, %v16413_v52  ;;  %14953 = vmatprep.mubr.msk.f32.mxu0 %vm16414_vm1, %v16413_v52 }
 0x326   : >> { %14449 = vmatmul.mubr.msk.f32.gmra.mrb[64].mxu1 %vm2235_vm2, %v17931_v45  ;;  %14954 = vmatmul.mubr.msk.f32.gmra.mrb[66].mxu0 %vm2235_vm2, %v8882_v56  ;;  %v6691_v45 = vld [vmem:[#allocation3 + $0x56] sm:$0xff] }
 0x327   : >> { %14451 = vmatprep.mubr.msk.f32.mxu1 %vm16414_vm1, %v16413_v52  ;;  %14958 = vmatprep.mubr.msk.f32.mxu0 %vm16414_vm1, %v16413_v52 }
 0x32a   : >> { %14452 = vmatmul.mubr.msk.f32.gmra.mrb[66].mxu1 %vm2235_vm2, %v17937_v47  ;;  %14959 = vmatmul.mubr.msk.f32.vlgmr.msra.gmra.mrb[50].mxu0 %vm2235_vm2, %v17713_v9  ;;  %v12691_v9 = vld [vmem:[%s19286_s3 + $0x20] sm:$0xff]  ;;  %v6693_v47 = vld [vmem:[#allocation3 + $0x66] sm:$0xff] }
 0x32b   : >> { %14454 = vmatprep.mubr.msk.f32.mxu1 %vm16414_vm1, %v16413_v52  ;;  %14986 = vmatpush3.msra.mxu0 %v17765_v44  ;;  %v6536_v44 = vld [vmem:[#allocation3 + $0x54] sm:$0xff] }
 0x32c   : >> { %14961 = vmatprep.mubr.msk.f32.mxu0 %vm16414_vm1, %v16413_v52  ;;  %15014 = vmatprep.subr.mxu0 %v16413_v52 }
 0x32e   : >> { %14455 = vmatmul.mubr.msk.f32.gmra.mrb[68].mxu1 %vm2235_vm2, %v17945_v7  ;;  %14962 = vmatmul.mubr.msk.f32.gmra.mrb[52].mxu0 %vm2235_vm2, %v17730_v4  ;;  %v12701_v4 = vld [vmem:[%s19286_s3 + $0x28] sm:$0xff] }
 0x32f   : >> { %14457 = vmatprep.mubr.msk.f32.mxu1 %vm16414_vm1, %v16413_v52  ;;  %14964 = vmatprep.mubr.msk.f32.mxu0 %vm16414_vm1, %v16413_v52 }
 0x332   : >> { %14458 = vmatmul.mubr.msk.f32.gmra.mrb[70].mxu1 %vm2235_vm2, %v18266_v62  ;;  %14965 = vmatmul.mubr.msk.f32.gmra.mrb[54].mxu0 %vm2235_vm2, %v17740_v33  ;;  %v9190_v33 = vld [vmem:[#allocation3 + $0x99] sm:$0xff] }
 0x333   : >> { %14460 = vmatprep.mubr.msk.f32.mxu1 %vm16414_vm1, %v16413_v52  ;;  %14967 = vmatprep.mubr.msk.f32.mxu0 %vm16414_vm1, %v16413_v52 }
 0x336   : >> { %14461 = vmatmul.mubr.msk.f32.gmra.mrb[72].mxu1 %vm2235_vm2, %v18276_v63  ;;  %14968 = vmatmul.mubr.msk.f32.gmra.mrb[56].mxu0 %vm2235_vm2, %v17750_v16  ;;  %v6535_v16 = vld [vmem:[#allocation3 + $0x4c] sm:$0xff] }
 0x337   : >> { %14465 = vmatprep.mubr.msk.f32.mxu1 %vm16414_vm1, %v16413_v52  ;;  %14970 = vmatprep.mubr.msk.f32.mxu0 %vm16414_vm1, %v16413_v52 }
 0x33a   : >> { %14466 = vmatmul.mubr.msk.f32.vlgmr.msra.gmra.mrb[56].mxu1 %vm2235_vm2, %v17633_v30  ;;  %14971 = vmatmul.mubr.msk.f32.gmra.mrb[58].mxu0 %vm2235_vm2, %v17760_v6  ;;  %v9036_v30 = vld [vmem:[#allocation3 + $0xa8] sm:$0xff] }
 0x33b   : >> { %14468 = vmatprep.mubr.msk.f32.mxu1 %vm16414_vm1, %v16413_v52  ;;  %14973 = vmatprep.mubr.msk.f32.mxu0 %vm16414_vm1, %v16413_v52  ;;  %v9191_v6 = vld [vmem:[#allocation3 + $0xa1] sm:$0xff] }
 0x33c   : >> { %14493 = vmatpush3.msra.mxu1 %v12691_v9  ;;  %v6848_v9 = vld [vmem:[#allocation3 + $0x5f] sm:$0xff] }
 0x33d   : >> { %14521 = vmatprep.subr.mxu1 %v16413_v52 }
 0x33e   : >> { %14469 = vmatmul.mubr.msk.f32.gmra.mrb[58].mxu1 %vm2235_vm2, %v17638_v1  ;;  %14974 = vmatmul.mubr.msk.f32.gmra.mrb[60].mxu0 %vm2235_vm2, %v17777_v21  ;;  %v9037_v1 = vld [vmem:[#allocation3 + $0xb0] sm:$0xff] }
 0x33f   : >> { %14471 = vmatprep.mubr.msk.f32.mxu1 %vm16414_vm1, %v16413_v52  ;;  %14976 = vmatprep.mubr.msk.f32.mxu0 %vm16414_vm1, %v16413_v52  ;;  %v9192_v21 = vld [vmem:[#allocation3 + $0xa9] sm:$0xff] }
 0x342   : >> { %14472 = vmatmul.mubr.msk.f32.gmra.mrb[60].mxu1 %vm2235_vm2, %v17645_v32  ;;  %14977 = vmatmul.mubr.msk.f32.gmra.mrb[62].mxu0 %vm2235_vm2, %v9036_v30  ;;  %v9038_v32 = vld [vmem:[#allocation3 + $0xb8] sm:$0xff] }
 0x343   : >> { %14474 = vmatprep.mubr.msk.f32.mxu1 %vm16414_vm1, %v16413_v52  ;;  %14979 = vmatprep.mubr.msk.f32.mxu0 %vm16414_vm1, %v16413_v52 }
 0x346   : >> { %14475 = vmatmul.mubr.msk.f32.gmra.mrb[62].mxu1 %vm2235_vm2, %v17649_v49  ;;  %14980 = vmatmul.mubr.msk.f32.gmra.mrb[64].mxu0 %vm2235_vm2, %v9037_v1  ;;  %v9188_v49 = vld [vmem:[#allocation3 + $0x89] sm:$0xff] }
 0x347   : >> { %14477 = vmatprep.mubr.msk.f32.mxu1 %vm16414_vm1, %v16413_v52  ;;  %14982 = vmatprep.mubr.msk.f32.mxu0 %vm16414_vm1, %v16413_v52  ;;  %v6849_v1 = vld [vmem:[#allocation3 + $0x67] sm:$0xff] }
 0x34a   : >> { %14478 = vmatmul.mubr.msk.f32.gmra.mrb[64].mxu1 %vm2235_vm2, %v17656_v54  ;;  %14983 = vmatmul.mubr.msk.f32.gmra.mrb[66].mxu0 %vm2235_vm2, %v9038_v32  ;;  %v9189_v54 = vld [vmem:[#allocation3 + $0x91] sm:$0xff] }
 0x34b   : >> { %14480 = vmatprep.mubr.msk.f32.mxu1 %vm16414_vm1, %v16413_v52  ;;  %14987 = vmatprep.mubr.msk.f32.mxu0 %vm16414_vm1, %v16413_v52 }
 0x34e   : >> { %14481 = vmatmul.mubr.msk.f32.gmra.mrb[66].mxu1 %vm2235_vm2, %v17891_v23  ;;  %14988 = vmatmul.mubr.msk.f32.vlgmr.msra.gmra.mrb[50].mxu0 %vm2235_vm2, %v18115_v27  ;;  %v9194_v23 = vld [vmem:[#allocation3 + $0xb9] sm:$0xff] }
 0x34f   : >> { %14483 = vmatprep.mubr.msk.f32.mxu1 %vm16414_vm1, %v16413_v52  ;;  %15015 = vmatpush3.msra.mxu0 %v17807_v5  ;;  %v9193_v5 = vld [vmem:[#allocation3 + $0xb1] sm:$0xff]  ;;  %v6696_v27 = vld [vmem:[#allocation3 + $0x7e] sm:$0xff] }
 0x350   : >> { %14990 = vmatprep.mubr.msk.f32.mxu0 %vm16414_vm1, %v16413_v52  ;;  %15043 = vmatprep.subr.mxu0 %v16413_v52 }
 0x352   : >> { %14484 = vmatmul.mubr.msk.f32.gmra.mrb[68].mxu1 %vm2235_vm2, %v17902_v28  ;;  %14991 = vmatmul.mubr.msk.f32.gmra.mrb[52].mxu0 %vm2235_vm2, %v18124_v38  ;;  %v9345_v28 = vld [vmem:[#allocation3 + $0x92] sm:$0xff] }
 0x353   : >> { %14486 = vmatprep.mubr.msk.f32.mxu1 %vm16414_vm1, %v16413_v52  ;;  %14993 = vmatprep.mubr.msk.f32.mxu0 %vm16414_vm1, %v16413_v52 }
 0x356   : >> { %14487 = vmatmul.mubr.msk.f32.gmra.mrb[70].mxu1 %vm2235_vm2, %v17921_v3  ;;  %14994 = vmatmul.mubr.msk.f32.gmra.mrb[54].mxu0 %vm2235_vm2, %v9188_v49  ;;  %v9505_v49 = vld [vmem:[#allocation3 + $0xb3] sm:$0xff] }
 0x357   : >> { %14489 = vmatprep.mubr.msk.f32.mxu1 %vm16414_vm1, %v16413_v52  ;;  %14996 = vmatprep.mubr.msk.f32.mxu0 %vm16414_vm1, %v16413_v52 }
 0x35a   : >> { %14490 = vmatmul.mubr.msk.f32.gmra.mrb[72].mxu1 %vm2235_vm2, %v17935_v46  ;;  %14997 = vmatmul.mubr.msk.f32.gmra.mrb[56].mxu0 %vm2235_vm2, %v9189_v54  ;;  %v6850_v54 = vld [vmem:[#allocation3 + $0x6f] sm:$0xff] }
 0x35b   : >> { %14494 = vmatprep.mubr.msk.f32.mxu1 %vm16414_vm1, %v16413_v52  ;;  %14999 = vmatprep.mubr.msk.f32.mxu0 %vm16414_vm1, %v16413_v52 }
 0x35e   : >> { %14495 = vmatmul.mubr.msk.f32.vlgmr.msra.gmra.mrb[56].mxu1 %vm2235_vm2, %v6534_v17  ;;  %15000 = vmatmul.mubr.msk.f32.gmra.mrb[58].mxu0 %vm2235_vm2, %v9190_v33  ;;  %v6851_v33 = vld [vmem:[#allocation3 + $0x77] sm:$0xff] }
 0x35f   : >> { %14497 = vmatprep.mubr.msk.f32.mxu1 %vm16414_vm1, %v16413_v52  ;;  %15002 = vmatprep.mubr.msk.f32.mxu0 %vm16414_vm1, %v16413_v52 }
 0x360   : >> { %14522 = vmatpush3.msra.mxu1 %v12701_v4  ;;  %v9506_v4 = vld [vmem:[#allocation3 + $0xbb] sm:$0xff] }
 0x361   : >> { %14550 = vmatprep.subr.mxu1 %v16413_v52 }
 0x362   : >> { %14498 = vmatmul.mubr.msk.f32.gmra.mrb[58].mxu1 %vm2235_vm2, %v6535_v16  ;;  %15003 = vmatmul.mubr.msk.f32.gmra.mrb[60].mxu0 %vm2235_vm2, %v9191_v6  ;;  %v6852_v16 = vld [vmem:[#allocation3 + $0x7f] sm:$0xff]  ;;  %v6853_v6 = vld [vmem:[#allocation3 + $0x87] sm:$0xff] }
 0x363   : >> { %14500 = vmatprep.mubr.msk.f32.mxu1 %vm16414_vm1, %v16413_v52  ;;  %15005 = vmatprep.mubr.msk.f32.mxu0 %vm16414_vm1, %v16413_v52 }
 0x366   : >> { %14501 = vmatmul.mubr.msk.f32.gmra.mrb[60].mxu1 %vm2235_vm2, %v6536_v44  ;;  %15006 = vmatmul.mubr.msk.f32.gmra.mrb[62].mxu0 %vm2235_vm2, %v9192_v21 }
 0x367   : >> { %14503 = vmatprep.mubr.msk.f32.mxu1 %vm16414_vm1, %v16413_v52  ;;  %15008 = vmatprep.mubr.msk.f32.mxu0 %vm16414_vm1, %v16413_v52 }
 0x36a   : >> { %14504 = vmatmul.mubr.msk.f32.gmra.mrb[62].mxu1 %vm2235_vm2, %v18016_v29  ;;  %15009 = vmatmul.mubr.msk.f32.gmra.mrb[64].mxu0 %vm2235_vm2, %v9193_v5 }
 0x36b   : >> { %14506 = vmatprep.mubr.msk.f32.mxu1 %vm16414_vm1, %v16413_v52  ;;  %15011 = vmatprep.mubr.msk.f32.mxu0 %vm16414_vm1, %v16413_v52 }
 0x36e   : >> { %14507 = vmatmul.mubr.msk.f32.gmra.mrb[64].mxu1 %vm2235_vm2, %v18025_v37  ;;  %15012 = vmatmul.mubr.msk.f32.gmra.mrb[66].mxu0 %vm2235_vm2, %v9194_v23 }
 0x36f   : >> { %14509 = vmatprep.mubr.msk.f32.mxu1 %vm16414_vm1, %v16413_v52  ;;  %15016 = vmatprep.mubr.msk.f32.mxu0 %vm16414_vm1, %v16413_v52 }
 0x372   : >> { %14510 = vmatmul.mubr.msk.f32.gmra.mrb[66].mxu1 %vm2235_vm2, %v17999_v48  ;;  %15017 = vmatmul.mubr.msk.f32.vlgmr.msra.gmra.mrb[50].mxu0 %vm2235_vm2, %v18266_v62  ;;  %v9350_v48 = vld [vmem:[#allocation3 + $0xba] sm:$0xff] }
 0x373   : >> { %14512 = vmatprep.mubr.msk.f32.mxu1 %vm16414_vm1, %v16413_v52  ;;  %15044 = vmatpush3.msra.mxu0 %v17849_v22  ;;  %v9344_v22 = vld [vmem:[#allocation3 + $0x8a] sm:$0xff]  ;;  %v6847_v62 = vld [vmem:[#allocation3 + $0x57] sm:$0xff] }
 0x374   : >> { %15019 = vmatprep.mubr.msk.f32.mxu0 %vm16414_vm1, %v16413_v52  ;;  %15072 = vmatprep.subr.mxu0 %v16413_v52 }
 0x376   : >> { %14513 = vmatmul.mubr.msk.f32.gmra.mrb[68].mxu1 %vm2235_vm2, %v18014_v36  ;;  %15020 = vmatmul.mubr.msk.f32.gmra.mrb[52].mxu0 %vm2235_vm2, %v18276_v63 }
 0x377   : >> { %14515 = vmatprep.mubr.msk.f32.mxu1 %vm16414_vm1, %v16413_v52  ;;  %15022 = vmatprep.mubr.msk.f32.mxu0 %vm16414_vm1, %v16413_v52 }
 0x37a   : >> { %14516 = vmatmul.mubr.msk.f32.gmra.mrb[70].mxu1 %vm2235_vm2, %v18029_v42  ;;  %15023 = vmatmul.mubr.msk.f32.gmra.mrb[54].mxu0 %vm2235_vm2, %v9344_v22 }
 0x37b   : >> { %14518 = vmatprep.mubr.msk.f32.mxu1 %vm16414_vm1, %v16413_v52  ;;  %15025 = vmatprep.mubr.msk.f32.mxu0 %vm16414_vm1, %v16413_v52 }
 0x37e   : >> { %14519 = vmatmul.mubr.msk.f32.gmra.mrb[72].mxu1 %vm2235_vm2, %v18039_v57  ;;  %15026 = vmatmul.mubr.msk.f32.gmra.mrb[56].mxu0 %vm2235_vm2, %v9345_v28 }
 0x37f   : >> { %14523 = vmatprep.mubr.msk.f32.mxu1 %vm16414_vm1, %v16413_v52  ;;  %15028 = vmatprep.mubr.msk.f32.mxu0 %vm16414_vm1, %v16413_v52 }
 0x382   : >> { %14524 = vmatmul.mubr.msk.f32.vlgmr.msra.gmra.mrb[56].mxu1 %vm2235_vm2, %v6690_v39  ;;  %15029 = vmatmul.mubr.msk.f32.gmra.mrb[58].mxu0 %vm2235_vm2, %v17844_v11  ;;  %v6692_v11 = vld [vmem:[#allocation3 + $0x5e] sm:$0xff] }
 0x383   : >> { %14526 = vmatprep.mubr.msk.f32.mxu1 %vm16414_vm1, %v16413_v52  ;;  %15031 = vmatprep.mubr.msk.f32.mxu0 %vm16414_vm1, %v16413_v52 }
 0x384   : >> { %14551 = vmatpush3.msra.mxu1 %v12711_v40 }
 0x386   : >> { %14527 = vmatmul.mubr.msk.f32.gmra.mrb[58].mxu1 %vm2235_vm2, %v6691_v45  ;;  %15032 = vmatmul.mubr.msk.f32.gmra.mrb[60].mxu0 %vm2235_vm2, %v17863_v55  ;;  %v9349_v55 = vld [vmem:[#allocation3 + $0xb2] sm:$0xff] }
 0x387   : >> { %14529 = vmatprep.mubr.msk.f32.mxu1 %vm16414_vm1, %v16413_v52  ;;  %15034 = vmatprep.mubr.msk.f32.mxu0 %vm16414_vm1, %v16413_v52 }
 0x38a   : >> { %14530 = vmatmul.mubr.msk.f32.gmra.mrb[60].mxu1 %vm2235_vm2, %v6692_v11  ;;  %15035 = vmatmul.mubr.msk.f32.gmra.mrb[62].mxu0 %vm2235_vm2, %v17877_v59 }
 0x38b   : >> { %14532 = vmatprep.mubr.msk.f32.mxu1 %vm16414_vm1, %v16413_v52  ;;  %15037 = vmatprep.mubr.msk.f32.mxu0 %vm16414_vm1, %v16413_v52 }
 0x38e   : >> { %14533 = vmatmul.mubr.msk.f32.gmra.mrb[62].mxu1 %vm2235_vm2, %v6693_v47  ;;  %15038 = vmatmul.mubr.msk.f32.gmra.mrb[64].mxu0 %vm2235_vm2, %v9349_v55 }
 0x38f   : >> { %14535 = vmatprep.mubr.msk.f32.mxu1 %vm16414_vm1, %v16413_v52  ;;  %15040 = vmatprep.mubr.msk.f32.mxu0 %vm16414_vm1, %v16413_v52 }
 0x391   : >> { %v14366_v7 = vpop.f32.mrb[48].mxu1 }
 0x392   : >> { %5921 = vst [vmem:[#allocation4 + $0x8] sm:$0xff] %v14366_v7  ;;  %v5873_v59 = vpop.f32.mrb[49].mxu1  ;;  %14536 = vmatmul.mubr.msk.f32.gmra.mrb[64].mxu1 %vm2235_vm2, %v18172_v35  ;;  %15041 = vmatmul.mubr.msk.f32.gmra.mrb[66].mxu0 %vm2235_vm2, %v9350_v48 }
 0x393   : >> { %14538 = vmatprep.mubr.msk.f32.mxu1 %vm16414_vm1, %v16413_v52  ;;  %15045 = vmatprep.mubr.msk.f32.mxu0 %vm16414_vm1, %v16413_v52 }
 0x395   : >> { %v14369_v36 = vpop.f32.mrb[50].mxu1 }
 0x396   : >> { %5923 = vst [vmem:[#allocation4 + $0x18] sm:$0xff] %v14369_v36  ;;  %v5883_v29 = vpop.f32.mrb[51].mxu1  ;;  %14539 = vmatmul.mubr.msk.f32.gmra.mrb[66].mxu1 %vm2235_vm2, %v18184_v24  ;;  %15046 = vmatmul.mubr.msk.f32.vlgmr.msra.gmra.mrb[50].mxu0 %vm2235_vm2, %v17921_v3  ;;  %v6697_v3 = vld [vmem:[#allocation3 + $0x86] sm:$0xff] }
 0x397   : >> { %5922 = vst [vmem:[#allocation4 + $0x10] sm:$0xff] %v5883_v29  ;;  %14541 = vmatprep.mubr.msk.f32.mxu1 %vm16414_vm1, %v16413_v52  ;;  %15073 = vmatpush3.msra.mxu0 %v17907_v8 }
 0x398   : >> { %15048 = vmatprep.mubr.msk.f32.mxu0 %vm16414_vm1, %v16413_v52 }
 0x399   : >> { %v14372_v37 = vpop.f32.mrb[52].mxu1  ;;  %v9820_v58 = vld [vmem:[#allocation4 + $0x8] sm:$0x3] }
 0x39a   : >> { %5925 = vst [vmem:[#allocation4 + $0x28] sm:$0xff] %v14372_v37  ;;  %v5893_v38 = vpop.f32.mrb[53].mxu1  ;;  %14542 = vmatmul.mubr.msk.f32.gmra.mrb[68].mxu1 %vm2235_vm2, %v6696_v27  ;;  %15049 = vmatmul.mubr.msk.f32.gmra.mrb[52].mxu0 %vm2235_vm2, %v17935_v46  ;;  %v6698_v46 = vld [vmem:[#allocation3 + $0x8e] sm:$0xff] }
 0x39b   : >> { %5924 = vst [vmem:[#allocation4 + $0x20] sm:$0xff] %v5893_v38  ;;  %14544 = vmatprep.mubr.msk.f32.mxu1 %vm16414_vm1, %v16413_v52  ;;  %15051 = vmatprep.mubr.msk.f32.mxu0 %vm16414_vm1, %v16413_v52 }
 0x39d   : >> { %v18480_v8 = vpop.f32.mrb[54].mxu1 }
 0x39e   : >> { %v9821_v61 = vld [vmem:[#allocation4 + $0xe] sm:$0xff]  ;;  %v9822_v10 = vld [vmem:[#allocation4 + $0x16] sm:$0x3]  ;;  %v5903_v41 = vpop.f32.mrb[55].mxu1  ;;  %14545 = vmatmul.mubr.msk.f32.gmra.mrb[70].mxu1 %vm2235_vm2, %v6697_v3  ;;  %15052 = vmatmul.mubr.msk.f32.gmra.mrb[54].mxu0 %vm2235_vm2, %v17949_v20 }
 0x39f   : >> { %v9823_v53 = vmax.f32 %v5873_v59, %v9821_v61  ;;  %v9824_v2 = vmax.f32 %v9820_v58, %v9822_v10  ;;  %5926 = vst [vmem:[#allocation4 + $0x30] sm:$0xff] %v5903_v41  ;;  %14547 = vmatprep.mubr.msk.f32.mxu1 %vm16414_vm1, %v16413_v52  ;;  %15054 = vmatprep.mubr.msk.f32.mxu0 %vm16414_vm1, %v16413_v52 }
 0x3a1   : >> { %9825 = vst [vmem:[#allocation5] sm:$0xff] %v9823_v53  ;;  %9826 = vst [vmem:[#allocation5 + $0x8] sm:$0x3] %v9824_v2 }
 0x3a2   : >> { %14548 = vmatmul.mubr.msk.f32.gmra.mrb[72].mxu1 %vm2235_vm2, %v6698_v46  ;;  %15055 = vmatmul.mubr.msk.f32.gmra.mrb[56].mxu0 %vm2235_vm2, %v17958_v12  ;;  %v9844_v20 = vld [vmem:[#allocation4 + $0x1c] sm:$0xff]  ;;  %v9845_v15 = vld [vmem:[#allocation4 + $0x24] sm:$0x3] }
 0x3a3   : >> { %14552 = vmatprep.mubr.msk.f32.mxu1 %vm16414_vm1, %v16413_v52  ;;  %15057 = vmatprep.mubr.msk.f32.mxu0 %vm16414_vm1, %v16413_v52 }
 0x3a6   : >> { %v9846_v35 = vld [vmem:[#allocation4 + $0x2a] sm:$0xff]  ;;  %v9847_v24 = vld [vmem:[#allocation4 + $0x32] sm:$0x3]  ;;  %14553 = vmatmul.mubr.msk.f32.vlgmr.msra.gmra.mrb[56].mxu1 %vm2235_vm2, %v6846_v31  ;;  %15058 = vmatmul.mubr.msk.f32.gmra.mrb[58].mxu0 %vm2235_vm2, %v17970_v14 }
 0x3a7   : >> { %v9848_v12 = vmax.f32 %v9844_v20, %v9846_v35  ;;  %v9849_v13 = vmax.f32 %v9845_v15, %v9847_v24  ;;  %14555 = vmatprep.mubr.msk.f32.mxu1 %vm16414_vm1, %v16413_v52  ;;  %15060 = vmatprep.mubr.msk.f32.mxu0 %vm16414_vm1, %v16413_v52 }
 0x3a8   : >> { %v9827_v19 = vld [vmem:[#allocation5] ss:$2 sm:$0x1f]  ;;  %v9829_v51 = vld [vmem:[#allocation5 + $0x1] ss:$2 sm:$0x1f] }
 0x3a9   : >> { %v9830_v56 = vmax.f32 %v9827_v19, %v9829_v51  ;;  %9850 = vst [vmem:[#allocation5] sm:$0xff] %v9848_v12  ;;  %9851 = vst [vmem:[#allocation5 + $0x8] sm:$0x3] %v9849_v13 }
 0x3aa   : >> { %14556 = vmatmul.mubr.msk.f32.gmra.mrb[58].mxu1 %vm2235_vm2, %v6847_v62  ;;  %15061 = vmatmul.mubr.msk.f32.gmra.mrb[60].mxu0 %vm2235_vm2, %v17980_v0 }
 0x3ab   : >> { %v9838_v63 = vadd.f32 %v18500_v60, %v9830_v56  ;;  %14558 = vmatprep.mubr.msk.f32.mxu1 %vm16414_vm1, %v16413_v52  ;;  %15063 = vmatprep.mubr.msk.f32.mxu0 %vm16414_vm1, %v16413_v52 }
 0x3ad   : >> { %v9839_v14 = vmax.f32 %v9838_v63, 0.0 }
 0x3ae   : >> { %14559 = vmatmul.mubr.msk.f32.gmra.mrb[60].mxu1 %vm2235_vm2, %v6848_v9  ;;  %15064 = vmatmul.mubr.msk.f32.gmra.mrb[62].mxu0 %vm2235_vm2, %v17990_v50 }
 0x3af   : >> { %9843 = vst.msk [vmem:[%s18518_s30] sm:$0x1f] %vm9842_vm4, %v9839_v14  ;;  %14561 = vmatprep.mubr.msk.f32.mxu1 %vm16414_vm1, %v16413_v52  ;;  %15066 = vmatprep.mubr.msk.f32.mxu0 %vm16414_vm1, %v16413_v52 }
 0x3b0   : >> { %v9852_v0 = vld [vmem:[#allocation5] ss:$2 sm:$0x1f]  ;;  %v9853_v30 = vld [vmem:[#allocation5 + $0x1] ss:$2 sm:$0x1f] }
 0x3b1   : >> { %v9854_v32 = vmax.f32 %v9852_v0, %v9853_v30 }
 0x3b2   : >> { %14562 = vmatmul.mubr.msk.f32.gmra.mrb[62].mxu1 %vm2235_vm2, %v6849_v1  ;;  %15067 = vmatmul.mubr.msk.f32.gmra.mrb[64].mxu0 %vm2235_vm2, %v9505_v49 }
 0x3b3   : >> { %14564 = vmatprep.mubr.msk.f32.mxu1 %vm16414_vm1, %v16413_v52  ;;  %v9862_v50 = vadd.f32 %v18500_v60, %v9854_v32  ;;  %15069 = vmatprep.mubr.msk.f32.mxu0 %vm16414_vm1, %v16413_v52 }
 0x3b5   : >> { %v9863_v17 = vmax.f32 %v9862_v50, 0.0 }
 0x3b6   : >> { %14565 = vmatmul.mubr.msk.f32.gmra.mrb[64].mxu1 %vm2235_vm2, %v6850_v54  ;;  %15070 = vmatmul.mubr.msk.f32.gmra.mrb[66].mxu0 %vm2235_vm2, %v9506_v4 }
 0x3b7   : >> { %14567 = vmatprep.mubr.msk.f32.mxu1 %vm16414_vm1, %v16413_v52  ;;  %9864 = vst.msk [vmem:[%s18518_s30 + $0x5] sm:$0x1f] %vm9842_vm4, %v9863_v17  ;;  %15074 = vmatprep.mubr.msk.f32.mxu0 %vm16414_vm1, %v16413_v52 }
 0x3ba   : >> { %14568 = vmatmul.mubr.msk.f32.gmra.mrb[66].mxu1 %vm2235_vm2, %v6851_v33  ;;  %15075 = vmatmul.mubr.msk.f32.vlgmr.msra.gmra.mrb[50].mxu0 %vm2235_vm2, %v18029_v42  ;;  %v6854_v42 = vld [vmem:[#allocation3 + $0x8f] sm:$0xff] }
 0x3bb   : >> { %14570 = vmatprep.mubr.msk.f32.mxu1 %vm16414_vm1, %v16413_v52  ;;  %15077 = vmatprep.mubr.msk.f32.mxu0 %vm16414_vm1, %v16413_v52 }
 0x3be   : >> { %14571 = vmatmul.mubr.msk.f32.gmra.mrb[68].mxu1 %vm2235_vm2, %v6852_v16  ;;  %15078 = vmatmul.mubr.msk.f32.gmra.mrb[52].mxu0 %vm2235_vm2, %v18039_v57  ;;  %v9661_v57 = vld [vmem:[#allocation3 + $0xb4] sm:$0xff] }
 0x3bf   : >> { %14573 = vmatprep.mubr.msk.f32.mxu1 %vm16414_vm1, %v16413_v52  ;;  %15080 = vmatprep.mubr.msk.f32.mxu0 %vm16414_vm1, %v16413_v52 }
 0x3c2   : >> { %14574 = vmatmul.mubr.msk.f32.gmra.mrb[70].mxu1 %vm2235_vm2, %v6853_v6  ;;  %15081 = vmatmul.mubr.msk.f32.gmra.mrb[54].mxu0 %vm2235_vm2, %v18051_v25  ;;  %v9662_v25 = vld [vmem:[#allocation3 + $0xbc] sm:$0xff] }
 0x3c3   : >> { %14576 = vmatprep.mubr.msk.f32.mxu1 %vm16414_vm1, %v16413_v52  ;;  %15083 = vmatprep.mubr.msk.f32.mxu0 %vm16414_vm1, %v16413_v52 }
 0x3c6   : >> { %14577 = vmatmul.mubr.msk.f32.gmra.mrb[72].mxu1 %vm2235_vm2, %v6854_v42  ;;  %15084 = vmatmul.mubr.msk.f32.gmra.mrb[56].mxu0 %vm2235_vm2, %v18061_v26 }
 0x3c7   : >> { %15086 = vmatprep.mubr.msk.f32.mxu0 %vm16414_vm1, %v16413_v52 }
 0x3ca   : >> { %15087 = vmatmul.mubr.msk.f32.gmra.mrb[58].mxu0 %vm2235_vm2, %v18071_v43 }
 0x3cb   : >> { %15089 = vmatprep.mubr.msk.f32.mxu0 %vm16414_vm1, %v16413_v52 }
 0x3ce   : >> { %15090 = vmatmul.mubr.msk.f32.gmra.mrb[60].mxu0 %vm2235_vm2, %v18081_v18 }
 0x3cf   : >> { %15092 = vmatprep.mubr.msk.f32.mxu0 %vm16414_vm1, %v16413_v52 }
 0x3d2   : >> { %15093 = vmatmul.mubr.msk.f32.gmra.mrb[62].mxu0 %vm2235_vm2, %v18091_v34 }
 0x3d3   : >> { %15095 = vmatprep.mubr.msk.f32.mxu0 %vm16414_vm1, %v16413_v52 }
 0x3d6   : >> { %15096 = vmatmul.mubr.msk.f32.gmra.mrb[64].mxu0 %vm2235_vm2, %v9661_v57 }
 0x3d7   : >> { %15098 = vmatprep.mubr.msk.f32.mxu0 %vm16414_vm1, %v16413_v52 }
 0x3da   : >> { %15099 = vmatmul.mubr.msk.f32.gmra.mrb[66].mxu0 %vm2235_vm2, %v9662_v25 }
 0x479   : >> { %v6949_v26 = vpop.f32.mrb[56].mxu1 }
 0x47a   : >> { %v14554_v43 = vpop.f32.mrb[57].mxu1 }
 0x47d   : >> { %v6954_v18 = vpop.f32.mrb[58].mxu1 }
 0x47e   : >> { %v14557_v44 = vpop.f32.mrb[59].mxu1 }
 0x481   : >> { %v6959_v21 = vpop.f32.mrb[60].mxu1 }
 0x482   : >> { %v14560_v5 = vpop.f32.mrb[61].mxu1 }
 0x485   : >> { %v6964_v23 = vpop.f32.mrb[62].mxu1 }
 0x486   : >> { %v14563_v34 = vpop.f32.mrb[63].mxu1 }
 0x489   : >> { %v6969_v22 = vpop.f32.mrb[64].mxu1 }
 0x48a   : >> { %v14566_v28 = vpop.f32.mrb[65].mxu1 }
 0x48d   : >> { %v6974_v39 = vpop.f32.mrb[66].mxu1  ;;  %v9757_v40 = vpop.f32.mrb[50].mxu0 }
 0x48e   : >> { %v14569_v45 = vpop.f32.mrb[67].mxu1  ;;  %v15619_v11 = vadd.f32 %v9757_v40, %v6949_v26  ;;  %v15076_v47 = vpop.f32.mrb[51].mxu0 }
 0x48f   : > { %v12919_v47 = vld [vmem:[%s19288_s5 + $0x48] sm:$0xff] (%p392_p11) }
 0x490   : >> { %9810 = vst [vmem:[#allocation4 + $0x40] sm:$0xff] %v15619_v11  ;;  %v12918_v11 = vld [vmem:[%s19288_s5 + $0x40] sm:$0xff] (%p392_p11) }
 0x491   : >> { %v6979_v52 = vpop.f32.mrb[68].mxu1  ;;  %v9762_v55 = vpop.f32.mrb[52].mxu0 }
 0x492   : >> { %v14572_v7 = vpop.f32.mrb[69].mxu1  ;;  %v15620_v59 = vadd.f32 %v9762_v55, %v6954_v18  ;;  %v15079_v48 = vpop.f32.mrb[53].mxu0  ;;  %v15499_v55 = vpack.c.bf16 (%p392_p11), %v12919_v47, %v12918_v11 }
 0x493   : > { %v16417_v7 = vmov (%p392_p11), 0.0  }
 0x494   : >> { %9811 = vst [vmem:[#allocation4 + $0x48] sm:$0xff] %v15620_v59  ;;  %15133 = vmatprep.mubr.msk.f32.mxu0 (%p392_p11), %vm16416_vm5, %v16417_v7  ;;  %15105 = vmatprep.mubr.msk.f32.mxu1 (%p392_p11), %vm16416_vm5, %v16417_v7 }
 0x495   : >> { %v6984_v36 = vpop.f32.mrb[70].mxu1  ;;  %v9767_v29 = vpop.f32.mrb[54].mxu0 }
 0x496   : >> { %v14575_v37 = vpop.f32.mrb[71].mxu1  ;;  %v15621_v27 = vadd.f32 %v9767_v29, %v6959_v21  ;;  %v15082_v38 = vpop.f32.mrb[55].mxu0 }
 0x497   : >> { %v9866_v53 = vld [vmem:[#allocation4 + $0x40] sm:$0x3]  ;;  %v12921_v38 = vld [vmem:[%s19288_s5 + $0x50] sm:$0xff] (%p392_p11) }
 0x498   : >> { %9812 = vst [vmem:[#allocation4 + $0x50] sm:$0xff] %v15621_v27 }
 0x499   : >> { %v6989_v3 = vpop.f32.mrb[72].mxu1  ;;  %v9772_v58 = vpop.f32.mrb[56].mxu0 }
 0x49a   : >> { %v14578_v61 = vpop.f32.mrb[73].mxu1  ;;  %v15622_v10 = vadd.f32 %v9772_v58, %v6964_v23  ;;  %v15085_v41 = vpop.f32.mrb[57].mxu0 }
 0x49b   : >> { %v9867_v2 = vld [vmem:[#allocation4 + $0x46] sm:$0xff]  ;;  %v9868_v46 = vld [vmem:[#allocation4 + $0x4e] sm:$0x3] }
 0x49c   : >> { %v9869_v20 = vmax.f32 %v18480_v8, %v9867_v2  ;;  %v9870_v31 = vmax.f32 %v9866_v53, %v9868_v46  ;;  %9813 = vst [vmem:[#allocation4 + $0x58] sm:$0xff] %v15622_v10 }
 0x49d   : >> { %v9777_v15 = vpop.f32.mrb[58].mxu0 }
 0x49e   : >> { %9871 = vst [vmem:[#allocation5] sm:$0xff] %v9869_v20  ;;  %9872 = vst [vmem:[#allocation5 + $0x8] sm:$0x3] %v9870_v31  ;;  %v15623_v35 = vadd.f32 %v9777_v15, %v6969_v22  ;;  %v15088_v24 = vpop.f32.mrb[59].mxu0 }
 0x4a0   : >> { %9814 = vst [vmem:[#allocation4 + $0x60] sm:$0xff] %v15623_v35 }
 0x4a1   : >> { %v9782_v12 = vpop.f32.mrb[60].mxu0 }
 0x4a2   : >> { %v15624_v13 = vadd.f32 %v9782_v12, %v6974_v39  ;;  %v15091_v19 = vpop.f32.mrb[61].mxu0  ;;  %v12924_v12 = vld [vmem:[%s19288_s5 + $0x60] sm:$0xff] (%p392_p11) }
 0x4a3   : >> { %v9886_v30 = vld [vmem:[#allocation4 + $0x54] sm:$0xff]  ;;  %v9887_v50 = vld [vmem:[#allocation4 + $0x5c] sm:$0x3] }
 0x4a4   : >> { %9815 = vst [vmem:[#allocation4 + $0x68] sm:$0xff] %v15624_v13  ;;  %v12925_v13 = vld [vmem:[%s19288_s5 + $0x68] sm:$0xff] (%p392_p11) }
 0x4a5   : >> { %v9873_v51 = vld [vmem:[#allocation5] ss:$2 sm:$0x1f]  ;;  %v9874_v56 = vld [vmem:[#allocation5 + $0x1] ss:$2 sm:$0x1f] }
 0x4a6   : >> { %v9875_v62 = vmax.f32 %v9873_v51, %v9874_v56  ;;  %v9787_v63 = vpop.f32.mrb[62].mxu0 }
 0x4a7   : >> { %v15625_v14 = vadd.f32 %v9787_v63, %v6979_v52  ;;  %v15094_v9 = vpop.f32.mrb[63].mxu0 }
 0x4a8   : >> { %v9883_v8 = vadd.f32 %v18500_v60, %v9875_v62  ;;  %v15505_v62 = vpack.c.bf16 (%p392_p11), %v12925_v13, %v12924_v12  ;;  %v12928_v9 = vld [vmem:[%s19288_s5 + $0x78] sm:$0xff] (%p392_p11) }
 0x4a9   : >> { %v9792_v0 = vpop.f32.mrb[64].mxu0 }
 0x4aa   : >> { %v9884_v1 = vmax.f32 %v9883_v8, 0.0  ;;  %v15626_v32 = vadd.f32 %v9792_v0, %v6984_v36  ;;  %v15097_v49 = vpop.f32.mrb[65].mxu0 }
 0x4ab   : >> { %v9888_v54 = vld [vmem:[#allocation4 + $0x62] sm:$0xff]  ;;  %v9889_v17 = vld [vmem:[#allocation4 + $0x6a] sm:$0x3]  ;;  %v18671_v49 = vld [vmem:[%s19288_s5 + $0x88] sm:$0xff] (%p392_p11) }
 0x4ac   : >> { %9885 = vst.msk [vmem:[%s18518_s30 + $0xa] sm:$0x1f] %vm9842_vm4, %v9884_v1  ;;  %v9890_v4 = vmax.f32 %v9886_v30, %v9888_v54  ;;  %v9891_v33 = vmax.f32 %v9887_v50, %v9889_v17  ;;  %9817 = vst [vmem:[#allocation4 + $0x78] sm:$0xff] %v15626_v32  ;;  %v18666_v32 = vld [vmem:[%s19288_s5 + $0x80] sm:$0xff] (%p392_p11) }
 0x4ad   : >> { %v9797_v16 = vpop.f32.mrb[66].mxu0 }
 0x4ae   : >> { %9892 = vst [vmem:[#allocation5] sm:$0xff] %v9890_v4  ;;  %9893 = vst [vmem:[#allocation5 + $0x8] sm:$0x3] %v9891_v33  ;;  %v15627_v6 = vadd.f32 %v9797_v16, %v6989_v3  ;;  %v15100_v42 = vpop.f32.mrb[67].mxu0  ;;  %v12922_v3 = vld [vmem:[%s19288_s5 + $0x58] sm:$0xff] (%p392_p11)  ;;  %v18683_v16 = vld [vmem:[%s19288_s5 + $0x90] sm:$0xff] (%p392_p11) }
 0x4af   : > { %v15502_v53 = vpack.c.bf16 (%p392_p11), %v12922_v3, %v12921_v38 }
 0x4b0   : >> { %9818 = vst [vmem:[#allocation4 + $0x80] sm:$0xff] %v15627_v6  ;;  %v18688_v6 = vld [vmem:[%s19288_s5 + $0x98] sm:$0xff] (%p392_p11) }
 0x4b3   : >> { %v9908_v43 = vld [vmem:[#allocation4 + $0x78] sm:$0x3] }
 0x4b5   : >> { %v9894_v57 = vld [vmem:[#allocation5] ss:$2 sm:$0x1f]  ;;  %v9895_v25 = vld [vmem:[#allocation5 + $0x1] ss:$2 sm:$0x1f] }
 0x4b6   : >> { %v9896_v26 = vmax.f32 %v9894_v57, %v9895_v25  ;;  %v15511_v25 = vpack.c.bf16 (%p392_p11), %v18671_v49, %v18666_v32 }
 0x4b7   : >> { %v9909_v18 = vld [vmem:[#allocation4 + $0x7e] sm:$0xff]  ;;  %v9910_v44 = vld [vmem:[#allocation4 + $0x86] sm:$0x3] }
 0x4b8   : >> { %v9904_v21 = vadd.f32 %v18500_v60, %v9896_v26  ;;  %v9911_v5 = vmax.f32 %v15625_v14, %v9909_v18  ;;  %v9912_v23 = vmax.f32 %v9908_v43, %v9910_v44  ;;  %v12927_v14 = vld [vmem:[%s19288_s5 + $0x70] sm:$0xff] (%p392_p11) }
 0x4b9   : > { %v15508_v17 = vpack.c.bf16 (%p392_p11), %v12928_v9, %v12927_v14 }
 0x4ba   : >> { %v9905_v34 = vmax.f32 %v9904_v21, 0.0  ;;  %9913 = vst [vmem:[#allocation5] sm:$0xff] %v9911_v5  ;;  %9914 = vst [vmem:[#allocation5 + $0x8] sm:$0x3] %v9912_v23 }
 0x4bc   : >> { %9906 = vst.msk [vmem:[%s18518_s30 + $0xf] sm:$0x1f] %vm9842_vm4, %v9905_v34 }
 0x4c1   : >> { %v9915_v22 = vld [vmem:[#allocation5] ss:$2 sm:$0x1f]  ;;  %v9916_v28 = vld [vmem:[#allocation5 + $0x1] ss:$2 sm:$0x1f] }
 0x4c2   : >> { %v9917_v39 = vmax.f32 %v9915_v22, %v9916_v28  ;;  %394 = sbr.rel (!%p392_p11) target bundleno = 28 (0x1c), region = 256  ;;  %v15514_v22 = vpack.c.bf16 (%p392_p11), %v18688_v6, %v18683_v16 }
 0x4c4   : >> { %v9925_v40 = vadd.f32 %v18500_v60, %v9917_v39  ;;  %v16415_v60 = vmov (%p392_p11), 0.0|0.0  }
 0x4c5   : > { %15498 = vmatprep.subr.bf16.mxu0 (%p392_p11), %v16415_v60  ;;  %15486 = vmatprep.subr.bf16.mxu1 (%p392_p11), %v16415_v60 }
 0x4c6   : >> { %v9926_v45 = vmax.f32 %v9925_v40, 0.0  ;;  %15500 = vmatpush3.bf16.msra.mxu0 (%p392_p11), %v15499_v55 }
 0x4c7   : > { %15501 = vmatprep.subr.bf16.mxu0 (%p392_p11), %v16415_v60 }
 0x4c8   : >> { %9927 = vst.msk [vmem:[%s18518_s30 + $0x14] sm:$0x1f] %vm9842_vm4, %v9926_v45  ;;  %s16341_s30 = scalar_lea.vmem (%p392_p11), %s19239_s16, 64 }
 0x4c9   : > { %p16342_p12 = scmp.ne.s32.totalorder %s19239_s16, %s16341_s30  ;;  %p16349_p2 = scmp.lt.s32.totalorder %s16347_s14, %s16341_s30 }
 0x4cb   : > { %p16343_p13 = pnand %p16342_p12, %p16517_p5  ;;  %p16350_p3 = por %p16349_p2, %p16348_p1 }
 0x4cd   : > { %p16344_p0 = pneg %p16343_p13 }
 0x4cf   : > { %v18604_v52 = vld [vmem:[#allocation6] sm:$0xff]  ;;  %v18673_v50 = vld [vmem:[#allocation6 + $0x28] sm:$0xff]  ;;  %p16351_p4 = pnand %p16350_p3, %p16344_p0 }
 0x4d0   : > { %v18609_v59 = vld [vmem:[#allocation6 + $0x20] sm:$0xff]  ;;  %v10289_v29 = vrot.slane %v18604_v52, 4  ;;  %v10372_v61 = vrot.slane %v18604_v52, 5  ;;  %v10455_v20 = vrot.slane %v18604_v52, 6  ;;  %v10538_v30 = vrot.slane %v18604_v52, 7  ;;  %v18675_v54 = vld [vmem:[#allocation6 + $0x48] sm:$0xff] }
 0x4d1   : > { %v18611_v48 = vld [vmem:[#allocation6 + $0x40] sm:$0xff]  ;;  %v10290_v37 = vrot.slane %v18609_v59, 3  ;;  %v10373_v10 = vrot.slane %v18609_v59, 4  ;;  %v10456_v31 = vrot.slane %v18609_v59, 5  ;;  %v10539_v1 = vrot.slane %v18609_v59, 6  ;;  %v18678_v33 = vld [vmem:[#allocation6 + $0x68] sm:$0xff] }
 0x4d2   : > { %v18613_v36 = vld [vmem:[#allocation6 + $0x60] sm:$0xff]  ;;  %v10292_v27 = vrot.slane %v18611_v48, 2  ;;  %v10375_v46 = vrot.slane %v18611_v48, 3  ;;  %v10458_v19 = vrot.slane %v18611_v48, 4  ;;  %v10541_v4 = vrot.slane %v18611_v48, 5  ;;  %v18695_v26 = vld [vmem:[#allocation6 + $0x8] sm:$0xff] }
 0x4d3   : > { %v10294_v58 = vrot.slane %v18613_v36, 1  ;;  %v10291_v41 = vsel %vm9952_vm6, %v10290_v37, %v10289_v29  ;;  %v10374_v35 = vsel %vm9952_vm6, %v10373_v10, %v10372_v61  ;;  %v10377_v24 = vrot.slane %v18613_v36, 2 }
 0x4d4   : > { %v10293_v2 = vsel %vm9955_vm7, %v10292_v27, %v10291_v41  ;;  %v10376_v51 = vsel %vm9955_vm7, %v10375_v46, %v10374_v35  ;;  %v10457_v56 = vsel %vm9952_vm6, %v10456_v31, %v10455_v20  ;;  %v10460_v63 = vrot.slane %v18613_v36, 3  ;;  %v18731_v46 = vld [vmem:[#allocation6 + $0x50] sm:$0xff] }
 0x4d5   : > { %v10295_v15 = vsel %vm9958_vm8, %v10294_v58, %v10293_v2  ;;  %v10378_v8 = vsel %vm9958_vm8, %v10377_v24, %v10376_v51  ;;  %v10459_v0 = vsel %vm9955_vm7, %v10458_v19, %v10457_v56  ;;  %v10543_v57 = vrot.slane %v18613_v36, 4  ;;  %v18729_v2 = vld [vmem:[#allocation6 + $0x30] sm:$0xff] }
 0x4d6   : > { %15134 = vmatmul.mubr.msk.f32.vlgmr.msra.gmra.mrb[0].mxu0 %vm9960_vm9, %v10295_v15  ;;  %v10461_v42 = vsel %vm9958_vm8, %v10460_v63, %v10459_v0  ;;  %v10625_v43 = vrot.slane %v18673_v50, 7  ;;  %v10540_v18 = vsel %vm9952_vm6, %v10539_v1, %v10538_v30  ;;  %v10953_v44 = vrot.slane %v18695_v26, 4  ;;  %v18739_v24 = vld [vmem:[#allocation6 + $0x70] sm:$0xff]  ;;  %v9946_v0 = vld [vmem:[%s19288_s5 + $0x8] sm:$0xff] }
 0x4d7   : > { %15503 = vmatpush3.bf16.msra.mxu0 %v15502_v53  ;;  %15140 = vmatprep.mubr.msk.f32.mxu0 %vm16416_vm5, %v16417_v7  ;;  %v10954_v21 = vrot.slane %v18673_v50, 3  ;;  %v10956_v5 = vrot.slane %v18675_v54, 2  ;;  %v10627_v23 = vrot.slane %v18675_v54, 6  ;;  %v10629_v34 = vrot.slane %v18678_v33, 5  ;;  %v18746_v56 = vld [vmem:[#allocation6 + $0x10] sm:$0xff] }
 0x4d8   : > { %15504 = vmatprep.subr.bf16.mxu0 %v16415_v60  ;;  %v10958_v28 = vrot.slane %v18678_v33, 1  ;;  %v10707_v39 = vrot.slane %v18695_v26, 1  ;;  %v11036_v45 = vrot.slane %v18695_v26, 5  ;;  %v11037_v11 = vrot.slane %v18673_v50, 4 }
 0x4d9   : > { %v10955_v40 = vsel %vm9952_vm6, %v10954_v21, %v10953_v44  ;;  %v10542_v47 = vsel %vm9955_vm7, %v10541_v4, %v10540_v18  ;;  %v11039_v29 = vrot.slane %v18675_v54, 3  ;;  %v11041_v37 = vrot.slane %v18678_v33, 2 }
 0x4da   : > { %v10957_v55 = vsel %vm9955_vm7, %v10956_v5, %v10955_v40  ;;  %v10626_v27 = vsel %vm9952_vm6, %v10625_v43, %v18695_v26  ;;  %v11038_v3 = vsel %vm9952_vm6, %v11037_v11, %v11036_v45  ;;  %v11119_v58 = vrot.slane %v18695_v26, 6 }
 0x4db   : > { %v18721_v38 = vsel %vm9958_vm8, %v10958_v28, %v10957_v55  ;;  %v11040_v61 = vsel %vm9955_vm7, %v11039_v29, %v11038_v3  ;;  %v11120_v10 = vrot.slane %v18673_v50, 5  ;;  %v11122_v41 = vrot.slane %v18675_v54, 4  ;;  %v12909_v55 = vld [vmem:[%s19288_s5 + $0x10] sm:$0xff] }
 0x4dc   : > { %v11124_v53 = vrot.slane %v18678_v33, 3  ;;  %v10709_v20 = vrot.slane %v18675_v54, 7  ;;  %v18735_v31 = vsel %vm9958_vm8, %v11041_v37, %v11040_v61  ;;  %v11202_v15 = vrot.slane %v18695_v26, 7 }
 0x4dd   : > { %v11203_v35 = vrot.slane %v18673_v50, 6  ;;  %v10711_v12 = vrot.slane %v18678_v33, 6  ;;  %v11121_v13 = vsel %vm9952_vm6, %v11120_v10, %v11119_v58  ;;  %v11205_v19 = vrot.slane %v18675_v54, 5 }
 0x4de   : > { %15141 = vmatmul.mubr.msk.f32.vlgmr.msra.gmra.mrb[0].mxu0 %vm9960_vm9, %v10378_v8  ;;  %v11207_v51 = vrot.slane %v18678_v33, 4  ;;  %v11289_v14 = vrot.slane %v18729_v2, 7  ;;  %v11291_v9 = vrot.slane %v18731_v46, 6  ;;  %v9945_v8 = vld [vmem:[%s19288_s5] sm:$0xff]  ;;  %v10544_v30 = vsel %vm9958_vm8, %v10543_v57, %v10542_v47 }
 0x4df   : > { %15506 = vmatpush3.bf16.msra.mxu0 %v15505_v62  ;;  %15147 = vmatprep.mubr.msk.f32.mxu0 %vm16416_vm5, %v16417_v7  ;;  %v11123_v62 = vsel %vm9955_vm7, %v11122_v41, %v11121_v13  ;;  %v11204_v63 = vsel %vm9952_vm6, %v11203_v35, %v11202_v15  ;;  %v11293_v4 = vrot.slane %v18739_v24, 5  ;;  %v11371_v18 = vrot.slane %v18746_v56, 1 }
 0x4e0   : > { %15507 = vmatprep.subr.bf16.mxu0 %v16415_v60  ;;  %v18763_v1 = vsel %vm9958_vm8, %v11124_v53, %v11123_v62  ;;  %v11290_v43 = vsel %vm9952_vm6, %v11289_v14, %v18746_v56  ;;  %v11373_v44 = vrot.slane %v18731_v46, 7  ;;  %v10628_v57 = vsel %vm9955_vm7, %v10627_v23, %v10626_v27  ;;  %v12910_v23 = vld [vmem:[%s19288_s5 + $0x18] sm:$0xff] }
 0x4e1   : > { %v11292_v21 = vsel %vm9955_vm7, %v11291_v9, %v11290_v43  ;;  %v11375_v5 = vrot.slane %v18739_v24, 6  ;;  %v15487_v28 = vpack.c.bf16 %v9946_v0, %v9945_v8  ;;  %v11372_v45 = vsel %vm9952_vm6, %v18729_v2, %v11371_v18  ;;  %v12936_v18 = vld [vmem:[%s19288_s5 + $0xa0] sm:$0xff] }
 0x4e2   : > { %v18778_v40 = vsel %vm9958_vm8, %v11293_v4, %v11292_v21  ;;  %v9951_v11 = vrot.slane %v18609_v59, 7  ;;  %v9954_v47 = vrot.slane %v18611_v48, 6  ;;  %v11374_v29 = vsel %vm9955_vm7, %v11373_v44, %v11372_v45  ;;  %v12937_v44 = vld [vmem:[%s19288_s5 + $0xa8] sm:$0xff] }
 0x4e3   : > { %15488 = vmatpush3.bf16.msra.mxu1 %v15487_v28  ;;  %v9957_v37 = vrot.slane %v18613_v36, 5  ;;  %v11453_v27 = vrot.slane %v18746_v56, 2  ;;  %v11454_v3 = vrot.slane %v18729_v2, 1  ;;  %v10708_v58 = vsel %vm9952_vm6, %v18673_v50, %v10707_v39 }
 0x4e4   : > { %v18797_v61 = vsel %vm9958_vm8, %v11375_v5, %v11374_v29  ;;  %v9953_v10 = vsel %vm9952_vm6, %v9951_v11, %v18604_v52  ;;  %v11457_v41 = vrot.slane %v18739_v24, 7  ;;  %15489 = vmatprep.subr.bf16.mxu1 %v16415_v60  ;;  %v15490_v35 = vpack.c.bf16 %v12910_v23, %v12909_v55 }
 0x4e5   : > { %v9956_v53 = vsel %vm9955_vm7, %v9954_v47, %v9953_v10  ;;  %v11455_v15 = vsel %vm9952_vm6, %v11454_v3, %v11453_v27  ;;  %v10043_v13 = vrot.slane %v18604_v52, 1  ;;  %v10630_v39 = vsel %vm9958_vm8, %v10629_v34, %v10628_v57  ;;  %v12915_v10 = vld [vmem:[%s19288_s5 + $0x30] sm:$0xff] }
 0x4e6   : > { %15148 = vmatmul.mubr.msk.f32.vlgmr.msra.gmra.mrb[0].mxu0 %vm9960_vm9, %v10461_v42  ;;  %v10045_v62 = vrot.slane %v18611_v48, 7  ;;  %v11536_v34 = vrot.slane %v18729_v2, 2  ;;  %v10789_v14 = vrot.slane %v18695_v26, 2  ;;  %v10047_v9 = vrot.slane %v18613_v36, 6 }
 0x4e7   : > { %15509 = vmatpush3.bf16.msra.mxu0 %v15508_v17  ;;  %15154 = vmatprep.mubr.msk.f32.mxu0 %vm16416_vm5, %v16417_v7  ;;  %v11206_v17 = vsel %vm9955_vm7, %v11205_v19, %v11204_v63  ;;  %v9959_v19 = vsel %vm9958_vm8, %v9957_v37, %v9956_v53  ;;  %v10044_v49 = vsel %vm9952_vm6, %v18609_v59, %v10043_v13  ;;  %v11538_v8 = vrot.slane %v18731_v46, 1 }
 0x4e8   : > { %15510 = vmatprep.subr.bf16.mxu0 %v16415_v60  ;;  %v18768_v42 = vsel %vm9958_vm8, %v11207_v51, %v11206_v17  ;;  %v11456_v51 = vsel %vm9955_vm7, %v18731_v46, %v11455_v15  ;;  %15106 = vmatmul.mubr.msk.f32.vlgmr.msra.gmra.mrb[0].mxu1 %vm9960_vm9, %v9959_v19  ;;  %v10710_v63 = vsel %vm9955_vm7, %v10709_v20, %v10708_v58  ;;  %v12912_v20 = vld [vmem:[%s19288_s5 + $0x20] sm:$0xff]  ;;  %v12913_v17 = vld [vmem:[%s19288_s5 + $0x28] sm:$0xff]  ;;  %v10125_v4 = vrot.slane %v18604_v52, 2 }
 0x4e9   : > { %v18822_v32 = vsel %vm9958_vm8, %v11457_v41, %v11456_v51  ;;  %15491 = vmatpush3.bf16.msra.mxu1 %v15490_v35  ;;  %15112 = vmatprep.mubr.msk.f32.mxu1 %vm16416_vm5, %v16417_v7  ;;  %v10046_v0 = vsel %vm9955_vm7, %v10045_v62, %v10044_v49  ;;  %v10126_v43 = vrot.slane %v18609_v59, 1  ;;  %v10790_v57 = vrot.slane %v18673_v50, 1  ;;  %v12916_v41 = vld [vmem:[%s19288_s5 + $0x38] sm:$0xff] }
 0x4ea   : > { %15492 = vmatprep.subr.bf16.mxu1 %v16415_v60  ;;  %v11617_v5 = vrot.slane %v18746_v56, 4  ;;  %v11618_v28 = vrot.slane %v18729_v2, 3  ;;  %v11620_v11 = vrot.slane %v18731_v46, 2  ;;  %v11622_v47 = vrot.slane %v18739_v24, 1 }
 0x4eb   : > { %v10048_v55 = vsel %vm9958_vm8, %v10047_v9, %v10046_v0  ;;  %v15493_v23 = vpack.c.bf16 %v12913_v17, %v12912_v20  ;;  %v10127_v29 = vsel %vm9952_vm6, %v10126_v43, %v10125_v4  ;;  %v10712_v27 = vsel %vm9958_vm8, %v10711_v12, %v10710_v63  ;;  %v9939_v9 = vld [vmem:[#allocation6 + $0x58] sm:$0xff] }
 0x4ec   : > { %v11619_v37 = vsel %vm9952_vm6, %v11618_v28, %v11617_v5  ;;  %v15517_v3 = vpack.c.bf16 %v12937_v44, %v12936_v18  ;;  %v10791_v12 = vsel %vm9952_vm6, %v10790_v57, %v10789_v14  ;;  %v11700_v15 = vrot.slane %v18746_v56, 5  ;;  %v9935_v14 = vld [vmem:[#allocation6 + $0x38] sm:$0xff] }
 0x4ed   : > { %v11621_v58 = vsel %vm9955_vm7, %v11620_v11, %v11619_v37  ;;  %v11701_v35 = vrot.slane %v18729_v2, 4  ;;  %v10128_v16 = vsel %vm9955_vm7, %v18611_v48, %v10127_v29  ;;  %v10129_v6 = vrot.slane %v18613_v36, 7  ;;  %v9943_v17 = vld [vmem:[#allocation6 + $0x78] sm:$0xff] }
 0x4ee   : > { %15155 = vmatmul.mubr.msk.f32.vlgmr.msra.gmra.mrb[0].mxu0 %vm9960_vm9, %v10544_v30  ;;  %v18884_v53 = vsel %vm9958_vm8, %v11622_v47, %v11621_v58  ;;  %v11705_v13 = vrot.slane %v18739_v24, 2  ;;  %v11783_v51 = vrot.slane %v18746_v56, 6  ;;  %v11784_v62 = vrot.slane %v18729_v2, 5  ;;  %v9931_v44 = vld [vmem:[#allocation6 + $0x18] sm:$0xff] }
 0x4ef   : > { %15512 = vmatpush3.bf16.msra.mxu0 %v15511_v25  ;;  %15161 = vmatprep.mubr.msk.f32.mxu0 %vm16416_vm5, %v16417_v7  ;;  %v11535_v25 = vrot.slane %v18746_v56, 3  ;;  %v11702_v19 = vsel %vm9952_vm6, %v11701_v35, %v11700_v15  ;;  %v10207_v49 = vrot.slane %v18604_v52, 3  ;;  %v11788_v63 = vrot.slane %v18739_v24, 3 }
 0x4f0   : > { %15513 = vmatprep.subr.bf16.mxu0 %v16415_v60  ;;  %15113 = vmatmul.mubr.msk.f32.vlgmr.msra.gmra.mrb[0].mxu1 %vm9960_vm9, %v10048_v55  ;;  %v11866_v20 = vrot.slane %v18746_v56, 7  ;;  %v11867_v4 = vrot.slane %v18729_v2, 6  ;;  %v11869_v43 = vrot.slane %v18731_v46, 5  ;;  %v11871_v18 = vrot.slane %v18739_v24, 4 }
 0x4f1   : > { %v11537_v30 = vsel %vm9952_vm6, %v11536_v34, %v11535_v25  ;;  %15494 = vmatpush3.bf16.msra.mxu1 %v15493_v23  ;;  %15119 = vmatprep.mubr.msk.f32.mxu1 %vm16416_vm5, %v16417_v7  ;;  %v11786_v34 = vrot.slane %v18731_v46, 4  ;;  %v10130_v57 = vsel %vm9958_vm8, %v10129_v6, %v10128_v16  ;;  %v11955_v5 = vrot.slane %v9939_v9, 6  ;;  %v12940_v23 = vld [vmem:[%s19288_s5 + $0xb8] sm:$0xff]  ;;  %v12942_v16 = vld [vmem:[%s19288_s5 + $0xc0] sm:$0xff]  ;;  %v12961_v9 = vld [vmem:[%s19288_s5 + $0x128] sm:$0xff] }
 0x4f2   : > { %v11539_v21 = vsel %vm9955_vm7, %v11538_v8, %v11537_v30  ;;  %15495 = vmatprep.subr.bf16.mxu1 %v16415_v60  ;;  %v10208_v8 = vrot.slane %v18609_v59, 2  ;;  %v11785_v30 = vsel %vm9952_vm6, %v11784_v62, %v11783_v51  ;;  %v10210_v56 = vrot.slane %v18611_v48, 1  ;;  %v12939_v48 = vld [vmem:[%s19288_s5 + $0xb0] sm:$0xff]  ;;  %v12952_v62 = vld [vmem:[%s19288_s5 + $0xf8] sm:$0xff] }
 0x4f3   : > { %v18859_v45 = vsel %vm9958_vm8, %v18739_v24, %v11539_v21  ;;  %v11787_v52 = vsel %vm9955_vm7, %v11786_v34, %v11785_v30  ;;  %v11953_v21 = vrot.slane %v9935_v14, 7  ;;  %v11868_v28 = vsel %vm9952_vm6, %v11867_v4, %v11866_v20  ;;  %v12964_v30 = vld [vmem:[%s19288_s5 + $0x138] sm:$0xff] }
 0x4f4   : > { %v18917_v59 = vsel %vm9958_vm8, %v11788_v63, %v11787_v52  ;;  %v11957_v11 = vrot.slane %v9943_v17, 5  ;;  %v10793_v2 = vrot.slane %v18678_v33, 7  ;;  %v11870_v24 = vsel %vm9955_vm7, %v11869_v43, %v11868_v28  ;;  %v12958_v63 = vld [vmem:[%s19288_s5 + $0x118] sm:$0xff]  ;;  %v12967_v17 = vld [vmem:[%s19288_s5 + $0x148] sm:$0xff]  ;;  %v12975_v28 = vld [vmem:[%s19288_s5 + $0x170] sm:$0xff] }
 0x4f5   : > { %v11954_v47 = vsel %vm9952_vm6, %v11953_v21, %v9931_v44  ;;  %v10792_v55 = vsel %vm9955_vm7, %v18675_v54, %v10791_v12  ;;  %v18939_v29 = vsel %vm9958_vm8, %v11871_v18, %v11870_v24  ;;  %v15520_v12 = vpack.c.bf16 %v12940_v23, %v12939_v48  ;;  %v12970_v4 = vld [vmem:[%s19288_s5 + $0x158] sm:$0xff]  ;;  %v12973_v18 = vld [vmem:[%s19288_s5 + $0x168] sm:$0xff]  ;;  %v12978_v23 = vld [vmem:[%s19288_s5 + $0x180] sm:$0xff] }
 0x4f6   : > { %15162 = vmatmul.mubr.msk.f32.vlgmr.msra.gmra.mrb[0].mxu0 %vm9960_vm9, %v10630_v39  ;;  %v15496_v39 = vpack.c.bf16 %v12916_v41, %v12915_v10  ;;  %v11956_v37 = vsel %vm9955_vm7, %v11955_v5, %v11954_v47  ;;  %v10794_v41 = vsel %vm9958_vm8, %v10793_v2, %v10792_v55  ;;  %v10874_v15 = vrot.slane %v18675_v54, 1  ;;  %v12943_v54 = vld [vmem:[%s19288_s5 + $0xc8] sm:$0xff]  ;;  %v12035_v5 = vld [vmem:[%s19290_s7 + $0x10] sm:$0xff]  ;;  %v12040_v48 = vld [vmem:[%s19290_s7 + $0x38] sm:$0xff] }
 0x4f7   : > { %15515 = vmatpush3.bf16.msra.mxu0 %v15514_v22  ;;  %15168 = vmatprep.mubr.msk.f32.mxu0 %vm16416_vm5, %v16417_v7  ;;  %v11703_v22 = vrot.slane %v18731_v46, 3  ;;  %v10209_v46 = vsel %vm9952_vm6, %v10208_v8, %v10207_v49  ;;  %v18947_v58 = vsel %vm9958_vm8, %v11957_v11, %v11956_v37  ;;  %v15523_v6 = vpack.c.bf16 %v12943_v54, %v12942_v16  ;;  %v12976_v11 = vld [vmem:[%s19288_s5 + $0x178] sm:$0xff]  ;;  %v12039_v55 = vld [vmem:[%s19290_s7 + $0x30] sm:$0xff]  ;;  %v12979_v37 = vld [vmem:[%s19288_s5 + $0x188] sm:$0xff] }
 0x4f8   : > { %15516 = vmatprep.subr.bf16.mxu0 %v16415_v60  ;;  %15120 = vmatmul.mubr.msk.f32.vlgmr.msra.gmra.mrb[0].mxu1 %vm9960_vm9, %v10130_v57  ;;  %v10211_v10 = vsel %vm9955_vm7, %v10210_v56, %v10209_v46  ;;  %v12033_v57 = vld [vmem:[%s19290_s7] sm:$0xff]  ;;  %v12036_v56 = vld [vmem:[%s19290_s7 + $0x18] sm:$0xff]  ;;  %v12038_v46 = vld [vmem:[%s19290_s7 + $0x28] sm:$0xff]  ;;  %v15556_v24 = vpack.c.bf16 %v12976_v11, %v12975_v28 }
 0x4f9   : > { %v11704_v25 = vsel %vm9955_vm7, %v11703_v22, %v11702_v19  ;;  %15497 = vmatpush3.bf16.msra.mxu1 %v15496_v39  ;;  %15126 = vmatprep.mubr.msk.f32.mxu1 %vm16416_vm5, %v16417_v7  ;;  %v12945_v22 = vld [vmem:[%s19288_s5 + $0xd0] sm:$0xff]  ;;  %v12949_v19 = vld [vmem:[%s19288_s5 + $0xe8] sm:$0xff]  ;;  %v15565_v2 = vpack.c.bf16 %v12036_v56, %v12035_v5  ;;  %v12048_v54 = vld [vmem:[%s19290_s7 + $0x78] sm:$0xff] }
 0x4fa   : > { %v18907_v0 = vsel %vm9958_vm8, %v11705_v13, %v11704_v25  ;;  %15561 = vmatprep.subr.bf16.mxu1 %v16415_v60  ;;  %v12946_v13 = vld [vmem:[%s19288_s5 + $0xd8] sm:$0xff]  ;;  %v12955_v25 = vld [vmem:[%s19288_s5 + $0x108] sm:$0xff]  ;;  %v12982_v28 = vld [vmem:[%s19293_s10] ss:$0 sm:$0xff] }
 0x4fb   : > { %v15526_v39 = vpack.c.bf16 %v12946_v13, %v12945_v22 }
 0x4fe   : > { %15169 = vmatmul.mubr.msk.f32.vlgmr.msra.gmra.mrb[0].mxu0 %vm9960_vm9, %v10712_v27  ;;  %v10871_v27 = vrot.slane %v18695_v26, 3 }
 0x4ff   : > { %15518 = vmatpush3.bf16.msra.mxu0 %v15517_v3  ;;  %15175 = vmatprep.mubr.msk.f32.mxu0 %vm16416_vm5, %v16417_v7  ;;  %v10872_v3 = vrot.slane %v18673_v50, 2  ;;  %v10212_v50 = vsel %vm9958_vm8, %v18613_v36, %v10211_v10  ;;  %v15559_v10 = vpack.c.bf16 %v12979_v37, %v12978_v23 }
 0x500   : > { %15519 = vmatprep.subr.bf16.mxu0 %v16415_v60  ;;  %15127 = vmatmul.mubr.msk.f32.vlgmr.msra.gmra.mrb[0].mxu1 %vm9960_vm9, %v10212_v50  ;;  %v12045_v50 = vld [vmem:[%s19290_s7 + $0x60] sm:$0xff] }
 0x501   : > { %v10873_v26 = vsel %vm9952_vm6, %v10872_v3, %v10871_v27  ;;  %15308 = vmatprep.mubr.msk.f32.mxu1 %vm16416_vm5, %v16417_v7  ;;  %v15571_v27 = vpack.c.bf16 %v12040_v48, %v12039_v55  ;;  %v12042_v3 = vld [vmem:[%s19290_s7 + $0x48] sm:$0xff] }
 0x502   : > { %v10875_v35 = vsel %vm9955_vm7, %v10874_v15, %v10873_v26  ;;  %v12044_v15 = vld [vmem:[%s19290_s7 + $0x58] sm:$0xff] }
 0x503   : > { %v10876_v36 = vsel %vm9958_vm8, %v18678_v33, %v10875_v35  ;;  %v12948_v33 = vld [vmem:[%s19288_s5 + $0xe0] sm:$0xff]  ;;  %v12046_v35 = vld [vmem:[%s19290_s7 + $0x68] sm:$0xff] }
 0x504   : > { %v15529_v51 = vpack.c.bf16 %v12949_v19, %v12948_v33  ;;  %v15580_v16 = vpack.c.bf16 %v12046_v35, %v12045_v50  ;;  %v12128_v33 = vld [vmem:[%s19292_s9 + $0x8] sm:$0xff] }
 0x506   : > { %15176 = vmatmul.mubr.msk.f32.vlgmr.msra.gmra.mrb[0].mxu0 %vm9960_vm9, %v10794_v41 }
 0x507   : > { %15521 = vmatpush3.bf16.msra.mxu0 %v15520_v12  ;;  %15182 = vmatprep.mubr.msk.f32.mxu0 %vm16416_vm5, %v16417_v7  ;;  %v12043_v12 = vld [vmem:[%s19290_s7 + $0x50] sm:$0xff] }
 0x508   : > { %15522 = vmatprep.subr.bf16.mxu0 %v16415_v60  ;;  %v15577_v26 = vpack.c.bf16 %v12044_v15, %v12043_v12 }
 0x50e   : > { %15183 = vmatmul.mubr.msk.f32.vlgmr.msra.gmra.mrb[0].mxu0 %vm9960_vm9, %v10876_v36 }
 0x50f   : > { %15524 = vmatpush3.bf16.msra.mxu0 %v15523_v6  ;;  %15189 = vmatprep.mubr.msk.f32.mxu0 %vm16416_vm5, %v16417_v7 }
 0x510   : > { %15525 = vmatprep.subr.bf16.mxu0 %v16415_v60 }
 0x516   : > { %15190 = vmatmul.mubr.msk.f32.vlgmr.msra.gmra.mrb[0].mxu0 %vm9960_vm9, %v18721_v38  ;;  %v12951_v38 = vld [vmem:[%s19288_s5 + $0xf0] sm:$0xff] }
 0x517   : > { %15527 = vmatpush3.bf16.msra.mxu0 %v15526_v39  ;;  %15196 = vmatprep.mubr.msk.f32.mxu0 %vm16416_vm5, %v16417_v7  ;;  %v15532_v49 = vpack.c.bf16 %v12952_v62, %v12951_v38  ;;  %v12127_v39 = vld [vmem:[%s19292_s9] sm:$0xff] }
 0x518   : > { %15528 = vmatprep.subr.bf16.mxu0 %v16415_v60  ;;  %v15586_v62 = vpack.c.bf16 %v12128_v33, %v12127_v39 }
 0x51e   : > { %15197 = vmatmul.mubr.msk.f32.vlgmr.msra.gmra.mrb[0].mxu0 %vm9960_vm9, %v18735_v31  ;;  %v12954_v31 = vld [vmem:[%s19288_s5 + $0x100] sm:$0xff] }
 0x51f   : > { %15530 = vmatpush3.bf16.msra.mxu0 %v15529_v51  ;;  %15203 = vmatprep.mubr.msk.f32.mxu0 %vm16416_vm5, %v16417_v7  ;;  %v15535_v34 = vpack.c.bf16 %v12955_v25, %v12954_v31  ;;  %v12129_v31 = vld [vmem:[%s19292_s9 + $0x10] sm:$0xff]  ;;  %v12130_v25 = vld [vmem:[%s19292_s9 + $0x18] sm:$0xff] }
 0x520   : > { %15531 = vmatprep.subr.bf16.mxu0 %v16415_v60 }
 0x526   : > { %15204 = vmatmul.mubr.msk.f32.vlgmr.msra.gmra.mrb[0].mxu0 %vm9960_vm9, %v18763_v1  ;;  %v12957_v1 = vld [vmem:[%s19288_s5 + $0x110] sm:$0xff] }
 0x527   : > { %15533 = vmatpush3.bf16.msra.mxu0 %v15532_v49  ;;  %15210 = vmatprep.mubr.msk.f32.mxu0 %vm16416_vm5, %v16417_v7  ;;  %v15538_v14 = vpack.c.bf16 %v12958_v63, %v12957_v1  ;;  %v12131_v1 = vld [vmem:[%s19292_s9 + $0x20] sm:$0xff]  ;;  %v12132_v63 = vld [vmem:[%s19292_s9 + $0x28] sm:$0xff] }
 0x528   : > { %15534 = vmatprep.subr.bf16.mxu0 %v16415_v60 }
 0x52e   : > { %15211 = vmatmul.mubr.msk.f32.vlgmr.msra.gmra.mrb[0].mxu0 %vm9960_vm9, %v18768_v42  ;;  %v12960_v42 = vld [vmem:[%s19288_s5 + $0x120] sm:$0xff] }
 0x52f   : > { %15536 = vmatpush3.bf16.msra.mxu0 %v15535_v34  ;;  %15217 = vmatprep.mubr.msk.f32.mxu0 %vm16416_vm5, %v16417_v7  ;;  %v15541_v8 = vpack.c.bf16 %v12961_v9, %v12960_v42  ;;  %v15589_v34 = vpack.c.bf16 %v12130_v25, %v12129_v31  ;;  %v12133_v42 = vld [vmem:[%s19292_s9 + $0x30] sm:$0xff] }
 0x530   : > { %15537 = vmatprep.subr.bf16.mxu0 %v16415_v60 }
 0x536   : > { %15218 = vmatmul.mubr.msk.f32.vlgmr.msra.gmra.mrb[0].mxu0 %vm9960_vm9, %v18778_v40  ;;  %v12963_v40 = vld [vmem:[%s19288_s5 + $0x130] sm:$0xff] }
 0x537   : > { %15539 = vmatpush3.bf16.msra.mxu0 %v15538_v14  ;;  %15224 = vmatprep.mubr.msk.f32.mxu0 %vm16416_vm5, %v16417_v7  ;;  %v15544_v20 = vpack.c.bf16 %v12964_v30, %v12963_v40  ;;  %v15592_v14 = vpack.c.bf16 %v12132_v63, %v12131_v1  ;;  %v12136_v40 = vld [vmem:[%s19292_s9 + $0x48] sm:$0xff] }
 0x538   : > { %15540 = vmatprep.subr.bf16.mxu0 %v16415_v60 }
 0x53e   : > { %15225 = vmatmul.mubr.msk.f32.vlgmr.msra.gmra.mrb[0].mxu0 %vm9960_vm9, %v18797_v61  ;;  %v12966_v61 = vld [vmem:[%s19288_s5 + $0x140] sm:$0xff] }
 0x53f   : > { %15542 = vmatpush3.bf16.msra.mxu0 %v15541_v8  ;;  %15231 = vmatprep.mubr.msk.f32.mxu0 %vm16416_vm5, %v16417_v7  ;;  %v15547_v52 = vpack.c.bf16 %v12967_v17, %v12966_v61  ;;  %v12135_v8 = vld [vmem:[%s19292_s9 + $0x40] sm:$0xff]  ;;  %v12138_v61 = vld [vmem:[%s19292_s9 + $0x58] sm:$0xff] }
 0x540   : > { %15543 = vmatprep.subr.bf16.mxu0 %v16415_v60  ;;  %v15598_v30 = vpack.c.bf16 %v12136_v40, %v12135_v8 }
 0x546   : > { %15232 = vmatmul.mubr.msk.f32.vlgmr.msra.gmra.mrb[0].mxu0 %vm9960_vm9, %v18822_v32  ;;  %v12969_v32 = vld [vmem:[%s19288_s5 + $0x150] sm:$0xff] }
 0x547   : > { %15545 = vmatpush3.bf16.msra.mxu0 %v15544_v20  ;;  %15238 = vmatprep.mubr.msk.f32.mxu0 %vm16416_vm5, %v16417_v7  ;;  %v15550_v43 = vpack.c.bf16 %v12970_v4, %v12969_v32  ;;  %v12137_v20 = vld [vmem:[%s19292_s9 + $0x50] sm:$0xff]  ;;  %v12140_v32 = vld [vmem:[%s19292_s9 + $0x68] sm:$0xff] }
 0x548   : > { %15546 = vmatprep.subr.bf16.mxu0 %v16415_v60  ;;  %v15601_v17 = vpack.c.bf16 %v12138_v61, %v12137_v20 }
 0x54e   : > { %15239 = vmatmul.mubr.msk.f32.vlgmr.msra.gmra.mrb[0].mxu0 %vm9960_vm9, %v18859_v45  ;;  %v12972_v45 = vld [vmem:[%s19288_s5 + $0x160] sm:$0xff] }
 0x54f   : > { %15548 = vmatpush3.bf16.msra.mxu0 %v15547_v52  ;;  %15245 = vmatprep.mubr.msk.f32.mxu0 %vm16416_vm5, %v16417_v7  ;;  %v15553_v44 = vpack.c.bf16 %v12973_v18, %v12972_v45  ;;  %v12139_v52 = vld [vmem:[%s19292_s9 + $0x60] sm:$0xff]  ;;  %v12142_v45 = vld [vmem:[%s19292_s9 + $0x78] sm:$0xff] }
 0x550   : > { %15549 = vmatprep.subr.bf16.mxu0 %v16415_v60  ;;  %v15604_v4 = vpack.c.bf16 %v12140_v32, %v12139_v52 }
 0x556   : > { %15246 = vmatmul.mubr.msk.f32.vlgmr.msra.gmra.mrb[0].mxu0 %vm9960_vm9, %v18884_v53  ;;  %v12034_v53 = vld [vmem:[%s19290_s7 + $0x8] sm:$0xff] }
 0x557   : > { %15551 = vmatpush3.bf16.msra.mxu0 %v15550_v43  ;;  %15252 = vmatprep.mubr.msk.f32.mxu0 %vm16416_vm5, %v16417_v7  ;;  %v15562_v21 = vpack.c.bf16 %v12034_v53, %v12033_v57  ;;  %v12141_v43 = vld [vmem:[%s19292_s9 + $0x70] sm:$0xff] }
 0x558   : > { %15552 = vmatprep.subr.bf16.mxu0 %v16415_v60  ;;  %v15607_v18 = vpack.c.bf16 %v12142_v45, %v12141_v43 }
 0x559   : > { %15563 = vmatpush3.bf16.msra.mxu1 %v15562_v21 }
 0x55a   : > { %15564 = vmatprep.subr.bf16.mxu1 %v16415_v60 }
 0x55d   : > { %15566 = vmatpush3.bf16.msra.mxu1 %v15565_v2 }
 0x55e   : > { %15253 = vmatmul.mubr.msk.f32.vlgmr.msra.gmra.mrb[0].mxu0 %vm9960_vm9, %v18907_v0  ;;  %v12037_v0 = vld [vmem:[%s19290_s7 + $0x20] sm:$0xff]  ;;  %15567 = vmatprep.subr.bf16.mxu1 %v16415_v60 }
 0x55f   : > { %15554 = vmatpush3.bf16.msra.mxu0 %v15553_v44  ;;  %15259 = vmatprep.mubr.msk.f32.mxu0 %vm16416_vm5, %v16417_v7  ;;  %v15568_v47 = vpack.c.bf16 %v12038_v46, %v12037_v0  ;;  %v12981_v44 = vld [vmem:[%s19291_s8] ss:$0 sm:$0xff] }
 0x560   : > { %15555 = vmatprep.subr.bf16.mxu0 %v16415_v60 }
 0x561   : > { %15569 = vmatpush3.bf16.msra.mxu1 %v15568_v47 }
 0x562   : > { %15570 = vmatprep.subr.bf16.mxu1 %v16415_v60 }
 0x565   : > { %15572 = vmatpush3.bf16.msra.mxu1 %v15571_v27 }
 0x566   : > { %15260 = vmatmul.mubr.msk.f32.vlgmr.msra.gmra.mrb[0].mxu0 %vm9960_vm9, %v18917_v59  ;;  %v12041_v59 = vld [vmem:[%s19290_s7 + $0x40] sm:$0xff]  ;;  %15573 = vmatprep.subr.bf16.mxu1 %v16415_v60 }
 0x567   : > { %15557 = vmatpush3.bf16.msra.mxu0 %v15556_v24  ;;  %15266 = vmatprep.mubr.msk.f32.mxu0 %vm16416_vm5, %v16417_v7  ;;  %v15574_v41 = vpack.c.bf16 %v12042_v3, %v12041_v59 }
 0x568   : > { %15558 = vmatprep.subr.bf16.mxu0 %v16415_v60 }
 0x569   : > { %15575 = vmatpush3.bf16.msra.mxu1 %v15574_v41 }
 0x56a   : > { %15576 = vmatprep.subr.bf16.mxu1 %v16415_v60 }
 0x56d   : > { %15578 = vmatpush3.bf16.msra.mxu1 %v15577_v26 }
 0x56e   : > { %15267 = vmatmul.mubr.msk.f32.vlgmr.msra.gmra.mrb[0].mxu0 %vm9960_vm9, %v18939_v29  ;;  %15579 = vmatprep.subr.bf16.mxu1 %v16415_v60  ;;  %v12047_v29 = vld [vmem:[%s19290_s7 + $0x70] sm:$0xff] }
 0x56f   : > { %15560 = vmatpush3.bf16.msra.mxu0 %v15559_v10  ;;  %15273 = vmatprep.mubr.msk.f32.mxu0 %vm16416_vm5, %v16417_v7  ;;  %v15583_v36 = vpack.c.bf16 %v12048_v54, %v12047_v29 }
 0x571   : > { %15581 = vmatpush3.bf16.msra.mxu1 %v15580_v16 }
 0x572   : > { %15582 = vmatprep.subr.bf16.mxu1 %v16415_v60 }
 0x575   : > { %15584 = vmatpush3.bf16.msra.mxu1 %v15583_v36 }
 0x576   : > { %15274 = vmatmul.mubr.msk.f32.vlgmr.msra.gmra.mrb[0].mxu0 %vm9960_vm9, %v18947_v58  ;;  %15585 = vmatprep.subr.bf16.mxu1 %v16415_v60  ;;  %v12908_v58 = vld [vmem:[%s19289_s6] ss:$0 sm:$0xff] }
 0x5d3   : > { %v10281_v6 = vpop.f32.mrb[0].mxu1 }
 0x5d4   : > { %v15128_v22 = vpop.f32.mrb[1].mxu1  ;;  %v16234_v13 = vadd.f32 %v12908_v58, %v10281_v6 }
 0x649   : > { %v12027_v19 = vpop.f32.mrb[0].mxu0 }
 0x64a   : > { %v16235_v51 = vadd.f32 %v16234_v13, %v12027_v19  ;;  %v15275_v38 = vpop.f32.mrb[1].mxu0 }
 0x64c   : > { %v12032_v49 = vmax.f32 %v16235_v51, 0.0 }
 0x64e   : > { %15309 = vmatmul.mubr.f32.vlgmr.msra.gmra.mrb[2].mxu1 %v12032_v49 }
 0x64f   : > { %15587 = vmatpush3.bf16.msra.mxu1 %v15586_v62  ;;  %15343 = vmatprep.mubr.msk.f32.mxu1 %vm16416_vm5, %v16417_v7  ;;  %v12134_v7 = vld [vmem:[%s19292_s9 + $0x38] sm:$0xff] }
 0x650   : > { %15588 = vmatprep.subr.bf16.mxu1 %v16415_v60  ;;  %v15595_v9 = vpack.c.bf16 %v12134_v7, %v12133_v42 }
 0x653   : > { %15590 = vmatpush3.bf16.msra.mxu1 %v15589_v34 }
 0x654   : > { %15591 = vmatprep.subr.bf16.mxu1 %v16415_v60 }
 0x657   : > { %15593 = vmatpush3.bf16.msra.mxu1 %v15592_v14 }
 0x658   : > { %15594 = vmatprep.subr.bf16.mxu1 %v16415_v60 }
 0x65b   : > { %15596 = vmatpush3.bf16.msra.mxu1 %v15595_v9 }
 0x65c   : > { %15597 = vmatprep.subr.bf16.mxu1 %v16415_v60 }
 0x65f   : > { %15599 = vmatpush3.bf16.msra.mxu1 %v15598_v30 }
 0x660   : > { %15600 = vmatprep.subr.bf16.mxu1 %v16415_v60 }
 0x663   : > { %15602 = vmatpush3.bf16.msra.mxu1 %v15601_v17 }
 0x664   : > { %15603 = vmatprep.subr.bf16.mxu1 %v16415_v60 }
 0x667   : > { %15605 = vmatpush3.bf16.msra.mxu1 %v15604_v4 }
 0x668   : > { %15606 = vmatprep.subr.bf16.mxu1 %v16415_v60  ;;  %v12220_v60 = vlaneseq }
 0x66a   : > { %v12221_v56 = vand.u32 127, %v12220_v60 }
 0x66b   : > { %15608 = vmatpush3.bf16.msra.mxu1 %v15607_v18 }
 0x66c   : > { %vm12222_vm10 = vcmp.lt.s32.totalorder %v12221_v56, 10 }
 0x721   : > { %v12122_v57 = vpop.f32.mrb[2].mxu1 }
 0x722   : > { %v12123_v53 = vadd.f32 %v12981_v44, %v12122_v57  ;;  %v15310_v21 = vpop.f32.mrb[3].mxu1 }
 0x724   : > { %v12126_v5 = vmax.f32 %v12123_v53, 0.0 }
 0x726   : > { %15344 = vmatmul.mubr.f32.vlgmr.msra.gmra.mrb[4].mxu1 %v12126_v5 }
 0x7f9   : > { %v12216_v11 = vpop.f32.mrb[4].mxu1 }
 0x7fa   : > { %v12217_v2 = vadd.f32 %v12982_v28, %v12216_v11  ;;  %v15345_v0 = vpop.f32.mrb[5].mxu1 }
 0x7fc   : > { %v12225_v46 = vsel %vm12222_vm10, %v12217_v2, -3.4028235e+38 }
 0x7fd   : > { %v12227_v24 = vsel %vm12226_vm11, %v12225_v46, -inf }
 0x7fe   : > { %12228 = vmax.xlane.f32.xlu0 %v12227_v24 }
 0x88b   : > { %v12229_v47 = vpop.xlane.xlu0 %12228 }
 0x88c   : > { %v12230_v55 = vsub.f32 %v12225_v46, %v12229_v47 }
 0x88e   : > { %v12231_v48 = vmul.f32 1.442695, %v12230_v55 }
 0x890   : > { %16337 = vpow2.f32 %v12231_v48 }
 0x89a   : > { %v16338_v23 = vpop.eup %16337 }
 0x89b   : > { %v12233_v37 = vsel %vm12226_vm11, %v16338_v23, 0.0 }
 0x89c   : > { %12234 = vadd.xlane.f32.xlu0 %v12233_v37 }
 0x929   : > { %v12235_v27 = vpop.xlane.xlu0 %12234 }
 0x92a   : > { %16339 = vlog2.f32 %v12235_v27 }
 0x934   : > { %v16340_v59 = vpop.eup %16339 }
 0x935   : > { %v12237_v3 = vmul.f32 0.6931472, %v16340_v59 }
 0x937   : > { %v12238_v10 = vsub.f32 %v12230_v55, %v12237_v3 }
 0x939   : > { %12239 = vst [vmem:[%s19304_s26] sm:$0xf] %v12238_v10 }
 0x93a   : > { %16354 = shalt.err (!%p16351_p4)
}
 0x93b   : > { %s16355_s12 = scalar_lea.hbm %s19237_s25, 64  ;;  %s16359_s24 = scalar_lea.hbm %s19294_s11, 128 }
 0x93c   : > { %p16356_p7 = scmp.ne.s32.totalorder %s19237_s25, %s16355_s12  ;;  %p16360_p10 = scmp.lt.u32.totalorder %s19237_s25, %s19294_s11 }
 0x93d   : > { %p16361_p11 = scmp.lt.u32.totalorder %s16359_s24, %s16355_s12  ;;  %p16363_p13 = scmp.lt.u32.totalorder %s16355_s12, %s19237_s25 }
 0x93e   : > { %p16357_p8 = pnand %p16356_p7, %p16517_p5 }
 0x93f   : > { %p16362_p12 = por %p16361_p11, %p16360_p10 }
 0x940   : > { %p16358_p9 = pneg %p16357_p8 }
 0x941   : > { %p16364_p0 = por %p16363_p13, %p16362_p12 }
 0x943   : > { %p16365_p1 = pnand %p16364_p0, %p16358_p9 }
 0x945   : > { %16368 = shalt.err (!%p16365_p1)
}
 0x946   : > { %16283 = dma.vmem_to_hbm [thread:$0]  (%p16517_p5), %s19239_s16, 64, %s19237_s25, %s12241_s19  }
 0x947 PF: > { %p16289_p2 = scmp.ge.s32.totalorder %s16407_s20, 2  ;;  %s12266_s0 = sand.u32 1, %s16395_s17  }
 0x948   : > { %s12267_s30 = scalar_lea.sflag [#allocation8], %s12266_s0 }
 0x949   : > { %p16286_p3 = pnand %p16289_p2, %p16521_p6 }
 0x94b   : > { %16390 = dma.done.wait (!%p16286_p3), %s12267_s30, 64  }
 0x94c   : > { %16392 = vsyncadd (!%p16286_p3), %s12267_s30, 4294967232  ;;  %s19306_s21 = sld [smem:[#allocation10_spill]]  ;;  %s19307_s19 = sld [smem:[#allocation11_spill]] }
 0x94d   : > { %p21_p4 = scmp.ge.s32.totalorder %s16504_s23, 4   ;;  %s19308_s17 = smov %s16399_s18 }
 0x94e   : > { %s19310_s20 = smov %s16504_s23 }
 0x94f   :  { %23 = sbr.rel (!%p21_p4) target bundleno = 5 (0x5), region = 267 }
 0x952   : > { %s19309_s18 = smov %s19306_s21 }
 0x956   :  { %12272 = vsyncpa [#allocation8], 1 }
 0x957   :  { %12274 = vsyncpa [#allocation8 + $0x1], 1 }

</bundles_post_ra>
